<compile_context>
chip_gen: v5e
topology: v5e:2x2
jax: 0.10.0
libtpu: 0.0.40
codegen_flags: <defaults>
</compile_context>

<pallas_src>
import jax
import jax.numpy as jnp
from jax import lax
from jax.experimental import pallas as pl
from jax.experimental.pallas import tpu as pltpu


def _cdiv(a, b):
    return -(-a // b)


def _default_compute_dtype():
    """bf16 VPU compute on v6e/v7x and later; f32 on v5e and earlier/unknown."""
    try:
        kind = jax.devices()[0].device_kind.lower()
    except Exception:
        return jnp.float32
    if any(tag in kind for tag in ("v2", "v3", "v4", "v5")):
        return jnp.float32
    return jnp.bfloat16


def _tree_sum(terms):
    """Pairwise tree-sum of a list of arrays (shorter dependency chains -> ILP)."""
    ts = list(terms)
    while len(ts) > 1:
        nxt = [ts[i] + ts[i + 1] for i in range(0, len(ts) - 1, 2)]
        if len(ts) % 2:
            nxt.append(ts[-1])
        ts = nxt
    return ts[0]


def _make_kernel(rc, n_iter, compute_dtype, unroll):
    """Kernel over one (4, r_tile, 128) input tile -> (3, r_tile, 128) output tile.

    rc:      rows (of 128 pixels) processed per inner-loop chunk (rc | r_tile).
    n_iter:  r_tile // rc
    """
    f32 = jnp.float32
    cdt = compute_dtype

    def kernel(x_ref, w_ref, o_ref):
        # x_ref: (4, r_tile, 128) VMEM f32
        # w_ref: (8, 64) SMEM f32 packed weight/bias table
        # o_ref: (3, r_tile, 128) VMEM f32

        # ---- hoist ALL SMEM scalar reads / casts out of the chunk loop ----
        w1 = [[w_ref[o, 0 + i].astype(cdt) for i in range(4)] for o in range(8)]
        b1 = [w_ref[o, 48].astype(cdt) for o in range(8)]
        w2 = [[w_ref[o, 4 + i].astype(cdt) for i in range(8)] for o in range(8)]
        b2 = [w_ref[o, 49].astype(cdt) for o in range(8)]
        w3 = [[w_ref[o, 12 + i].astype(cdt) for i in range(8)] for o in range(8)]
        b3 = [w_ref[o, 50].astype(cdt) for o in range(8)]
        # conv4, split per input branch; x-branch (residual folded) and bias stay f32
        # because the conv4 accumulators are kept in f32.
        w4c1 = [[w_ref[o, 20 + i].astype(cdt) for i in range(8)] for o in range(3)]
        w4c2 = [[w_ref[o, 28 + i].astype(cdt) for i in range(8)] for o in range(3)]
        w4c3 = [[w_ref[o, 36 + i].astype(cdt) for i in range(8)] for o in range(3)]
        w4x = [[w_ref[o, 44 + i] for i in range(4)] for o in range(3)]
        b4 = [w_ref[o, 51] for o in range(3)]

        def stage(planes, w, b):
            # ReLU(conv) in the compute dtype.
            outs = []
            for o in range(len(w)):
                s = _tree_sum([planes[i] * w[o][i] for i in range(len(planes))])
                outs.append(jnp.maximum(s + b[o], 0.0))
            return outs

        def c4_accumulate(acc, planes, w):
            # Add this stage's conv4 contribution; accumulator stays f32.
            out = []
            for o in range(len(acc)):
                s = _tree_sum([planes[i] * w[o][i] for i in range(len(planes))])
                out.append(acc[o] + s.astype(f32))
            return out

        def chunk(off):
            # Load the 4 input pixel planes for this chunk (f32).
            xpf = [x_ref[i, pl.ds(off, rc), :] for i in range(4)]
            # conv4 accumulators from the x branch (residual folded in) + bias, f32.
            acc = [_tree_sum([xpf[i] * w4x[o][i] for i in range(4)]) + b4[o]
                   for o in range(3)]
            xp = xpf if cdt == f32 else [p.astype(cdt) for p in xpf]

            c1 = stage(xp, w1, b1)            # conv1: 4 -> 8, ReLU
            acc = c4_accumulate(acc, c1, w4c1)
            c2 = stage(c1, w2, b2)            # conv2: 8 -> 8, ReLU
            acc = c4_accumulate(acc, c2, w4c2)
            c3 = stage(c2, w3, b3)            # conv3: 8 -> 8, ReLU
            acc = c4_accumulate(acc, c3, w4c3)

            for o in range(3):
                o_ref[o, pl.ds(off, rc), :] = acc[o]

        if n_iter == 1:
            chunk(0)
        else:
            # rc is a multiple of 8 and divides r_tile -> offsets always aligned.
            def body(ci, carry):
                off = pl.multiple_of(ci * rc, 8)
                chunk(off)
                return carry

            lax.fori_loop(0, n_iter, body, 0, unroll=unroll)

    return kernel


def _pack_weights(params):
    """Pack all conv weights/biases into one (8, 64) f32 table (SMEM-friendly)."""
    w1, b1, w2, b2, w3, b3, w4, b4 = params
    w1m = w1.reshape(8, 4).astype(jnp.float32)
    w2m = w2.reshape(8, 8).astype(jnp.float32)
    w3m = w3.reshape(8, 8).astype(jnp.float32)
    w4m = w4.reshape(3, 28).astype(jnp.float32)
    # Fold the residual (out = x[:, :3] + conv4) into conv4's x-branch weights.
    w4x_eff = w4m[:, 24:28] + jnp.eye(3, 4, dtype=jnp.float32)

    packed = jnp.zeros((8, 64), jnp.float32)
    packed = packed.at[:, 0:4].set(w1m)                # conv1 weights
    packed = packed.at[:, 4:12].set(w2m)               # conv2 weights
    packed = packed.at[:, 12:20].set(w3m)              # conv3 weights
    packed = packed.at[0:3, 20:28].set(w4m[:, 0:8])    # conv4 (c1 branch)
    packed = packed.at[0:3, 28:36].set(w4m[:, 8:16])   # conv4 (c2 branch)
    packed = packed.at[0:3, 36:44].set(w4m[:, 16:24])  # conv4 (c3 branch)
    packed = packed.at[0:3, 44:48].set(w4x_eff)        # conv4 (x branch) + residual
    packed = packed.at[:, 48].set(b1.astype(jnp.float32))
    packed = packed.at[:, 49].set(b2.astype(jnp.float32))
    packed = packed.at[:, 50].set(b3.astype(jnp.float32))
    packed = packed.at[0:3, 51].set(b4.astype(jnp.float32))
    return packed


def micro_uwcnn_depth_pallas(x_nchw, params, *, pix_per_tile=131072,
                             pix_per_chunk=None, compute_dtype=None):
    """x_nchw: (N, 4, H, W) float32 -> (N, 3, H, W) float32."""
    N, C, H, W = x_nchw.shape
    assert C == 4

    if compute_dtype is None:
        compute_dtype = _default_compute_dtype()
    if pix_per_chunk is None:
        # bf16 planes use half the vregs -> afford a larger chunk to amortise the
        # per-chunk scalar-weight splats (review items 2/7).
        pix_per_chunk = 4096 if compute_dtype == jnp.bfloat16 else 2048

    P = H * W
    rows = _cdiv(P, 128)
    rc_req = max(pix_per_chunk // 128, 8)

    if rows <= rc_req:
        # Tiny image: one chunk == one tile (full-extent block, always legal).
        rc = r_tile = rows
        n_tiles = 1
        n_iter = 1
    else:
        rc = max((rc_req // 8) * 8, 8)                 # aligned chunk rows
        rows_c = _cdiv(rows, rc) * rc                  # rows padded to multiple of rc
        rt_req = max(pix_per_tile // 128, rc)
        r_tile = min(max((rt_req // rc) * rc, rc), rows_c)
        n_tiles = _cdiv(rows_c, r_tile)
        # v7x has 2 TensorCores: make sure there are >= 2 parallel grid steps.
        if N * n_tiles < 2 and rows_c >= 2 * rc:
            n_tiles = 2
        # Rebalance tiles (keeps rc | r_tile, minimises pad waste).
        r_tile = _cdiv(_cdiv(rows_c, n_tiles), rc) * rc
        n_iter = r_tile // rc

    rows_pad = n_tiles * r_tile
    P_pad = rows_pad * 128

    # NCHW -> (N, C, rows_pad, 128): free reshape plus a small pad.
    x3 = x_nchw.reshape(N, C, P)
    if P_pad != P:
        x3 = jnp.pad(x3, ((0, 0), (0, 0), (0, P_pad - P)))
    x4 = x3.reshape(N, C, rows_pad, 128)

    packed = _pack_weights(params)
    kernel = _make_kernel(rc, n_iter, compute_dtype, unroll=2)

    out4 = pl.pallas_call(
        kernel,
        out_shape=jax.ShapeDtypeStruct((N, 3, rows_pad, 128), jnp.float32),
        grid=(N, n_tiles),
        in_specs=[
            pl.BlockSpec((None, 4, r_tile, 128), lambda n, t: (n, 0, t, 0)),
            # Packed weight table stays resident in SMEM (not pipelined per step).
            pl.BlockSpec(memory_space=pltpu.MemorySpace.SMEM),
        ],
        out_specs=pl.BlockSpec((None, 3, r_tile, 128), lambda n, t: (n, 0, t, 0)),
        compiler_params=pltpu.CompilerParams(
            dimension_semantics=("parallel", "parallel"),
            vmem_limit_bytes=24 * 1024 * 1024,
        ),
    )(x4, packed)

    out3 = out4.reshape(N, 3, P_pad)
    if P_pad != P:
        out3 = out3[:, :, :P]
    return out3.reshape(N, 3, H, W)


def _reference(x_nchw, params):
    """Pure-JAX reference mimicking the PyTorch forward exactly."""
    (w1, b1, w2, b2, w3, b3, w4, b4) = params

    def conv1x1(x, w, b):
        y = jnp.einsum('nchw,oc->nohw', x, w.reshape(w.shape[0], w.shape[1]))
        return y + b.reshape(1, -1, 1, 1)

    c1 = jax.nn.relu(conv1x1(x_nchw, w1, b1))
    c2 = jax.nn.relu(conv1x1(c1, w2, b2))
    c3 = jax.nn.relu(conv1x1(c2, w3, b3))
    cat = jnp.concatenate([c1, c2, c3, x_nchw], axis=1)
    c4 = conv1x1(cat, w4, b4)
    return x_nchw[:, :3] + c4


def _init_params(key):
    """Deterministic synthetic parameters with PyTorch Conv2d shapes."""
    ks = jax.random.split(key, 8)

    def wb(kw, kb, out_c, in_c):
        scale = 1.0 / jnp.sqrt(in_c)
        w = jax.random.uniform(kw, (out_c, in_c, 1, 1), jnp.float32, -scale, scale)
        b = jax.random.uniform(kb, (out_c,), jnp.float32, -scale, scale)
        return w, b

    w1, b1 = wb(ks[0], ks[1], 8, 4)
    w2, b2 = wb(ks[2], ks[3], 8, 8)
    w3, b3 = wb(ks[4], ks[5], 8, 8)
    w4, b4 = wb(ks[6], ks[7], 3, 28)
    return (w1, b1, w2, b2, w3, b3, w4, b4)


if __name__ == "__main__":
    key = jax.random.PRNGKey(0)
    k_x, k_x2, k_p = jax.random.split(key, 3)
    params = _init_params(k_p)

    cdt = _default_compute_dtype()
    tol = 5e-2 if cdt == jnp.bfloat16 else 1e-4  # bf16 intermediates on v6e/v7x

    # Small case from the module spec (single-chunk path).
    x = jax.random.normal(k_x, (2, 4, 16, 16), dtype=jnp.float32)
    out = jax.block_until_ready(micro_uwcnn_depth_pallas(x, params, compute_dtype=cdt))
    ref = _reference(x, params)
    assert out.shape == (2, 3, 16, 16)
    assert jnp.allclose(out, ref, atol=tol, rtol=tol), "mismatch vs reference (small)"

    # Larger case exercising the chunked / unrolled / padded path.
    x2 = jax.random.normal(k_x2, (2, 4, 80, 80), dtype=jnp.float32)
    out2 = jax.block_until_ready(micro_uwcnn_depth_pallas(x2, params, compute_dtype=cdt))
    ref2 = _reference(x2, params)
    assert out2.shape == (2, 3, 80, 80)
    assert jnp.allclose(out2, ref2, atol=tol, rtol=tol), "mismatch vs reference (chunked)"

    print("KERNEL_OK")
</pallas_src>

<mosaic_0001>
module attributes {stable_mosaic.version = 11 : i64} {
  func.func @kernel(%arg0: i32, %arg1: i32, %arg2: memref<1x4x2x128xf32, #tpu.memory_space<vmem>>, %arg3: memref<8x64xf32, #tpu.memory_space<smem>>, %arg4: memref<1x3x2x128xf32, #tpu.memory_space<vmem>>) attributes {dimension_semantics = [#tpu.dimension_semantics<parallel>, #tpu.dimension_semantics<parallel>], iteration_bounds = array<i64: 2, 1>, scalar_prefetch = 0 : i64, scratch_operands = 0 : i64, tpu.core_type = #tpu.core_type<tc>, window_params = [{transform_indices = @transform_0, window_bounds = array<i64: 1, 4, 2, 128>}, {transform_indices = @transform_1, window_bounds = array<i64: 8, 64>}, {transform_indices = @transform_2, window_bounds = array<i64: 1, 3, 2, 128>}]} {
    %c0 = arith.constant 0 : index
    %c0_0 = arith.constant 0 : index
    %0 = memref.load %arg3[%c0, %c0_0] : memref<8x64xf32, #tpu.memory_space<smem>>
    %1 = arith.truncf %0 : f32 to bf16
    %c0_1 = arith.constant 0 : index
    %c1 = arith.constant 1 : index
    %2 = memref.load %arg3[%c0_1, %c1] : memref<8x64xf32, #tpu.memory_space<smem>>
    %3 = arith.truncf %2 : f32 to bf16
    %c0_2 = arith.constant 0 : index
    %c2 = arith.constant 2 : index
    %4 = memref.load %arg3[%c0_2, %c2] : memref<8x64xf32, #tpu.memory_space<smem>>
    %5 = arith.truncf %4 : f32 to bf16
    %c0_3 = arith.constant 0 : index
    %c3 = arith.constant 3 : index
    %6 = memref.load %arg3[%c0_3, %c3] : memref<8x64xf32, #tpu.memory_space<smem>>
    %7 = arith.truncf %6 : f32 to bf16
    %c1_4 = arith.constant 1 : index
    %c0_5 = arith.constant 0 : index
    %8 = memref.load %arg3[%c1_4, %c0_5] : memref<8x64xf32, #tpu.memory_space<smem>>
    %9 = arith.truncf %8 : f32 to bf16
    %c1_6 = arith.constant 1 : index
    %c1_7 = arith.constant 1 : index
    %10 = memref.load %arg3[%c1_6, %c1_7] : memref<8x64xf32, #tpu.memory_space<smem>>
    %11 = arith.truncf %10 : f32 to bf16
    %c1_8 = arith.constant 1 : index
    %c2_9 = arith.constant 2 : index
    %12 = memref.load %arg3[%c1_8, %c2_9] : memref<8x64xf32, #tpu.memory_space<smem>>
    %13 = arith.truncf %12 : f32 to bf16
    %c1_10 = arith.constant 1 : index
    %c3_11 = arith.constant 3 : index
    %14 = memref.load %arg3[%c1_10, %c3_11] : memref<8x64xf32, #tpu.memory_space<smem>>
    %15 = arith.truncf %14 : f32 to bf16
    %c2_12 = arith.constant 2 : index
    %c0_13 = arith.constant 0 : index
    %16 = memref.load %arg3[%c2_12, %c0_13] : memref<8x64xf32, #tpu.memory_space<smem>>
    %17 = arith.truncf %16 : f32 to bf16
    %c2_14 = arith.constant 2 : index
    %c1_15 = arith.constant 1 : index
    %18 = memref.load %arg3[%c2_14, %c1_15] : memref<8x64xf32, #tpu.memory_space<smem>>
    %19 = arith.truncf %18 : f32 to bf16
    %c2_16 = arith.constant 2 : index
    %c2_17 = arith.constant 2 : index
    %20 = memref.load %arg3[%c2_16, %c2_17] : memref<8x64xf32, #tpu.memory_space<smem>>
    %21 = arith.truncf %20 : f32 to bf16
    %c2_18 = arith.constant 2 : index
    %c3_19 = arith.constant 3 : index
    %22 = memref.load %arg3[%c2_18, %c3_19] : memref<8x64xf32, #tpu.memory_space<smem>>
    %23 = arith.truncf %22 : f32 to bf16
    %c3_20 = arith.constant 3 : index
    %c0_21 = arith.constant 0 : index
    %24 = memref.load %arg3[%c3_20, %c0_21] : memref<8x64xf32, #tpu.memory_space<smem>>
    %25 = arith.truncf %24 : f32 to bf16
    %c3_22 = arith.constant 3 : index
    %c1_23 = arith.constant 1 : index
    %26 = memref.load %arg3[%c3_22, %c1_23] : memref<8x64xf32, #tpu.memory_space<smem>>
    %27 = arith.truncf %26 : f32 to bf16
    %c3_24 = arith.constant 3 : index
    %c2_25 = arith.constant 2 : index
    %28 = memref.load %arg3[%c3_24, %c2_25] : memref<8x64xf32, #tpu.memory_space<smem>>
    %29 = arith.truncf %28 : f32 to bf16
    %c3_26 = arith.constant 3 : index
    %c3_27 = arith.constant 3 : index
    %30 = memref.load %arg3[%c3_26, %c3_27] : memref<8x64xf32, #tpu.memory_space<smem>>
    %31 = arith.truncf %30 : f32 to bf16
    %c4 = arith.constant 4 : index
    %c0_28 = arith.constant 0 : index
    %32 = memref.load %arg3[%c4, %c0_28] : memref<8x64xf32, #tpu.memory_space<smem>>
    %33 = arith.truncf %32 : f32 to bf16
    %c4_29 = arith.constant 4 : index
    %c1_30 = arith.constant 1 : index
    %34 = memref.load %arg3[%c4_29, %c1_30] : memref<8x64xf32, #tpu.memory_space<smem>>
    %35 = arith.truncf %34 : f32 to bf16
    %c4_31 = arith.constant 4 : index
    %c2_32 = arith.constant 2 : index
    %36 = memref.load %arg3[%c4_31, %c2_32] : memref<8x64xf32, #tpu.memory_space<smem>>
    %37 = arith.truncf %36 : f32 to bf16
    %c4_33 = arith.constant 4 : index
    %c3_34 = arith.constant 3 : index
    %38 = memref.load %arg3[%c4_33, %c3_34] : memref<8x64xf32, #tpu.memory_space<smem>>
    %39 = arith.truncf %38 : f32 to bf16
    %c5 = arith.constant 5 : index
    %c0_35 = arith.constant 0 : index
    %40 = memref.load %arg3[%c5, %c0_35] : memref<8x64xf32, #tpu.memory_space<smem>>
    %41 = arith.truncf %40 : f32 to bf16
    %c5_36 = arith.constant 5 : index
    %c1_37 = arith.constant 1 : index
    %42 = memref.load %arg3[%c5_36, %c1_37] : memref<8x64xf32, #tpu.memory_space<smem>>
    %43 = arith.truncf %42 : f32 to bf16
    %c5_38 = arith.constant 5 : index
    %c2_39 = arith.constant 2 : index
    %44 = memref.load %arg3[%c5_38, %c2_39] : memref<8x64xf32, #tpu.memory_space<smem>>
    %45 = arith.truncf %44 : f32 to bf16
    %c5_40 = arith.constant 5 : index
    %c3_41 = arith.constant 3 : index
    %46 = memref.load %arg3[%c5_40, %c3_41] : memref<8x64xf32, #tpu.memory_space<smem>>
    %47 = arith.truncf %46 : f32 to bf16
    %c6 = arith.constant 6 : index
    %c0_42 = arith.constant 0 : index
    %48 = memref.load %arg3[%c6, %c0_42] : memref<8x64xf32, #tpu.memory_space<smem>>
    %49 = arith.truncf %48 : f32 to bf16
    %c6_43 = arith.constant 6 : index
    %c1_44 = arith.constant 1 : index
    %50 = memref.load %arg3[%c6_43, %c1_44] : memref<8x64xf32, #tpu.memory_space<smem>>
    %51 = arith.truncf %50 : f32 to bf16
    %c6_45 = arith.constant 6 : index
    %c2_46 = arith.constant 2 : index
    %52 = memref.load %arg3[%c6_45, %c2_46] : memref<8x64xf32, #tpu.memory_space<smem>>
    %53 = arith.truncf %52 : f32 to bf16
    %c6_47 = arith.constant 6 : index
    %c3_48 = arith.constant 3 : index
    %54 = memref.load %arg3[%c6_47, %c3_48] : memref<8x64xf32, #tpu.memory_space<smem>>
    %55 = arith.truncf %54 : f32 to bf16
    %c7 = arith.constant 7 : index
    %c0_49 = arith.constant 0 : index
    %56 = memref.load %arg3[%c7, %c0_49] : memref<8x64xf32, #tpu.memory_space<smem>>
    %57 = arith.truncf %56 : f32 to bf16
    %c7_50 = arith.constant 7 : index
    %c1_51 = arith.constant 1 : index
    %58 = memref.load %arg3[%c7_50, %c1_51] : memref<8x64xf32, #tpu.memory_space<smem>>
    %59 = arith.truncf %58 : f32 to bf16
    %c7_52 = arith.constant 7 : index
    %c2_53 = arith.constant 2 : index
    %60 = memref.load %arg3[%c7_52, %c2_53] : memref<8x64xf32, #tpu.memory_space<smem>>
    %61 = arith.truncf %60 : f32 to bf16
    %c7_54 = arith.constant 7 : index
    %c3_55 = arith.constant 3 : index
    %62 = memref.load %arg3[%c7_54, %c3_55] : memref<8x64xf32, #tpu.memory_space<smem>>
    %63 = arith.truncf %62 : f32 to bf16
    %c0_56 = arith.constant 0 : index
    %c48 = arith.constant 48 : index
    %64 = memref.load %arg3[%c0_56, %c48] : memref<8x64xf32, #tpu.memory_space<smem>>
    %65 = arith.truncf %64 : f32 to bf16
    %c1_57 = arith.constant 1 : index
    %c48_58 = arith.constant 48 : index
    %66 = memref.load %arg3[%c1_57, %c48_58] : memref<8x64xf32, #tpu.memory_space<smem>>
    %67 = arith.truncf %66 : f32 to bf16
    %c2_59 = arith.constant 2 : index
    %c48_60 = arith.constant 48 : index
    %68 = memref.load %arg3[%c2_59, %c48_60] : memref<8x64xf32, #tpu.memory_space<smem>>
    %69 = arith.truncf %68 : f32 to bf16
    %c3_61 = arith.constant 3 : index
    %c48_62 = arith.constant 48 : index
    %70 = memref.load %arg3[%c3_61, %c48_62] : memref<8x64xf32, #tpu.memory_space<smem>>
    %71 = arith.truncf %70 : f32 to bf16
    %c4_63 = arith.constant 4 : index
    %c48_64 = arith.constant 48 : index
    %72 = memref.load %arg3[%c4_63, %c48_64] : memref<8x64xf32, #tpu.memory_space<smem>>
    %73 = arith.truncf %72 : f32 to bf16
    %c5_65 = arith.constant 5 : index
    %c48_66 = arith.constant 48 : index
    %74 = memref.load %arg3[%c5_65, %c48_66] : memref<8x64xf32, #tpu.memory_space<smem>>
    %75 = arith.truncf %74 : f32 to bf16
    %c6_67 = arith.constant 6 : index
    %c48_68 = arith.constant 48 : index
    %76 = memref.load %arg3[%c6_67, %c48_68] : memref<8x64xf32, #tpu.memory_space<smem>>
    %77 = arith.truncf %76 : f32 to bf16
    %c7_69 = arith.constant 7 : index
    %c48_70 = arith.constant 48 : index
    %78 = memref.load %arg3[%c7_69, %c48_70] : memref<8x64xf32, #tpu.memory_space<smem>>
    %79 = arith.truncf %78 : f32 to bf16
    %c0_71 = arith.constant 0 : index
    %c4_72 = arith.constant 4 : index
    %80 = memref.load %arg3[%c0_71, %c4_72] : memref<8x64xf32, #tpu.memory_space<smem>>
    %81 = arith.truncf %80 : f32 to bf16
    %c0_73 = arith.constant 0 : index
    %c5_74 = arith.constant 5 : index
    %82 = memref.load %arg3[%c0_73, %c5_74] : memref<8x64xf32, #tpu.memory_space<smem>>
    %83 = arith.truncf %82 : f32 to bf16
    %c0_75 = arith.constant 0 : index
    %c6_76 = arith.constant 6 : index
    %84 = memref.load %arg3[%c0_75, %c6_76] : memref<8x64xf32, #tpu.memory_space<smem>>
    %85 = arith.truncf %84 : f32 to bf16
    %c0_77 = arith.constant 0 : index
    %c7_78 = arith.constant 7 : index
    %86 = memref.load %arg3[%c0_77, %c7_78] : memref<8x64xf32, #tpu.memory_space<smem>>
    %87 = arith.truncf %86 : f32 to bf16
    %c0_79 = arith.constant 0 : index
    %c8 = arith.constant 8 : index
    %88 = memref.load %arg3[%c0_79, %c8] : memref<8x64xf32, #tpu.memory_space<smem>>
    %89 = arith.truncf %88 : f32 to bf16
    %c0_80 = arith.constant 0 : index
    %c9 = arith.constant 9 : index
    %90 = memref.load %arg3[%c0_80, %c9] : memref<8x64xf32, #tpu.memory_space<smem>>
    %91 = arith.truncf %90 : f32 to bf16
    %c0_81 = arith.constant 0 : index
    %c10 = arith.constant 10 : index
    %92 = memref.load %arg3[%c0_81, %c10] : memref<8x64xf32, #tpu.memory_space<smem>>
    %93 = arith.truncf %92 : f32 to bf16
    %c0_82 = arith.constant 0 : index
    %c11 = arith.constant 11 : index
    %94 = memref.load %arg3[%c0_82, %c11] : memref<8x64xf32, #tpu.memory_space<smem>>
    %95 = arith.truncf %94 : f32 to bf16
    %c1_83 = arith.constant 1 : index
    %c4_84 = arith.constant 4 : index
    %96 = memref.load %arg3[%c1_83, %c4_84] : memref<8x64xf32, #tpu.memory_space<smem>>
    %97 = arith.truncf %96 : f32 to bf16
    %c1_85 = arith.constant 1 : index
    %c5_86 = arith.constant 5 : index
    %98 = memref.load %arg3[%c1_85, %c5_86] : memref<8x64xf32, #tpu.memory_space<smem>>
    %99 = arith.truncf %98 : f32 to bf16
    %c1_87 = arith.constant 1 : index
    %c6_88 = arith.constant 6 : index
    %100 = memref.load %arg3[%c1_87, %c6_88] : memref<8x64xf32, #tpu.memory_space<smem>>
    %101 = arith.truncf %100 : f32 to bf16
    %c1_89 = arith.constant 1 : index
    %c7_90 = arith.constant 7 : index
    %102 = memref.load %arg3[%c1_89, %c7_90] : memref<8x64xf32, #tpu.memory_space<smem>>
    %103 = arith.truncf %102 : f32 to bf16
    %c1_91 = arith.constant 1 : index
    %c8_92 = arith.constant 8 : index
    %104 = memref.load %arg3[%c1_91, %c8_92] : memref<8x64xf32, #tpu.memory_space<smem>>
    %105 = arith.truncf %104 : f32 to bf16
    %c1_93 = arith.constant 1 : index
    %c9_94 = arith.constant 9 : index
    %106 = memref.load %arg3[%c1_93, %c9_94] : memref<8x64xf32, #tpu.memory_space<smem>>
    %107 = arith.truncf %106 : f32 to bf16
    %c1_95 = arith.constant 1 : index
    %c10_96 = arith.constant 10 : index
    %108 = memref.load %arg3[%c1_95, %c10_96] : memref<8x64xf32, #tpu.memory_space<smem>>
    %109 = arith.truncf %108 : f32 to bf16
    %c1_97 = arith.constant 1 : index
    %c11_98 = arith.constant 11 : index
    %110 = memref.load %arg3[%c1_97, %c11_98] : memref<8x64xf32, #tpu.memory_space<smem>>
    %111 = arith.truncf %110 : f32 to bf16
    %c2_99 = arith.constant 2 : index
    %c4_100 = arith.constant 4 : index
    %112 = memref.load %arg3[%c2_99, %c4_100] : memref<8x64xf32, #tpu.memory_space<smem>>
    %113 = arith.truncf %112 : f32 to bf16
    %c2_101 = arith.constant 2 : index
    %c5_102 = arith.constant 5 : index
    %114 = memref.load %arg3[%c2_101, %c5_102] : memref<8x64xf32, #tpu.memory_space<smem>>
    %115 = arith.truncf %114 : f32 to bf16
    %c2_103 = arith.constant 2 : index
    %c6_104 = arith.constant 6 : index
    %116 = memref.load %arg3[%c2_103, %c6_104] : memref<8x64xf32, #tpu.memory_space<smem>>
    %117 = arith.truncf %116 : f32 to bf16
    %c2_105 = arith.constant 2 : index
    %c7_106 = arith.constant 7 : index
    %118 = memref.load %arg3[%c2_105, %c7_106] : memref<8x64xf32, #tpu.memory_space<smem>>
    %119 = arith.truncf %118 : f32 to bf16
    %c2_107 = arith.constant 2 : index
    %c8_108 = arith.constant 8 : index
    %120 = memref.load %arg3[%c2_107, %c8_108] : memref<8x64xf32, #tpu.memory_space<smem>>
    %121 = arith.truncf %120 : f32 to bf16
    %c2_109 = arith.constant 2 : index
    %c9_110 = arith.constant 9 : index
    %122 = memref.load %arg3[%c2_109, %c9_110] : memref<8x64xf32, #tpu.memory_space<smem>>
    %123 = arith.truncf %122 : f32 to bf16
    %c2_111 = arith.constant 2 : index
    %c10_112 = arith.constant 10 : index
    %124 = memref.load %arg3[%c2_111, %c10_112] : memref<8x64xf32, #tpu.memory_space<smem>>
    %125 = arith.truncf %124 : f32 to bf16
    %c2_113 = arith.constant 2 : index
    %c11_114 = arith.constant 11 : index
    %126 = memref.load %arg3[%c2_113, %c11_114] : memref<8x64xf32, #tpu.memory_space<smem>>
    %127 = arith.truncf %126 : f32 to bf16
    %c3_115 = arith.constant 3 : index
    %c4_116 = arith.constant 4 : index
    %128 = memref.load %arg3[%c3_115, %c4_116] : memref<8x64xf32, #tpu.memory_space<smem>>
    %129 = arith.truncf %128 : f32 to bf16
    %c3_117 = arith.constant 3 : index
    %c5_118 = arith.constant 5 : index
    %130 = memref.load %arg3[%c3_117, %c5_118] : memref<8x64xf32, #tpu.memory_space<smem>>
    %131 = arith.truncf %130 : f32 to bf16
    %c3_119 = arith.constant 3 : index
    %c6_120 = arith.constant 6 : index
    %132 = memref.load %arg3[%c3_119, %c6_120] : memref<8x64xf32, #tpu.memory_space<smem>>
    %133 = arith.truncf %132 : f32 to bf16
    %c3_121 = arith.constant 3 : index
    %c7_122 = arith.constant 7 : index
    %134 = memref.load %arg3[%c3_121, %c7_122] : memref<8x64xf32, #tpu.memory_space<smem>>
    %135 = arith.truncf %134 : f32 to bf16
    %c3_123 = arith.constant 3 : index
    %c8_124 = arith.constant 8 : index
    %136 = memref.load %arg3[%c3_123, %c8_124] : memref<8x64xf32, #tpu.memory_space<smem>>
    %137 = arith.truncf %136 : f32 to bf16
    %c3_125 = arith.constant 3 : index
    %c9_126 = arith.constant 9 : index
    %138 = memref.load %arg3[%c3_125, %c9_126] : memref<8x64xf32, #tpu.memory_space<smem>>
    %139 = arith.truncf %138 : f32 to bf16
    %c3_127 = arith.constant 3 : index
    %c10_128 = arith.constant 10 : index
    %140 = memref.load %arg3[%c3_127, %c10_128] : memref<8x64xf32, #tpu.memory_space<smem>>
    %141 = arith.truncf %140 : f32 to bf16
    %c3_129 = arith.constant 3 : index
    %c11_130 = arith.constant 11 : index
    %142 = memref.load %arg3[%c3_129, %c11_130] : memref<8x64xf32, #tpu.memory_space<smem>>
    %143 = arith.truncf %142 : f32 to bf16
    %c4_131 = arith.constant 4 : index
    %c4_132 = arith.constant 4 : index
    %144 = memref.load %arg3[%c4_131, %c4_132] : memref<8x64xf32, #tpu.memory_space<smem>>
    %145 = arith.truncf %144 : f32 to bf16
    %c4_133 = arith.constant 4 : index
    %c5_134 = arith.constant 5 : index
    %146 = memref.load %arg3[%c4_133, %c5_134] : memref<8x64xf32, #tpu.memory_space<smem>>
    %147 = arith.truncf %146 : f32 to bf16
    %c4_135 = arith.constant 4 : index
    %c6_136 = arith.constant 6 : index
    %148 = memref.load %arg3[%c4_135, %c6_136] : memref<8x64xf32, #tpu.memory_space<smem>>
    %149 = arith.truncf %148 : f32 to bf16
    %c4_137 = arith.constant 4 : index
    %c7_138 = arith.constant 7 : index
    %150 = memref.load %arg3[%c4_137, %c7_138] : memref<8x64xf32, #tpu.memory_space<smem>>
    %151 = arith.truncf %150 : f32 to bf16
    %c4_139 = arith.constant 4 : index
    %c8_140 = arith.constant 8 : index
    %152 = memref.load %arg3[%c4_139, %c8_140] : memref<8x64xf32, #tpu.memory_space<smem>>
    %153 = arith.truncf %152 : f32 to bf16
    %c4_141 = arith.constant 4 : index
    %c9_142 = arith.constant 9 : index
    %154 = memref.load %arg3[%c4_141, %c9_142] : memref<8x64xf32, #tpu.memory_space<smem>>
    %155 = arith.truncf %154 : f32 to bf16
    %c4_143 = arith.constant 4 : index
    %c10_144 = arith.constant 10 : index
    %156 = memref.load %arg3[%c4_143, %c10_144] : memref<8x64xf32, #tpu.memory_space<smem>>
    %157 = arith.truncf %156 : f32 to bf16
    %c4_145 = arith.constant 4 : index
    %c11_146 = arith.constant 11 : index
    %158 = memref.load %arg3[%c4_145, %c11_146] : memref<8x64xf32, #tpu.memory_space<smem>>
    %159 = arith.truncf %158 : f32 to bf16
    %c5_147 = arith.constant 5 : index
    %c4_148 = arith.constant 4 : index
    %160 = memref.load %arg3[%c5_147, %c4_148] : memref<8x64xf32, #tpu.memory_space<smem>>
    %161 = arith.truncf %160 : f32 to bf16
    %c5_149 = arith.constant 5 : index
    %c5_150 = arith.constant 5 : index
    %162 = memref.load %arg3[%c5_149, %c5_150] : memref<8x64xf32, #tpu.memory_space<smem>>
    %163 = arith.truncf %162 : f32 to bf16
    %c5_151 = arith.constant 5 : index
    %c6_152 = arith.constant 6 : index
    %164 = memref.load %arg3[%c5_151, %c6_152] : memref<8x64xf32, #tpu.memory_space<smem>>
    %165 = arith.truncf %164 : f32 to bf16
    %c5_153 = arith.constant 5 : index
    %c7_154 = arith.constant 7 : index
    %166 = memref.load %arg3[%c5_153, %c7_154] : memref<8x64xf32, #tpu.memory_space<smem>>
    %167 = arith.truncf %166 : f32 to bf16
    %c5_155 = arith.constant 5 : index
    %c8_156 = arith.constant 8 : index
    %168 = memref.load %arg3[%c5_155, %c8_156] : memref<8x64xf32, #tpu.memory_space<smem>>
    %169 = arith.truncf %168 : f32 to bf16
    %c5_157 = arith.constant 5 : index
    %c9_158 = arith.constant 9 : index
    %170 = memref.load %arg3[%c5_157, %c9_158] : memref<8x64xf32, #tpu.memory_space<smem>>
    %171 = arith.truncf %170 : f32 to bf16
    %c5_159 = arith.constant 5 : index
    %c10_160 = arith.constant 10 : index
    %172 = memref.load %arg3[%c5_159, %c10_160] : memref<8x64xf32, #tpu.memory_space<smem>>
    %173 = arith.truncf %172 : f32 to bf16
    %c5_161 = arith.constant 5 : index
    %c11_162 = arith.constant 11 : index
    %174 = memref.load %arg3[%c5_161, %c11_162] : memref<8x64xf32, #tpu.memory_space<smem>>
    %175 = arith.truncf %174 : f32 to bf16
    %c6_163 = arith.constant 6 : index
    %c4_164 = arith.constant 4 : index
    %176 = memref.load %arg3[%c6_163, %c4_164] : memref<8x64xf32, #tpu.memory_space<smem>>
    %177 = arith.truncf %176 : f32 to bf16
    %c6_165 = arith.constant 6 : index
    %c5_166 = arith.constant 5 : index
    %178 = memref.load %arg3[%c6_165, %c5_166] : memref<8x64xf32, #tpu.memory_space<smem>>
    %179 = arith.truncf %178 : f32 to bf16
    %c6_167 = arith.constant 6 : index
    %c6_168 = arith.constant 6 : index
    %180 = memref.load %arg3[%c6_167, %c6_168] : memref<8x64xf32, #tpu.memory_space<smem>>
    %181 = arith.truncf %180 : f32 to bf16
    %c6_169 = arith.constant 6 : index
    %c7_170 = arith.constant 7 : index
    %182 = memref.load %arg3[%c6_169, %c7_170] : memref<8x64xf32, #tpu.memory_space<smem>>
    %183 = arith.truncf %182 : f32 to bf16
    %c6_171 = arith.constant 6 : index
    %c8_172 = arith.constant 8 : index
    %184 = memref.load %arg3[%c6_171, %c8_172] : memref<8x64xf32, #tpu.memory_space<smem>>
    %185 = arith.truncf %184 : f32 to bf16
    %c6_173 = arith.constant 6 : index
    %c9_174 = arith.constant 9 : index
    %186 = memref.load %arg3[%c6_173, %c9_174] : memref<8x64xf32, #tpu.memory_space<smem>>
    %187 = arith.truncf %186 : f32 to bf16
    %c6_175 = arith.constant 6 : index
    %c10_176 = arith.constant 10 : index
    %188 = memref.load %arg3[%c6_175, %c10_176] : memref<8x64xf32, #tpu.memory_space<smem>>
    %189 = arith.truncf %188 : f32 to bf16
    %c6_177 = arith.constant 6 : index
    %c11_178 = arith.constant 11 : index
    %190 = memref.load %arg3[%c6_177, %c11_178] : memref<8x64xf32, #tpu.memory_space<smem>>
    %191 = arith.truncf %190 : f32 to bf16
    %c7_179 = arith.constant 7 : index
    %c4_180 = arith.constant 4 : index
    %192 = memref.load %arg3[%c7_179, %c4_180] : memref<8x64xf32, #tpu.memory_space<smem>>
    %193 = arith.truncf %192 : f32 to bf16
    %c7_181 = arith.constant 7 : index
    %c5_182 = arith.constant 5 : index
    %194 = memref.load %arg3[%c7_181, %c5_182] : memref<8x64xf32, #tpu.memory_space<smem>>
    %195 = arith.truncf %194 : f32 to bf16
    %c7_183 = arith.constant 7 : index
    %c6_184 = arith.constant 6 : index
    %196 = memref.load %arg3[%c7_183, %c6_184] : memref<8x64xf32, #tpu.memory_space<smem>>
    %197 = arith.truncf %196 : f32 to bf16
    %c7_185 = arith.constant 7 : index
    %c7_186 = arith.constant 7 : index
    %198 = memref.load %arg3[%c7_185, %c7_186] : memref<8x64xf32, #tpu.memory_space<smem>>
    %199 = arith.truncf %198 : f32 to bf16
    %c7_187 = arith.constant 7 : index
    %c8_188 = arith.constant 8 : index
    %200 = memref.load %arg3[%c7_187, %c8_188] : memref<8x64xf32, #tpu.memory_space<smem>>
    %201 = arith.truncf %200 : f32 to bf16
    %c7_189 = arith.constant 7 : index
    %c9_190 = arith.constant 9 : index
    %202 = memref.load %arg3[%c7_189, %c9_190] : memref<8x64xf32, #tpu.memory_space<smem>>
    %203 = arith.truncf %202 : f32 to bf16
    %c7_191 = arith.constant 7 : index
    %c10_192 = arith.constant 10 : index
    %204 = memref.load %arg3[%c7_191, %c10_192] : memref<8x64xf32, #tpu.memory_space<smem>>
    %205 = arith.truncf %204 : f32 to bf16
    %c7_193 = arith.constant 7 : index
    %c11_194 = arith.constant 11 : index
    %206 = memref.load %arg3[%c7_193, %c11_194] : memref<8x64xf32, #tpu.memory_space<smem>>
    %207 = arith.truncf %206 : f32 to bf16
    %c0_195 = arith.constant 0 : index
    %c49 = arith.constant 49 : index
    %208 = memref.load %arg3[%c0_195, %c49] : memref<8x64xf32, #tpu.memory_space<smem>>
    %209 = arith.truncf %208 : f32 to bf16
    %c1_196 = arith.constant 1 : index
    %c49_197 = arith.constant 49 : index
    %210 = memref.load %arg3[%c1_196, %c49_197] : memref<8x64xf32, #tpu.memory_space<smem>>
    %211 = arith.truncf %210 : f32 to bf16
    %c2_198 = arith.constant 2 : index
    %c49_199 = arith.constant 49 : index
    %212 = memref.load %arg3[%c2_198, %c49_199] : memref<8x64xf32, #tpu.memory_space<smem>>
    %213 = arith.truncf %212 : f32 to bf16
    %c3_200 = arith.constant 3 : index
    %c49_201 = arith.constant 49 : index
    %214 = memref.load %arg3[%c3_200, %c49_201] : memref<8x64xf32, #tpu.memory_space<smem>>
    %215 = arith.truncf %214 : f32 to bf16
    %c4_202 = arith.constant 4 : index
    %c49_203 = arith.constant 49 : index
    %216 = memref.load %arg3[%c4_202, %c49_203] : memref<8x64xf32, #tpu.memory_space<smem>>
    %217 = arith.truncf %216 : f32 to bf16
    %c5_204 = arith.constant 5 : index
    %c49_205 = arith.constant 49 : index
    %218 = memref.load %arg3[%c5_204, %c49_205] : memref<8x64xf32, #tpu.memory_space<smem>>
    %219 = arith.truncf %218 : f32 to bf16
    %c6_206 = arith.constant 6 : index
    %c49_207 = arith.constant 49 : index
    %220 = memref.load %arg3[%c6_206, %c49_207] : memref<8x64xf32, #tpu.memory_space<smem>>
    %221 = arith.truncf %220 : f32 to bf16
    %c7_208 = arith.constant 7 : index
    %c49_209 = arith.constant 49 : index
    %222 = memref.load %arg3[%c7_208, %c49_209] : memref<8x64xf32, #tpu.memory_space<smem>>
    %223 = arith.truncf %222 : f32 to bf16
    %c0_210 = arith.constant 0 : index
    %c12 = arith.constant 12 : index
    %224 = memref.load %arg3[%c0_210, %c12] : memref<8x64xf32, #tpu.memory_space<smem>>
    %225 = arith.truncf %224 : f32 to bf16
    %c0_211 = arith.constant 0 : index
    %c13 = arith.constant 13 : index
    %226 = memref.load %arg3[%c0_211, %c13] : memref<8x64xf32, #tpu.memory_space<smem>>
    %227 = arith.truncf %226 : f32 to bf16
    %c0_212 = arith.constant 0 : index
    %c14 = arith.constant 14 : index
    %228 = memref.load %arg3[%c0_212, %c14] : memref<8x64xf32, #tpu.memory_space<smem>>
    %229 = arith.truncf %228 : f32 to bf16
    %c0_213 = arith.constant 0 : index
    %c15 = arith.constant 15 : index
    %230 = memref.load %arg3[%c0_213, %c15] : memref<8x64xf32, #tpu.memory_space<smem>>
    %231 = arith.truncf %230 : f32 to bf16
    %c0_214 = arith.constant 0 : index
    %c16 = arith.constant 16 : index
    %232 = memref.load %arg3[%c0_214, %c16] : memref<8x64xf32, #tpu.memory_space<smem>>
    %233 = arith.truncf %232 : f32 to bf16
    %c0_215 = arith.constant 0 : index
    %c17 = arith.constant 17 : index
    %234 = memref.load %arg3[%c0_215, %c17] : memref<8x64xf32, #tpu.memory_space<smem>>
    %235 = arith.truncf %234 : f32 to bf16
    %c0_216 = arith.constant 0 : index
    %c18 = arith.constant 18 : index
    %236 = memref.load %arg3[%c0_216, %c18] : memref<8x64xf32, #tpu.memory_space<smem>>
    %237 = arith.truncf %236 : f32 to bf16
    %c0_217 = arith.constant 0 : index
    %c19 = arith.constant 19 : index
    %238 = memref.load %arg3[%c0_217, %c19] : memref<8x64xf32, #tpu.memory_space<smem>>
    %239 = arith.truncf %238 : f32 to bf16
    %c1_218 = arith.constant 1 : index
    %c12_219 = arith.constant 12 : index
    %240 = memref.load %arg3[%c1_218, %c12_219] : memref<8x64xf32, #tpu.memory_space<smem>>
    %241 = arith.truncf %240 : f32 to bf16
    %c1_220 = arith.constant 1 : index
    %c13_221 = arith.constant 13 : index
    %242 = memref.load %arg3[%c1_220, %c13_221] : memref<8x64xf32, #tpu.memory_space<smem>>
    %243 = arith.truncf %242 : f32 to bf16
    %c1_222 = arith.constant 1 : index
    %c14_223 = arith.constant 14 : index
    %244 = memref.load %arg3[%c1_222, %c14_223] : memref<8x64xf32, #tpu.memory_space<smem>>
    %245 = arith.truncf %244 : f32 to bf16
    %c1_224 = arith.constant 1 : index
    %c15_225 = arith.constant 15 : index
    %246 = memref.load %arg3[%c1_224, %c15_225] : memref<8x64xf32, #tpu.memory_space<smem>>
    %247 = arith.truncf %246 : f32 to bf16
    %c1_226 = arith.constant 1 : index
    %c16_227 = arith.constant 16 : index
    %248 = memref.load %arg3[%c1_226, %c16_227] : memref<8x64xf32, #tpu.memory_space<smem>>
    %249 = arith.truncf %248 : f32 to bf16
    %c1_228 = arith.constant 1 : index
    %c17_229 = arith.constant 17 : index
    %250 = memref.load %arg3[%c1_228, %c17_229] : memref<8x64xf32, #tpu.memory_space<smem>>
    %251 = arith.truncf %250 : f32 to bf16
    %c1_230 = arith.constant 1 : index
    %c18_231 = arith.constant 18 : index
    %252 = memref.load %arg3[%c1_230, %c18_231] : memref<8x64xf32, #tpu.memory_space<smem>>
    %253 = arith.truncf %252 : f32 to bf16
    %c1_232 = arith.constant 1 : index
    %c19_233 = arith.constant 19 : index
    %254 = memref.load %arg3[%c1_232, %c19_233] : memref<8x64xf32, #tpu.memory_space<smem>>
    %255 = arith.truncf %254 : f32 to bf16
    %c2_234 = arith.constant 2 : index
    %c12_235 = arith.constant 12 : index
    %256 = memref.load %arg3[%c2_234, %c12_235] : memref<8x64xf32, #tpu.memory_space<smem>>
    %257 = arith.truncf %256 : f32 to bf16
    %c2_236 = arith.constant 2 : index
    %c13_237 = arith.constant 13 : index
    %258 = memref.load %arg3[%c2_236, %c13_237] : memref<8x64xf32, #tpu.memory_space<smem>>
    %259 = arith.truncf %258 : f32 to bf16
    %c2_238 = arith.constant 2 : index
    %c14_239 = arith.constant 14 : index
    %260 = memref.load %arg3[%c2_238, %c14_239] : memref<8x64xf32, #tpu.memory_space<smem>>
    %261 = arith.truncf %260 : f32 to bf16
    %c2_240 = arith.constant 2 : index
    %c15_241 = arith.constant 15 : index
    %262 = memref.load %arg3[%c2_240, %c15_241] : memref<8x64xf32, #tpu.memory_space<smem>>
    %263 = arith.truncf %262 : f32 to bf16
    %c2_242 = arith.constant 2 : index
    %c16_243 = arith.constant 16 : index
    %264 = memref.load %arg3[%c2_242, %c16_243] : memref<8x64xf32, #tpu.memory_space<smem>>
    %265 = arith.truncf %264 : f32 to bf16
    %c2_244 = arith.constant 2 : index
    %c17_245 = arith.constant 17 : index
    %266 = memref.load %arg3[%c2_244, %c17_245] : memref<8x64xf32, #tpu.memory_space<smem>>
    %267 = arith.truncf %266 : f32 to bf16
    %c2_246 = arith.constant 2 : index
    %c18_247 = arith.constant 18 : index
    %268 = memref.load %arg3[%c2_246, %c18_247] : memref<8x64xf32, #tpu.memory_space<smem>>
    %269 = arith.truncf %268 : f32 to bf16
    %c2_248 = arith.constant 2 : index
    %c19_249 = arith.constant 19 : index
    %270 = memref.load %arg3[%c2_248, %c19_249] : memref<8x64xf32, #tpu.memory_space<smem>>
    %271 = arith.truncf %270 : f32 to bf16
    %c3_250 = arith.constant 3 : index
    %c12_251 = arith.constant 12 : index
    %272 = memref.load %arg3[%c3_250, %c12_251] : memref<8x64xf32, #tpu.memory_space<smem>>
    %273 = arith.truncf %272 : f32 to bf16
    %c3_252 = arith.constant 3 : index
    %c13_253 = arith.constant 13 : index
    %274 = memref.load %arg3[%c3_252, %c13_253] : memref<8x64xf32, #tpu.memory_space<smem>>
    %275 = arith.truncf %274 : f32 to bf16
    %c3_254 = arith.constant 3 : index
    %c14_255 = arith.constant 14 : index
    %276 = memref.load %arg3[%c3_254, %c14_255] : memref<8x64xf32, #tpu.memory_space<smem>>
    %277 = arith.truncf %276 : f32 to bf16
    %c3_256 = arith.constant 3 : index
    %c15_257 = arith.constant 15 : index
    %278 = memref.load %arg3[%c3_256, %c15_257] : memref<8x64xf32, #tpu.memory_space<smem>>
    %279 = arith.truncf %278 : f32 to bf16
    %c3_258 = arith.constant 3 : index
    %c16_259 = arith.constant 16 : index
    %280 = memref.load %arg3[%c3_258, %c16_259] : memref<8x64xf32, #tpu.memory_space<smem>>
    %281 = arith.truncf %280 : f32 to bf16
    %c3_260 = arith.constant 3 : index
    %c17_261 = arith.constant 17 : index
    %282 = memref.load %arg3[%c3_260, %c17_261] : memref<8x64xf32, #tpu.memory_space<smem>>
    %283 = arith.truncf %282 : f32 to bf16
    %c3_262 = arith.constant 3 : index
    %c18_263 = arith.constant 18 : index
    %284 = memref.load %arg3[%c3_262, %c18_263] : memref<8x64xf32, #tpu.memory_space<smem>>
    %285 = arith.truncf %284 : f32 to bf16
    %c3_264 = arith.constant 3 : index
    %c19_265 = arith.constant 19 : index
    %286 = memref.load %arg3[%c3_264, %c19_265] : memref<8x64xf32, #tpu.memory_space<smem>>
    %287 = arith.truncf %286 : f32 to bf16
    %c4_266 = arith.constant 4 : index
    %c12_267 = arith.constant 12 : index
    %288 = memref.load %arg3[%c4_266, %c12_267] : memref<8x64xf32, #tpu.memory_space<smem>>
    %289 = arith.truncf %288 : f32 to bf16
    %c4_268 = arith.constant 4 : index
    %c13_269 = arith.constant 13 : index
    %290 = memref.load %arg3[%c4_268, %c13_269] : memref<8x64xf32, #tpu.memory_space<smem>>
    %291 = arith.truncf %290 : f32 to bf16
    %c4_270 = arith.constant 4 : index
    %c14_271 = arith.constant 14 : index
    %292 = memref.load %arg3[%c4_270, %c14_271] : memref<8x64xf32, #tpu.memory_space<smem>>
    %293 = arith.truncf %292 : f32 to bf16
    %c4_272 = arith.constant 4 : index
    %c15_273 = arith.constant 15 : index
    %294 = memref.load %arg3[%c4_272, %c15_273] : memref<8x64xf32, #tpu.memory_space<smem>>
    %295 = arith.truncf %294 : f32 to bf16
    %c4_274 = arith.constant 4 : index
    %c16_275 = arith.constant 16 : index
    %296 = memref.load %arg3[%c4_274, %c16_275] : memref<8x64xf32, #tpu.memory_space<smem>>
    %297 = arith.truncf %296 : f32 to bf16
    %c4_276 = arith.constant 4 : index
    %c17_277 = arith.constant 17 : index
    %298 = memref.load %arg3[%c4_276, %c17_277] : memref<8x64xf32, #tpu.memory_space<smem>>
    %299 = arith.truncf %298 : f32 to bf16
    %c4_278 = arith.constant 4 : index
    %c18_279 = arith.constant 18 : index
    %300 = memref.load %arg3[%c4_278, %c18_279] : memref<8x64xf32, #tpu.memory_space<smem>>
    %301 = arith.truncf %300 : f32 to bf16
    %c4_280 = arith.constant 4 : index
    %c19_281 = arith.constant 19 : index
    %302 = memref.load %arg3[%c4_280, %c19_281] : memref<8x64xf32, #tpu.memory_space<smem>>
    %303 = arith.truncf %302 : f32 to bf16
    %c5_282 = arith.constant 5 : index
    %c12_283 = arith.constant 12 : index
    %304 = memref.load %arg3[%c5_282, %c12_283] : memref<8x64xf32, #tpu.memory_space<smem>>
    %305 = arith.truncf %304 : f32 to bf16
    %c5_284 = arith.constant 5 : index
    %c13_285 = arith.constant 13 : index
    %306 = memref.load %arg3[%c5_284, %c13_285] : memref<8x64xf32, #tpu.memory_space<smem>>
    %307 = arith.truncf %306 : f32 to bf16
    %c5_286 = arith.constant 5 : index
    %c14_287 = arith.constant 14 : index
    %308 = memref.load %arg3[%c5_286, %c14_287] : memref<8x64xf32, #tpu.memory_space<smem>>
    %309 = arith.truncf %308 : f32 to bf16
    %c5_288 = arith.constant 5 : index
    %c15_289 = arith.constant 15 : index
    %310 = memref.load %arg3[%c5_288, %c15_289] : memref<8x64xf32, #tpu.memory_space<smem>>
    %311 = arith.truncf %310 : f32 to bf16
    %c5_290 = arith.constant 5 : index
    %c16_291 = arith.constant 16 : index
    %312 = memref.load %arg3[%c5_290, %c16_291] : memref<8x64xf32, #tpu.memory_space<smem>>
    %313 = arith.truncf %312 : f32 to bf16
    %c5_292 = arith.constant 5 : index
    %c17_293 = arith.constant 17 : index
    %314 = memref.load %arg3[%c5_292, %c17_293] : memref<8x64xf32, #tpu.memory_space<smem>>
    %315 = arith.truncf %314 : f32 to bf16
    %c5_294 = arith.constant 5 : index
    %c18_295 = arith.constant 18 : index
    %316 = memref.load %arg3[%c5_294, %c18_295] : memref<8x64xf32, #tpu.memory_space<smem>>
    %317 = arith.truncf %316 : f32 to bf16
    %c5_296 = arith.constant 5 : index
    %c19_297 = arith.constant 19 : index
    %318 = memref.load %arg3[%c5_296, %c19_297] : memref<8x64xf32, #tpu.memory_space<smem>>
    %319 = arith.truncf %318 : f32 to bf16
    %c6_298 = arith.constant 6 : index
    %c12_299 = arith.constant 12 : index
    %320 = memref.load %arg3[%c6_298, %c12_299] : memref<8x64xf32, #tpu.memory_space<smem>>
    %321 = arith.truncf %320 : f32 to bf16
    %c6_300 = arith.constant 6 : index
    %c13_301 = arith.constant 13 : index
    %322 = memref.load %arg3[%c6_300, %c13_301] : memref<8x64xf32, #tpu.memory_space<smem>>
    %323 = arith.truncf %322 : f32 to bf16
    %c6_302 = arith.constant 6 : index
    %c14_303 = arith.constant 14 : index
    %324 = memref.load %arg3[%c6_302, %c14_303] : memref<8x64xf32, #tpu.memory_space<smem>>
    %325 = arith.truncf %324 : f32 to bf16
    %c6_304 = arith.constant 6 : index
    %c15_305 = arith.constant 15 : index
    %326 = memref.load %arg3[%c6_304, %c15_305] : memref<8x64xf32, #tpu.memory_space<smem>>
    %327 = arith.truncf %326 : f32 to bf16
    %c6_306 = arith.constant 6 : index
    %c16_307 = arith.constant 16 : index
    %328 = memref.load %arg3[%c6_306, %c16_307] : memref<8x64xf32, #tpu.memory_space<smem>>
    %329 = arith.truncf %328 : f32 to bf16
    %c6_308 = arith.constant 6 : index
    %c17_309 = arith.constant 17 : index
    %330 = memref.load %arg3[%c6_308, %c17_309] : memref<8x64xf32, #tpu.memory_space<smem>>
    %331 = arith.truncf %330 : f32 to bf16
    %c6_310 = arith.constant 6 : index
    %c18_311 = arith.constant 18 : index
    %332 = memref.load %arg3[%c6_310, %c18_311] : memref<8x64xf32, #tpu.memory_space<smem>>
    %333 = arith.truncf %332 : f32 to bf16
    %c6_312 = arith.constant 6 : index
    %c19_313 = arith.constant 19 : index
    %334 = memref.load %arg3[%c6_312, %c19_313] : memref<8x64xf32, #tpu.memory_space<smem>>
    %335 = arith.truncf %334 : f32 to bf16
    %c7_314 = arith.constant 7 : index
    %c12_315 = arith.constant 12 : index
    %336 = memref.load %arg3[%c7_314, %c12_315] : memref<8x64xf32, #tpu.memory_space<smem>>
    %337 = arith.truncf %336 : f32 to bf16
    %c7_316 = arith.constant 7 : index
    %c13_317 = arith.constant 13 : index
    %338 = memref.load %arg3[%c7_316, %c13_317] : memref<8x64xf32, #tpu.memory_space<smem>>
    %339 = arith.truncf %338 : f32 to bf16
    %c7_318 = arith.constant 7 : index
    %c14_319 = arith.constant 14 : index
    %340 = memref.load %arg3[%c7_318, %c14_319] : memref<8x64xf32, #tpu.memory_space<smem>>
    %341 = arith.truncf %340 : f32 to bf16
    %c7_320 = arith.constant 7 : index
    %c15_321 = arith.constant 15 : index
    %342 = memref.load %arg3[%c7_320, %c15_321] : memref<8x64xf32, #tpu.memory_space<smem>>
    %343 = arith.truncf %342 : f32 to bf16
    %c7_322 = arith.constant 7 : index
    %c16_323 = arith.constant 16 : index
    %344 = memref.load %arg3[%c7_322, %c16_323] : memref<8x64xf32, #tpu.memory_space<smem>>
    %345 = arith.truncf %344 : f32 to bf16
    %c7_324 = arith.constant 7 : index
    %c17_325 = arith.constant 17 : index
    %346 = memref.load %arg3[%c7_324, %c17_325] : memref<8x64xf32, #tpu.memory_space<smem>>
    %347 = arith.truncf %346 : f32 to bf16
    %c7_326 = arith.constant 7 : index
    %c18_327 = arith.constant 18 : index
    %348 = memref.load %arg3[%c7_326, %c18_327] : memref<8x64xf32, #tpu.memory_space<smem>>
    %349 = arith.truncf %348 : f32 to bf16
    %c7_328 = arith.constant 7 : index
    %c19_329 = arith.constant 19 : index
    %350 = memref.load %arg3[%c7_328, %c19_329] : memref<8x64xf32, #tpu.memory_space<smem>>
    %351 = arith.truncf %350 : f32 to bf16
    %c0_330 = arith.constant 0 : index
    %c50 = arith.constant 50 : index
    %352 = memref.load %arg3[%c0_330, %c50] : memref<8x64xf32, #tpu.memory_space<smem>>
    %353 = arith.truncf %352 : f32 to bf16
    %c1_331 = arith.constant 1 : index
    %c50_332 = arith.constant 50 : index
    %354 = memref.load %arg3[%c1_331, %c50_332] : memref<8x64xf32, #tpu.memory_space<smem>>
    %355 = arith.truncf %354 : f32 to bf16
    %c2_333 = arith.constant 2 : index
    %c50_334 = arith.constant 50 : index
    %356 = memref.load %arg3[%c2_333, %c50_334] : memref<8x64xf32, #tpu.memory_space<smem>>
    %357 = arith.truncf %356 : f32 to bf16
    %c3_335 = arith.constant 3 : index
    %c50_336 = arith.constant 50 : index
    %358 = memref.load %arg3[%c3_335, %c50_336] : memref<8x64xf32, #tpu.memory_space<smem>>
    %359 = arith.truncf %358 : f32 to bf16
    %c4_337 = arith.constant 4 : index
    %c50_338 = arith.constant 50 : index
    %360 = memref.load %arg3[%c4_337, %c50_338] : memref<8x64xf32, #tpu.memory_space<smem>>
    %361 = arith.truncf %360 : f32 to bf16
    %c5_339 = arith.constant 5 : index
    %c50_340 = arith.constant 50 : index
    %362 = memref.load %arg3[%c5_339, %c50_340] : memref<8x64xf32, #tpu.memory_space<smem>>
    %363 = arith.truncf %362 : f32 to bf16
    %c6_341 = arith.constant 6 : index
    %c50_342 = arith.constant 50 : index
    %364 = memref.load %arg3[%c6_341, %c50_342] : memref<8x64xf32, #tpu.memory_space<smem>>
    %365 = arith.truncf %364 : f32 to bf16
    %c7_343 = arith.constant 7 : index
    %c50_344 = arith.constant 50 : index
    %366 = memref.load %arg3[%c7_343, %c50_344] : memref<8x64xf32, #tpu.memory_space<smem>>
    %367 = arith.truncf %366 : f32 to bf16
    %c0_345 = arith.constant 0 : index
    %c20 = arith.constant 20 : index
    %368 = memref.load %arg3[%c0_345, %c20] : memref<8x64xf32, #tpu.memory_space<smem>>
    %369 = arith.truncf %368 : f32 to bf16
    %c0_346 = arith.constant 0 : index
    %c21 = arith.constant 21 : index
    %370 = memref.load %arg3[%c0_346, %c21] : memref<8x64xf32, #tpu.memory_space<smem>>
    %371 = arith.truncf %370 : f32 to bf16
    %c0_347 = arith.constant 0 : index
    %c22 = arith.constant 22 : index
    %372 = memref.load %arg3[%c0_347, %c22] : memref<8x64xf32, #tpu.memory_space<smem>>
    %373 = arith.truncf %372 : f32 to bf16
    %c0_348 = arith.constant 0 : index
    %c23 = arith.constant 23 : index
    %374 = memref.load %arg3[%c0_348, %c23] : memref<8x64xf32, #tpu.memory_space<smem>>
    %375 = arith.truncf %374 : f32 to bf16
    %c0_349 = arith.constant 0 : index
    %c24 = arith.constant 24 : index
    %376 = memref.load %arg3[%c0_349, %c24] : memref<8x64xf32, #tpu.memory_space<smem>>
    %377 = arith.truncf %376 : f32 to bf16
    %c0_350 = arith.constant 0 : index
    %c25 = arith.constant 25 : index
    %378 = memref.load %arg3[%c0_350, %c25] : memref<8x64xf32, #tpu.memory_space<smem>>
    %379 = arith.truncf %378 : f32 to bf16
    %c0_351 = arith.constant 0 : index
    %c26 = arith.constant 26 : index
    %380 = memref.load %arg3[%c0_351, %c26] : memref<8x64xf32, #tpu.memory_space<smem>>
    %381 = arith.truncf %380 : f32 to bf16
    %c0_352 = arith.constant 0 : index
    %c27 = arith.constant 27 : index
    %382 = memref.load %arg3[%c0_352, %c27] : memref<8x64xf32, #tpu.memory_space<smem>>
    %383 = arith.truncf %382 : f32 to bf16
    %c1_353 = arith.constant 1 : index
    %c20_354 = arith.constant 20 : index
    %384 = memref.load %arg3[%c1_353, %c20_354] : memref<8x64xf32, #tpu.memory_space<smem>>
    %385 = arith.truncf %384 : f32 to bf16
    %c1_355 = arith.constant 1 : index
    %c21_356 = arith.constant 21 : index
    %386 = memref.load %arg3[%c1_355, %c21_356] : memref<8x64xf32, #tpu.memory_space<smem>>
    %387 = arith.truncf %386 : f32 to bf16
    %c1_357 = arith.constant 1 : index
    %c22_358 = arith.constant 22 : index
    %388 = memref.load %arg3[%c1_357, %c22_358] : memref<8x64xf32, #tpu.memory_space<smem>>
    %389 = arith.truncf %388 : f32 to bf16
    %c1_359 = arith.constant 1 : index
    %c23_360 = arith.constant 23 : index
    %390 = memref.load %arg3[%c1_359, %c23_360] : memref<8x64xf32, #tpu.memory_space<smem>>
    %391 = arith.truncf %390 : f32 to bf16
    %c1_361 = arith.constant 1 : index
    %c24_362 = arith.constant 24 : index
    %392 = memref.load %arg3[%c1_361, %c24_362] : memref<8x64xf32, #tpu.memory_space<smem>>
    %393 = arith.truncf %392 : f32 to bf16
    %c1_363 = arith.constant 1 : index
    %c25_364 = arith.constant 25 : index
    %394 = memref.load %arg3[%c1_363, %c25_364] : memref<8x64xf32, #tpu.memory_space<smem>>
    %395 = arith.truncf %394 : f32 to bf16
    %c1_365 = arith.constant 1 : index
    %c26_366 = arith.constant 26 : index
    %396 = memref.load %arg3[%c1_365, %c26_366] : memref<8x64xf32, #tpu.memory_space<smem>>
    %397 = arith.truncf %396 : f32 to bf16
    %c1_367 = arith.constant 1 : index
    %c27_368 = arith.constant 27 : index
    %398 = memref.load %arg3[%c1_367, %c27_368] : memref<8x64xf32, #tpu.memory_space<smem>>
    %399 = arith.truncf %398 : f32 to bf16
    %c2_369 = arith.constant 2 : index
    %c20_370 = arith.constant 20 : index
    %400 = memref.load %arg3[%c2_369, %c20_370] : memref<8x64xf32, #tpu.memory_space<smem>>
    %401 = arith.truncf %400 : f32 to bf16
    %c2_371 = arith.constant 2 : index
    %c21_372 = arith.constant 21 : index
    %402 = memref.load %arg3[%c2_371, %c21_372] : memref<8x64xf32, #tpu.memory_space<smem>>
    %403 = arith.truncf %402 : f32 to bf16
    %c2_373 = arith.constant 2 : index
    %c22_374 = arith.constant 22 : index
    %404 = memref.load %arg3[%c2_373, %c22_374] : memref<8x64xf32, #tpu.memory_space<smem>>
    %405 = arith.truncf %404 : f32 to bf16
    %c2_375 = arith.constant 2 : index
    %c23_376 = arith.constant 23 : index
    %406 = memref.load %arg3[%c2_375, %c23_376] : memref<8x64xf32, #tpu.memory_space<smem>>
    %407 = arith.truncf %406 : f32 to bf16
    %c2_377 = arith.constant 2 : index
    %c24_378 = arith.constant 24 : index
    %408 = memref.load %arg3[%c2_377, %c24_378] : memref<8x64xf32, #tpu.memory_space<smem>>
    %409 = arith.truncf %408 : f32 to bf16
    %c2_379 = arith.constant 2 : index
    %c25_380 = arith.constant 25 : index
    %410 = memref.load %arg3[%c2_379, %c25_380] : memref<8x64xf32, #tpu.memory_space<smem>>
    %411 = arith.truncf %410 : f32 to bf16
    %c2_381 = arith.constant 2 : index
    %c26_382 = arith.constant 26 : index
    %412 = memref.load %arg3[%c2_381, %c26_382] : memref<8x64xf32, #tpu.memory_space<smem>>
    %413 = arith.truncf %412 : f32 to bf16
    %c2_383 = arith.constant 2 : index
    %c27_384 = arith.constant 27 : index
    %414 = memref.load %arg3[%c2_383, %c27_384] : memref<8x64xf32, #tpu.memory_space<smem>>
    %415 = arith.truncf %414 : f32 to bf16
    %c0_385 = arith.constant 0 : index
    %c28 = arith.constant 28 : index
    %416 = memref.load %arg3[%c0_385, %c28] : memref<8x64xf32, #tpu.memory_space<smem>>
    %417 = arith.truncf %416 : f32 to bf16
    %c0_386 = arith.constant 0 : index
    %c29 = arith.constant 29 : index
    %418 = memref.load %arg3[%c0_386, %c29] : memref<8x64xf32, #tpu.memory_space<smem>>
    %419 = arith.truncf %418 : f32 to bf16
    %c0_387 = arith.constant 0 : index
    %c30 = arith.constant 30 : index
    %420 = memref.load %arg3[%c0_387, %c30] : memref<8x64xf32, #tpu.memory_space<smem>>
    %421 = arith.truncf %420 : f32 to bf16
    %c0_388 = arith.constant 0 : index
    %c31 = arith.constant 31 : index
    %422 = memref.load %arg3[%c0_388, %c31] : memref<8x64xf32, #tpu.memory_space<smem>>
    %423 = arith.truncf %422 : f32 to bf16
    %c0_389 = arith.constant 0 : index
    %c32 = arith.constant 32 : index
    %424 = memref.load %arg3[%c0_389, %c32] : memref<8x64xf32, #tpu.memory_space<smem>>
    %425 = arith.truncf %424 : f32 to bf16
    %c0_390 = arith.constant 0 : index
    %c33 = arith.constant 33 : index
    %426 = memref.load %arg3[%c0_390, %c33] : memref<8x64xf32, #tpu.memory_space<smem>>
    %427 = arith.truncf %426 : f32 to bf16
    %c0_391 = arith.constant 0 : index
    %c34 = arith.constant 34 : index
    %428 = memref.load %arg3[%c0_391, %c34] : memref<8x64xf32, #tpu.memory_space<smem>>
    %429 = arith.truncf %428 : f32 to bf16
    %c0_392 = arith.constant 0 : index
    %c35 = arith.constant 35 : index
    %430 = memref.load %arg3[%c0_392, %c35] : memref<8x64xf32, #tpu.memory_space<smem>>
    %431 = arith.truncf %430 : f32 to bf16
    %c1_393 = arith.constant 1 : index
    %c28_394 = arith.constant 28 : index
    %432 = memref.load %arg3[%c1_393, %c28_394] : memref<8x64xf32, #tpu.memory_space<smem>>
    %433 = arith.truncf %432 : f32 to bf16
    %c1_395 = arith.constant 1 : index
    %c29_396 = arith.constant 29 : index
    %434 = memref.load %arg3[%c1_395, %c29_396] : memref<8x64xf32, #tpu.memory_space<smem>>
    %435 = arith.truncf %434 : f32 to bf16
    %c1_397 = arith.constant 1 : index
    %c30_398 = arith.constant 30 : index
    %436 = memref.load %arg3[%c1_397, %c30_398] : memref<8x64xf32, #tpu.memory_space<smem>>
    %437 = arith.truncf %436 : f32 to bf16
    %c1_399 = arith.constant 1 : index
    %c31_400 = arith.constant 31 : index
    %438 = memref.load %arg3[%c1_399, %c31_400] : memref<8x64xf32, #tpu.memory_space<smem>>
    %439 = arith.truncf %438 : f32 to bf16
    %c1_401 = arith.constant 1 : index
    %c32_402 = arith.constant 32 : index
    %440 = memref.load %arg3[%c1_401, %c32_402] : memref<8x64xf32, #tpu.memory_space<smem>>
    %441 = arith.truncf %440 : f32 to bf16
    %c1_403 = arith.constant 1 : index
    %c33_404 = arith.constant 33 : index
    %442 = memref.load %arg3[%c1_403, %c33_404] : memref<8x64xf32, #tpu.memory_space<smem>>
    %443 = arith.truncf %442 : f32 to bf16
    %c1_405 = arith.constant 1 : index
    %c34_406 = arith.constant 34 : index
    %444 = memref.load %arg3[%c1_405, %c34_406] : memref<8x64xf32, #tpu.memory_space<smem>>
    %445 = arith.truncf %444 : f32 to bf16
    %c1_407 = arith.constant 1 : index
    %c35_408 = arith.constant 35 : index
    %446 = memref.load %arg3[%c1_407, %c35_408] : memref<8x64xf32, #tpu.memory_space<smem>>
    %447 = arith.truncf %446 : f32 to bf16
    %c2_409 = arith.constant 2 : index
    %c28_410 = arith.constant 28 : index
    %448 = memref.load %arg3[%c2_409, %c28_410] : memref<8x64xf32, #tpu.memory_space<smem>>
    %449 = arith.truncf %448 : f32 to bf16
    %c2_411 = arith.constant 2 : index
    %c29_412 = arith.constant 29 : index
    %450 = memref.load %arg3[%c2_411, %c29_412] : memref<8x64xf32, #tpu.memory_space<smem>>
    %451 = arith.truncf %450 : f32 to bf16
    %c2_413 = arith.constant 2 : index
    %c30_414 = arith.constant 30 : index
    %452 = memref.load %arg3[%c2_413, %c30_414] : memref<8x64xf32, #tpu.memory_space<smem>>
    %453 = arith.truncf %452 : f32 to bf16
    %c2_415 = arith.constant 2 : index
    %c31_416 = arith.constant 31 : index
    %454 = memref.load %arg3[%c2_415, %c31_416] : memref<8x64xf32, #tpu.memory_space<smem>>
    %455 = arith.truncf %454 : f32 to bf16
    %c2_417 = arith.constant 2 : index
    %c32_418 = arith.constant 32 : index
    %456 = memref.load %arg3[%c2_417, %c32_418] : memref<8x64xf32, #tpu.memory_space<smem>>
    %457 = arith.truncf %456 : f32 to bf16
    %c2_419 = arith.constant 2 : index
    %c33_420 = arith.constant 33 : index
    %458 = memref.load %arg3[%c2_419, %c33_420] : memref<8x64xf32, #tpu.memory_space<smem>>
    %459 = arith.truncf %458 : f32 to bf16
    %c2_421 = arith.constant 2 : index
    %c34_422 = arith.constant 34 : index
    %460 = memref.load %arg3[%c2_421, %c34_422] : memref<8x64xf32, #tpu.memory_space<smem>>
    %461 = arith.truncf %460 : f32 to bf16
    %c2_423 = arith.constant 2 : index
    %c35_424 = arith.constant 35 : index
    %462 = memref.load %arg3[%c2_423, %c35_424] : memref<8x64xf32, #tpu.memory_space<smem>>
    %463 = arith.truncf %462 : f32 to bf16
    %c0_425 = arith.constant 0 : index
    %c36 = arith.constant 36 : index
    %464 = memref.load %arg3[%c0_425, %c36] : memref<8x64xf32, #tpu.memory_space<smem>>
    %465 = arith.truncf %464 : f32 to bf16
    %c0_426 = arith.constant 0 : index
    %c37 = arith.constant 37 : index
    %466 = memref.load %arg3[%c0_426, %c37] : memref<8x64xf32, #tpu.memory_space<smem>>
    %467 = arith.truncf %466 : f32 to bf16
    %c0_427 = arith.constant 0 : index
    %c38 = arith.constant 38 : index
    %468 = memref.load %arg3[%c0_427, %c38] : memref<8x64xf32, #tpu.memory_space<smem>>
    %469 = arith.truncf %468 : f32 to bf16
    %c0_428 = arith.constant 0 : index
    %c39 = arith.constant 39 : index
    %470 = memref.load %arg3[%c0_428, %c39] : memref<8x64xf32, #tpu.memory_space<smem>>
    %471 = arith.truncf %470 : f32 to bf16
    %c0_429 = arith.constant 0 : index
    %c40 = arith.constant 40 : index
    %472 = memref.load %arg3[%c0_429, %c40] : memref<8x64xf32, #tpu.memory_space<smem>>
    %473 = arith.truncf %472 : f32 to bf16
    %c0_430 = arith.constant 0 : index
    %c41 = arith.constant 41 : index
    %474 = memref.load %arg3[%c0_430, %c41] : memref<8x64xf32, #tpu.memory_space<smem>>
    %475 = arith.truncf %474 : f32 to bf16
    %c0_431 = arith.constant 0 : index
    %c42 = arith.constant 42 : index
    %476 = memref.load %arg3[%c0_431, %c42] : memref<8x64xf32, #tpu.memory_space<smem>>
    %477 = arith.truncf %476 : f32 to bf16
    %c0_432 = arith.constant 0 : index
    %c43 = arith.constant 43 : index
    %478 = memref.load %arg3[%c0_432, %c43] : memref<8x64xf32, #tpu.memory_space<smem>>
    %479 = arith.truncf %478 : f32 to bf16
    %c1_433 = arith.constant 1 : index
    %c36_434 = arith.constant 36 : index
    %480 = memref.load %arg3[%c1_433, %c36_434] : memref<8x64xf32, #tpu.memory_space<smem>>
    %481 = arith.truncf %480 : f32 to bf16
    %c1_435 = arith.constant 1 : index
    %c37_436 = arith.constant 37 : index
    %482 = memref.load %arg3[%c1_435, %c37_436] : memref<8x64xf32, #tpu.memory_space<smem>>
    %483 = arith.truncf %482 : f32 to bf16
    %c1_437 = arith.constant 1 : index
    %c38_438 = arith.constant 38 : index
    %484 = memref.load %arg3[%c1_437, %c38_438] : memref<8x64xf32, #tpu.memory_space<smem>>
    %485 = arith.truncf %484 : f32 to bf16
    %c1_439 = arith.constant 1 : index
    %c39_440 = arith.constant 39 : index
    %486 = memref.load %arg3[%c1_439, %c39_440] : memref<8x64xf32, #tpu.memory_space<smem>>
    %487 = arith.truncf %486 : f32 to bf16
    %c1_441 = arith.constant 1 : index
    %c40_442 = arith.constant 40 : index
    %488 = memref.load %arg3[%c1_441, %c40_442] : memref<8x64xf32, #tpu.memory_space<smem>>
    %489 = arith.truncf %488 : f32 to bf16
    %c1_443 = arith.constant 1 : index
    %c41_444 = arith.constant 41 : index
    %490 = memref.load %arg3[%c1_443, %c41_444] : memref<8x64xf32, #tpu.memory_space<smem>>
    %491 = arith.truncf %490 : f32 to bf16
    %c1_445 = arith.constant 1 : index
    %c42_446 = arith.constant 42 : index
    %492 = memref.load %arg3[%c1_445, %c42_446] : memref<8x64xf32, #tpu.memory_space<smem>>
    %493 = arith.truncf %492 : f32 to bf16
    %c1_447 = arith.constant 1 : index
    %c43_448 = arith.constant 43 : index
    %494 = memref.load %arg3[%c1_447, %c43_448] : memref<8x64xf32, #tpu.memory_space<smem>>
    %495 = arith.truncf %494 : f32 to bf16
    %c2_449 = arith.constant 2 : index
    %c36_450 = arith.constant 36 : index
    %496 = memref.load %arg3[%c2_449, %c36_450] : memref<8x64xf32, #tpu.memory_space<smem>>
    %497 = arith.truncf %496 : f32 to bf16
    %c2_451 = arith.constant 2 : index
    %c37_452 = arith.constant 37 : index
    %498 = memref.load %arg3[%c2_451, %c37_452] : memref<8x64xf32, #tpu.memory_space<smem>>
    %499 = arith.truncf %498 : f32 to bf16
    %c2_453 = arith.constant 2 : index
    %c38_454 = arith.constant 38 : index
    %500 = memref.load %arg3[%c2_453, %c38_454] : memref<8x64xf32, #tpu.memory_space<smem>>
    %501 = arith.truncf %500 : f32 to bf16
    %c2_455 = arith.constant 2 : index
    %c39_456 = arith.constant 39 : index
    %502 = memref.load %arg3[%c2_455, %c39_456] : memref<8x64xf32, #tpu.memory_space<smem>>
    %503 = arith.truncf %502 : f32 to bf16
    %c2_457 = arith.constant 2 : index
    %c40_458 = arith.constant 40 : index
    %504 = memref.load %arg3[%c2_457, %c40_458] : memref<8x64xf32, #tpu.memory_space<smem>>
    %505 = arith.truncf %504 : f32 to bf16
    %c2_459 = arith.constant 2 : index
    %c41_460 = arith.constant 41 : index
    %506 = memref.load %arg3[%c2_459, %c41_460] : memref<8x64xf32, #tpu.memory_space<smem>>
    %507 = arith.truncf %506 : f32 to bf16
    %c2_461 = arith.constant 2 : index
    %c42_462 = arith.constant 42 : index
    %508 = memref.load %arg3[%c2_461, %c42_462] : memref<8x64xf32, #tpu.memory_space<smem>>
    %509 = arith.truncf %508 : f32 to bf16
    %c2_463 = arith.constant 2 : index
    %c43_464 = arith.constant 43 : index
    %510 = memref.load %arg3[%c2_463, %c43_464] : memref<8x64xf32, #tpu.memory_space<smem>>
    %511 = arith.truncf %510 : f32 to bf16
    %c0_465 = arith.constant 0 : index
    %c44 = arith.constant 44 : index
    %512 = memref.load %arg3[%c0_465, %c44] : memref<8x64xf32, #tpu.memory_space<smem>>
    %c0_466 = arith.constant 0 : index
    %c45 = arith.constant 45 : index
    %513 = memref.load %arg3[%c0_466, %c45] : memref<8x64xf32, #tpu.memory_space<smem>>
    %c0_467 = arith.constant 0 : index
    %c46 = arith.constant 46 : index
    %514 = memref.load %arg3[%c0_467, %c46] : memref<8x64xf32, #tpu.memory_space<smem>>
    %c0_468 = arith.constant 0 : index
    %c47 = arith.constant 47 : index
    %515 = memref.load %arg3[%c0_468, %c47] : memref<8x64xf32, #tpu.memory_space<smem>>
    %c1_469 = arith.constant 1 : index
    %c44_470 = arith.constant 44 : index
    %516 = memref.load %arg3[%c1_469, %c44_470] : memref<8x64xf32, #tpu.memory_space<smem>>
    %c1_471 = arith.constant 1 : index
    %c45_472 = arith.constant 45 : index
    %517 = memref.load %arg3[%c1_471, %c45_472] : memref<8x64xf32, #tpu.memory_space<smem>>
    %c1_473 = arith.constant 1 : index
    %c46_474 = arith.constant 46 : index
    %518 = memref.load %arg3[%c1_473, %c46_474] : memref<8x64xf32, #tpu.memory_space<smem>>
    %c1_475 = arith.constant 1 : index
    %c47_476 = arith.constant 47 : index
    %519 = memref.load %arg3[%c1_475, %c47_476] : memref<8x64xf32, #tpu.memory_space<smem>>
    %c2_477 = arith.constant 2 : index
    %c44_478 = arith.constant 44 : index
    %520 = memref.load %arg3[%c2_477, %c44_478] : memref<8x64xf32, #tpu.memory_space<smem>>
    %c2_479 = arith.constant 2 : index
    %c45_480 = arith.constant 45 : index
    %521 = memref.load %arg3[%c2_479, %c45_480] : memref<8x64xf32, #tpu.memory_space<smem>>
    %c2_481 = arith.constant 2 : index
    %c46_482 = arith.constant 46 : index
    %522 = memref.load %arg3[%c2_481, %c46_482] : memref<8x64xf32, #tpu.memory_space<smem>>
    %c2_483 = arith.constant 2 : index
    %c47_484 = arith.constant 47 : index
    %523 = memref.load %arg3[%c2_483, %c47_484] : memref<8x64xf32, #tpu.memory_space<smem>>
    %c0_485 = arith.constant 0 : index
    %c51 = arith.constant 51 : index
    %524 = memref.load %arg3[%c0_485, %c51] : memref<8x64xf32, #tpu.memory_space<smem>>
    %c1_486 = arith.constant 1 : index
    %c51_487 = arith.constant 51 : index
    %525 = memref.load %arg3[%c1_486, %c51_487] : memref<8x64xf32, #tpu.memory_space<smem>>
    %c2_488 = arith.constant 2 : index
    %c51_489 = arith.constant 51 : index
    %526 = memref.load %arg3[%c2_488, %c51_489] : memref<8x64xf32, #tpu.memory_space<smem>>
    %c0_490 = arith.constant 0 : index
    %c0_491 = arith.constant 0 : index
    %c0_492 = arith.constant 0 : index
    %c0_493 = arith.constant 0 : index
    %527 = vector.load %arg2[%c0_490, %c0_491, %c0_492, %c0_493] : memref<1x4x2x128xf32, #tpu.memory_space<vmem>>, vector<1x1x2x128xf32>
    %528 = vector.shape_cast %527 : vector<1x1x2x128xf32> to vector<2x128xf32>
    %c0_494 = arith.constant 0 : index
    %c1_495 = arith.constant 1 : index
    %c0_496 = arith.constant 0 : index
    %c0_497 = arith.constant 0 : index
    %529 = vector.load %arg2[%c0_494, %c1_495, %c0_496, %c0_497] : memref<1x4x2x128xf32, #tpu.memory_space<vmem>>, vector<1x1x2x128xf32>
    %530 = vector.shape_cast %529 : vector<1x1x2x128xf32> to vector<2x128xf32>
    %c0_498 = arith.constant 0 : index
    %c2_499 = arith.constant 2 : index
    %c0_500 = arith.constant 0 : index
    %c0_501 = arith.constant 0 : index
    %531 = vector.load %arg2[%c0_498, %c2_499, %c0_500, %c0_501] : memref<1x4x2x128xf32, #tpu.memory_space<vmem>>, vector<1x1x2x128xf32>
    %532 = vector.shape_cast %531 : vector<1x1x2x128xf32> to vector<2x128xf32>
    %c0_502 = arith.constant 0 : index
    %c3_503 = arith.constant 3 : index
    %c0_504 = arith.constant 0 : index
    %c0_505 = arith.constant 0 : index
    %533 = vector.load %arg2[%c0_502, %c3_503, %c0_504, %c0_505] : memref<1x4x2x128xf32, #tpu.memory_space<vmem>>, vector<1x1x2x128xf32>
    %534 = vector.shape_cast %533 : vector<1x1x2x128xf32> to vector<2x128xf32>
    %535 = vector.broadcast %512 : f32 to vector<2x128xf32>
    %536 = arith.mulf %528, %535 : vector<2x128xf32>
    %537 = vector.broadcast %513 : f32 to vector<2x128xf32>
    %538 = arith.mulf %530, %537 : vector<2x128xf32>
    %539 = vector.broadcast %514 : f32 to vector<2x128xf32>
    %540 = arith.mulf %532, %539 : vector<2x128xf32>
    %541 = vector.broadcast %515 : f32 to vector<2x128xf32>
    %542 = arith.mulf %534, %541 : vector<2x128xf32>
    %543 = arith.addf %536, %538 : vector<2x128xf32>
    %544 = arith.addf %540, %542 : vector<2x128xf32>
    %545 = arith.addf %543, %544 : vector<2x128xf32>
    %546 = vector.broadcast %524 : f32 to vector<2x128xf32>
    %547 = arith.addf %545, %546 : vector<2x128xf32>
    %548 = vector.broadcast %516 : f32 to vector<2x128xf32>
    %549 = arith.mulf %528, %548 : vector<2x128xf32>
    %550 = vector.broadcast %517 : f32 to vector<2x128xf32>
    %551 = arith.mulf %530, %550 : vector<2x128xf32>
    %552 = vector.broadcast %518 : f32 to vector<2x128xf32>
    %553 = arith.mulf %532, %552 : vector<2x128xf32>
    %554 = vector.broadcast %519 : f32 to vector<2x128xf32>
    %555 = arith.mulf %534, %554 : vector<2x128xf32>
    %556 = arith.addf %549, %551 : vector<2x128xf32>
    %557 = arith.addf %553, %555 : vector<2x128xf32>
    %558 = arith.addf %556, %557 : vector<2x128xf32>
    %559 = vector.broadcast %525 : f32 to vector<2x128xf32>
    %560 = arith.addf %558, %559 : vector<2x128xf32>
    %561 = vector.broadcast %520 : f32 to vector<2x128xf32>
    %562 = arith.mulf %528, %561 : vector<2x128xf32>
    %563 = vector.broadcast %521 : f32 to vector<2x128xf32>
    %564 = arith.mulf %530, %563 : vector<2x128xf32>
    %565 = vector.broadcast %522 : f32 to vector<2x128xf32>
    %566 = arith.mulf %532, %565 : vector<2x128xf32>
    %567 = vector.broadcast %523 : f32 to vector<2x128xf32>
    %568 = arith.mulf %534, %567 : vector<2x128xf32>
    %569 = arith.addf %562, %564 : vector<2x128xf32>
    %570 = arith.addf %566, %568 : vector<2x128xf32>
    %571 = arith.addf %569, %570 : vector<2x128xf32>
    %572 = vector.broadcast %526 : f32 to vector<2x128xf32>
    %573 = arith.addf %571, %572 : vector<2x128xf32>
    %574 = arith.truncf %528 : vector<2x128xf32> to vector<2x128xbf16>
    %575 = arith.truncf %530 : vector<2x128xf32> to vector<2x128xbf16>
    %576 = arith.truncf %532 : vector<2x128xf32> to vector<2x128xbf16>
    %577 = arith.truncf %534 : vector<2x128xf32> to vector<2x128xbf16>
    %578 = vector.broadcast %1 : bf16 to vector<2x128xbf16>
    %579 = arith.mulf %574, %578 : vector<2x128xbf16>
    %580 = vector.broadcast %3 : bf16 to vector<2x128xbf16>
    %581 = arith.mulf %575, %580 : vector<2x128xbf16>
    %582 = vector.broadcast %5 : bf16 to vector<2x128xbf16>
    %583 = arith.mulf %576, %582 : vector<2x128xbf16>
    %584 = vector.broadcast %7 : bf16 to vector<2x128xbf16>
    %585 = arith.mulf %577, %584 : vector<2x128xbf16>
    %586 = arith.addf %579, %581 : vector<2x128xbf16>
    %587 = arith.addf %583, %585 : vector<2x128xbf16>
    %588 = arith.addf %586, %587 : vector<2x128xbf16>
    %589 = vector.broadcast %65 : bf16 to vector<2x128xbf16>
    %590 = arith.addf %588, %589 : vector<2x128xbf16>
    %cst = arith.constant 0.000000e+00 : bf16
    %591 = vector.broadcast %cst : bf16 to vector<2x128xbf16>
    %592 = arith.maximumf %590, %591 : vector<2x128xbf16>
    %593 = vector.broadcast %9 : bf16 to vector<2x128xbf16>
    %594 = arith.mulf %574, %593 : vector<2x128xbf16>
    %595 = vector.broadcast %11 : bf16 to vector<2x128xbf16>
    %596 = arith.mulf %575, %595 : vector<2x128xbf16>
    %597 = vector.broadcast %13 : bf16 to vector<2x128xbf16>
    %598 = arith.mulf %576, %597 : vector<2x128xbf16>
    %599 = vector.broadcast %15 : bf16 to vector<2x128xbf16>
    %600 = arith.mulf %577, %599 : vector<2x128xbf16>
    %601 = arith.addf %594, %596 : vector<2x128xbf16>
    %602 = arith.addf %598, %600 : vector<2x128xbf16>
    %603 = arith.addf %601, %602 : vector<2x128xbf16>
    %604 = vector.broadcast %67 : bf16 to vector<2x128xbf16>
    %605 = arith.addf %603, %604 : vector<2x128xbf16>
    %cst_506 = arith.constant 0.000000e+00 : bf16
    %606 = vector.broadcast %cst_506 : bf16 to vector<2x128xbf16>
    %607 = arith.maximumf %605, %606 : vector<2x128xbf16>
    %608 = vector.broadcast %17 : bf16 to vector<2x128xbf16>
    %609 = arith.mulf %574, %608 : vector<2x128xbf16>
    %610 = vector.broadcast %19 : bf16 to vector<2x128xbf16>
    %611 = arith.mulf %575, %610 : vector<2x128xbf16>
    %612 = vector.broadcast %21 : bf16 to vector<2x128xbf16>
    %613 = arith.mulf %576, %612 : vector<2x128xbf16>
    %614 = vector.broadcast %23 : bf16 to vector<2x128xbf16>
    %615 = arith.mulf %577, %614 : vector<2x128xbf16>
    %616 = arith.addf %609, %611 : vector<2x128xbf16>
    %617 = arith.addf %613, %615 : vector<2x128xbf16>
    %618 = arith.addf %616, %617 : vector<2x128xbf16>
    %619 = vector.broadcast %69 : bf16 to vector<2x128xbf16>
    %620 = arith.addf %618, %619 : vector<2x128xbf16>
    %cst_507 = arith.constant 0.000000e+00 : bf16
    %621 = vector.broadcast %cst_507 : bf16 to vector<2x128xbf16>
    %622 = arith.maximumf %620, %621 : vector<2x128xbf16>
    %623 = vector.broadcast %25 : bf16 to vector<2x128xbf16>
    %624 = arith.mulf %574, %623 : vector<2x128xbf16>
    %625 = vector.broadcast %27 : bf16 to vector<2x128xbf16>
    %626 = arith.mulf %575, %625 : vector<2x128xbf16>
    %627 = vector.broadcast %29 : bf16 to vector<2x128xbf16>
    %628 = arith.mulf %576, %627 : vector<2x128xbf16>
    %629 = vector.broadcast %31 : bf16 to vector<2x128xbf16>
    %630 = arith.mulf %577, %629 : vector<2x128xbf16>
    %631 = arith.addf %624, %626 : vector<2x128xbf16>
    %632 = arith.addf %628, %630 : vector<2x128xbf16>
    %633 = arith.addf %631, %632 : vector<2x128xbf16>
    %634 = vector.broadcast %71 : bf16 to vector<2x128xbf16>
    %635 = arith.addf %633, %634 : vector<2x128xbf16>
    %cst_508 = arith.constant 0.000000e+00 : bf16
    %636 = vector.broadcast %cst_508 : bf16 to vector<2x128xbf16>
    %637 = arith.maximumf %635, %636 : vector<2x128xbf16>
    %638 = vector.broadcast %33 : bf16 to vector<2x128xbf16>
    %639 = arith.mulf %574, %638 : vector<2x128xbf16>
    %640 = vector.broadcast %35 : bf16 to vector<2x128xbf16>
    %641 = arith.mulf %575, %640 : vector<2x128xbf16>
    %642 = vector.broadcast %37 : bf16 to vector<2x128xbf16>
    %643 = arith.mulf %576, %642 : vector<2x128xbf16>
    %644 = vector.broadcast %39 : bf16 to vector<2x128xbf16>
    %645 = arith.mulf %577, %644 : vector<2x128xbf16>
    %646 = arith.addf %639, %641 : vector<2x128xbf16>
    %647 = arith.addf %643, %645 : vector<2x128xbf16>
    %648 = arith.addf %646, %647 : vector<2x128xbf16>
    %649 = vector.broadcast %73 : bf16 to vector<2x128xbf16>
    %650 = arith.addf %648, %649 : vector<2x128xbf16>
    %cst_509 = arith.constant 0.000000e+00 : bf16
    %651 = vector.broadcast %cst_509 : bf16 to vector<2x128xbf16>
    %652 = arith.maximumf %650, %651 : vector<2x128xbf16>
    %653 = vector.broadcast %41 : bf16 to vector<2x128xbf16>
    %654 = arith.mulf %574, %653 : vector<2x128xbf16>
    %655 = vector.broadcast %43 : bf16 to vector<2x128xbf16>
    %656 = arith.mulf %575, %655 : vector<2x128xbf16>
    %657 = vector.broadcast %45 : bf16 to vector<2x128xbf16>
    %658 = arith.mulf %576, %657 : vector<2x128xbf16>
    %659 = vector.broadcast %47 : bf16 to vector<2x128xbf16>
    %660 = arith.mulf %577, %659 : vector<2x128xbf16>
    %661 = arith.addf %654, %656 : vector<2x128xbf16>
    %662 = arith.addf %658, %660 : vector<2x128xbf16>
    %663 = arith.addf %661, %662 : vector<2x128xbf16>
    %664 = vector.broadcast %75 : bf16 to vector<2x128xbf16>
    %665 = arith.addf %663, %664 : vector<2x128xbf16>
    %cst_510 = arith.constant 0.000000e+00 : bf16
    %666 = vector.broadcast %cst_510 : bf16 to vector<2x128xbf16>
    %667 = arith.maximumf %665, %666 : vector<2x128xbf16>
    %668 = vector.broadcast %49 : bf16 to vector<2x128xbf16>
    %669 = arith.mulf %574, %668 : vector<2x128xbf16>
    %670 = vector.broadcast %51 : bf16 to vector<2x128xbf16>
    %671 = arith.mulf %575, %670 : vector<2x128xbf16>
    %672 = vector.broadcast %53 : bf16 to vector<2x128xbf16>
    %673 = arith.mulf %576, %672 : vector<2x128xbf16>
    %674 = vector.broadcast %55 : bf16 to vector<2x128xbf16>
    %675 = arith.mulf %577, %674 : vector<2x128xbf16>
    %676 = arith.addf %669, %671 : vector<2x128xbf16>
    %677 = arith.addf %673, %675 : vector<2x128xbf16>
    %678 = arith.addf %676, %677 : vector<2x128xbf16>
    %679 = vector.broadcast %77 : bf16 to vector<2x128xbf16>
    %680 = arith.addf %678, %679 : vector<2x128xbf16>
    %cst_511 = arith.constant 0.000000e+00 : bf16
    %681 = vector.broadcast %cst_511 : bf16 to vector<2x128xbf16>
    %682 = arith.maximumf %680, %681 : vector<2x128xbf16>
    %683 = vector.broadcast %57 : bf16 to vector<2x128xbf16>
    %684 = arith.mulf %574, %683 : vector<2x128xbf16>
    %685 = vector.broadcast %59 : bf16 to vector<2x128xbf16>
    %686 = arith.mulf %575, %685 : vector<2x128xbf16>
    %687 = vector.broadcast %61 : bf16 to vector<2x128xbf16>
    %688 = arith.mulf %576, %687 : vector<2x128xbf16>
    %689 = vector.broadcast %63 : bf16 to vector<2x128xbf16>
    %690 = arith.mulf %577, %689 : vector<2x128xbf16>
    %691 = arith.addf %684, %686 : vector<2x128xbf16>
    %692 = arith.addf %688, %690 : vector<2x128xbf16>
    %693 = arith.addf %691, %692 : vector<2x128xbf16>
    %694 = vector.broadcast %79 : bf16 to vector<2x128xbf16>
    %695 = arith.addf %693, %694 : vector<2x128xbf16>
    %cst_512 = arith.constant 0.000000e+00 : bf16
    %696 = vector.broadcast %cst_512 : bf16 to vector<2x128xbf16>
    %697 = arith.maximumf %695, %696 : vector<2x128xbf16>
    %698 = vector.broadcast %369 : bf16 to vector<2x128xbf16>
    %699 = arith.mulf %592, %698 : vector<2x128xbf16>
    %700 = vector.broadcast %371 : bf16 to vector<2x128xbf16>
    %701 = arith.mulf %607, %700 : vector<2x128xbf16>
    %702 = vector.broadcast %373 : bf16 to vector<2x128xbf16>
    %703 = arith.mulf %622, %702 : vector<2x128xbf16>
    %704 = vector.broadcast %375 : bf16 to vector<2x128xbf16>
    %705 = arith.mulf %637, %704 : vector<2x128xbf16>
    %706 = vector.broadcast %377 : bf16 to vector<2x128xbf16>
    %707 = arith.mulf %652, %706 : vector<2x128xbf16>
    %708 = vector.broadcast %379 : bf16 to vector<2x128xbf16>
    %709 = arith.mulf %667, %708 : vector<2x128xbf16>
    %710 = vector.broadcast %381 : bf16 to vector<2x128xbf16>
    %711 = arith.mulf %682, %710 : vector<2x128xbf16>
    %712 = vector.broadcast %383 : bf16 to vector<2x128xbf16>
    %713 = arith.mulf %697, %712 : vector<2x128xbf16>
    %714 = arith.addf %699, %701 : vector<2x128xbf16>
    %715 = arith.addf %703, %705 : vector<2x128xbf16>
    %716 = arith.addf %707, %709 : vector<2x128xbf16>
    %717 = arith.addf %711, %713 : vector<2x128xbf16>
    %718 = arith.addf %714, %715 : vector<2x128xbf16>
    %719 = arith.addf %716, %717 : vector<2x128xbf16>
    %720 = arith.addf %718, %719 : vector<2x128xbf16>
    %721 = arith.extf %720 : vector<2x128xbf16> to vector<2x128xf32>
    %722 = arith.addf %547, %721 : vector<2x128xf32>
    %723 = vector.broadcast %385 : bf16 to vector<2x128xbf16>
    %724 = arith.mulf %592, %723 : vector<2x128xbf16>
    %725 = vector.broadcast %387 : bf16 to vector<2x128xbf16>
    %726 = arith.mulf %607, %725 : vector<2x128xbf16>
    %727 = vector.broadcast %389 : bf16 to vector<2x128xbf16>
    %728 = arith.mulf %622, %727 : vector<2x128xbf16>
    %729 = vector.broadcast %391 : bf16 to vector<2x128xbf16>
    %730 = arith.mulf %637, %729 : vector<2x128xbf16>
    %731 = vector.broadcast %393 : bf16 to vector<2x128xbf16>
    %732 = arith.mulf %652, %731 : vector<2x128xbf16>
    %733 = vector.broadcast %395 : bf16 to vector<2x128xbf16>
    %734 = arith.mulf %667, %733 : vector<2x128xbf16>
    %735 = vector.broadcast %397 : bf16 to vector<2x128xbf16>
    %736 = arith.mulf %682, %735 : vector<2x128xbf16>
    %737 = vector.broadcast %399 : bf16 to vector<2x128xbf16>
    %738 = arith.mulf %697, %737 : vector<2x128xbf16>
    %739 = arith.addf %724, %726 : vector<2x128xbf16>
    %740 = arith.addf %728, %730 : vector<2x128xbf16>
    %741 = arith.addf %732, %734 : vector<2x128xbf16>
    %742 = arith.addf %736, %738 : vector<2x128xbf16>
    %743 = arith.addf %739, %740 : vector<2x128xbf16>
    %744 = arith.addf %741, %742 : vector<2x128xbf16>
    %745 = arith.addf %743, %744 : vector<2x128xbf16>
    %746 = arith.extf %745 : vector<2x128xbf16> to vector<2x128xf32>
    %747 = arith.addf %560, %746 : vector<2x128xf32>
    %748 = vector.broadcast %401 : bf16 to vector<2x128xbf16>
    %749 = arith.mulf %592, %748 : vector<2x128xbf16>
    %750 = vector.broadcast %403 : bf16 to vector<2x128xbf16>
    %751 = arith.mulf %607, %750 : vector<2x128xbf16>
    %752 = vector.broadcast %405 : bf16 to vector<2x128xbf16>
    %753 = arith.mulf %622, %752 : vector<2x128xbf16>
    %754 = vector.broadcast %407 : bf16 to vector<2x128xbf16>
    %755 = arith.mulf %637, %754 : vector<2x128xbf16>
    %756 = vector.broadcast %409 : bf16 to vector<2x128xbf16>
    %757 = arith.mulf %652, %756 : vector<2x128xbf16>
    %758 = vector.broadcast %411 : bf16 to vector<2x128xbf16>
    %759 = arith.mulf %667, %758 : vector<2x128xbf16>
    %760 = vector.broadcast %413 : bf16 to vector<2x128xbf16>
    %761 = arith.mulf %682, %760 : vector<2x128xbf16>
    %762 = vector.broadcast %415 : bf16 to vector<2x128xbf16>
    %763 = arith.mulf %697, %762 : vector<2x128xbf16>
    %764 = arith.addf %749, %751 : vector<2x128xbf16>
    %765 = arith.addf %753, %755 : vector<2x128xbf16>
    %766 = arith.addf %757, %759 : vector<2x128xbf16>
    %767 = arith.addf %761, %763 : vector<2x128xbf16>
    %768 = arith.addf %764, %765 : vector<2x128xbf16>
    %769 = arith.addf %766, %767 : vector<2x128xbf16>
    %770 = arith.addf %768, %769 : vector<2x128xbf16>
    %771 = arith.extf %770 : vector<2x128xbf16> to vector<2x128xf32>
    %772 = arith.addf %573, %771 : vector<2x128xf32>
    %773 = vector.broadcast %81 : bf16 to vector<2x128xbf16>
    %774 = arith.mulf %592, %773 : vector<2x128xbf16>
    %775 = vector.broadcast %83 : bf16 to vector<2x128xbf16>
    %776 = arith.mulf %607, %775 : vector<2x128xbf16>
    %777 = vector.broadcast %85 : bf16 to vector<2x128xbf16>
    %778 = arith.mulf %622, %777 : vector<2x128xbf16>
    %779 = vector.broadcast %87 : bf16 to vector<2x128xbf16>
    %780 = arith.mulf %637, %779 : vector<2x128xbf16>
    %781 = vector.broadcast %89 : bf16 to vector<2x128xbf16>
    %782 = arith.mulf %652, %781 : vector<2x128xbf16>
    %783 = vector.broadcast %91 : bf16 to vector<2x128xbf16>
    %784 = arith.mulf %667, %783 : vector<2x128xbf16>
    %785 = vector.broadcast %93 : bf16 to vector<2x128xbf16>
    %786 = arith.mulf %682, %785 : vector<2x128xbf16>
    %787 = vector.broadcast %95 : bf16 to vector<2x128xbf16>
    %788 = arith.mulf %697, %787 : vector<2x128xbf16>
    %789 = arith.addf %774, %776 : vector<2x128xbf16>
    %790 = arith.addf %778, %780 : vector<2x128xbf16>
    %791 = arith.addf %782, %784 : vector<2x128xbf16>
    %792 = arith.addf %786, %788 : vector<2x128xbf16>
    %793 = arith.addf %789, %790 : vector<2x128xbf16>
    %794 = arith.addf %791, %792 : vector<2x128xbf16>
    %795 = arith.addf %793, %794 : vector<2x128xbf16>
    %796 = vector.broadcast %209 : bf16 to vector<2x128xbf16>
    %797 = arith.addf %795, %796 : vector<2x128xbf16>
    %cst_513 = arith.constant 0.000000e+00 : bf16
    %798 = vector.broadcast %cst_513 : bf16 to vector<2x128xbf16>
    %799 = arith.maximumf %797, %798 : vector<2x128xbf16>
    %800 = vector.broadcast %97 : bf16 to vector<2x128xbf16>
    %801 = arith.mulf %592, %800 : vector<2x128xbf16>
    %802 = vector.broadcast %99 : bf16 to vector<2x128xbf16>
    %803 = arith.mulf %607, %802 : vector<2x128xbf16>
    %804 = vector.broadcast %101 : bf16 to vector<2x128xbf16>
    %805 = arith.mulf %622, %804 : vector<2x128xbf16>
    %806 = vector.broadcast %103 : bf16 to vector<2x128xbf16>
    %807 = arith.mulf %637, %806 : vector<2x128xbf16>
    %808 = vector.broadcast %105 : bf16 to vector<2x128xbf16>
    %809 = arith.mulf %652, %808 : vector<2x128xbf16>
    %810 = vector.broadcast %107 : bf16 to vector<2x128xbf16>
    %811 = arith.mulf %667, %810 : vector<2x128xbf16>
    %812 = vector.broadcast %109 : bf16 to vector<2x128xbf16>
    %813 = arith.mulf %682, %812 : vector<2x128xbf16>
    %814 = vector.broadcast %111 : bf16 to vector<2x128xbf16>
    %815 = arith.mulf %697, %814 : vector<2x128xbf16>
    %816 = arith.addf %801, %803 : vector<2x128xbf16>
    %817 = arith.addf %805, %807 : vector<2x128xbf16>
    %818 = arith.addf %809, %811 : vector<2x128xbf16>
    %819 = arith.addf %813, %815 : vector<2x128xbf16>
    %820 = arith.addf %816, %817 : vector<2x128xbf16>
    %821 = arith.addf %818, %819 : vector<2x128xbf16>
    %822 = arith.addf %820, %821 : vector<2x128xbf16>
    %823 = vector.broadcast %211 : bf16 to vector<2x128xbf16>
    %824 = arith.addf %822, %823 : vector<2x128xbf16>
    %cst_514 = arith.constant 0.000000e+00 : bf16
    %825 = vector.broadcast %cst_514 : bf16 to vector<2x128xbf16>
    %826 = arith.maximumf %824, %825 : vector<2x128xbf16>
    %827 = vector.broadcast %113 : bf16 to vector<2x128xbf16>
    %828 = arith.mulf %592, %827 : vector<2x128xbf16>
    %829 = vector.broadcast %115 : bf16 to vector<2x128xbf16>
    %830 = arith.mulf %607, %829 : vector<2x128xbf16>
    %831 = vector.broadcast %117 : bf16 to vector<2x128xbf16>
    %832 = arith.mulf %622, %831 : vector<2x128xbf16>
    %833 = vector.broadcast %119 : bf16 to vector<2x128xbf16>
    %834 = arith.mulf %637, %833 : vector<2x128xbf16>
    %835 = vector.broadcast %121 : bf16 to vector<2x128xbf16>
    %836 = arith.mulf %652, %835 : vector<2x128xbf16>
    %837 = vector.broadcast %123 : bf16 to vector<2x128xbf16>
    %838 = arith.mulf %667, %837 : vector<2x128xbf16>
    %839 = vector.broadcast %125 : bf16 to vector<2x128xbf16>
    %840 = arith.mulf %682, %839 : vector<2x128xbf16>
    %841 = vector.broadcast %127 : bf16 to vector<2x128xbf16>
    %842 = arith.mulf %697, %841 : vector<2x128xbf16>
    %843 = arith.addf %828, %830 : vector<2x128xbf16>
    %844 = arith.addf %832, %834 : vector<2x128xbf16>
    %845 = arith.addf %836, %838 : vector<2x128xbf16>
    %846 = arith.addf %840, %842 : vector<2x128xbf16>
    %847 = arith.addf %843, %844 : vector<2x128xbf16>
    %848 = arith.addf %845, %846 : vector<2x128xbf16>
    %849 = arith.addf %847, %848 : vector<2x128xbf16>
    %850 = vector.broadcast %213 : bf16 to vector<2x128xbf16>
    %851 = arith.addf %849, %850 : vector<2x128xbf16>
    %cst_515 = arith.constant 0.000000e+00 : bf16
    %852 = vector.broadcast %cst_515 : bf16 to vector<2x128xbf16>
    %853 = arith.maximumf %851, %852 : vector<2x128xbf16>
    %854 = vector.broadcast %129 : bf16 to vector<2x128xbf16>
    %855 = arith.mulf %592, %854 : vector<2x128xbf16>
    %856 = vector.broadcast %131 : bf16 to vector<2x128xbf16>
    %857 = arith.mulf %607, %856 : vector<2x128xbf16>
    %858 = vector.broadcast %133 : bf16 to vector<2x128xbf16>
    %859 = arith.mulf %622, %858 : vector<2x128xbf16>
    %860 = vector.broadcast %135 : bf16 to vector<2x128xbf16>
    %861 = arith.mulf %637, %860 : vector<2x128xbf16>
    %862 = vector.broadcast %137 : bf16 to vector<2x128xbf16>
    %863 = arith.mulf %652, %862 : vector<2x128xbf16>
    %864 = vector.broadcast %139 : bf16 to vector<2x128xbf16>
    %865 = arith.mulf %667, %864 : vector<2x128xbf16>
    %866 = vector.broadcast %141 : bf16 to vector<2x128xbf16>
    %867 = arith.mulf %682, %866 : vector<2x128xbf16>
    %868 = vector.broadcast %143 : bf16 to vector<2x128xbf16>
    %869 = arith.mulf %697, %868 : vector<2x128xbf16>
    %870 = arith.addf %855, %857 : vector<2x128xbf16>
    %871 = arith.addf %859, %861 : vector<2x128xbf16>
    %872 = arith.addf %863, %865 : vector<2x128xbf16>
    %873 = arith.addf %867, %869 : vector<2x128xbf16>
    %874 = arith.addf %870, %871 : vector<2x128xbf16>
    %875 = arith.addf %872, %873 : vector<2x128xbf16>
    %876 = arith.addf %874, %875 : vector<2x128xbf16>
    %877 = vector.broadcast %215 : bf16 to vector<2x128xbf16>
    %878 = arith.addf %876, %877 : vector<2x128xbf16>
    %cst_516 = arith.constant 0.000000e+00 : bf16
    %879 = vector.broadcast %cst_516 : bf16 to vector<2x128xbf16>
    %880 = arith.maximumf %878, %879 : vector<2x128xbf16>
    %881 = vector.broadcast %145 : bf16 to vector<2x128xbf16>
    %882 = arith.mulf %592, %881 : vector<2x128xbf16>
    %883 = vector.broadcast %147 : bf16 to vector<2x128xbf16>
    %884 = arith.mulf %607, %883 : vector<2x128xbf16>
    %885 = vector.broadcast %149 : bf16 to vector<2x128xbf16>
    %886 = arith.mulf %622, %885 : vector<2x128xbf16>
    %887 = vector.broadcast %151 : bf16 to vector<2x128xbf16>
    %888 = arith.mulf %637, %887 : vector<2x128xbf16>
    %889 = vector.broadcast %153 : bf16 to vector<2x128xbf16>
    %890 = arith.mulf %652, %889 : vector<2x128xbf16>
    %891 = vector.broadcast %155 : bf16 to vector<2x128xbf16>
    %892 = arith.mulf %667, %891 : vector<2x128xbf16>
    %893 = vector.broadcast %157 : bf16 to vector<2x128xbf16>
    %894 = arith.mulf %682, %893 : vector<2x128xbf16>
    %895 = vector.broadcast %159 : bf16 to vector<2x128xbf16>
    %896 = arith.mulf %697, %895 : vector<2x128xbf16>
    %897 = arith.addf %882, %884 : vector<2x128xbf16>
    %898 = arith.addf %886, %888 : vector<2x128xbf16>
    %899 = arith.addf %890, %892 : vector<2x128xbf16>
    %900 = arith.addf %894, %896 : vector<2x128xbf16>
    %901 = arith.addf %897, %898 : vector<2x128xbf16>
    %902 = arith.addf %899, %900 : vector<2x128xbf16>
    %903 = arith.addf %901, %902 : vector<2x128xbf16>
    %904 = vector.broadcast %217 : bf16 to vector<2x128xbf16>
    %905 = arith.addf %903, %904 : vector<2x128xbf16>
    %cst_517 = arith.constant 0.000000e+00 : bf16
    %906 = vector.broadcast %cst_517 : bf16 to vector<2x128xbf16>
    %907 = arith.maximumf %905, %906 : vector<2x128xbf16>
    %908 = vector.broadcast %161 : bf16 to vector<2x128xbf16>
    %909 = arith.mulf %592, %908 : vector<2x128xbf16>
    %910 = vector.broadcast %163 : bf16 to vector<2x128xbf16>
    %911 = arith.mulf %607, %910 : vector<2x128xbf16>
    %912 = vector.broadcast %165 : bf16 to vector<2x128xbf16>
    %913 = arith.mulf %622, %912 : vector<2x128xbf16>
    %914 = vector.broadcast %167 : bf16 to vector<2x128xbf16>
    %915 = arith.mulf %637, %914 : vector<2x128xbf16>
    %916 = vector.broadcast %169 : bf16 to vector<2x128xbf16>
    %917 = arith.mulf %652, %916 : vector<2x128xbf16>
    %918 = vector.broadcast %171 : bf16 to vector<2x128xbf16>
    %919 = arith.mulf %667, %918 : vector<2x128xbf16>
    %920 = vector.broadcast %173 : bf16 to vector<2x128xbf16>
    %921 = arith.mulf %682, %920 : vector<2x128xbf16>
    %922 = vector.broadcast %175 : bf16 to vector<2x128xbf16>
    %923 = arith.mulf %697, %922 : vector<2x128xbf16>
    %924 = arith.addf %909, %911 : vector<2x128xbf16>
    %925 = arith.addf %913, %915 : vector<2x128xbf16>
    %926 = arith.addf %917, %919 : vector<2x128xbf16>
    %927 = arith.addf %921, %923 : vector<2x128xbf16>
    %928 = arith.addf %924, %925 : vector<2x128xbf16>
    %929 = arith.addf %926, %927 : vector<2x128xbf16>
    %930 = arith.addf %928, %929 : vector<2x128xbf16>
    %931 = vector.broadcast %219 : bf16 to vector<2x128xbf16>
    %932 = arith.addf %930, %931 : vector<2x128xbf16>
    %cst_518 = arith.constant 0.000000e+00 : bf16
    %933 = vector.broadcast %cst_518 : bf16 to vector<2x128xbf16>
    %934 = arith.maximumf %932, %933 : vector<2x128xbf16>
    %935 = vector.broadcast %177 : bf16 to vector<2x128xbf16>
    %936 = arith.mulf %592, %935 : vector<2x128xbf16>
    %937 = vector.broadcast %179 : bf16 to vector<2x128xbf16>
    %938 = arith.mulf %607, %937 : vector<2x128xbf16>
    %939 = vector.broadcast %181 : bf16 to vector<2x128xbf16>
    %940 = arith.mulf %622, %939 : vector<2x128xbf16>
    %941 = vector.broadcast %183 : bf16 to vector<2x128xbf16>
    %942 = arith.mulf %637, %941 : vector<2x128xbf16>
    %943 = vector.broadcast %185 : bf16 to vector<2x128xbf16>
    %944 = arith.mulf %652, %943 : vector<2x128xbf16>
    %945 = vector.broadcast %187 : bf16 to vector<2x128xbf16>
    %946 = arith.mulf %667, %945 : vector<2x128xbf16>
    %947 = vector.broadcast %189 : bf16 to vector<2x128xbf16>
    %948 = arith.mulf %682, %947 : vector<2x128xbf16>
    %949 = vector.broadcast %191 : bf16 to vector<2x128xbf16>
    %950 = arith.mulf %697, %949 : vector<2x128xbf16>
    %951 = arith.addf %936, %938 : vector<2x128xbf16>
    %952 = arith.addf %940, %942 : vector<2x128xbf16>
    %953 = arith.addf %944, %946 : vector<2x128xbf16>
    %954 = arith.addf %948, %950 : vector<2x128xbf16>
    %955 = arith.addf %951, %952 : vector<2x128xbf16>
    %956 = arith.addf %953, %954 : vector<2x128xbf16>
    %957 = arith.addf %955, %956 : vector<2x128xbf16>
    %958 = vector.broadcast %221 : bf16 to vector<2x128xbf16>
    %959 = arith.addf %957, %958 : vector<2x128xbf16>
    %cst_519 = arith.constant 0.000000e+00 : bf16
    %960 = vector.broadcast %cst_519 : bf16 to vector<2x128xbf16>
    %961 = arith.maximumf %959, %960 : vector<2x128xbf16>
    %962 = vector.broadcast %193 : bf16 to vector<2x128xbf16>
    %963 = arith.mulf %592, %962 : vector<2x128xbf16>
    %964 = vector.broadcast %195 : bf16 to vector<2x128xbf16>
    %965 = arith.mulf %607, %964 : vector<2x128xbf16>
    %966 = vector.broadcast %197 : bf16 to vector<2x128xbf16>
    %967 = arith.mulf %622, %966 : vector<2x128xbf16>
    %968 = vector.broadcast %199 : bf16 to vector<2x128xbf16>
    %969 = arith.mulf %637, %968 : vector<2x128xbf16>
    %970 = vector.broadcast %201 : bf16 to vector<2x128xbf16>
    %971 = arith.mulf %652, %970 : vector<2x128xbf16>
    %972 = vector.broadcast %203 : bf16 to vector<2x128xbf16>
    %973 = arith.mulf %667, %972 : vector<2x128xbf16>
    %974 = vector.broadcast %205 : bf16 to vector<2x128xbf16>
    %975 = arith.mulf %682, %974 : vector<2x128xbf16>
    %976 = vector.broadcast %207 : bf16 to vector<2x128xbf16>
    %977 = arith.mulf %697, %976 : vector<2x128xbf16>
    %978 = arith.addf %963, %965 : vector<2x128xbf16>
    %979 = arith.addf %967, %969 : vector<2x128xbf16>
    %980 = arith.addf %971, %973 : vector<2x128xbf16>
    %981 = arith.addf %975, %977 : vector<2x128xbf16>
    %982 = arith.addf %978, %979 : vector<2x128xbf16>
    %983 = arith.addf %980, %981 : vector<2x128xbf16>
    %984 = arith.addf %982, %983 : vector<2x128xbf16>
    %985 = vector.broadcast %223 : bf16 to vector<2x128xbf16>
    %986 = arith.addf %984, %985 : vector<2x128xbf16>
    %cst_520 = arith.constant 0.000000e+00 : bf16
    %987 = vector.broadcast %cst_520 : bf16 to vector<2x128xbf16>
    %988 = arith.maximumf %986, %987 : vector<2x128xbf16>
    %989 = vector.broadcast %417 : bf16 to vector<2x128xbf16>
    %990 = arith.mulf %799, %989 : vector<2x128xbf16>
    %991 = vector.broadcast %419 : bf16 to vector<2x128xbf16>
    %992 = arith.mulf %826, %991 : vector<2x128xbf16>
    %993 = vector.broadcast %421 : bf16 to vector<2x128xbf16>
    %994 = arith.mulf %853, %993 : vector<2x128xbf16>
    %995 = vector.broadcast %423 : bf16 to vector<2x128xbf16>
    %996 = arith.mulf %880, %995 : vector<2x128xbf16>
    %997 = vector.broadcast %425 : bf16 to vector<2x128xbf16>
    %998 = arith.mulf %907, %997 : vector<2x128xbf16>
    %999 = vector.broadcast %427 : bf16 to vector<2x128xbf16>
    %1000 = arith.mulf %934, %999 : vector<2x128xbf16>
    %1001 = vector.broadcast %429 : bf16 to vector<2x128xbf16>
    %1002 = arith.mulf %961, %1001 : vector<2x128xbf16>
    %1003 = vector.broadcast %431 : bf16 to vector<2x128xbf16>
    %1004 = arith.mulf %988, %1003 : vector<2x128xbf16>
    %1005 = arith.addf %990, %992 : vector<2x128xbf16>
    %1006 = arith.addf %994, %996 : vector<2x128xbf16>
    %1007 = arith.addf %998, %1000 : vector<2x128xbf16>
    %1008 = arith.addf %1002, %1004 : vector<2x128xbf16>
    %1009 = arith.addf %1005, %1006 : vector<2x128xbf16>
    %1010 = arith.addf %1007, %1008 : vector<2x128xbf16>
    %1011 = arith.addf %1009, %1010 : vector<2x128xbf16>
    %1012 = arith.extf %1011 : vector<2x128xbf16> to vector<2x128xf32>
    %1013 = arith.addf %722, %1012 : vector<2x128xf32>
    %1014 = vector.broadcast %433 : bf16 to vector<2x128xbf16>
    %1015 = arith.mulf %799, %1014 : vector<2x128xbf16>
    %1016 = vector.broadcast %435 : bf16 to vector<2x128xbf16>
    %1017 = arith.mulf %826, %1016 : vector<2x128xbf16>
    %1018 = vector.broadcast %437 : bf16 to vector<2x128xbf16>
    %1019 = arith.mulf %853, %1018 : vector<2x128xbf16>
    %1020 = vector.broadcast %439 : bf16 to vector<2x128xbf16>
    %1021 = arith.mulf %880, %1020 : vector<2x128xbf16>
    %1022 = vector.broadcast %441 : bf16 to vector<2x128xbf16>
    %1023 = arith.mulf %907, %1022 : vector<2x128xbf16>
    %1024 = vector.broadcast %443 : bf16 to vector<2x128xbf16>
    %1025 = arith.mulf %934, %1024 : vector<2x128xbf16>
    %1026 = vector.broadcast %445 : bf16 to vector<2x128xbf16>
    %1027 = arith.mulf %961, %1026 : vector<2x128xbf16>
    %1028 = vector.broadcast %447 : bf16 to vector<2x128xbf16>
    %1029 = arith.mulf %988, %1028 : vector<2x128xbf16>
    %1030 = arith.addf %1015, %1017 : vector<2x128xbf16>
    %1031 = arith.addf %1019, %1021 : vector<2x128xbf16>
    %1032 = arith.addf %1023, %1025 : vector<2x128xbf16>
    %1033 = arith.addf %1027, %1029 : vector<2x128xbf16>
    %1034 = arith.addf %1030, %1031 : vector<2x128xbf16>
    %1035 = arith.addf %1032, %1033 : vector<2x128xbf16>
    %1036 = arith.addf %1034, %1035 : vector<2x128xbf16>
    %1037 = arith.extf %1036 : vector<2x128xbf16> to vector<2x128xf32>
    %1038 = arith.addf %747, %1037 : vector<2x128xf32>
    %1039 = vector.broadcast %449 : bf16 to vector<2x128xbf16>
    %1040 = arith.mulf %799, %1039 : vector<2x128xbf16>
    %1041 = vector.broadcast %451 : bf16 to vector<2x128xbf16>
    %1042 = arith.mulf %826, %1041 : vector<2x128xbf16>
    %1043 = vector.broadcast %453 : bf16 to vector<2x128xbf16>
    %1044 = arith.mulf %853, %1043 : vector<2x128xbf16>
    %1045 = vector.broadcast %455 : bf16 to vector<2x128xbf16>
    %1046 = arith.mulf %880, %1045 : vector<2x128xbf16>
    %1047 = vector.broadcast %457 : bf16 to vector<2x128xbf16>
    %1048 = arith.mulf %907, %1047 : vector<2x128xbf16>
    %1049 = vector.broadcast %459 : bf16 to vector<2x128xbf16>
    %1050 = arith.mulf %934, %1049 : vector<2x128xbf16>
    %1051 = vector.broadcast %461 : bf16 to vector<2x128xbf16>
    %1052 = arith.mulf %961, %1051 : vector<2x128xbf16>
    %1053 = vector.broadcast %463 : bf16 to vector<2x128xbf16>
    %1054 = arith.mulf %988, %1053 : vector<2x128xbf16>
    %1055 = arith.addf %1040, %1042 : vector<2x128xbf16>
    %1056 = arith.addf %1044, %1046 : vector<2x128xbf16>
    %1057 = arith.addf %1048, %1050 : vector<2x128xbf16>
    %1058 = arith.addf %1052, %1054 : vector<2x128xbf16>
    %1059 = arith.addf %1055, %1056 : vector<2x128xbf16>
    %1060 = arith.addf %1057, %1058 : vector<2x128xbf16>
    %1061 = arith.addf %1059, %1060 : vector<2x128xbf16>
    %1062 = arith.extf %1061 : vector<2x128xbf16> to vector<2x128xf32>
    %1063 = arith.addf %772, %1062 : vector<2x128xf32>
    %1064 = vector.broadcast %225 : bf16 to vector<2x128xbf16>
    %1065 = arith.mulf %799, %1064 : vector<2x128xbf16>
    %1066 = vector.broadcast %227 : bf16 to vector<2x128xbf16>
    %1067 = arith.mulf %826, %1066 : vector<2x128xbf16>
    %1068 = vector.broadcast %229 : bf16 to vector<2x128xbf16>
    %1069 = arith.mulf %853, %1068 : vector<2x128xbf16>
    %1070 = vector.broadcast %231 : bf16 to vector<2x128xbf16>
    %1071 = arith.mulf %880, %1070 : vector<2x128xbf16>
    %1072 = vector.broadcast %233 : bf16 to vector<2x128xbf16>
    %1073 = arith.mulf %907, %1072 : vector<2x128xbf16>
    %1074 = vector.broadcast %235 : bf16 to vector<2x128xbf16>
    %1075 = arith.mulf %934, %1074 : vector<2x128xbf16>
    %1076 = vector.broadcast %237 : bf16 to vector<2x128xbf16>
    %1077 = arith.mulf %961, %1076 : vector<2x128xbf16>
    %1078 = vector.broadcast %239 : bf16 to vector<2x128xbf16>
    %1079 = arith.mulf %988, %1078 : vector<2x128xbf16>
    %1080 = arith.addf %1065, %1067 : vector<2x128xbf16>
    %1081 = arith.addf %1069, %1071 : vector<2x128xbf16>
    %1082 = arith.addf %1073, %1075 : vector<2x128xbf16>
    %1083 = arith.addf %1077, %1079 : vector<2x128xbf16>
    %1084 = arith.addf %1080, %1081 : vector<2x128xbf16>
    %1085 = arith.addf %1082, %1083 : vector<2x128xbf16>
    %1086 = arith.addf %1084, %1085 : vector<2x128xbf16>
    %1087 = vector.broadcast %353 : bf16 to vector<2x128xbf16>
    %1088 = arith.addf %1086, %1087 : vector<2x128xbf16>
    %cst_521 = arith.constant 0.000000e+00 : bf16
    %1089 = vector.broadcast %cst_521 : bf16 to vector<2x128xbf16>
    %1090 = arith.maximumf %1088, %1089 : vector<2x128xbf16>
    %1091 = vector.broadcast %241 : bf16 to vector<2x128xbf16>
    %1092 = arith.mulf %799, %1091 : vector<2x128xbf16>
    %1093 = vector.broadcast %243 : bf16 to vector<2x128xbf16>
    %1094 = arith.mulf %826, %1093 : vector<2x128xbf16>
    %1095 = vector.broadcast %245 : bf16 to vector<2x128xbf16>
    %1096 = arith.mulf %853, %1095 : vector<2x128xbf16>
    %1097 = vector.broadcast %247 : bf16 to vector<2x128xbf16>
    %1098 = arith.mulf %880, %1097 : vector<2x128xbf16>
    %1099 = vector.broadcast %249 : bf16 to vector<2x128xbf16>
    %1100 = arith.mulf %907, %1099 : vector<2x128xbf16>
    %1101 = vector.broadcast %251 : bf16 to vector<2x128xbf16>
    %1102 = arith.mulf %934, %1101 : vector<2x128xbf16>
    %1103 = vector.broadcast %253 : bf16 to vector<2x128xbf16>
    %1104 = arith.mulf %961, %1103 : vector<2x128xbf16>
    %1105 = vector.broadcast %255 : bf16 to vector<2x128xbf16>
    %1106 = arith.mulf %988, %1105 : vector<2x128xbf16>
    %1107 = arith.addf %1092, %1094 : vector<2x128xbf16>
    %1108 = arith.addf %1096, %1098 : vector<2x128xbf16>
    %1109 = arith.addf %1100, %1102 : vector<2x128xbf16>
    %1110 = arith.addf %1104, %1106 : vector<2x128xbf16>
    %1111 = arith.addf %1107, %1108 : vector<2x128xbf16>
    %1112 = arith.addf %1109, %1110 : vector<2x128xbf16>
    %1113 = arith.addf %1111, %1112 : vector<2x128xbf16>
    %1114 = vector.broadcast %355 : bf16 to vector<2x128xbf16>
    %1115 = arith.addf %1113, %1114 : vector<2x128xbf16>
    %cst_522 = arith.constant 0.000000e+00 : bf16
    %1116 = vector.broadcast %cst_522 : bf16 to vector<2x128xbf16>
    %1117 = arith.maximumf %1115, %1116 : vector<2x128xbf16>
    %1118 = vector.broadcast %257 : bf16 to vector<2x128xbf16>
    %1119 = arith.mulf %799, %1118 : vector<2x128xbf16>
    %1120 = vector.broadcast %259 : bf16 to vector<2x128xbf16>
    %1121 = arith.mulf %826, %1120 : vector<2x128xbf16>
    %1122 = vector.broadcast %261 : bf16 to vector<2x128xbf16>
    %1123 = arith.mulf %853, %1122 : vector<2x128xbf16>
    %1124 = vector.broadcast %263 : bf16 to vector<2x128xbf16>
    %1125 = arith.mulf %880, %1124 : vector<2x128xbf16>
    %1126 = vector.broadcast %265 : bf16 to vector<2x128xbf16>
    %1127 = arith.mulf %907, %1126 : vector<2x128xbf16>
    %1128 = vector.broadcast %267 : bf16 to vector<2x128xbf16>
    %1129 = arith.mulf %934, %1128 : vector<2x128xbf16>
    %1130 = vector.broadcast %269 : bf16 to vector<2x128xbf16>
    %1131 = arith.mulf %961, %1130 : vector<2x128xbf16>
    %1132 = vector.broadcast %271 : bf16 to vector<2x128xbf16>
    %1133 = arith.mulf %988, %1132 : vector<2x128xbf16>
    %1134 = arith.addf %1119, %1121 : vector<2x128xbf16>
    %1135 = arith.addf %1123, %1125 : vector<2x128xbf16>
    %1136 = arith.addf %1127, %1129 : vector<2x128xbf16>
    %1137 = arith.addf %1131, %1133 : vector<2x128xbf16>
    %1138 = arith.addf %1134, %1135 : vector<2x128xbf16>
    %1139 = arith.addf %1136, %1137 : vector<2x128xbf16>
    %1140 = arith.addf %1138, %1139 : vector<2x128xbf16>
    %1141 = vector.broadcast %357 : bf16 to vector<2x128xbf16>
    %1142 = arith.addf %1140, %1141 : vector<2x128xbf16>
    %cst_523 = arith.constant 0.000000e+00 : bf16
    %1143 = vector.broadcast %cst_523 : bf16 to vector<2x128xbf16>
    %1144 = arith.maximumf %1142, %1143 : vector<2x128xbf16>
    %1145 = vector.broadcast %273 : bf16 to vector<2x128xbf16>
    %1146 = arith.mulf %799, %1145 : vector<2x128xbf16>
    %1147 = vector.broadcast %275 : bf16 to vector<2x128xbf16>
    %1148 = arith.mulf %826, %1147 : vector<2x128xbf16>
    %1149 = vector.broadcast %277 : bf16 to vector<2x128xbf16>
    %1150 = arith.mulf %853, %1149 : vector<2x128xbf16>
    %1151 = vector.broadcast %279 : bf16 to vector<2x128xbf16>
    %1152 = arith.mulf %880, %1151 : vector<2x128xbf16>
    %1153 = vector.broadcast %281 : bf16 to vector<2x128xbf16>
    %1154 = arith.mulf %907, %1153 : vector<2x128xbf16>
    %1155 = vector.broadcast %283 : bf16 to vector<2x128xbf16>
    %1156 = arith.mulf %934, %1155 : vector<2x128xbf16>
    %1157 = vector.broadcast %285 : bf16 to vector<2x128xbf16>
    %1158 = arith.mulf %961, %1157 : vector<2x128xbf16>
    %1159 = vector.broadcast %287 : bf16 to vector<2x128xbf16>
    %1160 = arith.mulf %988, %1159 : vector<2x128xbf16>
    %1161 = arith.addf %1146, %1148 : vector<2x128xbf16>
    %1162 = arith.addf %1150, %1152 : vector<2x128xbf16>
    %1163 = arith.addf %1154, %1156 : vector<2x128xbf16>
    %1164 = arith.addf %1158, %1160 : vector<2x128xbf16>
    %1165 = arith.addf %1161, %1162 : vector<2x128xbf16>
    %1166 = arith.addf %1163, %1164 : vector<2x128xbf16>
    %1167 = arith.addf %1165, %1166 : vector<2x128xbf16>
    %1168 = vector.broadcast %359 : bf16 to vector<2x128xbf16>
    %1169 = arith.addf %1167, %1168 : vector<2x128xbf16>
    %cst_524 = arith.constant 0.000000e+00 : bf16
    %1170 = vector.broadcast %cst_524 : bf16 to vector<2x128xbf16>
    %1171 = arith.maximumf %1169, %1170 : vector<2x128xbf16>
    %1172 = vector.broadcast %289 : bf16 to vector<2x128xbf16>
    %1173 = arith.mulf %799, %1172 : vector<2x128xbf16>
    %1174 = vector.broadcast %291 : bf16 to vector<2x128xbf16>
    %1175 = arith.mulf %826, %1174 : vector<2x128xbf16>
    %1176 = vector.broadcast %293 : bf16 to vector<2x128xbf16>
    %1177 = arith.mulf %853, %1176 : vector<2x128xbf16>
    %1178 = vector.broadcast %295 : bf16 to vector<2x128xbf16>
    %1179 = arith.mulf %880, %1178 : vector<2x128xbf16>
    %1180 = vector.broadcast %297 : bf16 to vector<2x128xbf16>
    %1181 = arith.mulf %907, %1180 : vector<2x128xbf16>
    %1182 = vector.broadcast %299 : bf16 to vector<2x128xbf16>
    %1183 = arith.mulf %934, %1182 : vector<2x128xbf16>
    %1184 = vector.broadcast %301 : bf16 to vector<2x128xbf16>
    %1185 = arith.mulf %961, %1184 : vector<2x128xbf16>
    %1186 = vector.broadcast %303 : bf16 to vector<2x128xbf16>
    %1187 = arith.mulf %988, %1186 : vector<2x128xbf16>
    %1188 = arith.addf %1173, %1175 : vector<2x128xbf16>
    %1189 = arith.addf %1177, %1179 : vector<2x128xbf16>
    %1190 = arith.addf %1181, %1183 : vector<2x128xbf16>
    %1191 = arith.addf %1185, %1187 : vector<2x128xbf16>
    %1192 = arith.addf %1188, %1189 : vector<2x128xbf16>
    %1193 = arith.addf %1190, %1191 : vector<2x128xbf16>
    %1194 = arith.addf %1192, %1193 : vector<2x128xbf16>
    %1195 = vector.broadcast %361 : bf16 to vector<2x128xbf16>
    %1196 = arith.addf %1194, %1195 : vector<2x128xbf16>
    %cst_525 = arith.constant 0.000000e+00 : bf16
    %1197 = vector.broadcast %cst_525 : bf16 to vector<2x128xbf16>
    %1198 = arith.maximumf %1196, %1197 : vector<2x128xbf16>
    %1199 = vector.broadcast %305 : bf16 to vector<2x128xbf16>
    %1200 = arith.mulf %799, %1199 : vector<2x128xbf16>
    %1201 = vector.broadcast %307 : bf16 to vector<2x128xbf16>
    %1202 = arith.mulf %826, %1201 : vector<2x128xbf16>
    %1203 = vector.broadcast %309 : bf16 to vector<2x128xbf16>
    %1204 = arith.mulf %853, %1203 : vector<2x128xbf16>
    %1205 = vector.broadcast %311 : bf16 to vector<2x128xbf16>
    %1206 = arith.mulf %880, %1205 : vector<2x128xbf16>
    %1207 = vector.broadcast %313 : bf16 to vector<2x128xbf16>
    %1208 = arith.mulf %907, %1207 : vector<2x128xbf16>
    %1209 = vector.broadcast %315 : bf16 to vector<2x128xbf16>
    %1210 = arith.mulf %934, %1209 : vector<2x128xbf16>
    %1211 = vector.broadcast %317 : bf16 to vector<2x128xbf16>
    %1212 = arith.mulf %961, %1211 : vector<2x128xbf16>
    %1213 = vector.broadcast %319 : bf16 to vector<2x128xbf16>
    %1214 = arith.mulf %988, %1213 : vector<2x128xbf16>
    %1215 = arith.addf %1200, %1202 : vector<2x128xbf16>
    %1216 = arith.addf %1204, %1206 : vector<2x128xbf16>
    %1217 = arith.addf %1208, %1210 : vector<2x128xbf16>
    %1218 = arith.addf %1212, %1214 : vector<2x128xbf16>
    %1219 = arith.addf %1215, %1216 : vector<2x128xbf16>
    %1220 = arith.addf %1217, %1218 : vector<2x128xbf16>
    %1221 = arith.addf %1219, %1220 : vector<2x128xbf16>
    %1222 = vector.broadcast %363 : bf16 to vector<2x128xbf16>
    %1223 = arith.addf %1221, %1222 : vector<2x128xbf16>
    %cst_526 = arith.constant 0.000000e+00 : bf16
    %1224 = vector.broadcast %cst_526 : bf16 to vector<2x128xbf16>
    %1225 = arith.maximumf %1223, %1224 : vector<2x128xbf16>
    %1226 = vector.broadcast %321 : bf16 to vector<2x128xbf16>
    %1227 = arith.mulf %799, %1226 : vector<2x128xbf16>
    %1228 = vector.broadcast %323 : bf16 to vector<2x128xbf16>
    %1229 = arith.mulf %826, %1228 : vector<2x128xbf16>
    %1230 = vector.broadcast %325 : bf16 to vector<2x128xbf16>
    %1231 = arith.mulf %853, %1230 : vector<2x128xbf16>
    %1232 = vector.broadcast %327 : bf16 to vector<2x128xbf16>
    %1233 = arith.mulf %880, %1232 : vector<2x128xbf16>
    %1234 = vector.broadcast %329 : bf16 to vector<2x128xbf16>
    %1235 = arith.mulf %907, %1234 : vector<2x128xbf16>
    %1236 = vector.broadcast %331 : bf16 to vector<2x128xbf16>
    %1237 = arith.mulf %934, %1236 : vector<2x128xbf16>
    %1238 = vector.broadcast %333 : bf16 to vector<2x128xbf16>
    %1239 = arith.mulf %961, %1238 : vector<2x128xbf16>
    %1240 = vector.broadcast %335 : bf16 to vector<2x128xbf16>
    %1241 = arith.mulf %988, %1240 : vector<2x128xbf16>
    %1242 = arith.addf %1227, %1229 : vector<2x128xbf16>
    %1243 = arith.addf %1231, %1233 : vector<2x128xbf16>
    %1244 = arith.addf %1235, %1237 : vector<2x128xbf16>
    %1245 = arith.addf %1239, %1241 : vector<2x128xbf16>
    %1246 = arith.addf %1242, %1243 : vector<2x128xbf16>
    %1247 = arith.addf %1244, %1245 : vector<2x128xbf16>
    %1248 = arith.addf %1246, %1247 : vector<2x128xbf16>
    %1249 = vector.broadcast %365 : bf16 to vector<2x128xbf16>
    %1250 = arith.addf %1248, %1249 : vector<2x128xbf16>
    %cst_527 = arith.constant 0.000000e+00 : bf16
    %1251 = vector.broadcast %cst_527 : bf16 to vector<2x128xbf16>
    %1252 = arith.maximumf %1250, %1251 : vector<2x128xbf16>
    %1253 = vector.broadcast %337 : bf16 to vector<2x128xbf16>
    %1254 = arith.mulf %799, %1253 : vector<2x128xbf16>
    %1255 = vector.broadcast %339 : bf16 to vector<2x128xbf16>
    %1256 = arith.mulf %826, %1255 : vector<2x128xbf16>
    %1257 = vector.broadcast %341 : bf16 to vector<2x128xbf16>
    %1258 = arith.mulf %853, %1257 : vector<2x128xbf16>
    %1259 = vector.broadcast %343 : bf16 to vector<2x128xbf16>
    %1260 = arith.mulf %880, %1259 : vector<2x128xbf16>
    %1261 = vector.broadcast %345 : bf16 to vector<2x128xbf16>
    %1262 = arith.mulf %907, %1261 : vector<2x128xbf16>
    %1263 = vector.broadcast %347 : bf16 to vector<2x128xbf16>
    %1264 = arith.mulf %934, %1263 : vector<2x128xbf16>
    %1265 = vector.broadcast %349 : bf16 to vector<2x128xbf16>
    %1266 = arith.mulf %961, %1265 : vector<2x128xbf16>
    %1267 = vector.broadcast %351 : bf16 to vector<2x128xbf16>
    %1268 = arith.mulf %988, %1267 : vector<2x128xbf16>
    %1269 = arith.addf %1254, %1256 : vector<2x128xbf16>
    %1270 = arith.addf %1258, %1260 : vector<2x128xbf16>
    %1271 = arith.addf %1262, %1264 : vector<2x128xbf16>
    %1272 = arith.addf %1266, %1268 : vector<2x128xbf16>
    %1273 = arith.addf %1269, %1270 : vector<2x128xbf16>
    %1274 = arith.addf %1271, %1272 : vector<2x128xbf16>
    %1275 = arith.addf %1273, %1274 : vector<2x128xbf16>
    %1276 = vector.broadcast %367 : bf16 to vector<2x128xbf16>
    %1277 = arith.addf %1275, %1276 : vector<2x128xbf16>
    %cst_528 = arith.constant 0.000000e+00 : bf16
    %1278 = vector.broadcast %cst_528 : bf16 to vector<2x128xbf16>
    %1279 = arith.maximumf %1277, %1278 : vector<2x128xbf16>
    %1280 = vector.broadcast %465 : bf16 to vector<2x128xbf16>
    %1281 = arith.mulf %1090, %1280 : vector<2x128xbf16>
    %1282 = vector.broadcast %467 : bf16 to vector<2x128xbf16>
    %1283 = arith.mulf %1117, %1282 : vector<2x128xbf16>
    %1284 = vector.broadcast %469 : bf16 to vector<2x128xbf16>
    %1285 = arith.mulf %1144, %1284 : vector<2x128xbf16>
    %1286 = vector.broadcast %471 : bf16 to vector<2x128xbf16>
    %1287 = arith.mulf %1171, %1286 : vector<2x128xbf16>
    %1288 = vector.broadcast %473 : bf16 to vector<2x128xbf16>
    %1289 = arith.mulf %1198, %1288 : vector<2x128xbf16>
    %1290 = vector.broadcast %475 : bf16 to vector<2x128xbf16>
    %1291 = arith.mulf %1225, %1290 : vector<2x128xbf16>
    %1292 = vector.broadcast %477 : bf16 to vector<2x128xbf16>
    %1293 = arith.mulf %1252, %1292 : vector<2x128xbf16>
    %1294 = vector.broadcast %479 : bf16 to vector<2x128xbf16>
    %1295 = arith.mulf %1279, %1294 : vector<2x128xbf16>
    %1296 = arith.addf %1281, %1283 : vector<2x128xbf16>
    %1297 = arith.addf %1285, %1287 : vector<2x128xbf16>
    %1298 = arith.addf %1289, %1291 : vector<2x128xbf16>
    %1299 = arith.addf %1293, %1295 : vector<2x128xbf16>
    %1300 = arith.addf %1296, %1297 : vector<2x128xbf16>
    %1301 = arith.addf %1298, %1299 : vector<2x128xbf16>
    %1302 = arith.addf %1300, %1301 : vector<2x128xbf16>
    %1303 = arith.extf %1302 : vector<2x128xbf16> to vector<2x128xf32>
    %1304 = arith.addf %1013, %1303 : vector<2x128xf32>
    %1305 = vector.broadcast %481 : bf16 to vector<2x128xbf16>
    %1306 = arith.mulf %1090, %1305 : vector<2x128xbf16>
    %1307 = vector.broadcast %483 : bf16 to vector<2x128xbf16>
    %1308 = arith.mulf %1117, %1307 : vector<2x128xbf16>
    %1309 = vector.broadcast %485 : bf16 to vector<2x128xbf16>
    %1310 = arith.mulf %1144, %1309 : vector<2x128xbf16>
    %1311 = vector.broadcast %487 : bf16 to vector<2x128xbf16>
    %1312 = arith.mulf %1171, %1311 : vector<2x128xbf16>
    %1313 = vector.broadcast %489 : bf16 to vector<2x128xbf16>
    %1314 = arith.mulf %1198, %1313 : vector<2x128xbf16>
    %1315 = vector.broadcast %491 : bf16 to vector<2x128xbf16>
    %1316 = arith.mulf %1225, %1315 : vector<2x128xbf16>
    %1317 = vector.broadcast %493 : bf16 to vector<2x128xbf16>
    %1318 = arith.mulf %1252, %1317 : vector<2x128xbf16>
    %1319 = vector.broadcast %495 : bf16 to vector<2x128xbf16>
    %1320 = arith.mulf %1279, %1319 : vector<2x128xbf16>
    %1321 = arith.addf %1306, %1308 : vector<2x128xbf16>
    %1322 = arith.addf %1310, %1312 : vector<2x128xbf16>
    %1323 = arith.addf %1314, %1316 : vector<2x128xbf16>
    %1324 = arith.addf %1318, %1320 : vector<2x128xbf16>
    %1325 = arith.addf %1321, %1322 : vector<2x128xbf16>
    %1326 = arith.addf %1323, %1324 : vector<2x128xbf16>
    %1327 = arith.addf %1325, %1326 : vector<2x128xbf16>
    %1328 = arith.extf %1327 : vector<2x128xbf16> to vector<2x128xf32>
    %1329 = arith.addf %1038, %1328 : vector<2x128xf32>
    %1330 = vector.broadcast %497 : bf16 to vector<2x128xbf16>
    %1331 = arith.mulf %1090, %1330 : vector<2x128xbf16>
    %1332 = vector.broadcast %499 : bf16 to vector<2x128xbf16>
    %1333 = arith.mulf %1117, %1332 : vector<2x128xbf16>
    %1334 = vector.broadcast %501 : bf16 to vector<2x128xbf16>
    %1335 = arith.mulf %1144, %1334 : vector<2x128xbf16>
    %1336 = vector.broadcast %503 : bf16 to vector<2x128xbf16>
    %1337 = arith.mulf %1171, %1336 : vector<2x128xbf16>
    %1338 = vector.broadcast %505 : bf16 to vector<2x128xbf16>
    %1339 = arith.mulf %1198, %1338 : vector<2x128xbf16>
    %1340 = vector.broadcast %507 : bf16 to vector<2x128xbf16>
    %1341 = arith.mulf %1225, %1340 : vector<2x128xbf16>
    %1342 = vector.broadcast %509 : bf16 to vector<2x128xbf16>
    %1343 = arith.mulf %1252, %1342 : vector<2x128xbf16>
    %1344 = vector.broadcast %511 : bf16 to vector<2x128xbf16>
    %1345 = arith.mulf %1279, %1344 : vector<2x128xbf16>
    %1346 = arith.addf %1331, %1333 : vector<2x128xbf16>
    %1347 = arith.addf %1335, %1337 : vector<2x128xbf16>
    %1348 = arith.addf %1339, %1341 : vector<2x128xbf16>
    %1349 = arith.addf %1343, %1345 : vector<2x128xbf16>
    %1350 = arith.addf %1346, %1347 : vector<2x128xbf16>
    %1351 = arith.addf %1348, %1349 : vector<2x128xbf16>
    %1352 = arith.addf %1350, %1351 : vector<2x128xbf16>
    %1353 = arith.extf %1352 : vector<2x128xbf16> to vector<2x128xf32>
    %1354 = arith.addf %1063, %1353 : vector<2x128xf32>
    %c0_529 = arith.constant 0 : index
    %c0_530 = arith.constant 0 : index
    %c0_531 = arith.constant 0 : index
    %c0_532 = arith.constant 0 : index
    %1355 = vector.load %arg4[%c0_529, %c0_530, %c0_531, %c0_532] : memref<1x3x2x128xf32, #tpu.memory_space<vmem>>, vector<1x1x2x128xf32>
    %1356 = vector.shape_cast %1355 : vector<1x1x2x128xf32> to vector<2x128xf32>
    %1357 = vector.shape_cast %1304 : vector<2x128xf32> to vector<1x1x2x128xf32>
    tpu.vector_store %arg4[%c0_529, %c0_530, %c0_531, %c0_532], %1357 {strides = array<i32>} : memref<1x3x2x128xf32, #tpu.memory_space<vmem>>, vector<1x1x2x128xf32>,
    %c0_533 = arith.constant 0 : index
    %c1_534 = arith.constant 1 : index
    %c0_535 = arith.constant 0 : index
    %c0_536 = arith.constant 0 : index
    %1358 = vector.load %arg4[%c0_533, %c1_534, %c0_535, %c0_536] : memref<1x3x2x128xf32, #tpu.memory_space<vmem>>, vector<1x1x2x128xf32>
    %1359 = vector.shape_cast %1358 : vector<1x1x2x128xf32> to vector<2x128xf32>
    %1360 = vector.shape_cast %1329 : vector<2x128xf32> to vector<1x1x2x128xf32>
    tpu.vector_store %arg4[%c0_533, %c1_534, %c0_535, %c0_536], %1360 {strides = array<i32>} : memref<1x3x2x128xf32, #tpu.memory_space<vmem>>, vector<1x1x2x128xf32>,
    %c0_537 = arith.constant 0 : index
    %c2_538 = arith.constant 2 : index
    %c0_539 = arith.constant 0 : index
    %c0_540 = arith.constant 0 : index
    %1361 = vector.load %arg4[%c0_537, %c2_538, %c0_539, %c0_540] : memref<1x3x2x128xf32, #tpu.memory_space<vmem>>, vector<1x1x2x128xf32>
    %1362 = vector.shape_cast %1361 : vector<1x1x2x128xf32> to vector<2x128xf32>
    %1363 = vector.shape_cast %1354 : vector<2x128xf32> to vector<1x1x2x128xf32>
    tpu.vector_store %arg4[%c0_537, %c2_538, %c0_539, %c0_540], %1363 {strides = array<i32>} : memref<1x3x2x128xf32, #tpu.memory_space<vmem>>, vector<1x1x2x128xf32>,
    return
  }
  func.func @transform_0(%arg0: i32, %arg1: i32) -> (i32, i32, i32, i32) {
    %c0_i32 = arith.constant 0 : i32
    %c0_i32_0 = arith.constant 0 : i32
    %c0_i32_1 = arith.constant 0 : i32
    return %arg0, %c0_i32, %arg1, %c0_i32_0 : i32, i32, i32, i32
  }
  func.func @transform_1(%arg0: i32, %arg1: i32) -> (i32, i32) {
    %c0_i32 = arith.constant 0 : i32
    %c0_i32_0 = arith.constant 0 : i32
    %c0_i32_1 = arith.constant 0 : i32
    return %c0_i32, %c0_i32_0 : i32, i32
  }
  func.func @transform_2(%arg0: i32, %arg1: i32) -> (i32, i32, i32, i32) {
    %c0_i32 = arith.constant 0 : i32
    %c0_i32_0 = arith.constant 0 : i32
    %c0_i32_1 = arith.constant 0 : i32
    return %arg0, %c0_i32, %arg1, %c0_i32_0 : i32, i32, i32, i32
  }
}

</mosaic_0001>

<bundles_post_ra>
// kernel: tpu_custom_call.1
= control target key start
LH: loop header
LB: loop body
LE: loop exit
PB: predicated region body
PF: predicated region fallthrough
CT: control target
= control target key end

     0   :  { %s10532_s0 = inlined_call_operand.hbm [shape: f32[2,4,2,128], index: 0, kind: input, shape index: {}]   ;;  %s10533_s1 = inlined_call_operand.hbm [shape: f32[8,64], index: 1, kind: input, shape index: {}]   ;;  %s10534_s2 = inlined_call_operand.hbm [shape: f32[2,3,2,128], index: 2, kind: output, shape index: {}]  }
   0x1   :  { %10799 = sst [smem:[#allocation238_spill]] %s10532_s0 }
   0x2   :  { %10800 = sst [smem:[#allocation239_spill]] %s10533_s1 }
   0x3   :  { %10801 = sst [smem:[#allocation240_spill]] %s10534_s2 }
   0x4   :  { %7 = vsyncpa [#allocation3], 0 }
   0x5   :  { %9 = vsyncpa [#allocation3 + $0x1], 0 }
   0x6   :  { %10 = vsyncpa [#allocation5], 0 }
   0x7   :  { %11 = vsyncpa [#allocation4], 0 }
   0x8   :  { %13 = vsyncpa [#allocation4 + $0x1], 0  ;;  %s6448_s9 = smov 0   ;;  %s6450_s10 = smov 0  }
   0x9   :  { %s6452_s11 = smov 0   ;;  %s6454_s12 = smov 0  }
   0xa   :  { %s6456_s13 = smov 0   ;;  %s6458_s14 = smov 0  }
   0xb LB: > { %10802 = sst [smem:[#allocation11_spill]] %s6406_s9  ;;  %s5925_s15 = sadd.s32 4294967295, %s6426_s14   ;;  %s6426_s14 = sphi %s6458_s14, %s19_s14   ;;  %s6422_s13 = sphi %s6456_s13, %s11971_s13   ;;  %s6418_s12 = sphi %s6454_s12, %s11970_s12   ;;  %s6414_s11 = sphi %s6452_s11, %s11969_s11   ;;  %s6410_s10 = sphi %s6450_s10, %s11968_s10   ;;  %s6406_s9 = sphi %s6448_s9, %s11967_s9  }
   0xc   : > { %10803 = sst [smem:[#allocation12_spill]] %s6410_s10  ;;  %s5926_s16 = sadd.s32 4294967294, %s6426_s14  }
   0xd   : > { %10804 = sst [smem:[#allocation13_spill]] %s6414_s11  ;;  %s40_s17 = sadd.s32 1, %s6414_s11 }
   0xe   : > { %10805 = sst [smem:[#allocation14_spill]] %s6418_s12  ;;  %p47_p0 = scmp.ne.s32.totalorder %s6414_s11, %s6410_s10 }
   0xf   : > { %10806 = sst [smem:[#allocation15_spill]] %s6422_s13  ;;  %p48_p1 = scmp.eq.s32.totalorder %s6426_s14, 0 }
  0x10   : > { %10807 = sst [smem:[#allocation16_spill]] %s6426_s14  ;;  %p53_p2 = scmp.ne.s32.totalorder %s6410_s10, %s6406_s9 }
  0x11   : > { %p6486_p3 = scmp.eq.s32.totalorder %s5925_s15, 0  ;;  %p100_p4 = scmp.eq.s32.totalorder %s5925_s15, 1 }
  0x12   : > { %p6490_p5 = por %p48_p1, %p47_p0  ;;  %p106_p6 = scmp.eq.s32.totalorder %s5926_s16, 1 }
  0x13   : > { %p6496_p7 = por %p6486_p3, %p53_p2  ;;  %p6500_p8 = por %p100_p4, %p47_p0 }
  0x14   : > { %p6504_p9 = por %p106_p6, %p53_p2  ;;  %p5927_p10 = scmp.ge.s32.totalorder %s6426_s14, 1 }
  0x15   : > { %s10811_s21 = scalar_select %p6500_p8, 1, 0 }
  0x16   : > { %s10813_s22 = scalar_select %p6504_p9, 1, 0 }
  0x17   : > { %10812 = sst [smem:[#allocation17_spill]] %s10811_s21  ;;  %p113_p11 = scmp.lt.s32.totalorder %s6426_s14, 3 }
  0x18   : > { %10814 = sst [smem:[#allocation18_spill]] %s10813_s22  ;;  %p5929_p13 = scmp.ge.s32.totalorder %s6426_s14, 2 }
  0x19   : > { %s10815_s1 = sld [smem:[#allocation239_spill]]  ;;  %p6513_p12 = pnand %p5927_p10, %p113_p11 }
  0x1a   : > { %p6238_p0 = scmp.lt.s32.totalorder %s6426_s14, 2  ;;  %s31_s28 = sadd.s32 1, %s6422_s13 }
  0x1b   : > { %p6225_p1 = pneg %p6513_p12  ;;  %p33_p6 = scmp.ge.s32.totalorder %s31_s28, 2 }
  0x1c   : > { %p6523_p2 = pnand %p6238_p0, %p6490_p5  ;;  %s136_s29 = sand.u32 1, %s6414_s11  }
  0x1d   : > { %p6226_p4 = pnand %p6225_p1, %p6486_p3  ;;  %s6428_s30 = smov [#allocation6]  }
  0x1e   : > { %s11973_s28 = smov (%p33_p6, %s31_s28), 0  ;;  %s5930_s3 = sshll.u32 %s136_s29, 3 }
  0x1f   : > { %s125_s25 = sshll.u32 %s10815_s1, 4  ;;  %10818 = sst [smem:[#allocation19_spill]] %s11973_s28  ;;  %s126_s25 = int_to_ptr.hbm [resolvable:$true] %s125_s25 }
  0x20   : > { %6228 = dma.hbm_to_smem (!%p6226_p4), %s126_s25, 128, %s6428_s30, [#allocation5]  }
  0x21   : > { %s35_s4 = ssub.s32 %s6422_s13, %s11973_s28  ;;  %s6214_s5 = sshll.u32 %s6422_s13, 3 }
  0x22   : > { %p38_p10 = scmp.eq.s32.totalorder %s35_s4, 0  ;;  %s10819_s0 = sld [smem:[#allocation238_spill]] }
  0x23   : > { %s140_s15 = scalar_lea.vmem [#allocation2], %s5930_s3  ;;  %s137_s24 = scalar_lea.sflag [#allocation3], %s136_s29 }
  0x24   : > { %s149_s16 = sshll.u32 %s140_s15, 4  ;;  %s6429_s25 = smov 32   ;;  %s150_s16 = int_to_ptr.vmem [resolvable:$true] %s149_s16 }
  0x25   : > { %s6542_s19 = scalar_select %p38_p10, %s6414_s11, %s40_s17  }
  0x26   : > { %s6430_s30 = smov 2   ;;  %161 = sbr.rel (%p6513_p12) target bundleno = 1864 (0x748), region = 28 }
  0x27   : > { %10820 = sst [smem:[#allocation20_spill]] %s6542_s19 }
  0x28   : > { %s146_s8 = scalar_lea.hbm %s10819_s0, %s6214_s5 }
  0x29   : > { %s147_s23 = sshll.u32 %s146_s8, 4  ;;  %s148_s23 = int_to_ptr.hbm [resolvable:$true] %s147_s23 }
  0x2a   : > { %6232 = dma.hbm_to_vmem [thread:$0]  (!%p6523_p2), %s148_s23, 128, %s150_s16, %s137_s24, %s6429_s25, %s6429_s25, %s6430_s30  }
  0x2b   : > { %s6549_s4 = sand.u32 1, %s6410_s10  }
  0x2c   : > { %10821 = sst [smem:[#allocation21_spill]] %s6549_s4  ;;  %s5934_s3 = sshll.u32 %s6549_s4, 3 }
  0x2d   : > { %s164_s17 = scalar_lea.sflag [#allocation3], %s6549_s4  ;;  %s6553_s5 = scalar_lea.vmem [#allocation2], %s5934_s3 }
  0x2e   : > { %10822 = sst [smem:[#allocation22_spill]] %s6553_s5 }
  0x2f   : > { %6393 = dma.done.wait (%p6496_p7), %s164_s17, 128  }
  0x30   : > { %6395 = vsyncadd (%p6496_p7), %s164_s17, 4294967168 }
  0x31   : > { %6397 = dma.done.wait (%p6486_p3), [#allocation5], 128  }
  0x32   : > { %6399 = vsyncadd (%p6486_p3), [#allocation5], 4294967168 }
  0x33   : > { %178 = sfence }
  0x34   : > { %s195_s26 = sld [smem:[#allocation6]] }
  0x35   : > { %s5936_s27 = sld [smem:[#allocation6 + $0x1]] }
  0x36   : > { %s5937_s29 = sld [smem:[#allocation6 + $0x2]] }
  0x37   : > { %s6563_s6 = sld [smem:[#allocation6 + $0x3]] }
  0x38   : > { %s6567_s30 = sld [smem:[#allocation6 + $0x80]] }
  0x39   : > { %s6569_s17 = sld [smem:[#allocation6 + $0x81]] }
  0x3a   : > { %p197_p5 = scmp.ne.f32.partialorder %s195_s26, %s195_s26  ;;  %s198_s7 = sshrl.u32 %s195_s26, 16 }
  0x3b   : > { %s199_s8 = sand.u32 1, %s198_s7  ;;  %p208_p11 = scmp.ne.f32.partialorder %s5936_s27, %s5936_s27 }
  0x3c   : > { %s200_s15 = sadd.s32 32767, %s199_s8  ;;  %s209_s20 = sshrl.u32 %s5936_s27, 16 }
  0x3d   : > { %s201_s16 = sadd.s32 %s200_s15, %s195_s26  ;;  %s210_s23 = sand.u32 1, %s209_s20 }
  0x3e   : > { %s202_s24 = sand.u32 4294901760, %s201_s16  ;;  %s211_s25 = sadd.s32 32767, %s210_s23 }
  0x3f   : > { %s11975_s24 = smov (%p197_p5, %s202_s24), 2143289344  ;;  %s212_s18 = sadd.s32 %s5936_s27, %s211_s25 }
  0x40   : > { %s213_s3 = sand.u32 4294901760, %s212_s18  ;;  %p219_p3 = scmp.ne.f32.partialorder %s5937_s29, %s5937_s29 }
  0x41   : > { %s11977_s3 = smov (%p208_p11, %s213_s3), 2143289344  ;;  %s220_s7 = sshrl.u32 %s5937_s29, 16 }
  0x42   : > { %s221_s8 = sand.u32 1, %s220_s7  ;;  %p230_p7 = scmp.ne.f32.partialorder %s6563_s6, %s6563_s6 }
  0x43   : > { %s222_s26 = sadd.s32 32767, %s221_s8  ;;  %s231_s15 = sshrl.u32 %s6563_s6, 16 }
  0x44   : > { %s223_s27 = sadd.s32 %s5937_s29, %s222_s26  ;;  %s232_s20 = sand.u32 1, %s231_s15 }
  0x45   : > { %s224_s16 = sand.u32 4294901760, %s223_s27  ;;  %s233_s23 = sadd.s32 32767, %s232_s20 }
  0x46   : > { %s11979_s16 = smov (%p219_p3, %s224_s16), 2143289344  ;;  %s234_s25 = sadd.s32 %s6563_s6, %s233_s23 }
  0x47   : > { %s235_s18 = sand.u32 4294901760, %s234_s25  ;;  %s242_s0 = sshrl.u32 %s6567_s30, 16 }
  0x48   : > { %s11981_s18 = smov (%p230_p7, %s235_s18), 2143289344  ;;  %s243_s7 = sand.u32 1, %s242_s0 }
  0x49   : > { %10823 = sst [smem:[#allocation23_spill]] %s11981_s18  ;;  %s244_s1 = sadd.s32 32767, %s243_s7 }
  0x4a   : > { %s253_s28 = sshrl.u32 %s6569_s17, 16  ;;  %s245_s8 = sadd.s32 %s6567_s30, %s244_s1 }
  0x4b   : > { %s254_s13 = sand.u32 1, %s253_s28  ;;  %p241_p12 = scmp.ne.f32.partialorder %s6567_s30, %s6567_s30 }
  0x4c   : > { %s255_s19 = sadd.s32 32767, %s254_s13  ;;  %s5941_s29 = sld [smem:[#allocation6 + $0x82]] }
  0x4d   : > { %s246_s26 = sand.u32 4294901760, %s245_s8  ;;  %s256_s15 = sadd.s32 %s6569_s17, %s255_s19 }
  0x4e   : > { %s5942_s27 = sld [smem:[#allocation6 + $0x83]]  ;;  %s11983_s26 = smov (%p241_p12, %s246_s26), 2143289344 }
  0x4f   : > { %10824 = sst [smem:[#allocation24_spill]] %s11983_s26  ;;  %p252_p0 = scmp.ne.f32.partialorder %s6569_s17, %s6569_s17 }
  0x50   : > { %s257_s6 = sand.u32 4294901760, %s256_s15  ;;  %s6591_s23 = sld [smem:[#allocation6 + $0x100]] }
  0x51   : > { %s11985_s6 = smov (%p252_p0, %s257_s6), 2143289344  ;;  %s5944_s28 = sld [smem:[#allocation6 + $0x101]] }
  0x52   : > { %s264_s20 = sshrl.u32 %s5941_s29, 16  ;;  %10825 = sst [smem:[#allocation25_spill]] %s11985_s6 }
  0x53   : > { %s265_s0 = sand.u32 1, %s264_s20  ;;  %p263_p1 = scmp.ne.f32.partialorder %s5941_s29, %s5941_s29 }
  0x54   : > { %s266_s25 = sadd.s32 32767, %s265_s0  ;;  %s275_s13 = sshrl.u32 %s5942_s27, 16 }
  0x55   : > { %s267_s1 = sadd.s32 %s5941_s29, %s266_s25  ;;  %s276_s19 = sand.u32 1, %s275_s13 }
  0x56   : > { %s6595_s30 = sld [smem:[#allocation6 + $0x102]]  ;;  %s268_s7 = sand.u32 4294901760, %s267_s1 }
  0x57   : > { %s277_s17 = sadd.s32 32767, %s276_s19  ;;  %s286_s15 = sshrl.u32 %s6591_s23, 16 }
  0x58   : > { %s278_s8 = sadd.s32 %s5942_s27, %s277_s17  ;;  %p274_p2 = scmp.ne.f32.partialorder %s5942_s27, %s5942_s27 }
  0x59   : > { %s287_s11 = sand.u32 1, %s286_s15  ;;  %s11987_s7 = smov (%p263_p1, %s268_s7), 2143289344 }
  0x5a   : > { %10826 = sst [smem:[#allocation26_spill]] %s11987_s7  ;;  %s279_s20 = sand.u32 4294901760, %s278_s8 }
  0x5b   : > { %s288_s0 = sadd.s32 32767, %s287_s11  ;;  %p285_p4 = scmp.ne.f32.partialorder %s6591_s23, %s6591_s23 }
  0x5c   : > { %s6602_s25 = sld [smem:[#allocation6 + $0x103]]  ;;  %s289_s29 = sadd.s32 %s6591_s23, %s288_s0 }
  0x5d   : > { %s297_s13 = sshrl.u32 %s5944_s28, 16  ;;  %s11989_s20 = smov (%p274_p2, %s279_s20), 2143289344 }
  0x5e   : > { %10827 = sst [smem:[#allocation27_spill]] %s11989_s20  ;;  %p296_p6 = scmp.ne.f32.partialorder %s5944_s28, %s5944_s28 }
  0x5f   : > { %s298_s1 = sand.u32 1, %s297_s13  ;;  %s290_s19 = sand.u32 4294901760, %s289_s29 }
  0x60   : > { %s299_s27 = sadd.s32 32767, %s298_s1  ;;  %s308_s8 = sshrl.u32 %s6595_s30, 16 }
  0x61   : > { %s300_s17 = sadd.s32 %s5944_s28, %s299_s27  ;;  %s309_s15 = sand.u32 1, %s308_s8 }
  0x62   : > { %s301_s11 = sand.u32 4294901760, %s300_s17  ;;  %s11991_s19 = smov (%p285_p4, %s290_s19), 2143289344 }
  0x63   : > { %10828 = sst [smem:[#allocation28_spill]] %s11991_s19  ;;  %s310_s10 = sadd.s32 32767, %s309_s15 }
  0x64   : > { %s11993_s11 = smov (%p296_p6, %s301_s11), 2143289344  ;;  %s319_s23 = sshrl.u32 %s6602_s25, 16 }
  0x65   : > { %10829 = sst [smem:[#allocation29_spill]] %s11993_s11  ;;  %s311_s0 = sadd.s32 %s6595_s30, %s310_s10 }
  0x66   : > { %s320_s14 = sand.u32 1, %s319_s23  ;;  %s5947_s22 = sld [smem:[#allocation6 + $0x180]] }
  0x67   : > { %s321_s9 = sadd.s32 32767, %s320_s14  ;;  %p307_p10 = scmp.ne.f32.partialorder %s6595_s30, %s6595_s30 }
  0x68   : > { %s6616_s29 = sld [smem:[#allocation6 + $0x181]]  ;;  %s312_s28 = sand.u32 4294901760, %s311_s0 }
  0x69   : > { %s322_s13 = sadd.s32 %s6602_s25, %s321_s9  ;;  %p318_p5 = scmp.ne.f32.partialorder %s6602_s25, %s6602_s25 }
  0x6a   : > { %s11995_s28 = smov (%p307_p10, %s312_s28), 2143289344  ;;  %s323_s1 = sand.u32 4294901760, %s322_s13 }
  0x6b   : > { %10830 = sst [smem:[#allocation30_spill]] %s11995_s28  ;;  %s11997_s1 = smov (%p318_p5, %s323_s1), 2143289344 }
  0x6c   : > { %s330_s27 = sshrl.u32 %s5947_s22, 16  ;;  %s6623_s8 = sld [smem:[#allocation6 + $0x182]] }
  0x6d   : > { %s331_s17 = sand.u32 1, %s330_s27  ;;  %s6626_s15 = sld [smem:[#allocation6 + $0x183]] }
  0x6e   : > { %s332_s10 = sadd.s32 32767, %s331_s17  ;;  %s341_s14 = sshrl.u32 %s6616_s29, 16 }
  0x6f   : > { %s333_s30 = sadd.s32 %s5947_s22, %s332_s10  ;;  %p329_p11 = scmp.ne.f32.partialorder %s5947_s22, %s5947_s22 }
  0x70   : > { %s342_s9 = sand.u32 1, %s341_s14  ;;  %s334_s25 = sand.u32 4294901760, %s333_s30 }
  0x71   : > { %10831 = sst [smem:[#allocation31_spill]] %s11997_s1  ;;  %s343_s23 = sadd.s32 32767, %s342_s9 }
  0x72   : > { %s11999_s25 = smov (%p329_p11, %s334_s25), 2143289344  ;;  %s352_s0 = sshrl.u32 %s6623_s8, 16 }
  0x73   : > { %10832 = sst [smem:[#allocation32_spill]] %s11999_s25  ;;  %s344_s27 = sadd.s32 %s6616_s29, %s343_s23 }
  0x74   : > { %s6633_s13 = sld [smem:[#allocation6 + $0x200]]  ;;  %s353_s17 = sand.u32 1, %s352_s0 }
  0x75   : > { %s354_s10 = sadd.s32 32767, %s353_s17  ;;  %s363_s21 = sshrl.u32 %s6626_s15, 16 }
  0x76   : > { %p340_p3 = scmp.ne.f32.partialorder %s6616_s29, %s6616_s29  ;;  %s364_s22 = sand.u32 1, %s363_s21 }
  0x77   : > { %s345_s14 = sand.u32 4294901760, %s344_s27  ;;  %s355_s30 = sadd.s32 %s6623_s8, %s354_s10 }
  0x78   : > { %s365_s2 = sadd.s32 32767, %s364_s22  ;;  %p351_p7 = scmp.ne.f32.partialorder %s6623_s8, %s6623_s8 }
  0x79   : > { %s12001_s14 = smov (%p340_p3, %s345_s14), 2143289344  ;;  %s356_s9 = sand.u32 4294901760, %s355_s30 }
  0x7a   : > { %10833 = sst [smem:[#allocation33_spill]] %s12001_s14  ;;  %s366_s12 = sadd.s32 %s6626_s15, %s365_s2 }
  0x7b   : > { %s374_s4 = sshrl.u32 %s6633_s13, 16  ;;  %s5952_s5 = sld [smem:[#allocation6 + $0x201]] }
  0x7c   : > { %p362_p12 = scmp.ne.f32.partialorder %s6626_s15, %s6626_s15  ;;  %s375_s23 = sand.u32 1, %s374_s4 }
  0x7d   : > { %s367_s0 = sand.u32 4294901760, %s366_s12  ;;  %s6648_s17 = sld [smem:[#allocation6 + $0x202]] }
  0x7e   : > { %s12003_s9 = smov (%p351_p7, %s356_s9), 2143289344  ;;  %s376_s21 = sadd.s32 32767, %s375_s23 }
  0x7f   : > { %10834 = sst [smem:[#allocation34_spill]] %s12003_s9  ;;  %s12005_s0 = smov (%p362_p12, %s367_s0), 2143289344 }
  0x80   : > { %10835 = sst [smem:[#allocation35_spill]] %s12005_s0  ;;  %s377_s2 = sadd.s32 %s6633_s13, %s376_s21 }
  0x81   : > { %s385_s29 = sshrl.u32 %s5952_s5, 16  ;;  %s6654_s8 = sld [smem:[#allocation6 + $0x203]] }
  0x82   : > { %s386_s27 = sand.u32 1, %s385_s29  ;;  %p373_p0 = scmp.ne.f32.partialorder %s6633_s13, %s6633_s13 }
  0x83   : > { %s387_s4 = sadd.s32 32767, %s386_s27  ;;  %s396_s15 = sshrl.u32 %s6648_s17, 16 }
  0x84   : > { %s388_s12 = sadd.s32 %s5952_s5, %s387_s4  ;;  %s378_s10 = sand.u32 4294901760, %s377_s2 }
  0x85   : > { %s5955_s22 = sld [smem:[#allocation6 + $0x280]]  ;;  %p384_p1 = scmp.ne.f32.partialorder %s5952_s5, %s5952_s5 }
  0x86   : > { %s397_s30 = sand.u32 1, %s396_s15  ;;  %s389_s23 = sand.u32 4294901760, %s388_s12 }
  0x87   : > { %s12007_s10 = smov (%p373_p0, %s378_s10), 2143289344  ;;  %s398_s0 = sadd.s32 32767, %s397_s30 }
  0x88   : > { %10836 = sst [smem:[#allocation36_spill]] %s12007_s10  ;;  %s407_s9 = sshrl.u32 %s6654_s8, 16 }
  0x89   : > { %s12009_s23 = smov (%p384_p1, %s389_s23), 2143289344  ;;  %p395_p2 = scmp.ne.f32.partialorder %s6648_s17, %s6648_s17 }
  0x8a   : > { %10837 = sst [smem:[#allocation37_spill]] %s12009_s23  ;;  %s408_s13 = sand.u32 1, %s407_s9 }
  0x8b   : > { %s399_s21 = sadd.s32 %s6648_s17, %s398_s0  ;;  %s409_s29 = sadd.s32 32767, %s408_s13 }
  0x8c   : > { %p406_p4 = scmp.ne.f32.partialorder %s6654_s8, %s6654_s8  ;;  %s418_s2 = sshrl.u32 %s5955_s22, 16 }
  0x8d   : > { %s410_s27 = sadd.s32 %s6654_s8, %s409_s29  ;;  %s419_s5 = sand.u32 1, %s418_s2 }
  0x8e   : > { %s400_s4 = sand.u32 4294901760, %s399_s21  ;;  %p417_p6 = scmp.ne.f32.partialorder %s5955_s22, %s5955_s22 }
  0x8f   : > { %s420_s12 = sadd.s32 32767, %s419_s5  ;;  %s5956_s15 = sld [smem:[#allocation6 + $0x281]] }
  0x90   : > { %s411_s30 = sand.u32 4294901760, %s410_s27  ;;  %s421_s10 = sadd.s32 %s5955_s22, %s420_s12 }
  0x91   : > { %s422_s14 = sand.u32 4294901760, %s421_s10  ;;  %s5957_s23 = sld [smem:[#allocation6 + $0x282]] }
  0x92   : > { %s12011_s4 = smov (%p395_p2, %s400_s4), 2143289344  ;;  %s12013_s30 = smov (%p406_p4, %s411_s30), 2143289344 }
  0x93   : > { %10838 = sst [smem:[#allocation38_spill]] %s12011_s4  ;;  %s12015_s14 = smov (%p417_p6, %s422_s14), 2143289344 }
  0x94   : > { %10839 = sst [smem:[#allocation39_spill]] %s12013_s30 }
  0x95   : > { %10840 = sst [smem:[#allocation40_spill]] %s12015_s14  ;;  %s429_s9 = sshrl.u32 %s5956_s15, 16 }
  0x96   : > { %s5958_s0 = sld [smem:[#allocation6 + $0x283]]  ;;  %s430_s13 = sand.u32 1, %s429_s9 }
  0x97   : > { %s431_s8 = sadd.s32 32767, %s430_s13  ;;  %s440_s21 = sshrl.u32 %s5957_s23, 16 }
  0x98   : > { %s432_s29 = sadd.s32 %s5956_s15, %s431_s8  ;;  %s441_s2 = sand.u32 1, %s440_s21 }
  0x99   : > { %s6680_s5 = sld [smem:[#allocation6 + $0x300]]  ;;  %p428_p10 = scmp.ne.f32.partialorder %s5956_s15, %s5956_s15 }
  0x9a   : > { %s433_s10 = sand.u32 4294901760, %s432_s29  ;;  %s442_s22 = sadd.s32 32767, %s441_s2 }
  0x9b   : > { %p439_p5 = scmp.ne.f32.partialorder %s5957_s23, %s5957_s23  ;;  %s6682_s17 = sld [smem:[#allocation6 + $0x301]] }
  0x9c   : > { %s443_s27 = sadd.s32 %s5957_s23, %s442_s22  ;;  %s451_s12 = sshrl.u32 %s5958_s0, 16 }
  0x9d   : > { %s12017_s10 = smov (%p428_p10, %s433_s10), 2143289344  ;;  %p450_p11 = scmp.ne.f32.partialorder %s5958_s0, %s5958_s0 }
  0x9e   : > { %10841 = sst [smem:[#allocation41_spill]] %s12017_s10  ;;  %s452_s9 = sand.u32 1, %s451_s12 }
  0x9f   : > { %s444_s13 = sand.u32 4294901760, %s443_s27  ;;  %s453_s8 = sadd.s32 32767, %s452_s9 }
  0xa0   : > { %s454_s21 = sadd.s32 %s5958_s0, %s453_s8  ;;  %s462_s15 = sshrl.u32 %s6680_s5, 16 }
  0xa1   : > { %s455_s29 = sand.u32 4294901760, %s454_s21  ;;  %s463_s2 = sand.u32 1, %s462_s15 }
  0xa2   : > { %s12019_s13 = smov (%p439_p5, %s444_s13), 2143289344  ;;  %s464_s14 = sadd.s32 32767, %s463_s2 }
  0xa3   : > { %10842 = sst [smem:[#allocation42_spill]] %s12019_s13  ;;  %s12021_s29 = smov (%p450_p11, %s455_s29), 2143289344 }
  0xa4   : > { %10843 = sst [smem:[#allocation43_spill]] %s12021_s29  ;;  %s473_s23 = sshrl.u32 %s6682_s17, 16 }
  0xa5   : > { %s465_s22 = sadd.s32 %s6680_s5, %s464_s14  ;;  %s474_s30 = sand.u32 1, %s473_s23 }
  0xa6   : > { %s5961_s10 = sld [smem:[#allocation6 + $0x302]]  ;;  %s475_s4 = sadd.s32 32767, %s474_s30 }
  0xa7   : > { %p461_p3 = scmp.ne.f32.partialorder %s6680_s5, %s6680_s5  ;;  %s6695_s27 = sld [smem:[#allocation6 + $0x303]] }
  0xa8   : > { %s466_s0 = sand.u32 4294901760, %s465_s22  ;;  %s476_s12 = sadd.s32 %s6682_s17, %s475_s4 }
  0xa9   : > { %p472_p7 = scmp.ne.f32.partialorder %s6682_s17, %s6682_s17  ;;  %s12023_s0 = smov (%p461_p3, %s466_s0), 2143289344 }
  0xaa   : > { %10844 = sst [smem:[#allocation44_spill]] %s12023_s0  ;;  %s477_s9 = sand.u32 4294901760, %s476_s12 }
  0xab   : > { %s6702_s15 = sld [smem:[#allocation6 + $0x380]]  ;;  %s12025_s9 = smov (%p472_p7, %s477_s9), 2143289344 }
  0xac   : > { %s484_s8 = sshrl.u32 %s5961_s10, 16  ;;  %s6705_s2 = sld [smem:[#allocation6 + $0x381]] }
  0xad   : > { %s485_s21 = sand.u32 1, %s484_s8  ;;  %s495_s30 = sshrl.u32 %s6695_s27, 16 }
  0xae   : > { %s486_s14 = sadd.s32 32767, %s485_s21  ;;  %p483_p12 = scmp.ne.f32.partialorder %s5961_s10, %s5961_s10 }
  0xaf   : > { %s487_s5 = sadd.s32 %s5961_s10, %s486_s14  ;;  %s496_s4 = sand.u32 1, %s495_s30 }
  0xb0   : > { %s488_s17 = sand.u32 4294901760, %s487_s5  ;;  %10845 = sst [smem:[#allocation45_spill]] %s12025_s9 }
  0xb1   : > { %s497_s23 = sadd.s32 32767, %s496_s4  ;;  %s12027_s17 = smov (%p483_p12, %s488_s17), 2143289344 }
  0xb2   : > { %10846 = sst [smem:[#allocation46_spill]] %s12027_s17  ;;  %s506_s22 = sshrl.u32 %s6702_s15, 16 }
  0xb3   : > { %s6712_s12 = sld [smem:[#allocation6 + $0x382]]  ;;  %s498_s8 = sadd.s32 %s6695_s27, %s497_s23 }
  0xb4   : > { %s507_s21 = sand.u32 1, %s506_s22  ;;  %s517_s0 = sshrl.u32 %s6705_s2, 16 }
  0xb5   : > { %s508_s14 = sadd.s32 32767, %s507_s21  ;;  %p494_p0 = scmp.ne.f32.partialorder %s6695_s27, %s6695_s27 }
  0xb6   : > { %s518_s10 = sand.u32 1, %s517_s0  ;;  %s499_s30 = sand.u32 4294901760, %s498_s8 }
  0xb7   : > { %s509_s5 = sadd.s32 %s6702_s15, %s508_s14  ;;  %s519_s29 = sadd.s32 32767, %s518_s10 }
  0xb8   : > { %p505_p1 = scmp.ne.f32.partialorder %s6702_s15, %s6702_s15  ;;  %s12029_s30 = smov (%p494_p0, %s499_s30), 2143289344 }
  0xb9   : > { %10847 = sst [smem:[#allocation47_spill]] %s12029_s30  ;;  %s510_s4 = sand.u32 4294901760, %s509_s5 }
  0xba   : > { %s520_s17 = sadd.s32 %s6705_s2, %s519_s29  ;;  %s528_s9 = sshrl.u32 %s6712_s12, 16 }
  0xbb   : > { %s5966_s13 = sld [smem:[#allocation6 + $0x383]]  ;;  %p516_p2 = scmp.ne.f32.partialorder %s6705_s2, %s6705_s2 }
  0xbc   : > { %s529_s23 = sand.u32 1, %s528_s9  ;;  %s521_s22 = sand.u32 4294901760, %s520_s17 }
  0xbd   : > { %s6727_s21 = sld [smem:[#allocation6 + $0x30]]  ;;  %s12031_s4 = smov (%p505_p1, %s510_s4), 2143289344 }
  0xbe   : > { %10848 = sst [smem:[#allocation48_spill]] %s12031_s4  ;;  %s530_s27 = sadd.s32 32767, %s529_s23 }
  0xbf   : > { %s12033_s22 = smov (%p516_p2, %s521_s22), 2143289344  ;;  %s6733_s15 = sld [smem:[#allocation6 + $0xb0]] }
  0xc0   : > { %10849 = sst [smem:[#allocation49_spill]] %s12033_s22  ;;  %s531_s29 = sadd.s32 %s6712_s12, %s530_s27 }
  0xc1   : > { %s539_s0 = sshrl.u32 %s5966_s13, 16  ;;  %p527_p4 = scmp.ne.f32.partialorder %s6712_s12, %s6712_s12 }
  0xc2   : > { %s540_s8 = sand.u32 1, %s539_s0  ;;  %s532_s14 = sand.u32 4294901760, %s531_s29 }
  0xc3   : > { %s541_s9 = sadd.s32 32767, %s540_s8  ;;  %s550_s17 = sshrl.u32 %s6727_s21, 16 }
  0xc4   : > { %s542_s2 = sadd.s32 %s5966_s13, %s541_s9  ;;  %s5969_s10 = sld [smem:[#allocation6 + $0x130]] }
  0xc5   : > { %p538_p6 = scmp.ne.f32.partialorder %s5966_s13, %s5966_s13  ;;  %s551_s5 = sand.u32 1, %s550_s17 }
  0xc6   : > { %s543_s23 = sand.u32 4294901760, %s542_s2  ;;  %s12035_s14 = smov (%p527_p4, %s532_s14), 2143289344 }
  0xc7   : > { %10850 = sst [smem:[#allocation50_spill]] %s12035_s14  ;;  %s552_s22 = sadd.s32 32767, %s551_s5 }
  0xc8   : > { %s561_s4 = sshrl.u32 %s6733_s15, 16  ;;  %s12037_s23 = smov (%p538_p6, %s543_s23), 2143289344 }
  0xc9   : > { %10851 = sst [smem:[#allocation51_spill]] %s12037_s23  ;;  %p549_p10 = scmp.ne.f32.partialorder %s6727_s21, %s6727_s21 }
  0xca   : > { %s562_s12 = sand.u32 1, %s561_s4  ;;  %s553_s27 = sadd.s32 %s6727_s21, %s552_s22 }
  0xcb   : > { %s563_s0 = sadd.s32 32767, %s562_s12  ;;  %p560_p5 = scmp.ne.f32.partialorder %s6733_s15, %s6733_s15 }
  0xcc   : > { %s572_s29 = sshrl.u32 %s5969_s10, 16  ;;  %s564_s8 = sadd.s32 %s6733_s15, %s563_s0 }
  0xcd   : > { %s573_s13 = sand.u32 1, %s572_s29  ;;  %s554_s9 = sand.u32 4294901760, %s553_s27 }
  0xce   : > { %p571_p11 = scmp.ne.f32.partialorder %s5969_s10, %s5969_s10  ;;  %s574_s2 = sadd.s32 32767, %s573_s13 }
  0xcf   : > { %s5970_s17 = sld [smem:[#allocation6 + $0x1b0]]  ;;  %s565_s5 = sand.u32 4294901760, %s564_s8 }
  0xd0   : > { %s575_s14 = sadd.s32 %s5969_s10, %s574_s2  ;;  %s5971_s23 = sld [smem:[#allocation6 + $0x230]] }
  0xd1   : > { %s576_s30 = sand.u32 4294901760, %s575_s14  ;;  %s12039_s9 = smov (%p549_p10, %s554_s9), 2143289344 }
  0xd2   : > { %10852 = sst [smem:[#allocation52_spill]] %s12039_s9  ;;  %s12041_s5 = smov (%p560_p5, %s565_s5), 2143289344 }
  0xd3   : > { %10853 = sst [smem:[#allocation53_spill]] %s12041_s5  ;;  %s12043_s30 = smov (%p571_p11, %s576_s30), 2143289344 }
  0xd4   : > { %10854 = sst [smem:[#allocation54_spill]] %s12043_s30 }
  0xd5   : > { %s583_s4 = sshrl.u32 %s5970_s17, 16  ;;  %s5972_s22 = sld [smem:[#allocation6 + $0x2b0]] }
  0xd6   : > { %s584_s12 = sand.u32 1, %s583_s4  ;;  %s594_s27 = sshrl.u32 %s5971_s23, 16 }
  0xd7   : > { %s585_s15 = sadd.s32 32767, %s584_s12  ;;  %s595_s29 = sand.u32 1, %s594_s27 }
  0xd8   : > { %s586_s0 = sadd.s32 %s5970_s17, %s585_s15  ;;  %s6759_s13 = sld [smem:[#allocation6 + $0x330]] }
  0xd9   : > { %p582_p3 = scmp.ne.f32.partialorder %s5970_s17, %s5970_s17  ;;  %s587_s14 = sand.u32 4294901760, %s586_s0 }
  0xda   : > { %s596_s10 = sadd.s32 32767, %s595_s29  ;;  %p593_p7 = scmp.ne.f32.partialorder %s5971_s23, %s5971_s23 }
  0xdb   : > { %s6761_s21 = sld [smem:[#allocation6 + $0x3b0]]  ;;  %s597_s8 = sadd.s32 %s5971_s23, %s596_s10 }
  0xdc   : > { %s605_s2 = sshrl.u32 %s5972_s22, 16  ;;  %s12045_s14 = smov (%p582_p3, %s587_s14), 2143289344 }
  0xdd   : > { %10855 = sst [smem:[#allocation55_spill]] %s12045_s14  ;;  %p604_p12 = scmp.ne.f32.partialorder %s5972_s22, %s5972_s22 }
  0xde   : > { %s606_s4 = sand.u32 1, %s605_s2  ;;  %s598_s12 = sand.u32 4294901760, %s597_s8 }
  0xdf   : > { %s607_s15 = sadd.s32 32767, %s606_s4  ;;  %s616_s17 = sshrl.u32 %s6759_s13, 16 }
  0xe0   : > { %s608_s27 = sadd.s32 %s5972_s22, %s607_s15  ;;  %s617_s29 = sand.u32 1, %s616_s17 }
  0xe1   : > { %s609_s0 = sand.u32 4294901760, %s608_s27  ;;  %s12047_s12 = smov (%p593_p7, %s598_s12), 2143289344 }
  0xe2   : > { %10856 = sst [smem:[#allocation56_spill]] %s12047_s12  ;;  %s618_s30 = sadd.s32 32767, %s617_s29 }
  0xe3   : > { %s12049_s0 = smov (%p604_p12, %s609_s0), 2143289344  ;;  %s627_s23 = sshrl.u32 %s6761_s21, 16 }
  0xe4   : > { %10857 = sst [smem:[#allocation57_spill]] %s12049_s0  ;;  %s619_s10 = sadd.s32 %s6759_s13, %s618_s30 }
  0xe5   : > { %s628_s5 = sand.u32 1, %s627_s23  ;;  %s5975_s14 = sld [smem:[#allocation6 + $0x4]] }
  0xe6   : > { %s629_s9 = sadd.s32 32767, %s628_s5  ;;  %p615_p0 = scmp.ne.f32.partialorder %s6759_s13, %s6759_s13 }
  0xe7   : > { %s6774_s8 = sld [smem:[#allocation6 + $0x5]]  ;;  %s620_s22 = sand.u32 4294901760, %s619_s10 }
  0xe8   : > { %s630_s2 = sadd.s32 %s6761_s21, %s629_s9  ;;  %p626_p1 = scmp.ne.f32.partialorder %s6761_s21, %s6761_s21 }
  0xe9   : > { %s12051_s22 = smov (%p615_p0, %s620_s22), 2143289344  ;;  %s631_s4 = sand.u32 4294901760, %s630_s2 }
  0xea   : > { %10858 = sst [smem:[#allocation58_spill]] %s12051_s22  ;;  %s12053_s4 = smov (%p626_p1, %s631_s4), 2143289344 }
  0xeb   : > { %s638_s15 = sshrl.u32 %s5975_s14, 16  ;;  %s6781_s17 = sld [smem:[#allocation6 + $0x6]] }
  0xec   : > { %s639_s27 = sand.u32 1, %s638_s15  ;;  %s6784_s29 = sld [smem:[#allocation6 + $0x7]] }
  0xed   : > { %s640_s30 = sadd.s32 32767, %s639_s27  ;;  %s649_s5 = sshrl.u32 %s6774_s8, 16 }
  0xee   : > { %s641_s13 = sadd.s32 %s5975_s14, %s640_s30  ;;  %p637_p2 = scmp.ne.f32.partialorder %s5975_s14, %s5975_s14 }
  0xef   : > { %s650_s9 = sand.u32 1, %s649_s5  ;;  %s642_s21 = sand.u32 4294901760, %s641_s13 }
  0xf0   : > { %10859 = sst [smem:[#allocation59_spill]] %s12053_s4  ;;  %s651_s23 = sadd.s32 32767, %s650_s9 }
  0xf1   : > { %s12055_s21 = smov (%p637_p2, %s642_s21), 2143289344  ;;  %s660_s10 = sshrl.u32 %s6781_s17, 16 }
  0xf2   : > { %10860 = sst [smem:[#allocation60_spill]] %s12055_s21  ;;  %s652_s15 = sadd.s32 %s6774_s8, %s651_s23 }
  0xf3   : > { %s6791_s2 = sld [smem:[#allocation6 + $0x8]]  ;;  %s661_s27 = sand.u32 1, %s660_s10 }
  0xf4   : > { %s662_s30 = sadd.s32 32767, %s661_s27  ;;  %s671_s22 = sshrl.u32 %s6784_s29, 16 }
  0xf5   : > { %p648_p4 = scmp.ne.f32.partialorder %s6774_s8, %s6774_s8  ;;  %s672_s14 = sand.u32 1, %s671_s22 }
  0xf6   : > { %s653_s5 = sand.u32 4294901760, %s652_s15  ;;  %s663_s13 = sadd.s32 %s6781_s17, %s662_s30 }
  0xf7   : > { %s673_s0 = sadd.s32 32767, %s672_s14  ;;  %p659_p6 = scmp.ne.f32.partialorder %s6781_s17, %s6781_s17 }
  0xf8   : > { %s12057_s5 = smov (%p648_p4, %s653_s5), 2143289344  ;;  %s664_s9 = sand.u32 4294901760, %s663_s13 }
  0xf9   : > { %10861 = sst [smem:[#allocation61_spill]] %s12057_s5  ;;  %s674_s21 = sadd.s32 %s6784_s29, %s673_s0 }
  0xfa   : > { %s682_s4 = sshrl.u32 %s6791_s2, 16  ;;  %s5980_s12 = sld [smem:[#allocation6 + $0x9]] }
  0xfb   : > { %p670_p10 = scmp.ne.f32.partialorder %s6784_s29, %s6784_s29  ;;  %s683_s23 = sand.u32 1, %s682_s4 }
  0xfc   : > { %s675_s10 = sand.u32 4294901760, %s674_s21  ;;  %s6806_s27 = sld [smem:[#allocation6 + $0xa]] }
  0xfd   : > { %s12059_s9 = smov (%p659_p6, %s664_s9), 2143289344  ;;  %s684_s8 = sadd.s32 32767, %s683_s23 }
  0xfe   : > { %10862 = sst [smem:[#allocation62_spill]] %s12059_s9  ;;  %s12061_s10 = smov (%p670_p10, %s675_s10), 2143289344 }
  0xff   : > { %10863 = sst [smem:[#allocation63_spill]] %s12061_s10  ;;  %s685_s0 = sadd.s32 %s6791_s2, %s684_s8 }
 0x100   : > { %s693_s22 = sshrl.u32 %s5980_s12, 16  ;;  %s6812_s17 = sld [smem:[#allocation6 + $0xb]] }
 0x101   : > { %s694_s15 = sand.u32 1, %s693_s22  ;;  %p681_p5 = scmp.ne.f32.partialorder %s6791_s2, %s6791_s2 }
 0x102   : > { %s695_s4 = sadd.s32 32767, %s694_s15  ;;  %s704_s21 = sshrl.u32 %s6806_s27, 16 }
 0x103   : > { %s696_s29 = sadd.s32 %s5980_s12, %s695_s4  ;;  %s686_s30 = sand.u32 4294901760, %s685_s0 }
 0x104   : > { %s5983_s14 = sld [smem:[#allocation6 + $0x84]]  ;;  %p692_p11 = scmp.ne.f32.partialorder %s5980_s12, %s5980_s12 }
 0x105   : > { %s705_s13 = sand.u32 1, %s704_s21  ;;  %s697_s23 = sand.u32 4294901760, %s696_s29 }
 0x106   : > { %s12063_s30 = smov (%p681_p5, %s686_s30), 2143289344  ;;  %s706_s10 = sadd.s32 32767, %s705_s13 }
 0x107   : > { %10864 = sst [smem:[#allocation64_spill]] %s12063_s30  ;;  %s715_s9 = sshrl.u32 %s6812_s17, 16 }
 0x108   : > { %s12065_s23 = smov (%p692_p11, %s697_s23), 2143289344  ;;  %p703_p3 = scmp.ne.f32.partialorder %s6806_s27, %s6806_s27 }
 0x109   : > { %10865 = sst [smem:[#allocation65_spill]] %s12065_s23  ;;  %s716_s2 = sand.u32 1, %s715_s9 }
 0x10a   : > { %s707_s8 = sadd.s32 %s6806_s27, %s706_s10  ;;  %s717_s22 = sadd.s32 32767, %s716_s2 }
 0x10b   : > { %p714_p7 = scmp.ne.f32.partialorder %s6812_s17, %s6812_s17  ;;  %s726_s0 = sshrl.u32 %s5983_s14, 16 }
 0x10c   : > { %s718_s15 = sadd.s32 %s6812_s17, %s717_s22  ;;  %s727_s12 = sand.u32 1, %s726_s0 }
 0x10d   : > { %s708_s4 = sand.u32 4294901760, %s707_s8  ;;  %p725_p12 = scmp.ne.f32.partialorder %s5983_s14, %s5983_s14 }
 0x10e   : > { %s728_s29 = sadd.s32 32767, %s727_s12  ;;  %s5984_s21 = sld [smem:[#allocation6 + $0x85]] }
 0x10f   : > { %s719_s13 = sand.u32 4294901760, %s718_s15  ;;  %s729_s30 = sadd.s32 %s5983_s14, %s728_s29 }
 0x110   : > { %s730_s5 = sand.u32 4294901760, %s729_s30  ;;  %s5985_s23 = sld [smem:[#allocation6 + $0x86]] }
 0x111   : > { %s12067_s4 = smov (%p703_p3, %s708_s4), 2143289344  ;;  %s12069_s13 = smov (%p714_p7, %s719_s13), 2143289344 }
 0x112   : > { %10866 = sst [smem:[#allocation66_spill]] %s12067_s4  ;;  %s12071_s5 = smov (%p725_p12, %s730_s5), 2143289344 }
 0x113   : > { %10867 = sst [smem:[#allocation67_spill]] %s12069_s13 }
 0x114   : > { %10868 = sst [smem:[#allocation68_spill]] %s12071_s5  ;;  %s737_s9 = sshrl.u32 %s5984_s21, 16 }
 0x115   : > { %s5986_s10 = sld [smem:[#allocation6 + $0x87]]  ;;  %s738_s2 = sand.u32 1, %s737_s9 }
 0x116   : > { %s739_s17 = sadd.s32 32767, %s738_s2  ;;  %s748_s8 = sshrl.u32 %s5985_s23, 16 }
 0x117   : > { %s740_s22 = sadd.s32 %s5984_s21, %s739_s17  ;;  %s749_s0 = sand.u32 1, %s748_s8 }
 0x118   : > { %s6838_s12 = sld [smem:[#allocation6 + $0x88]]  ;;  %p736_p0 = scmp.ne.f32.partialorder %s5984_s21, %s5984_s21 }
 0x119   : > { %s741_s30 = sand.u32 4294901760, %s740_s22  ;;  %s750_s14 = sadd.s32 32767, %s749_s0 }
 0x11a   : > { %p747_p1 = scmp.ne.f32.partialorder %s5985_s23, %s5985_s23  ;;  %s6840_s27 = sld [smem:[#allocation6 + $0x89]] }
 0x11b   : > { %s751_s15 = sadd.s32 %s5985_s23, %s750_s14  ;;  %s759_s29 = sshrl.u32 %s5986_s10, 16 }
 0x11c   : > { %s12073_s30 = smov (%p736_p0, %s741_s30), 2143289344  ;;  %p758_p2 = scmp.ne.f32.partialorder %s5986_s10, %s5986_s10 }
 0x11d   : > { %10869 = sst [smem:[#allocation69_spill]] %s12073_s30  ;;  %s760_s9 = sand.u32 1, %s759_s29 }
 0x11e   : > { %s752_s2 = sand.u32 4294901760, %s751_s15  ;;  %s761_s17 = sadd.s32 32767, %s760_s9 }
 0x11f   : > { %s762_s8 = sadd.s32 %s5986_s10, %s761_s17  ;;  %s770_s21 = sshrl.u32 %s6838_s12, 16 }
 0x120   : > { %s763_s22 = sand.u32 4294901760, %s762_s8  ;;  %s771_s0 = sand.u32 1, %s770_s21 }
 0x121   : > { %s12075_s2 = smov (%p747_p1, %s752_s2), 2143289344  ;;  %s772_s5 = sadd.s32 32767, %s771_s0 }
 0x122   : > { %10870 = sst [smem:[#allocation70_spill]] %s12075_s2  ;;  %s12077_s22 = smov (%p758_p2, %s763_s22), 2143289344 }
 0x123   : > { %10871 = sst [smem:[#allocation71_spill]] %s12077_s22  ;;  %s781_s23 = sshrl.u32 %s6840_s27, 16 }
 0x124   : > { %s773_s14 = sadd.s32 %s6838_s12, %s772_s5  ;;  %s782_s13 = sand.u32 1, %s781_s23 }
 0x125   : > { %s5989_s30 = sld [smem:[#allocation6 + $0x8a]]  ;;  %s783_s4 = sadd.s32 32767, %s782_s13 }
 0x126   : > { %p769_p4 = scmp.ne.f32.partialorder %s6838_s12, %s6838_s12  ;;  %s6853_s15 = sld [smem:[#allocation6 + $0x8b]] }
 0x127   : > { %s774_s10 = sand.u32 4294901760, %s773_s14  ;;  %s784_s29 = sadd.s32 %s6840_s27, %s783_s4 }
 0x128   : > { %p780_p6 = scmp.ne.f32.partialorder %s6840_s27, %s6840_s27  ;;  %s12079_s10 = smov (%p769_p4, %s774_s10), 2143289344 }
 0x129   : > { %10872 = sst [smem:[#allocation72_spill]] %s12079_s10  ;;  %s785_s9 = sand.u32 4294901760, %s784_s29 }
 0x12a   : > { %s6860_s21 = sld [smem:[#allocation6 + $0x104]]  ;;  %s12081_s9 = smov (%p780_p6, %s785_s9), 2143289344 }
 0x12b   : > { %s792_s17 = sshrl.u32 %s5989_s30, 16  ;;  %s6863_s0 = sld [smem:[#allocation6 + $0x105]] }
 0x12c   : > { %s793_s8 = sand.u32 1, %s792_s17  ;;  %s803_s13 = sshrl.u32 %s6853_s15, 16 }
 0x12d   : > { %s794_s5 = sadd.s32 32767, %s793_s8  ;;  %p791_p10 = scmp.ne.f32.partialorder %s5989_s30, %s5989_s30 }
 0x12e   : > { %s795_s12 = sadd.s32 %s5989_s30, %s794_s5  ;;  %s804_s4 = sand.u32 1, %s803_s13 }
 0x12f   : > { %s796_s27 = sand.u32 4294901760, %s795_s12  ;;  %10873 = sst [smem:[#allocation73_spill]] %s12081_s9 }
 0x130   : > { %s805_s23 = sadd.s32 32767, %s804_s4  ;;  %s12083_s27 = smov (%p791_p10, %s796_s27), 2143289344 }
 0x131   : > { %10874 = sst [smem:[#allocation74_spill]] %s12083_s27  ;;  %s814_s14 = sshrl.u32 %s6860_s21, 16 }
 0x132   : > { %s6870_s29 = sld [smem:[#allocation6 + $0x106]]  ;;  %s806_s17 = sadd.s32 %s6853_s15, %s805_s23 }
 0x133   : > { %s815_s8 = sand.u32 1, %s814_s14  ;;  %s825_s10 = sshrl.u32 %s6863_s0, 16 }
 0x134   : > { %s816_s5 = sadd.s32 32767, %s815_s8  ;;  %p802_p5 = scmp.ne.f32.partialorder %s6853_s15, %s6853_s15 }
 0x135   : > { %s826_s30 = sand.u32 1, %s825_s10  ;;  %s807_s13 = sand.u32 4294901760, %s806_s17 }
 0x136   : > { %s817_s12 = sadd.s32 %s6860_s21, %s816_s5  ;;  %s827_s22 = sadd.s32 32767, %s826_s30 }
 0x137   : > { %p813_p11 = scmp.ne.f32.partialorder %s6860_s21, %s6860_s21  ;;  %s12085_s13 = smov (%p802_p5, %s807_s13), 2143289344 }
 0x138   : > { %10875 = sst [smem:[#allocation75_spill]] %s12085_s13  ;;  %s818_s4 = sand.u32 4294901760, %s817_s12 }
 0x139   : > { %s828_s27 = sadd.s32 %s6863_s0, %s827_s22  ;;  %s836_s9 = sshrl.u32 %s6870_s29, 16 }
 0x13a   : > { %s5994_s2 = sld [smem:[#allocation6 + $0x107]]  ;;  %p824_p3 = scmp.ne.f32.partialorder %s6863_s0, %s6863_s0 }
 0x13b   : > { %s837_s23 = sand.u32 1, %s836_s9  ;;  %s829_s14 = sand.u32 4294901760, %s828_s27 }
 0x13c   : > { %s6885_s8 = sld [smem:[#allocation6 + $0x108]]  ;;  %s12087_s4 = smov (%p813_p11, %s818_s4), 2143289344 }
 0x13d   : > { %10876 = sst [smem:[#allocation76_spill]] %s12087_s4  ;;  %s838_s15 = sadd.s32 32767, %s837_s23 }
 0x13e   : > { %s12089_s14 = smov (%p824_p3, %s829_s14), 2143289344  ;;  %s6891_s21 = sld [smem:[#allocation6 + $0x109]] }
 0x13f   : > { %10877 = sst [smem:[#allocation77_spill]] %s12089_s14  ;;  %s839_s22 = sadd.s32 %s6870_s29, %s838_s15 }
 0x140   : > { %s847_s10 = sshrl.u32 %s5994_s2, 16  ;;  %p835_p7 = scmp.ne.f32.partialorder %s6870_s29, %s6870_s29 }
 0x141   : > { %s848_s17 = sand.u32 1, %s847_s10  ;;  %s840_s5 = sand.u32 4294901760, %s839_s22 }
 0x142   : > { %s849_s9 = sadd.s32 32767, %s848_s17  ;;  %s858_s27 = sshrl.u32 %s6885_s8, 16 }
 0x143   : > { %s850_s0 = sadd.s32 %s5994_s2, %s849_s9  ;;  %s5997_s30 = sld [smem:[#allocation6 + $0x10a]] }
 0x144   : > { %p846_p12 = scmp.ne.f32.partialorder %s5994_s2, %s5994_s2  ;;  %s859_s12 = sand.u32 1, %s858_s27 }
 0x145   : > { %s851_s23 = sand.u32 4294901760, %s850_s0  ;;  %s12091_s5 = smov (%p835_p7, %s840_s5), 2143289344 }
 0x146   : > { %10878 = sst [smem:[#allocation78_spill]] %s12091_s5  ;;  %s860_s14 = sadd.s32 32767, %s859_s12 }
 0x147   : > { %s869_s4 = sshrl.u32 %s6891_s21, 16  ;;  %s12093_s23 = smov (%p846_p12, %s851_s23), 2143289344 }
 0x148   : > { %10879 = sst [smem:[#allocation79_spill]] %s12093_s23  ;;  %p857_p0 = scmp.ne.f32.partialorder %s6885_s8, %s6885_s8 }
 0x149   : > { %s870_s29 = sand.u32 1, %s869_s4  ;;  %s861_s15 = sadd.s32 %s6885_s8, %s860_s14 }
 0x14a   : > { %s871_s10 = sadd.s32 32767, %s870_s29  ;;  %p868_p1 = scmp.ne.f32.partialorder %s6891_s21, %s6891_s21 }
 0x14b   : > { %s880_s22 = sshrl.u32 %s5997_s30, 16  ;;  %s872_s17 = sadd.s32 %s6891_s21, %s871_s10 }
 0x14c   : > { %s881_s2 = sand.u32 1, %s880_s22  ;;  %s862_s9 = sand.u32 4294901760, %s861_s15 }
 0x14d   : > { %p879_p2 = scmp.ne.f32.partialorder %s5997_s30, %s5997_s30  ;;  %s882_s0 = sadd.s32 32767, %s881_s2 }
 0x14e   : > { %s5998_s27 = sld [smem:[#allocation6 + $0x10b]]  ;;  %s873_s12 = sand.u32 4294901760, %s872_s17 }
 0x14f   : > { %s883_s5 = sadd.s32 %s5997_s30, %s882_s0  ;;  %s5999_s23 = sld [smem:[#allocation6 + $0x184]] }
 0x150   : > { %s884_s13 = sand.u32 4294901760, %s883_s5  ;;  %s12095_s9 = smov (%p857_p0, %s862_s9), 2143289344 }
 0x151   : > { %10880 = sst [smem:[#allocation80_spill]] %s12095_s9  ;;  %s12097_s12 = smov (%p868_p1, %s873_s12), 2143289344 }
 0x152   : > { %10881 = sst [smem:[#allocation81_spill]] %s12097_s12  ;;  %s12099_s13 = smov (%p879_p2, %s884_s13), 2143289344 }
 0x153   : > { %10882 = sst [smem:[#allocation82_spill]] %s12099_s13 }
 0x154   : > { %s891_s4 = sshrl.u32 %s5998_s27, 16  ;;  %s6000_s14 = sld [smem:[#allocation6 + $0x185]] }
 0x155   : > { %s892_s29 = sand.u32 1, %s891_s4  ;;  %s902_s15 = sshrl.u32 %s5999_s23, 16 }
 0x156   : > { %s893_s21 = sadd.s32 32767, %s892_s29  ;;  %s903_s22 = sand.u32 1, %s902_s15 }
 0x157   : > { %s894_s10 = sadd.s32 %s5998_s27, %s893_s21  ;;  %s6917_s2 = sld [smem:[#allocation6 + $0x186]] }
 0x158   : > { %p890_p4 = scmp.ne.f32.partialorder %s5998_s27, %s5998_s27  ;;  %s895_s5 = sand.u32 4294901760, %s894_s10 }
 0x159   : > { %s904_s30 = sadd.s32 32767, %s903_s22  ;;  %p901_p6 = scmp.ne.f32.partialorder %s5999_s23, %s5999_s23 }
 0x15a   : > { %s6919_s8 = sld [smem:[#allocation6 + $0x187]]  ;;  %s905_s17 = sadd.s32 %s5999_s23, %s904_s30 }
 0x15b   : > { %s913_s0 = sshrl.u32 %s6000_s14, 16  ;;  %s12101_s5 = smov (%p890_p4, %s895_s5), 2143289344 }
 0x15c   : > { %10883 = sst [smem:[#allocation83_spill]] %s12101_s5  ;;  %p912_p10 = scmp.ne.f32.partialorder %s6000_s14, %s6000_s14 }
 0x15d   : > { %s914_s4 = sand.u32 1, %s913_s0  ;;  %s906_s29 = sand.u32 4294901760, %s905_s17 }
 0x15e   : > { %s915_s21 = sadd.s32 32767, %s914_s4  ;;  %s924_s27 = sshrl.u32 %s6917_s2, 16 }
 0x15f   : > { %s916_s15 = sadd.s32 %s6000_s14, %s915_s21  ;;  %s925_s22 = sand.u32 1, %s924_s27 }
 0x160   : > { %s917_s10 = sand.u32 4294901760, %s916_s15  ;;  %s12103_s29 = smov (%p901_p6, %s906_s29), 2143289344 }
 0x161   : > { %10884 = sst [smem:[#allocation84_spill]] %s12103_s29  ;;  %s926_s13 = sadd.s32 32767, %s925_s22 }
 0x162   : > { %s12105_s10 = smov (%p912_p10, %s917_s10), 2143289344  ;;  %s935_s23 = sshrl.u32 %s6919_s8, 16 }
 0x163   : > { %10885 = sst [smem:[#allocation85_spill]] %s12105_s10  ;;  %s927_s30 = sadd.s32 %s6917_s2, %s926_s13 }
 0x164   : > { %s936_s12 = sand.u32 1, %s935_s23  ;;  %s6003_s5 = sld [smem:[#allocation6 + $0x188]] }
 0x165   : > { %s937_s9 = sadd.s32 32767, %s936_s12  ;;  %p923_p5 = scmp.ne.f32.partialorder %s6917_s2, %s6917_s2 }
 0x166   : > { %s6932_s17 = sld [smem:[#allocation6 + $0x189]]  ;;  %s928_s14 = sand.u32 4294901760, %s927_s30 }
 0x167   : > { %s938_s0 = sadd.s32 %s6919_s8, %s937_s9  ;;  %p934_p11 = scmp.ne.f32.partialorder %s6919_s8, %s6919_s8 }
 0x168   : > { %s12107_s14 = smov (%p923_p5, %s928_s14), 2143289344  ;;  %s939_s4 = sand.u32 4294901760, %s938_s0 }
 0x169   : > { %10886 = sst [smem:[#allocation86_spill]] %s12107_s14  ;;  %s12109_s4 = smov (%p934_p11, %s939_s4), 2143289344 }
 0x16a   : > { %s946_s21 = sshrl.u32 %s6003_s5, 16  ;;  %s6939_s27 = sld [smem:[#allocation6 + $0x18a]] }
 0x16b   : > { %s947_s15 = sand.u32 1, %s946_s21  ;;  %s6942_s22 = sld [smem:[#allocation6 + $0x18b]] }
 0x16c   : > { %s948_s13 = sadd.s32 32767, %s947_s15  ;;  %s957_s12 = sshrl.u32 %s6932_s17, 16 }
 0x16d   : > { %s949_s2 = sadd.s32 %s6003_s5, %s948_s13  ;;  %p945_p3 = scmp.ne.f32.partialorder %s6003_s5, %s6003_s5 }
 0x16e   : > { %s958_s9 = sand.u32 1, %s957_s12  ;;  %s950_s8 = sand.u32 4294901760, %s949_s2 }
 0x16f   : > { %10887 = sst [smem:[#allocation87_spill]] %s12109_s4  ;;  %s959_s23 = sadd.s32 32767, %s958_s9 }
 0x170   : > { %s12111_s8 = smov (%p945_p3, %s950_s8), 2143289344  ;;  %s968_s30 = sshrl.u32 %s6939_s27, 16 }
 0x171   : > { %10888 = sst [smem:[#allocation88_spill]] %s12111_s8  ;;  %s960_s21 = sadd.s32 %s6932_s17, %s959_s23 }
 0x172   : > { %s6949_s0 = sld [smem:[#allocation6 + $0x204]]  ;;  %s969_s15 = sand.u32 1, %s968_s30 }
 0x173   : > { %s970_s13 = sadd.s32 32767, %s969_s15  ;;  %s979_s14 = sshrl.u32 %s6942_s22, 16 }
 0x174   : > { %p956_p7 = scmp.ne.f32.partialorder %s6932_s17, %s6932_s17  ;;  %s980_s5 = sand.u32 1, %s979_s14 }
 0x175   : > { %s961_s12 = sand.u32 4294901760, %s960_s21  ;;  %s971_s2 = sadd.s32 %s6939_s27, %s970_s13 }
 0x176   : > { %s981_s10 = sadd.s32 32767, %s980_s5  ;;  %p967_p12 = scmp.ne.f32.partialorder %s6939_s27, %s6939_s27 }
 0x177   : > { %s12113_s12 = smov (%p956_p7, %s961_s12), 2143289344  ;;  %s972_s9 = sand.u32 4294901760, %s971_s2 }
 0x178   : > { %10889 = sst [smem:[#allocation89_spill]] %s12113_s12  ;;  %s982_s8 = sadd.s32 %s6942_s22, %s981_s10 }
 0x179   : > { %s990_s4 = sshrl.u32 %s6949_s0, 16  ;;  %s6008_s29 = sld [smem:[#allocation6 + $0x205]] }
 0x17a   : > { %p978_p0 = scmp.ne.f32.partialorder %s6942_s22, %s6942_s22  ;;  %s991_s23 = sand.u32 1, %s990_s4 }
 0x17b   : > { %s983_s30 = sand.u32 4294901760, %s982_s8  ;;  %s6964_s15 = sld [smem:[#allocation6 + $0x206]] }
 0x17c   : > { %s12115_s9 = smov (%p967_p12, %s972_s9), 2143289344  ;;  %s992_s17 = sadd.s32 32767, %s991_s23 }
 0x17d   : > { %10890 = sst [smem:[#allocation90_spill]] %s12115_s9  ;;  %s12117_s30 = smov (%p978_p0, %s983_s30), 2143289344 }
 0x17e   : > { %10891 = sst [smem:[#allocation91_spill]] %s12117_s30  ;;  %s993_s10 = sadd.s32 %s6949_s0, %s992_s17 }
 0x17f   : > { %s1001_s14 = sshrl.u32 %s6008_s29, 16  ;;  %s6970_s27 = sld [smem:[#allocation6 + $0x207]] }
 0x180   : > { %s1002_s21 = sand.u32 1, %s1001_s14  ;;  %p989_p1 = scmp.ne.f32.partialorder %s6949_s0, %s6949_s0 }
 0x181   : > { %s1003_s4 = sadd.s32 32767, %s1002_s21  ;;  %s1012_s8 = sshrl.u32 %s6964_s15, 16 }
 0x182   : > { %s1004_s22 = sadd.s32 %s6008_s29, %s1003_s4  ;;  %s994_s13 = sand.u32 4294901760, %s993_s10 }
 0x183   : > { %s6011_s5 = sld [smem:[#allocation6 + $0x208]]  ;;  %p1000_p2 = scmp.ne.f32.partialorder %s6008_s29, %s6008_s29 }
 0x184   : > { %s1013_s2 = sand.u32 1, %s1012_s8  ;;  %s1005_s23 = sand.u32 4294901760, %s1004_s22 }
 0x185   : > { %s12119_s13 = smov (%p989_p1, %s994_s13), 2143289344  ;;  %s1014_s30 = sadd.s32 32767, %s1013_s2 }
 0x186   : > { %10892 = sst [smem:[#allocation92_spill]] %s12119_s13  ;;  %s1023_s9 = sshrl.u32 %s6970_s27, 16 }
 0x187   : > { %s12121_s23 = smov (%p1000_p2, %s1005_s23), 2143289344  ;;  %p1011_p4 = scmp.ne.f32.partialorder %s6964_s15, %s6964_s15 }
 0x188   : > { %10893 = sst [smem:[#allocation93_spill]] %s12121_s23  ;;  %s1024_s0 = sand.u32 1, %s1023_s9 }
 0x189   : > { %s1015_s17 = sadd.s32 %s6964_s15, %s1014_s30  ;;  %s1025_s14 = sadd.s32 32767, %s1024_s0 }
 0x18a   : > { %p1022_p6 = scmp.ne.f32.partialorder %s6970_s27, %s6970_s27  ;;  %s1034_s10 = sshrl.u32 %s6011_s5, 16 }
 0x18b   : > { %s1026_s21 = sadd.s32 %s6970_s27, %s1025_s14  ;;  %s1035_s29 = sand.u32 1, %s1034_s10 }
 0x18c   : > { %s1016_s4 = sand.u32 4294901760, %s1015_s17  ;;  %p1033_p10 = scmp.ne.f32.partialorder %s6011_s5, %s6011_s5 }
 0x18d   : > { %s1036_s22 = sadd.s32 32767, %s1035_s29  ;;  %s6012_s8 = sld [smem:[#allocation6 + $0x209]] }
 0x18e   : > { %s1027_s2 = sand.u32 4294901760, %s1026_s21  ;;  %s1037_s13 = sadd.s32 %s6011_s5, %s1036_s22 }
 0x18f   : > { %s1038_s12 = sand.u32 4294901760, %s1037_s13  ;;  %s6013_s23 = sld [smem:[#allocation6 + $0x20a]] }
 0x190   : > { %s12123_s4 = smov (%p1011_p4, %s1016_s4), 2143289344  ;;  %s12125_s2 = smov (%p1022_p6, %s1027_s2), 2143289344 }
 0x191   : > { %10894 = sst [smem:[#allocation94_spill]] %s12123_s4  ;;  %s12127_s12 = smov (%p1033_p10, %s1038_s12), 2143289344 }
 0x192   : > { %10895 = sst [smem:[#allocation95_spill]] %s12125_s2 }
 0x193   : > { %10896 = sst [smem:[#allocation96_spill]] %s12127_s12  ;;  %s1045_s9 = sshrl.u32 %s6012_s8, 16 }
 0x194   : > { %s6014_s30 = sld [smem:[#allocation6 + $0x20b]]  ;;  %s1046_s0 = sand.u32 1, %s1045_s9 }
 0x195   : > { %s1047_s27 = sadd.s32 32767, %s1046_s0  ;;  %s1056_s17 = sshrl.u32 %s6013_s23, 16 }
 0x196   : > { %s1048_s14 = sadd.s32 %s6012_s8, %s1047_s27  ;;  %s1057_s10 = sand.u32 1, %s1056_s17 }
 0x197   : > { %s6996_s29 = sld [smem:[#allocation6 + $0x284]]  ;;  %p1044_p5 = scmp.ne.f32.partialorder %s6012_s8, %s6012_s8 }
 0x198   : > { %s1049_s13 = sand.u32 4294901760, %s1048_s14  ;;  %s1058_s5 = sadd.s32 32767, %s1057_s10 }
 0x199   : > { %p1055_p11 = scmp.ne.f32.partialorder %s6013_s23, %s6013_s23  ;;  %s6998_s15 = sld [smem:[#allocation6 + $0x285]] }
 0x19a   : > { %s1059_s21 = sadd.s32 %s6013_s23, %s1058_s5  ;;  %s1067_s22 = sshrl.u32 %s6014_s30, 16 }
 0x19b   : > { %s12129_s13 = smov (%p1044_p5, %s1049_s13), 2143289344  ;;  %p1066_p3 = scmp.ne.f32.partialorder %s6014_s30, %s6014_s30 }
 0x19c   : > { %10897 = sst [smem:[#allocation97_spill]] %s12129_s13  ;;  %s1068_s9 = sand.u32 1, %s1067_s22 }
 0x19d   : > { %s1060_s0 = sand.u32 4294901760, %s1059_s21  ;;  %s1069_s27 = sadd.s32 32767, %s1068_s9 }
 0x19e   : > { %s1070_s17 = sadd.s32 %s6014_s30, %s1069_s27  ;;  %s1078_s8 = sshrl.u32 %s6996_s29, 16 }
 0x19f   : > { %s1071_s14 = sand.u32 4294901760, %s1070_s17  ;;  %s1079_s10 = sand.u32 1, %s1078_s8 }
 0x1a0   : > { %s12131_s0 = smov (%p1055_p11, %s1060_s0), 2143289344  ;;  %s1080_s12 = sadd.s32 32767, %s1079_s10 }
 0x1a1   : > { %10898 = sst [smem:[#allocation98_spill]] %s12131_s0  ;;  %s12133_s14 = smov (%p1066_p3, %s1071_s14), 2143289344 }
 0x1a2   : > { %10899 = sst [smem:[#allocation99_spill]] %s12133_s14  ;;  %s1089_s23 = sshrl.u32 %s6998_s15, 16 }
 0x1a3   : > { %s1081_s5 = sadd.s32 %s6996_s29, %s1080_s12  ;;  %s1090_s2 = sand.u32 1, %s1089_s23 }
 0x1a4   : > { %s6017_s13 = sld [smem:[#allocation6 + $0x286]]  ;;  %s1091_s4 = sadd.s32 32767, %s1090_s2 }
 0x1a5   : > { %p1077_p7 = scmp.ne.f32.partialorder %s6996_s29, %s6996_s29  ;;  %s7011_s21 = sld [smem:[#allocation6 + $0x287]] }
 0x1a6   : > { %s1082_s30 = sand.u32 4294901760, %s1081_s5  ;;  %s1092_s22 = sadd.s32 %s6998_s15, %s1091_s4 }
 0x1a7   : > { %p1088_p12 = scmp.ne.f32.partialorder %s6998_s15, %s6998_s15  ;;  %s12135_s30 = smov (%p1077_p7, %s1082_s30), 2143289344 }
 0x1a8   : > { %10900 = sst [smem:[#allocation100_spill]] %s12135_s30  ;;  %s1093_s9 = sand.u32 4294901760, %s1092_s22 }
 0x1a9   : > { %s7018_s8 = sld [smem:[#allocation6 + $0x288]]  ;;  %s12137_s9 = smov (%p1088_p12, %s1093_s9), 2143289344 }
 0x1aa   : > { %s1100_s27 = sshrl.u32 %s6017_s13, 16  ;;  %s7021_s10 = sld [smem:[#allocation6 + $0x289]] }
 0x1ab   : > { %s1101_s17 = sand.u32 1, %s1100_s27  ;;  %s1111_s2 = sshrl.u32 %s7011_s21, 16 }
 0x1ac   : > { %s1102_s12 = sadd.s32 32767, %s1101_s17  ;;  %p1099_p0 = scmp.ne.f32.partialorder %s6017_s13, %s6017_s13 }
 0x1ad   : > { %s1103_s29 = sadd.s32 %s6017_s13, %s1102_s12  ;;  %s1112_s4 = sand.u32 1, %s1111_s2 }
 0x1ae   : > { %s1104_s15 = sand.u32 4294901760, %s1103_s29  ;;  %10901 = sst [smem:[#allocation101_spill]] %s12137_s9 }
 0x1af   : > { %s1113_s23 = sadd.s32 32767, %s1112_s4  ;;  %s12139_s15 = smov (%p1099_p0, %s1104_s15), 2143289344 }
 0x1b0   : > { %10902 = sst [smem:[#allocation102_spill]] %s12139_s15  ;;  %s1122_s5 = sshrl.u32 %s7018_s8, 16 }
 0x1b1   : > { %s7028_s22 = sld [smem:[#allocation6 + $0x28a]]  ;;  %s1114_s27 = sadd.s32 %s7011_s21, %s1113_s23 }
 0x1b2   : > { %s1123_s17 = sand.u32 1, %s1122_s5  ;;  %s1133_s30 = sshrl.u32 %s7021_s10, 16 }
 0x1b3   : > { %s1124_s12 = sadd.s32 32767, %s1123_s17  ;;  %p1110_p1 = scmp.ne.f32.partialorder %s7011_s21, %s7011_s21 }
 0x1b4   : > { %s1134_s13 = sand.u32 1, %s1133_s30  ;;  %s1115_s2 = sand.u32 4294901760, %s1114_s27 }
 0x1b5   : > { %s1125_s29 = sadd.s32 %s7018_s8, %s1124_s12  ;;  %s1135_s9 = sadd.s32 32767, %s1134_s13 }
 0x1b6   : > { %p1121_p2 = scmp.ne.f32.partialorder %s7018_s8, %s7018_s8  ;;  %s12141_s2 = smov (%p1110_p1, %s1115_s2), 2143289344 }
 0x1b7   : > { %10903 = sst [smem:[#allocation103_spill]] %s12141_s2  ;;  %s1126_s4 = sand.u32 4294901760, %s1125_s29 }
 0x1b8   : > { %s1136_s15 = sadd.s32 %s7021_s10, %s1135_s9  ;;  %s1144_s14 = sshrl.u32 %s7028_s22, 16 }
 0x1b9   : > { %s6022_s0 = sld [smem:[#allocation6 + $0x28b]]  ;;  %p1132_p4 = scmp.ne.f32.partialorder %s7021_s10, %s7021_s10 }
 0x1ba   : > { %s1145_s23 = sand.u32 1, %s1144_s14  ;;  %s1137_s5 = sand.u32 4294901760, %s1136_s15 }
 0x1bb   : > { %s6023_s17 = sld [smem:[#allocation6 + $0x304]]  ;;  %s12143_s4 = smov (%p1121_p2, %s1126_s4), 2143289344 }
 0x1bc   : > { %10904 = sst [smem:[#allocation104_spill]] %s12143_s4  ;;  %s1146_s21 = sadd.s32 32767, %s1145_s23 }
 0x1bd   : > { %s12145_s5 = smov (%p1132_p4, %s1137_s5), 2143289344  ;;  %s1147_s27 = sadd.s32 %s7028_s22, %s1146_s21 }
 0x1be   : > { %10905 = sst [smem:[#allocation105_spill]] %s12145_s5  ;;  %p1143_p6 = scmp.ne.f32.partialorder %s7028_s22, %s7028_s22 }
 0x1bf   : > { %s1155_s30 = sshrl.u32 %s6022_s0, 16  ;;  %s7050_s12 = sld [smem:[#allocation6 + $0x305]] }
 0x1c0   : > { %s1156_s8 = sand.u32 1, %s1155_s30  ;;  %s1148_s29 = sand.u32 4294901760, %s1147_s27 }
 0x1c1   : > { %s1157_s9 = sadd.s32 32767, %s1156_s8  ;;  %s1166_s13 = sshrl.u32 %s6023_s17, 16 }
 0x1c2   : > { %s1167_s10 = sand.u32 1, %s1166_s13  ;;  %s1158_s14 = sadd.s32 %s6022_s0, %s1157_s9 }
 0x1c3   : > { %s7052_s15 = sld [smem:[#allocation6 + $0x306]]  ;;  %s12147_s29 = smov (%p1143_p6, %s1148_s29), 2143289344 }
 0x1c4   : > { %10906 = sst [smem:[#allocation106_spill]] %s12147_s29  ;;  %p1154_p10 = scmp.ne.f32.partialorder %s6022_s0, %s6022_s0 }
 0x1c5   : > { %s1168_s23 = sadd.s32 32767, %s1167_s10  ;;  %s1159_s21 = sand.u32 4294901760, %s1158_s14 }
 0x1c6   : > { %s1177_s30 = sshrl.u32 %s7050_s12, 16  ;;  %s1169_s22 = sadd.s32 %s6023_s17, %s1168_s23 }
 0x1c7   : > { %s12149_s21 = smov (%p1154_p10, %s1159_s21), 2143289344  ;;  %p1165_p5 = scmp.ne.f32.partialorder %s6023_s17, %s6023_s17 }
 0x1c8   : > { %10907 = sst [smem:[#allocation107_spill]] %s12149_s21  ;;  %s1178_s27 = sand.u32 1, %s1177_s30 }
 0x1c9   : > { %s1170_s8 = sand.u32 4294901760, %s1169_s22  ;;  %s1188_s9 = sshrl.u32 %s7052_s15, 16 }
 0x1ca   : > { %s6026_s13 = sld [smem:[#allocation6 + $0x307]]  ;;  %s1179_s5 = sadd.s32 32767, %s1178_s27 }
 0x1cb   : > { %s12151_s8 = smov (%p1165_p5, %s1170_s8), 2143289344  ;;  %s1189_s4 = sand.u32 1, %s1188_s9 }
 0x1cc   : > { %10908 = sst [smem:[#allocation108_spill]] %s12151_s8  ;;  %s1180_s29 = sadd.s32 %s7050_s12, %s1179_s5 }
 0x1cd   : > { %s7063_s0 = sld [smem:[#allocation6 + $0x308]]  ;;  %p1176_p11 = scmp.ne.f32.partialorder %s7050_s12, %s7050_s12 }
 0x1ce   : > { %s1190_s10 = sadd.s32 32767, %s1189_s4  ;;  %s1181_s14 = sand.u32 4294901760, %s1180_s29 }
 0x1cf   : > { %s1191_s21 = sadd.s32 %s7052_s15, %s1190_s10  ;;  %s12153_s14 = smov (%p1176_p11, %s1181_s14), 2143289344 }
 0x1d0   : > { %s1199_s23 = sshrl.u32 %s6026_s13, 16  ;;  %10909 = sst [smem:[#allocation109_spill]] %s12153_s14 }
 0x1d1   : > { %p1187_p3 = scmp.ne.f32.partialorder %s7052_s15, %s7052_s15  ;;  %s1200_s17 = sand.u32 1, %s1199_s23 }
 0x1d2   : > { %s1192_s30 = sand.u32 4294901760, %s1191_s21  ;;  %s6028_s27 = sld [smem:[#allocation6 + $0x309]] }
 0x1d3   : > { %s1210_s22 = sshrl.u32 %s7063_s0, 16  ;;  %s1201_s5 = sadd.s32 32767, %s1200_s17 }
 0x1d4   : > { %s12155_s30 = smov (%p1187_p3, %s1192_s30), 2143289344  ;;  %s1211_s9 = sand.u32 1, %s1210_s22 }
 0x1d5   : > { %10910 = sst [smem:[#allocation110_spill]] %s12155_s30  ;;  %s1202_s8 = sadd.s32 %s6026_s13, %s1201_s5 }
 0x1d6   : > { %s7075_s12 = sld [smem:[#allocation6 + $0x30a]]  ;;  %p1198_p7 = scmp.ne.f32.partialorder %s6026_s13, %s6026_s13 }
 0x1d7   : > { %s1212_s4 = sadd.s32 32767, %s1211_s9  ;;  %s1203_s29 = sand.u32 4294901760, %s1202_s8 }
 0x1d8   : > { %s1221_s10 = sshrl.u32 %s6028_s27, 16  ;;  %s1213_s14 = sadd.s32 %s7063_s0, %s1212_s4 }
 0x1d9   : > { %s7078_s2 = sld [smem:[#allocation6 + $0x30b]]  ;;  %s12157_s29 = smov (%p1198_p7, %s1203_s29), 2143289344 }
 0x1da   : > { %10911 = sst [smem:[#allocation111_spill]] %s12157_s29  ;;  %p1209_p12 = scmp.ne.f32.partialorder %s7063_s0, %s7063_s0 }
 0x1db   : > { %s1222_s15 = sand.u32 1, %s1221_s10  ;;  %s1214_s21 = sand.u32 4294901760, %s1213_s14 }
 0x1dc   : > { %s1232_s23 = sshrl.u32 %s7075_s12, 16  ;;  %s1223_s17 = sadd.s32 32767, %s1222_s15 }
 0x1dd   : > { %s12159_s21 = smov (%p1209_p12, %s1214_s21), 2143289344  ;;  %s1233_s13 = sand.u32 1, %s1232_s23 }
 0x1de   : > { %10912 = sst [smem:[#allocation112_spill]] %s12159_s21  ;;  %s1224_s8 = sadd.s32 %s6028_s27, %s1223_s17 }
 0x1df   : > { %s1243_s22 = sshrl.u32 %s7078_s2, 16  ;;  %s6031_s5 = sld [smem:[#allocation6 + $0x384]] }
 0x1e0   : > { %p1220_p0 = scmp.ne.f32.partialorder %s6028_s27, %s6028_s27  ;;  %s1234_s9 = sadd.s32 32767, %s1233_s13 }
 0x1e1   : > { %s1225_s4 = sand.u32 4294901760, %s1224_s8  ;;  %s1244_s30 = sand.u32 1, %s1243_s22 }
 0x1e2   : > { %s1235_s29 = sadd.s32 %s7075_s12, %s1234_s9  ;;  %s12161_s4 = smov (%p1220_p0, %s1225_s4), 2143289344 }
 0x1e3   : > { %10913 = sst [smem:[#allocation113_spill]] %s12161_s4  ;;  %p1231_p1 = scmp.ne.f32.partialorder %s7075_s12, %s7075_s12 }
 0x1e4   : > { %s1245_s0 = sadd.s32 32767, %s1244_s30  ;;  %s1236_s14 = sand.u32 4294901760, %s1235_s29 }
 0x1e5   : > { %s1254_s10 = sshrl.u32 %s6031_s5, 16  ;;  %s6032_s15 = sld [smem:[#allocation6 + $0x385]] }
 0x1e6   : > { %s1246_s21 = sadd.s32 %s7078_s2, %s1245_s0  ;;  %s12163_s14 = smov (%p1231_p1, %s1236_s14), 2143289344 }
 0x1e7   : > { %10914 = sst [smem:[#allocation114_spill]] %s12163_s14  ;;  %p1242_p2 = scmp.ne.f32.partialorder %s7078_s2, %s7078_s2 }
 0x1e8   : > { %s1255_s23 = sand.u32 1, %s1254_s10  ;;  %s1247_s17 = sand.u32 4294901760, %s1246_s21 }
 0x1e9   : > { %s6033_s27 = sld [smem:[#allocation6 + $0x386]]  ;;  %s1256_s13 = sadd.s32 32767, %s1255_s23 }
 0x1ea   : > { %s12165_s17 = smov (%p1242_p2, %s1247_s17), 2143289344  ;;  %s1257_s22 = sadd.s32 %s6031_s5, %s1256_s13 }
 0x1eb   : > { %10915 = sst [smem:[#allocation115_spill]] %s12165_s17  ;;  %s1265_s8 = sshrl.u32 %s6032_s15, 16 }
 0x1ec   : > { %s7100_s9 = sld [smem:[#allocation6 + $0x387]]  ;;  %p1253_p4 = scmp.ne.f32.partialorder %s6031_s5, %s6031_s5 }
 0x1ed   : > { %s1266_s30 = sand.u32 1, %s1265_s8  ;;  %s1258_s12 = sand.u32 4294901760, %s1257_s22 }
 0x1ee   : > { %s1267_s0 = sadd.s32 32767, %s1266_s30  ;;  %s12167_s12 = smov (%p1253_p4, %s1258_s12), 2143289344 }
 0x1ef   : > { %s1276_s29 = sshrl.u32 %s6033_s27, 16  ;;  %10916 = sst [smem:[#allocation116_spill]] %s12167_s12 }
 0x1f0   : > { %s1277_s2 = sand.u32 1, %s1276_s29  ;;  %s1268_s10 = sadd.s32 %s6032_s15, %s1267_s0 }
 0x1f1   : > { %s6035_s23 = sld [smem:[#allocation6 + $0x388]]  ;;  %p1264_p6 = scmp.ne.f32.partialorder %s6032_s15, %s6032_s15 }
 0x1f2   : > { %s1287_s21 = sshrl.u32 %s7100_s9, 16  ;;  %s1278_s17 = sadd.s32 32767, %s1277_s2 }
 0x1f3   : > { %s1269_s14 = sand.u32 4294901760, %s1268_s10  ;;  %s1288_s13 = sand.u32 1, %s1287_s21 }
 0x1f4   : > { %s1279_s4 = sadd.s32 %s6033_s27, %s1278_s17  ;;  %s12169_s14 = smov (%p1264_p6, %s1269_s14), 2143289344 }
 0x1f5   : > { %10917 = sst [smem:[#allocation117_spill]] %s12169_s14  ;;  %p1275_p10 = scmp.ne.f32.partialorder %s6033_s27, %s6033_s27 }
 0x1f6   : > { %s1289_s5 = sadd.s32 32767, %s1288_s13  ;;  %s1280_s8 = sand.u32 4294901760, %s1279_s4 }
 0x1f7   : > { %s1298_s22 = sshrl.u32 %s6035_s23, 16  ;;  %s6036_s30 = sld [smem:[#allocation6 + $0x389]] }
 0x1f8   : > { %s1290_s25 = sadd.s32 %s7100_s9, %s1289_s5  ;;  %s12171_s8 = smov (%p1275_p10, %s1280_s8), 2143289344 }
 0x1f9   : > { %10918 = sst [smem:[#allocation118_spill]] %s12171_s8  ;;  %p1286_p5 = scmp.ne.f32.partialorder %s7100_s9, %s7100_s9 }
 0x1fa   : > { %s1299_s29 = sand.u32 1, %s1298_s22  ;;  %s1291_s0 = sand.u32 4294901760, %s1290_s25 }
 0x1fb   : > { %s6037_s12 = sld [smem:[#allocation6 + $0x38a]]  ;;  %s1300_s15 = sadd.s32 32767, %s1299_s29 }
 0x1fc   : > { %s12173_s0 = smov (%p1286_p5, %s1291_s0), 2143289344  ;;  %s1301_s17 = sadd.s32 %s6035_s23, %s1300_s15 }
 0x1fd   : > { %10919 = sst [smem:[#allocation119_spill]] %s12173_s0  ;;  %s1309_s2 = sshrl.u32 %s6036_s30, 16 }
 0x1fe   : > { %s7114_s10 = sld [smem:[#allocation6 + $0x38b]]  ;;  %p1297_p11 = scmp.ne.f32.partialorder %s6035_s23, %s6035_s23 }
 0x1ff   : > { %s1310_s4 = sand.u32 1, %s1309_s2  ;;  %s1302_s27 = sand.u32 4294901760, %s1301_s17 }
 0x200   : > { %s1311_s13 = sadd.s32 32767, %s1310_s4  ;;  %s12175_s27 = smov (%p1297_p11, %s1302_s27), 2143289344 }
 0x201   : > { %s1320_s21 = sshrl.u32 %s6037_s12, 16  ;;  %10920 = sst [smem:[#allocation120_spill]] %s12175_s27 }
 0x202   : > { %s1321_s9 = sand.u32 1, %s1320_s21  ;;  %s1312_s5 = sadd.s32 %s6036_s30, %s1311_s13 }
 0x203   : > { %s6039_s22 = sld [smem:[#allocation6 + $0x31]]  ;;  %p1308_p3 = scmp.ne.f32.partialorder %s6036_s30, %s6036_s30 }
 0x204   : > { %s1331_s25 = sshrl.u32 %s7114_s10, 16  ;;  %s1322_s29 = sadd.s32 32767, %s1321_s9 }
 0x205   : > { %s1313_s0 = sand.u32 4294901760, %s1312_s5  ;;  %s1332_s15 = sand.u32 1, %s1331_s25 }
 0x206   : > { %s1323_s8 = sadd.s32 %s6037_s12, %s1322_s29  ;;  %s12177_s0 = smov (%p1308_p3, %s1313_s0), 2143289344 }
 0x207   : > { %10921 = sst [smem:[#allocation121_spill]] %s12177_s0  ;;  %p1319_p7 = scmp.ne.f32.partialorder %s6037_s12, %s6037_s12 }
 0x208   : > { %s1333_s23 = sadd.s32 32767, %s1332_s15  ;;  %s1324_s2 = sand.u32 4294901760, %s1323_s8 }
 0x209   : > { %s1342_s17 = sshrl.u32 %s6039_s22, 16  ;;  %s6040_s4 = sld [smem:[#allocation6 + $0xb1]] }
 0x20a   : > { %s1334_s14 = sadd.s32 %s7114_s10, %s1333_s23  ;;  %s12179_s2 = smov (%p1319_p7, %s1324_s2), 2143289344 }
 0x20b   : > { %10922 = sst [smem:[#allocation122_spill]] %s12179_s2  ;;  %p1330_p12 = scmp.ne.f32.partialorder %s7114_s10, %s7114_s10 }
 0x20c   : > { %s1343_s21 = sand.u32 1, %s1342_s17  ;;  %s1335_s13 = sand.u32 4294901760, %s1334_s14 }
 0x20d   : > { %s6041_s27 = sld [smem:[#allocation6 + $0x131]]  ;;  %s1344_s30 = sadd.s32 32767, %s1343_s21 }
 0x20e   : > { %s12181_s13 = smov (%p1330_p12, %s1335_s13), 2143289344  ;;  %s1345_s5 = sadd.s32 %s6039_s22, %s1344_s30 }
 0x20f   : > { %10923 = sst [smem:[#allocation123_spill]] %s12181_s13  ;;  %s1353_s9 = sshrl.u32 %s6040_s4, 16 }
 0x210   : > { %s7128_s25 = sld [smem:[#allocation6 + $0x1b1]]  ;;  %p1341_p0 = scmp.ne.f32.partialorder %s6039_s22, %s6039_s22 }
 0x211   : > { %s1354_s12 = sand.u32 1, %s1353_s9  ;;  %s1346_s8 = sand.u32 4294901760, %s1345_s5 }
 0x212   : > { %s1355_s15 = sadd.s32 32767, %s1354_s12  ;;  %s12183_s8 = smov (%p1341_p0, %s1346_s8), 2143289344 }
 0x213   : > { %s1364_s29 = sshrl.u32 %s6041_s27, 16  ;;  %10924 = sst [smem:[#allocation124_spill]] %s12183_s8 }
 0x214   : > { %s1365_s10 = sand.u32 1, %s1364_s29  ;;  %s1356_s23 = sadd.s32 %s6040_s4, %s1355_s15 }
 0x215   : > { %s7133_s17 = sld [smem:[#allocation6 + $0x231]]  ;;  %p1352_p1 = scmp.ne.f32.partialorder %s6040_s4, %s6040_s4 }
 0x216   : > { %s1375_s14 = sshrl.u32 %s7128_s25, 16  ;;  %s1366_s21 = sadd.s32 32767, %s1365_s10 }
 0x217   : > { %s1357_s30 = sand.u32 4294901760, %s1356_s23  ;;  %s1376_s13 = sand.u32 1, %s1375_s14 }
 0x218   : > { %s1367_s2 = sadd.s32 %s6041_s27, %s1366_s21  ;;  %s7135_s22 = sld [smem:[#allocation6 + $0x2b1]] }
 0x219   : > { %s12185_s30 = smov (%p1352_p1, %s1357_s30), 2143289344  ;;  %p1363_p2 = scmp.ne.f32.partialorder %s6041_s27, %s6041_s27 }
 0x21a   : > { %10925 = sst [smem:[#allocation125_spill]] %s12185_s30  ;;  %s1377_s9 = sadd.s32 32767, %s1376_s13 }
 0x21b   : > { %s1368_s5 = sand.u32 4294901760, %s1367_s2  ;;  %s1386_s12 = sshrl.u32 %s7133_s17, 16 }
 0x21c   : > { %s1378_s29 = sadd.s32 %s7128_s25, %s1377_s9  ;;  %s12187_s5 = smov (%p1363_p2, %s1368_s5), 2143289344 }
 0x21d   : > { %10926 = sst [smem:[#allocation126_spill]] %s12187_s5  ;;  %p1374_p4 = scmp.ne.f32.partialorder %s7128_s25, %s7128_s25 }
 0x21e   : > { %s1387_s4 = sand.u32 1, %s1386_s12  ;;  %s1379_s15 = sand.u32 4294901760, %s1378_s29 }
 0x21f   : > { %s1397_s10 = sshrl.u32 %s7135_s22, 16  ;;  %s6045_s23 = sld [smem:[#allocation6 + $0x331]] }
 0x220   : > { %s1388_s14 = sadd.s32 32767, %s1387_s4  ;;  %s12189_s15 = smov (%p1374_p4, %s1379_s15), 2143289344 }
 0x221   : > { %10927 = sst [smem:[#allocation127_spill]] %s12189_s15  ;;  %s1398_s21 = sand.u32 1, %s1397_s10 }
 0x222   : > { %s1389_s27 = sadd.s32 %s7133_s17, %s1388_s14  ;;  %s7149_s30 = sld [smem:[#allocation6 + $0x3b1]] }
 0x223   : > { %p1385_p6 = scmp.ne.f32.partialorder %s7133_s17, %s7133_s17  ;;  %s1399_s2 = sadd.s32 32767, %s1398_s21 }
 0x224   : > { %s1390_s13 = sand.u32 4294901760, %s1389_s27  ;;  %s1400_s5 = sadd.s32 %s7135_s22, %s1399_s2 }
 0x225   : > { %s1408_s9 = sshrl.u32 %s6045_s23, 16  ;;  %s12191_s13 = smov (%p1385_p6, %s1390_s13), 2143289344 }
 0x226   : > { %10928 = sst [smem:[#allocation128_spill]] %s12191_s13  ;;  %p1396_p10 = scmp.ne.f32.partialorder %s7135_s22, %s7135_s22 }
 0x227   : > { %s1409_s25 = sand.u32 1, %s1408_s9  ;;  %s1401_s12 = sand.u32 4294901760, %s1400_s5 }
 0x228   : > { %s1419_s29 = sshrl.u32 %s7149_s30, 16  ;;  %s6047_s4 = sld [smem:[#allocation6 + $0xc]] }
 0x229   : > { %s1410_s10 = sadd.s32 32767, %s1409_s25  ;;  %s12193_s12 = smov (%p1396_p10, %s1401_s12), 2143289344 }
 0x22a   : > { %10929 = sst [smem:[#allocation129_spill]] %s12193_s12  ;;  %s1420_s14 = sand.u32 1, %s1419_s29 }
 0x22b   : > { %s1411_s15 = sadd.s32 %s6045_s23, %s1410_s10  ;;  %s7161_s17 = sld [smem:[#allocation6 + $0xd]] }
 0x22c   : > { %p1407_p5 = scmp.ne.f32.partialorder %s6045_s23, %s6045_s23  ;;  %s1421_s21 = sadd.s32 32767, %s1420_s14 }
 0x22d   : > { %s1412_s27 = sand.u32 4294901760, %s1411_s15  ;;  %s1422_s13 = sadd.s32 %s7149_s30, %s1421_s21 }
 0x22e   : > { %s1430_s2 = sshrl.u32 %s6047_s4, 16  ;;  %s12195_s27 = smov (%p1407_p5, %s1412_s27), 2143289344 }
 0x22f   : > { %10930 = sst [smem:[#allocation130_spill]] %s12195_s27  ;;  %p1418_p11 = scmp.ne.f32.partialorder %s7149_s30, %s7149_s30 }
 0x230   : > { %s1431_s22 = sand.u32 1, %s1430_s2  ;;  %s1423_s5 = sand.u32 4294901760, %s1422_s13 }
 0x231   : > { %s1441_s9 = sshrl.u32 %s7161_s17, 16  ;;  %s6049_s25 = sld [smem:[#allocation6 + $0xe]] }
 0x232   : > { %s1432_s29 = sadd.s32 32767, %s1431_s22  ;;  %s12197_s5 = smov (%p1418_p11, %s1423_s5), 2143289344 }
 0x233   : > { %10931 = sst [smem:[#allocation131_spill]] %s12197_s5  ;;  %s1442_s10 = sand.u32 1, %s1441_s9 }
 0x234   : > { %s1433_s12 = sadd.s32 %s6047_s4, %s1432_s29  ;;  %s7171_s23 = sld [smem:[#allocation6 + $0xf]] }
 0x235   : > { %p1429_p3 = scmp.ne.f32.partialorder %s6047_s4, %s6047_s4  ;;  %s1443_s15 = sadd.s32 32767, %s1442_s10 }
 0x236   : > { %s1434_s14 = sand.u32 4294901760, %s1433_s12  ;;  %s1444_s27 = sadd.s32 %s7161_s17, %s1443_s15 }
 0x237   : > { %s1452_s21 = sshrl.u32 %s6049_s25, 16  ;;  %s12199_s14 = smov (%p1429_p3, %s1434_s14), 2143289344 }
 0x238   : > { %10932 = sst [smem:[#allocation132_spill]] %s12199_s14  ;;  %p1440_p7 = scmp.ne.f32.partialorder %s7161_s17, %s7161_s17 }
 0x239   : > { %s1453_s30 = sand.u32 1, %s1452_s21  ;;  %s1445_s13 = sand.u32 4294901760, %s1444_s27 }
 0x23a   : > { %s1463_s2 = sshrl.u32 %s7171_s23, 16  ;;  %s6051_s22 = sld [smem:[#allocation6 + $0x10]] }
 0x23b   : > { %s1454_s9 = sadd.s32 32767, %s1453_s30  ;;  %s12201_s13 = smov (%p1440_p7, %s1445_s13), 2143289344 }
 0x23c   : > { %10933 = sst [smem:[#allocation133_spill]] %s12201_s13  ;;  %s1464_s29 = sand.u32 1, %s1463_s2 }
 0x23d   : > { %s1455_s5 = sadd.s32 %s6049_s25, %s1454_s9  ;;  %s7181_s4 = sld [smem:[#allocation6 + $0x11]] }
 0x23e   : > { %p1451_p12 = scmp.ne.f32.partialorder %s6049_s25, %s6049_s25  ;;  %s1465_s12 = sadd.s32 32767, %s1464_s29 }
 0x23f   : > { %s1456_s10 = sand.u32 4294901760, %s1455_s5  ;;  %s1466_s14 = sadd.s32 %s7171_s23, %s1465_s12 }
 0x240   : > { %s1474_s15 = sshrl.u32 %s6051_s22, 16  ;;  %s7184_s8 = sld [smem:[#allocation6 + $0x12]] }
 0x241   : > { %s12203_s10 = smov (%p1451_p12, %s1456_s10), 2143289344  ;;  %p1462_p0 = scmp.ne.f32.partialorder %s7171_s23, %s7171_s23 }
 0x242   : > { %10934 = sst [smem:[#allocation134_spill]] %s12203_s10  ;;  %s1475_s17 = sand.u32 1, %s1474_s15 }
 0x243   : > { %s1467_s27 = sand.u32 4294901760, %s1466_s14  ;;  %s1485_s21 = sshrl.u32 %s7181_s4, 16 }
 0x244   : > { %s1476_s30 = sadd.s32 32767, %s1475_s17  ;;  %s12205_s27 = smov (%p1462_p0, %s1467_s27), 2143289344 }
 0x245   : > { %10935 = sst [smem:[#allocation135_spill]] %s12205_s27  ;;  %s1486_s25 = sand.u32 1, %s1485_s21 }
 0x246   : > { %s1477_s5 = sadd.s32 %s6051_s22, %s1476_s30  ;;  %s1496_s2 = sshrl.u32 %s7184_s8, 16 }
 0x247   : > { %s6054_s9 = sld [smem:[#allocation6 + $0x13]]  ;;  %p1473_p1 = scmp.ne.f32.partialorder %s6051_s22, %s6051_s22 }
 0x248   : > { %s1487_s29 = sadd.s32 32767, %s1486_s25  ;;  %s1478_s12 = sand.u32 4294901760, %s1477_s5 }
 0x249   : > { %s1497_s13 = sand.u32 1, %s1496_s2  ;;  %s1488_s10 = sadd.s32 %s7181_s4, %s1487_s29 }
 0x24a   : > { %s12207_s12 = smov (%p1473_p1, %s1478_s12), 2143289344  ;;  %p1484_p2 = scmp.ne.f32.partialorder %s7181_s4, %s7181_s4 }
 0x24b   : > { %10936 = sst [smem:[#allocation136_spill]] %s12207_s12  ;;  %s1498_s23 = sadd.s32 32767, %s1497_s13 }
 0x24c   : > { %s1489_s14 = sand.u32 4294901760, %s1488_s10  ;;  %s6055_s17 = sld [smem:[#allocation6 + $0x8c]] }
 0x24d   : > { %s1507_s15 = sshrl.u32 %s6054_s9, 16  ;;  %s1499_s27 = sadd.s32 %s7184_s8, %s1498_s23 }
 0x24e   : > { %s12209_s14 = smov (%p1484_p2, %s1489_s14), 2143289344  ;;  %p1495_p4 = scmp.ne.f32.partialorder %s7184_s8, %s7184_s8 }
 0x24f   : > { %10937 = sst [smem:[#allocation137_spill]] %s12209_s14  ;;  %s1508_s21 = sand.u32 1, %s1507_s15 }
 0x250   : > { %s1500_s30 = sand.u32 4294901760, %s1499_s27  ;;  %s6056_s22 = sld [smem:[#allocation6 + $0x8d]] }
 0x251   : > { %s1509_s25 = sadd.s32 32767, %s1508_s21  ;;  %s12211_s30 = smov (%p1495_p4, %s1500_s30), 2143289344 }
 0x252   : > { %10938 = sst [smem:[#allocation138_spill]] %s12211_s30  ;;  %s1518_s5 = sshrl.u32 %s6055_s17, 16 }
 0x253   : > { %s1510_s2 = sadd.s32 %s6054_s9, %s1509_s25  ;;  %s7206_s29 = sld [smem:[#allocation6 + $0x8e]] }
 0x254   : > { %p1506_p6 = scmp.ne.f32.partialorder %s6054_s9, %s6054_s9  ;;  %s1519_s13 = sand.u32 1, %s1518_s5 }
 0x255   : > { %s1511_s4 = sand.u32 4294901760, %s1510_s2  ;;  %s1520_s23 = sadd.s32 32767, %s1519_s13 }
 0x256   : > { %s1529_s10 = sshrl.u32 %s6056_s22, 16  ;;  %s12213_s4 = smov (%p1506_p6, %s1511_s4), 2143289344 }
 0x257   : > { %10939 = sst [smem:[#allocation139_spill]] %s12213_s4  ;;  %s1530_s8 = sand.u32 1, %s1529_s10 }
 0x258   : > { %s1521_s15 = sadd.s32 %s6055_s17, %s1520_s23  ;;  %s6058_s21 = sld [smem:[#allocation6 + $0x8f]] }
 0x259   : > { %s1540_s27 = sshrl.u32 %s7206_s29, 16  ;;  %p1517_p10 = scmp.ne.f32.partialorder %s6055_s17, %s6055_s17 }
 0x25a   : > { %s1531_s30 = sadd.s32 32767, %s1530_s8  ;;  %s1522_s14 = sand.u32 4294901760, %s1521_s15 }
 0x25b   : > { %s1541_s25 = sand.u32 1, %s1540_s27  ;;  %s1532_s12 = sadd.s32 %s6056_s22, %s1531_s30 }
 0x25c   : > { %s12215_s14 = smov (%p1517_p10, %s1522_s14), 2143289344  ;;  %p1528_p5 = scmp.ne.f32.partialorder %s6056_s22, %s6056_s22 }
 0x25d   : > { %10940 = sst [smem:[#allocation140_spill]] %s12215_s14  ;;  %s1542_s9 = sadd.s32 32767, %s1541_s25 }
 0x25e   : > { %s1533_s5 = sand.u32 4294901760, %s1532_s12  ;;  %s1551_s2 = sshrl.u32 %s6058_s21, 16 }
 0x25f   : > { %s6059_s13 = sld [smem:[#allocation6 + $0x90]]  ;;  %s1543_s0 = sadd.s32 %s7206_s29, %s1542_s9 }
 0x260   : > { %s12217_s5 = smov (%p1528_p5, %s1533_s5), 2143289344  ;;  %p1539_p11 = scmp.ne.f32.partialorder %s7206_s29, %s7206_s29 }
 0x261   : > { %10941 = sst [smem:[#allocation141_spill]] %s12217_s5  ;;  %s1552_s10 = sand.u32 1, %s1551_s2 }
 0x262   : > { %s1544_s23 = sand.u32 4294901760, %s1543_s0  ;;  %s6060_s4 = sld [smem:[#allocation6 + $0x91]] }
 0x263   : > { %s1553_s17 = sadd.s32 32767, %s1552_s10  ;;  %s12219_s23 = smov (%p1539_p11, %s1544_s23), 2143289344 }
 0x264   : > { %10942 = sst [smem:[#allocation142_spill]] %s12219_s23  ;;  %s1554_s30 = sadd.s32 %s6058_s21, %s1553_s17 }
 0x265   : > { %s1562_s8 = sshrl.u32 %s6059_s13, 16  ;;  %s7220_s15 = sld [smem:[#allocation6 + $0x92]] }
 0x266   : > { %p1550_p3 = scmp.ne.f32.partialorder %s6058_s21, %s6058_s21  ;;  %s1563_s12 = sand.u32 1, %s1562_s8 }
 0x267   : > { %s1555_s22 = sand.u32 4294901760, %s1554_s30  ;;  %s1564_s25 = sadd.s32 32767, %s1563_s12 }
 0x268   : > { %s1573_s27 = sshrl.u32 %s6060_s4, 16  ;;  %s12221_s22 = smov (%p1550_p3, %s1555_s22), 2143289344 }
 0x269   : > { %10943 = sst [smem:[#allocation143_spill]] %s12221_s22  ;;  %s1574_s29 = sand.u32 1, %s1573_s27 }
 0x26a   : > { %s1565_s9 = sadd.s32 %s6059_s13, %s1564_s25  ;;  %s6062_s2 = sld [smem:[#allocation6 + $0x93]] }
 0x26b   : > { %s1584_s0 = sshrl.u32 %s7220_s15, 16  ;;  %p1561_p7 = scmp.ne.f32.partialorder %s6059_s13, %s6059_s13 }
 0x26c   : > { %s1575_s10 = sadd.s32 32767, %s1574_s29  ;;  %s1566_s23 = sand.u32 4294901760, %s1565_s9 }
 0x26d   : > { %s1585_s17 = sand.u32 1, %s1584_s0  ;;  %s1576_s5 = sadd.s32 %s6060_s4, %s1575_s10 }
 0x26e   : > { %s12223_s23 = smov (%p1561_p7, %s1566_s23), 2143289344  ;;  %p1572_p12 = scmp.ne.f32.partialorder %s6060_s4, %s6060_s4 }
 0x26f   : > { %10944 = sst [smem:[#allocation144_spill]] %s12223_s23  ;;  %s1586_s21 = sadd.s32 32767, %s1585_s17 }
 0x270   : > { %s1577_s8 = sand.u32 4294901760, %s1576_s5  ;;  %s1595_s30 = sshrl.u32 %s6062_s2, 16 }
 0x271   : > { %s6063_s12 = sld [smem:[#allocation6 + $0x10c]]  ;;  %s1587_s14 = sadd.s32 %s7220_s15, %s1586_s21 }
 0x272   : > { %s12225_s8 = smov (%p1572_p12, %s1577_s8), 2143289344  ;;  %p1583_p0 = scmp.ne.f32.partialorder %s7220_s15, %s7220_s15 }
 0x273   : > { %10945 = sst [smem:[#allocation145_spill]] %s12225_s8  ;;  %s1596_s27 = sand.u32 1, %s1595_s30 }
 0x274   : > { %s1588_s25 = sand.u32 4294901760, %s1587_s14  ;;  %s6064_s22 = sld [smem:[#allocation6 + $0x10d]] }
 0x275   : > { %s1597_s13 = sadd.s32 32767, %s1596_s27  ;;  %s12227_s25 = smov (%p1583_p0, %s1588_s25), 2143289344 }
 0x276   : > { %10946 = sst [smem:[#allocation146_spill]] %s12227_s25  ;;  %s1598_s9 = sadd.s32 %s6062_s2, %s1597_s13 }
 0x277   : > { %s1606_s29 = sshrl.u32 %s6063_s12, 16  ;;  %s7234_s0 = sld [smem:[#allocation6 + $0x10e]] }
 0x278   : > { %p1594_p1 = scmp.ne.f32.partialorder %s6062_s2, %s6062_s2  ;;  %s1607_s4 = sand.u32 1, %s1606_s29 }
 0x279   : > { %s1599_s5 = sand.u32 4294901760, %s1598_s9  ;;  %s1608_s17 = sadd.s32 32767, %s1607_s4 }
 0x27a   : > { %s1617_s10 = sshrl.u32 %s6064_s22, 16  ;;  %s12229_s5 = smov (%p1594_p1, %s1599_s5), 2143289344 }
 0x27b   : > { %10947 = sst [smem:[#allocation147_spill]] %s12229_s5  ;;  %s1618_s15 = sand.u32 1, %s1617_s10 }
 0x27c   : > { %s1609_s21 = sadd.s32 %s6063_s12, %s1608_s17  ;;  %s7239_s30 = sld [smem:[#allocation6 + $0x10f]] }
 0x27d   : > { %s1628_s14 = sshrl.u32 %s7234_s0, 16  ;;  %p1605_p2 = scmp.ne.f32.partialorder %s6063_s12, %s6063_s12 }
 0x27e   : > { %s1619_s27 = sadd.s32 32767, %s1618_s15  ;;  %s1610_s13 = sand.u32 4294901760, %s1609_s21 }
 0x27f   : > { %s1629_s25 = sand.u32 1, %s1628_s14  ;;  %s1620_s8 = sadd.s32 %s6064_s22, %s1619_s27 }
 0x280   : > { %s7241_s2 = sld [smem:[#allocation6 + $0x110]]  ;;  %s12231_s13 = smov (%p1605_p2, %s1610_s13), 2143289344 }
 0x281   : > { %10948 = sst [smem:[#allocation148_spill]] %s12231_s13  ;;  %p1616_p4 = scmp.ne.f32.partialorder %s6064_s22, %s6064_s22 }
 0x282   : > { %s1630_s29 = sadd.s32 32767, %s1629_s25  ;;  %s1621_s9 = sand.u32 4294901760, %s1620_s8 }
 0x283   : > { %s1639_s4 = sshrl.u32 %s7239_s30, 16  ;;  %s1631_s10 = sadd.s32 %s7234_s0, %s1630_s29 }
 0x284   : > { %s12233_s9 = smov (%p1616_p4, %s1621_s9), 2143289344  ;;  %p1627_p6 = scmp.ne.f32.partialorder %s7234_s0, %s7234_s0 }
 0x285   : > { %10949 = sst [smem:[#allocation149_spill]] %s12233_s9  ;;  %s1640_s12 = sand.u32 1, %s1639_s4 }
 0x286   : > { %s1632_s17 = sand.u32 4294901760, %s1631_s10  ;;  %s1650_s15 = sshrl.u32 %s7241_s2, 16 }
 0x287   : > { %s6068_s21 = sld [smem:[#allocation6 + $0x111]]  ;;  %s1641_s14 = sadd.s32 32767, %s1640_s12 }
 0x288   : > { %s12235_s17 = smov (%p1627_p6, %s1632_s17), 2143289344  ;;  %s1651_s27 = sand.u32 1, %s1650_s15 }
 0x289   : > { %10950 = sst [smem:[#allocation150_spill]] %s12235_s17  ;;  %s1642_s22 = sadd.s32 %s7239_s30, %s1641_s14 }
 0x28a   : > { %s7255_s13 = sld [smem:[#allocation6 + $0x112]]  ;;  %p1638_p10 = scmp.ne.f32.partialorder %s7239_s30, %s7239_s30 }
 0x28b   : > { %s1652_s8 = sadd.s32 32767, %s1651_s27  ;;  %s1643_s25 = sand.u32 4294901760, %s1642_s22 }
 0x28c   : > { %s1653_s9 = sadd.s32 %s7241_s2, %s1652_s8  ;;  %s12237_s25 = smov (%p1638_p10, %s1643_s25), 2143289344 }
 0x28d   : > { %s1661_s29 = sshrl.u32 %s6068_s21, 16  ;;  %10951 = sst [smem:[#allocation151_spill]] %s12237_s25 }
 0x28e   : > { %p1649_p5 = scmp.ne.f32.partialorder %s7241_s2, %s7241_s2  ;;  %s1662_s0 = sand.u32 1, %s1661_s29 }
 0x28f   : > { %s1654_s4 = sand.u32 4294901760, %s1653_s9  ;;  %s6070_s12 = sld [smem:[#allocation6 + $0x113]] }
 0x290   : > { %s1672_s10 = sshrl.u32 %s7255_s13, 16  ;;  %s1663_s15 = sadd.s32 32767, %s1662_s0 }
 0x291   : > { %s12239_s4 = smov (%p1649_p5, %s1654_s4), 2143289344  ;;  %s1673_s14 = sand.u32 1, %s1672_s10 }
 0x292   : > { %10952 = sst [smem:[#allocation152_spill]] %s12239_s4  ;;  %s1664_s17 = sadd.s32 %s6068_s21, %s1663_s15 }
 0x293   : > { %s7267_s30 = sld [smem:[#allocation6 + $0x18c]]  ;;  %p1660_p11 = scmp.ne.f32.partialorder %s6068_s21, %s6068_s21 }
 0x294   : > { %s1674_s27 = sadd.s32 32767, %s1673_s14  ;;  %s1665_s22 = sand.u32 4294901760, %s1664_s17 }
 0x295   : > { %s1683_s8 = sshrl.u32 %s6070_s12, 16  ;;  %s1675_s25 = sadd.s32 %s7255_s13, %s1674_s27 }
 0x296   : > { %s7270_s5 = sld [smem:[#allocation6 + $0x18d]]  ;;  %s12241_s22 = smov (%p1660_p11, %s1665_s22), 2143289344 }
 0x297   : > { %10953 = sst [smem:[#allocation153_spill]] %s12241_s22  ;;  %p1671_p3 = scmp.ne.f32.partialorder %s7255_s13, %s7255_s13 }
 0x298   : > { %s1684_s2 = sand.u32 1, %s1683_s8  ;;  %s1676_s9 = sand.u32 4294901760, %s1675_s25 }
 0x299   : > { %s1694_s29 = sshrl.u32 %s7267_s30, 16  ;;  %s1685_s0 = sadd.s32 32767, %s1684_s2 }
 0x29a   : > { %s12243_s9 = smov (%p1671_p3, %s1676_s9), 2143289344  ;;  %s1695_s21 = sand.u32 1, %s1694_s29 }
 0x29b   : > { %10954 = sst [smem:[#allocation154_spill]] %s12243_s9  ;;  %s1686_s17 = sadd.s32 %s6070_s12, %s1685_s0 }
 0x29c   : > { %s1705_s10 = sshrl.u32 %s7270_s5, 16  ;;  %s6073_s15 = sld [smem:[#allocation6 + $0x18e]] }
 0x29d   : > { %p1682_p7 = scmp.ne.f32.partialorder %s6070_s12, %s6070_s12  ;;  %s1696_s14 = sadd.s32 32767, %s1695_s21 }
 0x29e   : > { %s1687_s27 = sand.u32 4294901760, %s1686_s17  ;;  %s1706_s4 = sand.u32 1, %s1705_s10 }
 0x29f   : > { %s1697_s22 = sadd.s32 %s7267_s30, %s1696_s14  ;;  %s12245_s27 = smov (%p1682_p7, %s1687_s27), 2143289344 }
 0x2a0   : > { %10955 = sst [smem:[#allocation155_spill]] %s12245_s27  ;;  %p1693_p12 = scmp.ne.f32.partialorder %s7267_s30, %s7267_s30 }
 0x2a1   : > { %s1707_s13 = sadd.s32 32767, %s1706_s4  ;;  %s1698_s25 = sand.u32 4294901760, %s1697_s22 }
 0x2a2   : > { %s1716_s8 = sshrl.u32 %s6073_s15, 16  ;;  %s6074_s2 = sld [smem:[#allocation6 + $0x18f]] }
 0x2a3   : > { %s1708_s9 = sadd.s32 %s7270_s5, %s1707_s13  ;;  %s12247_s25 = smov (%p1693_p12, %s1698_s25), 2143289344 }
 0x2a4   : > { %10956 = sst [smem:[#allocation156_spill]] %s12247_s25  ;;  %p1704_p0 = scmp.ne.f32.partialorder %s7270_s5, %s7270_s5 }
 0x2a5   : > { %s1717_s29 = sand.u32 1, %s1716_s8  ;;  %s1709_s0 = sand.u32 4294901760, %s1708_s9 }
 0x2a6   : > { %s6075_s12 = sld [smem:[#allocation6 + $0x190]]  ;;  %s1718_s21 = sadd.s32 32767, %s1717_s29 }
 0x2a7   : > { %s12249_s0 = smov (%p1704_p0, %s1709_s0), 2143289344  ;;  %s1719_s10 = sadd.s32 %s6073_s15, %s1718_s21 }
 0x2a8   : > { %10957 = sst [smem:[#allocation157_spill]] %s12249_s0  ;;  %s1727_s17 = sshrl.u32 %s6074_s2, 16 }
 0x2a9   : > { %s7292_s14 = sld [smem:[#allocation6 + $0x191]]  ;;  %p1715_p1 = scmp.ne.f32.partialorder %s6073_s15, %s6073_s15 }
 0x2aa   : > { %s1728_s4 = sand.u32 1, %s1727_s17  ;;  %s1720_s30 = sand.u32 4294901760, %s1719_s10 }
 0x2ab   : > { %s1729_s13 = sadd.s32 32767, %s1728_s4  ;;  %s12251_s30 = smov (%p1715_p1, %s1720_s30), 2143289344 }
 0x2ac   : > { %s1738_s22 = sshrl.u32 %s6075_s12, 16  ;;  %10958 = sst [smem:[#allocation158_spill]] %s12251_s30 }
 0x2ad   : > { %s1739_s5 = sand.u32 1, %s1738_s22  ;;  %s1730_s8 = sadd.s32 %s6074_s2, %s1729_s13 }
 0x2ae   : > { %s6077_s29 = sld [smem:[#allocation6 + $0x192]]  ;;  %p1726_p2 = scmp.ne.f32.partialorder %s6074_s2, %s6074_s2 }
 0x2af   : > { %s1749_s9 = sshrl.u32 %s7292_s14, 16  ;;  %s1740_s0 = sadd.s32 32767, %s1739_s5 }
 0x2b0   : > { %s1731_s25 = sand.u32 4294901760, %s1730_s8  ;;  %s1750_s21 = sand.u32 1, %s1749_s9 }
 0x2b1   : > { %s1741_s27 = sadd.s32 %s6075_s12, %s1740_s0  ;;  %s12253_s25 = smov (%p1726_p2, %s1731_s25), 2143289344 }
 0x2b2   : > { %10959 = sst [smem:[#allocation159_spill]] %s12253_s25  ;;  %p1737_p4 = scmp.ne.f32.partialorder %s6075_s12, %s6075_s12 }
 0x2b3   : > { %s1751_s15 = sadd.s32 32767, %s1750_s21  ;;  %s1742_s17 = sand.u32 4294901760, %s1741_s27 }
 0x2b4   : > { %s1760_s10 = sshrl.u32 %s6077_s29, 16  ;;  %s6078_s4 = sld [smem:[#allocation6 + $0x193]] }
 0x2b5   : > { %s1752_s23 = sadd.s32 %s7292_s14, %s1751_s15  ;;  %s12255_s17 = smov (%p1737_p4, %s1742_s17), 2143289344 }
 0x2b6   : > { %10960 = sst [smem:[#allocation160_spill]] %s12255_s17  ;;  %p1748_p6 = scmp.ne.f32.partialorder %s7292_s14, %s7292_s14 }
 0x2b7   : > { %s1761_s22 = sand.u32 1, %s1760_s10  ;;  %s1753_s13 = sand.u32 4294901760, %s1752_s23 }
 0x2b8   : > { %s6079_s30 = sld [smem:[#allocation6 + $0x20c]]  ;;  %s1762_s2 = sadd.s32 32767, %s1761_s22 }
 0x2b9   : > { %s12257_s13 = smov (%p1748_p6, %s1753_s13), 2143289344  ;;  %s1763_s0 = sadd.s32 %s6077_s29, %s1762_s2 }
 0x2ba   : > { %10961 = sst [smem:[#allocation161_spill]] %s12257_s13  ;;  %s1771_s5 = sshrl.u32 %s6078_s4, 16 }
 0x2bb   : > { %s7306_s8 = sld [smem:[#allocation6 + $0x20d]]  ;;  %p1759_p10 = scmp.ne.f32.partialorder %s6077_s29, %s6077_s29 }
 0x2bc   : > { %s1772_s27 = sand.u32 1, %s1771_s5  ;;  %s1764_s12 = sand.u32 4294901760, %s1763_s0 }
 0x2bd   : > { %s1773_s21 = sadd.s32 32767, %s1772_s27  ;;  %s12259_s12 = smov (%p1759_p10, %s1764_s12), 2143289344 }
 0x2be   : > { %s1782_s9 = sshrl.u32 %s6079_s30, 16  ;;  %10962 = sst [smem:[#allocation162_spill]] %s12259_s12 }
 0x2bf   : > { %s1783_s14 = sand.u32 1, %s1782_s9  ;;  %s1774_s15 = sadd.s32 %s6078_s4, %s1773_s21 }
 0x2c0   : > { %s6081_s10 = sld [smem:[#allocation6 + $0x20e]]  ;;  %p1770_p5 = scmp.ne.f32.partialorder %s6078_s4, %s6078_s4 }
 0x2c1   : > { %s1793_s23 = sshrl.u32 %s7306_s8, 16  ;;  %s1784_s22 = sadd.s32 32767, %s1783_s14 }
 0x2c2   : > { %s1775_s13 = sand.u32 4294901760, %s1774_s15  ;;  %s1794_s2 = sand.u32 1, %s1793_s23 }
 0x2c3   : > { %s1785_s17 = sadd.s32 %s6079_s30, %s1784_s22  ;;  %s12261_s13 = smov (%p1770_p5, %s1775_s13), 2143289344 }
 0x2c4   : > { %10963 = sst [smem:[#allocation163_spill]] %s12261_s13  ;;  %p1781_p11 = scmp.ne.f32.partialorder %s6079_s30, %s6079_s30 }
 0x2c5   : > { %s1795_s29 = sadd.s32 32767, %s1794_s2  ;;  %s1786_s5 = sand.u32 4294901760, %s1785_s17 }
 0x2c6   : > { %s1804_s0 = sshrl.u32 %s6081_s10, 16  ;;  %s6082_s27 = sld [smem:[#allocation6 + $0x20f]] }
 0x2c7   : > { %s1796_s25 = sadd.s32 %s7306_s8, %s1795_s29  ;;  %s12263_s5 = smov (%p1781_p11, %s1786_s5), 2143289344 }
 0x2c8   : > { %10964 = sst [smem:[#allocation164_spill]] %s12263_s5  ;;  %p1792_p3 = scmp.ne.f32.partialorder %s7306_s8, %s7306_s8 }
 0x2c9   : > { %s1805_s9 = sand.u32 1, %s1804_s0  ;;  %s1797_s21 = sand.u32 4294901760, %s1796_s25 }
 0x2ca   : > { %s6083_s12 = sld [smem:[#allocation6 + $0x210]]  ;;  %s1806_s4 = sadd.s32 32767, %s1805_s9 }
 0x2cb   : > { %s12265_s21 = smov (%p1792_p3, %s1797_s21), 2143289344  ;;  %s1807_s15 = sadd.s32 %s6081_s10, %s1806_s4 }
 0x2cc   : > { %10965 = sst [smem:[#allocation165_spill]] %s12265_s21  ;;  %s1815_s14 = sshrl.u32 %s6082_s27, 16 }
 0x2cd   : > { %s7320_s23 = sld [smem:[#allocation6 + $0x211]]  ;;  %p1803_p7 = scmp.ne.f32.partialorder %s6081_s10, %s6081_s10 }
 0x2ce   : > { %s1816_s30 = sand.u32 1, %s1815_s14  ;;  %s1808_s17 = sand.u32 4294901760, %s1807_s15 }
 0x2cf   : > { %s1817_s2 = sadd.s32 32767, %s1816_s30  ;;  %s12267_s17 = smov (%p1803_p7, %s1808_s17), 2143289344 }
 0x2d0   : > { %s1826_s22 = sshrl.u32 %s6083_s12, 16  ;;  %10966 = sst [smem:[#allocation166_spill]] %s12267_s17 }
 0x2d1   : > { %s1827_s8 = sand.u32 1, %s1826_s22  ;;  %s1818_s29 = sadd.s32 %s6082_s27, %s1817_s2 }
 0x2d2   : > { %s7325_s0 = sld [smem:[#allocation6 + $0x212]]  ;;  %p1814_p12 = scmp.ne.f32.partialorder %s6082_s27, %s6082_s27 }
 0x2d3   : > { %s1837_s25 = sshrl.u32 %s7320_s23, 16  ;;  %s1828_s9 = sadd.s32 32767, %s1827_s8 }
 0x2d4   : > { %s1819_s4 = sand.u32 4294901760, %s1818_s29  ;;  %s1838_s21 = sand.u32 1, %s1837_s25 }
 0x2d5   : > { %s1829_s5 = sadd.s32 %s6083_s12, %s1828_s9  ;;  %s7327_s10 = sld [smem:[#allocation6 + $0x213]] }
 0x2d6   : > { %s12269_s4 = smov (%p1814_p12, %s1819_s4), 2143289344  ;;  %p1825_p0 = scmp.ne.f32.partialorder %s6083_s12, %s6083_s12 }
 0x2d7   : > { %10967 = sst [smem:[#allocation167_spill]] %s12269_s4  ;;  %s1839_s14 = sadd.s32 32767, %s1838_s21 }
 0x2d8   : > { %s1830_s15 = sand.u32 4294901760, %s1829_s5  ;;  %s1848_s30 = sshrl.u32 %s7325_s0, 16 }
 0x2d9   : > { %s1840_s22 = sadd.s32 %s7320_s23, %s1839_s14  ;;  %s12271_s15 = smov (%p1825_p0, %s1830_s15), 2143289344 }
 0x2da   : > { %10968 = sst [smem:[#allocation168_spill]] %s12271_s15  ;;  %p1836_p1 = scmp.ne.f32.partialorder %s7320_s23, %s7320_s23 }
 0x2db   : > { %s1849_s27 = sand.u32 1, %s1848_s30  ;;  %s1841_s2 = sand.u32 4294901760, %s1840_s22 }
 0x2dc   : > { %s1859_s8 = sshrl.u32 %s7327_s10, 16  ;;  %s6087_s29 = sld [smem:[#allocation6 + $0x28c]] }
 0x2dd   : > { %s1850_s25 = sadd.s32 32767, %s1849_s27  ;;  %s12273_s2 = smov (%p1836_p1, %s1841_s2), 2143289344 }
 0x2de   : > { %10969 = sst [smem:[#allocation169_spill]] %s12273_s2  ;;  %s1860_s9 = sand.u32 1, %s1859_s8 }
 0x2df   : > { %s1851_s12 = sadd.s32 %s7325_s0, %s1850_s25  ;;  %s7341_s4 = sld [smem:[#allocation6 + $0x28d]] }
 0x2e0   : > { %p1847_p2 = scmp.ne.f32.partialorder %s7325_s0, %s7325_s0  ;;  %s1861_s5 = sadd.s32 32767, %s1860_s9 }
 0x2e1   : > { %s1852_s21 = sand.u32 4294901760, %s1851_s12  ;;  %s1862_s15 = sadd.s32 %s7327_s10, %s1861_s5 }
 0x2e2   : > { %s1870_s14 = sshrl.u32 %s6087_s29, 16  ;;  %s12275_s21 = smov (%p1847_p2, %s1852_s21), 2143289344 }
 0x2e3   : > { %10970 = sst [smem:[#allocation170_spill]] %s12275_s21  ;;  %p1858_p4 = scmp.ne.f32.partialorder %s7327_s10, %s7327_s10 }
 0x2e4   : > { %s1871_s23 = sand.u32 1, %s1870_s14  ;;  %s1863_s30 = sand.u32 4294901760, %s1862_s15 }
 0x2e5   : > { %s1881_s22 = sshrl.u32 %s7341_s4, 16  ;;  %s6089_s27 = sld [smem:[#allocation6 + $0x28e]] }
 0x2e6   : > { %s1872_s8 = sadd.s32 32767, %s1871_s23  ;;  %s12277_s30 = smov (%p1858_p4, %s1863_s30), 2143289344 }
 0x2e7   : > { %10971 = sst [smem:[#allocation171_spill]] %s12277_s30  ;;  %s1882_s25 = sand.u32 1, %s1881_s22 }
 0x2e8   : > { %s1873_s2 = sadd.s32 %s6087_s29, %s1872_s8  ;;  %s7353_s0 = sld [smem:[#allocation6 + $0x28f]] }
 0x2e9   : > { %p1869_p6 = scmp.ne.f32.partialorder %s6087_s29, %s6087_s29  ;;  %s1883_s9 = sadd.s32 32767, %s1882_s25 }
 0x2ea   : > { %s1874_s12 = sand.u32 4294901760, %s1873_s2  ;;  %s1884_s21 = sadd.s32 %s7341_s4, %s1883_s9 }
 0x2eb   : > { %s1892_s5 = sshrl.u32 %s6089_s27, 16  ;;  %s12279_s12 = smov (%p1869_p6, %s1874_s12), 2143289344 }
 0x2ec   : > { %10972 = sst [smem:[#allocation172_spill]] %s12279_s12  ;;  %p1880_p10 = scmp.ne.f32.partialorder %s7341_s4, %s7341_s4 }
 0x2ed   : > { %s1893_s10 = sand.u32 1, %s1892_s5  ;;  %s1885_s15 = sand.u32 4294901760, %s1884_s21 }
 0x2ee   : > { %s1903_s14 = sshrl.u32 %s7353_s0, 16  ;;  %s6091_s23 = sld [smem:[#allocation6 + $0x290]] }
 0x2ef   : > { %s1894_s22 = sadd.s32 32767, %s1893_s10  ;;  %s12281_s15 = smov (%p1880_p10, %s1885_s15), 2143289344 }
 0x2f0   : > { %10973 = sst [smem:[#allocation173_spill]] %s12281_s15  ;;  %s1904_s8 = sand.u32 1, %s1903_s14 }
 0x2f1   : > { %s1895_s30 = sadd.s32 %s6089_s27, %s1894_s22  ;;  %s7363_s29 = sld [smem:[#allocation6 + $0x291]] }
 0x2f2   : > { %p1891_p5 = scmp.ne.f32.partialorder %s6089_s27, %s6089_s27  ;;  %s1905_s2 = sadd.s32 32767, %s1904_s8 }
 0x2f3   : > { %s1896_s25 = sand.u32 4294901760, %s1895_s30  ;;  %s1906_s12 = sadd.s32 %s7353_s0, %s1905_s2 }
 0x2f4   : > { %s1914_s9 = sshrl.u32 %s6091_s23, 16  ;;  %s12283_s25 = smov (%p1891_p5, %s1896_s25), 2143289344 }
 0x2f5   : > { %10974 = sst [smem:[#allocation174_spill]] %s12283_s25  ;;  %p1902_p11 = scmp.ne.f32.partialorder %s7353_s0, %s7353_s0 }
 0x2f6   : > { %s1915_s4 = sand.u32 1, %s1914_s9  ;;  %s1907_s21 = sand.u32 4294901760, %s1906_s12 }
 0x2f7   : > { %s1925_s5 = sshrl.u32 %s7363_s29, 16  ;;  %s6093_s10 = sld [smem:[#allocation6 + $0x292]] }
 0x2f8   : > { %s1916_s14 = sadd.s32 32767, %s1915_s4  ;;  %s12285_s21 = smov (%p1902_p11, %s1907_s21), 2143289344 }
 0x2f9   : > { %10975 = sst [smem:[#allocation175_spill]] %s12285_s21  ;;  %s1926_s22 = sand.u32 1, %s1925_s5 }
 0x2fa   : > { %s1917_s15 = sadd.s32 %s6091_s23, %s1916_s14  ;;  %s7373_s27 = sld [smem:[#allocation6 + $0x293]] }
 0x2fb   : > { %p1913_p3 = scmp.ne.f32.partialorder %s6091_s23, %s6091_s23  ;;  %s1927_s30 = sadd.s32 32767, %s1926_s22 }
 0x2fc   : > { %s1918_s8 = sand.u32 4294901760, %s1917_s15  ;;  %s1928_s25 = sadd.s32 %s7363_s29, %s1927_s30 }
 0x2fd   : > { %s1936_s2 = sshrl.u32 %s6093_s10, 16  ;;  %s7376_s17 = sld [smem:[#allocation6 + $0x30c]] }
 0x2fe   : > { %s12287_s8 = smov (%p1913_p3, %s1918_s8), 2143289344  ;;  %p1924_p7 = scmp.ne.f32.partialorder %s7363_s29, %s7363_s29 }
 0x2ff   : > { %10976 = sst [smem:[#allocation176_spill]] %s12287_s8  ;;  %s1937_s0 = sand.u32 1, %s1936_s2 }
 0x300   : > { %s1929_s12 = sand.u32 4294901760, %s1928_s25  ;;  %s1947_s9 = sshrl.u32 %s7373_s27, 16 }
 0x301   : > { %s1938_s4 = sadd.s32 32767, %s1937_s0  ;;  %s12289_s12 = smov (%p1924_p7, %s1929_s12), 2143289344 }
 0x302   : > { %10977 = sst [smem:[#allocation177_spill]] %s12289_s12  ;;  %s1948_s23 = sand.u32 1, %s1947_s9 }
 0x303   : > { %s1939_s15 = sadd.s32 %s6093_s10, %s1938_s4  ;;  %s1958_s5 = sshrl.u32 %s7376_s17, 16 }
 0x304   : > { %s6096_s14 = sld [smem:[#allocation6 + $0x30d]]  ;;  %p1935_p12 = scmp.ne.f32.partialorder %s6093_s10, %s6093_s10 }
 0x305   : > { %s1949_s22 = sadd.s32 32767, %s1948_s23  ;;  %s1940_s30 = sand.u32 4294901760, %s1939_s15 }
 0x306   : > { %s1959_s21 = sand.u32 1, %s1958_s5  ;;  %s1950_s8 = sadd.s32 %s7373_s27, %s1949_s22 }
 0x307   : > { %s12291_s30 = smov (%p1935_p12, %s1940_s30), 2143289344  ;;  %p1946_p0 = scmp.ne.f32.partialorder %s7373_s27, %s7373_s27 }
 0x308   : > { %10978 = sst [smem:[#allocation178_spill]] %s12291_s30  ;;  %s1960_s29 = sadd.s32 32767, %s1959_s21 }
 0x309   : > { %s1951_s25 = sand.u32 4294901760, %s1950_s8  ;;  %s6097_s0 = sld [smem:[#allocation6 + $0x30e]] }
 0x30a   : > { %s1969_s2 = sshrl.u32 %s6096_s14, 16  ;;  %s1961_s12 = sadd.s32 %s7376_s17, %s1960_s29 }
 0x30b   : > { %s12293_s25 = smov (%p1946_p0, %s1951_s25), 2143289344  ;;  %p1957_p1 = scmp.ne.f32.partialorder %s7376_s17, %s7376_s17 }
 0x30c   : > { %10979 = sst [smem:[#allocation179_spill]] %s12293_s25  ;;  %s1970_s9 = sand.u32 1, %s1969_s2 }
 0x30d   : > { %s1962_s4 = sand.u32 4294901760, %s1961_s12  ;;  %s6098_s10 = sld [smem:[#allocation6 + $0x30f]] }
 0x30e   : > { %s1971_s23 = sadd.s32 32767, %s1970_s9  ;;  %s12295_s4 = smov (%p1957_p1, %s1962_s4), 2143289344 }
 0x30f   : > { %10980 = sst [smem:[#allocation180_spill]] %s12295_s4  ;;  %s1980_s15 = sshrl.u32 %s6097_s0, 16 }
 0x310   : > { %s1972_s5 = sadd.s32 %s6096_s14, %s1971_s23  ;;  %s7398_s22 = sld [smem:[#allocation6 + $0x310]] }
 0x311   : > { %p1968_p2 = scmp.ne.f32.partialorder %s6096_s14, %s6096_s14  ;;  %s1981_s21 = sand.u32 1, %s1980_s15 }
 0x312   : > { %s1973_s27 = sand.u32 4294901760, %s1972_s5  ;;  %s1982_s29 = sadd.s32 32767, %s1981_s21 }
 0x313   : > { %s1991_s8 = sshrl.u32 %s6098_s10, 16  ;;  %s12297_s27 = smov (%p1968_p2, %s1973_s27), 2143289344 }
 0x314   : > { %10981 = sst [smem:[#allocation181_spill]] %s12297_s27  ;;  %s1992_s17 = sand.u32 1, %s1991_s8 }
 0x315   : > { %s1983_s2 = sadd.s32 %s6097_s0, %s1982_s29  ;;  %s6100_s9 = sld [smem:[#allocation6 + $0x311]] }
 0x316   : > { %s2002_s12 = sshrl.u32 %s7398_s22, 16  ;;  %p1979_p4 = scmp.ne.f32.partialorder %s6097_s0, %s6097_s0 }
 0x317   : > { %s1993_s4 = sadd.s32 32767, %s1992_s17  ;;  %s1984_s25 = sand.u32 4294901760, %s1983_s2 }
 0x318   : > { %s2003_s23 = sand.u32 1, %s2002_s12  ;;  %s1994_s30 = sadd.s32 %s6098_s10, %s1993_s4 }
 0x319   : > { %s12299_s25 = smov (%p1979_p4, %s1984_s25), 2143289344  ;;  %p1990_p6 = scmp.ne.f32.partialorder %s6098_s10, %s6098_s10 }
 0x31a   : > { %10982 = sst [smem:[#allocation182_spill]] %s12299_s25  ;;  %s2004_s14 = sadd.s32 32767, %s2003_s23 }
 0x31b   : > { %s1995_s15 = sand.u32 4294901760, %s1994_s30  ;;  %s2013_s5 = sshrl.u32 %s6100_s9, 16 }
 0x31c   : > { %s6101_s21 = sld [smem:[#allocation6 + $0x312]]  ;;  %s2005_s13 = sadd.s32 %s7398_s22, %s2004_s14 }
 0x31d   : > { %s12301_s15 = smov (%p1990_p6, %s1995_s15), 2143289344  ;;  %p2001_p10 = scmp.ne.f32.partialorder %s7398_s22, %s7398_s22 }
 0x31e   : > { %10983 = sst [smem:[#allocation183_spill]] %s12301_s15  ;;  %s2014_s8 = sand.u32 1, %s2013_s5 }
 0x31f   : > { %s2006_s29 = sand.u32 4294901760, %s2005_s13  ;;  %s6102_s27 = sld [smem:[#allocation6 + $0x313]] }
 0x320   : > { %s2015_s0 = sadd.s32 32767, %s2014_s8  ;;  %s12303_s29 = smov (%p2001_p10, %s2006_s29), 2143289344 }
 0x321   : > { %10984 = sst [smem:[#allocation184_spill]] %s12303_s29  ;;  %s2016_s4 = sadd.s32 %s6100_s9, %s2015_s0 }
 0x322   : > { %s2024_s17 = sshrl.u32 %s6101_s21, 16  ;;  %s7412_s2 = sld [smem:[#allocation6 + $0x38c]] }
 0x323   : > { %p2012_p5 = scmp.ne.f32.partialorder %s6100_s9, %s6100_s9  ;;  %s2025_s30 = sand.u32 1, %s2024_s17 }
 0x324   : > { %s2017_s10 = sand.u32 4294901760, %s2016_s4  ;;  %s2026_s23 = sadd.s32 32767, %s2025_s30 }
 0x325   : > { %s2035_s12 = sshrl.u32 %s6102_s27, 16  ;;  %s12305_s10 = smov (%p2012_p5, %s2017_s10), 2143289344 }
 0x326   : > { %10985 = sst [smem:[#allocation185_spill]] %s12305_s10  ;;  %s2036_s22 = sand.u32 1, %s2035_s12 }
 0x327   : > { %s2027_s14 = sadd.s32 %s6101_s21, %s2026_s23  ;;  %s6104_s5 = sld [smem:[#allocation6 + $0x38d]] }
 0x328   : > { %s2046_s13 = sshrl.u32 %s7412_s2, 16  ;;  %p2023_p11 = scmp.ne.f32.partialorder %s6101_s21, %s6101_s21 }
 0x329   : > { %s2037_s8 = sadd.s32 32767, %s2036_s22  ;;  %s2028_s29 = sand.u32 4294901760, %s2027_s14 }
 0x32a   : > { %s2047_s0 = sand.u32 1, %s2046_s13  ;;  %s2038_s15 = sadd.s32 %s6102_s27, %s2037_s8 }
 0x32b   : > { %s12307_s29 = smov (%p2023_p11, %s2028_s29), 2143289344  ;;  %p2034_p3 = scmp.ne.f32.partialorder %s6102_s27, %s6102_s27 }
 0x32c   : > { %10986 = sst [smem:[#allocation186_spill]] %s12307_s29  ;;  %s2048_s9 = sadd.s32 32767, %s2047_s0 }
 0x32d   : > { %s2039_s17 = sand.u32 4294901760, %s2038_s15  ;;  %s2057_s4 = sshrl.u32 %s6104_s5, 16 }
 0x32e   : > { %s6105_s30 = sld [smem:[#allocation6 + $0x38e]]  ;;  %s2049_s25 = sadd.s32 %s7412_s2, %s2048_s9 }
 0x32f   : > { %s12309_s17 = smov (%p2034_p3, %s2039_s17), 2143289344  ;;  %p2045_p7 = scmp.ne.f32.partialorder %s7412_s2, %s7412_s2 }
 0x330   : > { %10987 = sst [smem:[#allocation187_spill]] %s12309_s17  ;;  %s2058_s12 = sand.u32 1, %s2057_s4 }
 0x331   : > { %s2050_s23 = sand.u32 4294901760, %s2049_s25  ;;  %s6106_s10 = sld [smem:[#allocation6 + $0x38f]] }
 0x332   : > { %s2059_s21 = sadd.s32 32767, %s2058_s12  ;;  %s12311_s23 = smov (%p2045_p7, %s2050_s23), 2143289344 }
 0x333   : > { %10988 = sst [smem:[#allocation188_spill]] %s12311_s23  ;;  %s2060_s14 = sadd.s32 %s6104_s5, %s2059_s21 }
 0x334   : > { %s2068_s22 = sshrl.u32 %s6105_s30, 16  ;;  %s7426_s13 = sld [smem:[#allocation6 + $0x390]] }
 0x335   : > { %p2056_p12 = scmp.ne.f32.partialorder %s6104_s5, %s6104_s5  ;;  %s2069_s27 = sand.u32 1, %s2068_s22 }
 0x336   : > { %s2061_s15 = sand.u32 4294901760, %s2060_s14  ;;  %s2070_s0 = sadd.s32 32767, %s2069_s27 }
 0x337   : > { %s2079_s8 = sshrl.u32 %s6106_s10, 16  ;;  %s12313_s15 = smov (%p2056_p12, %s2061_s15), 2143289344 }
 0x338   : > { %10989 = sst [smem:[#allocation189_spill]] %s12313_s15  ;;  %s2080_s2 = sand.u32 1, %s2079_s8 }
 0x339   : > { %s2071_s9 = sadd.s32 %s6105_s30, %s2070_s0  ;;  %s7431_s4 = sld [smem:[#allocation6 + $0x391]] }
 0x33a   : > { %s2090_s25 = sshrl.u32 %s7426_s13, 16  ;;  %p2067_p0 = scmp.ne.f32.partialorder %s6105_s30, %s6105_s30 }
 0x33b   : > { %s2081_s12 = sadd.s32 32767, %s2080_s2  ;;  %s2072_s21 = sand.u32 4294901760, %s2071_s9 }
 0x33c   : > { %s2091_s23 = sand.u32 1, %s2090_s25  ;;  %s2082_s17 = sadd.s32 %s6106_s10, %s2081_s12 }
 0x33d   : > { %s7433_s5 = sld [smem:[#allocation6 + $0x392]]  ;;  %s12315_s21 = smov (%p2067_p0, %s2072_s21), 2143289344 }
 0x33e   : > { %10990 = sst [smem:[#allocation190_spill]] %s12315_s21  ;;  %p2078_p1 = scmp.ne.f32.partialorder %s6106_s10, %s6106_s10 }
 0x33f   : > { %s2092_s22 = sadd.s32 32767, %s2091_s23  ;;  %s2083_s14 = sand.u32 4294901760, %s2082_s17 }
 0x340   : > { %s2101_s27 = sshrl.u32 %s7431_s4, 16  ;;  %s2093_s8 = sadd.s32 %s7426_s13, %s2092_s22 }
 0x341   : > { %s12317_s14 = smov (%p2078_p1, %s2083_s14), 2143289344  ;;  %p2089_p2 = scmp.ne.f32.partialorder %s7426_s13, %s7426_s13 }
 0x342   : > { %10991 = sst [smem:[#allocation191_spill]] %s12317_s14  ;;  %s2102_s30 = sand.u32 1, %s2101_s27 }
 0x343   : > { %s2094_s0 = sand.u32 4294901760, %s2093_s8  ;;  %s2112_s2 = sshrl.u32 %s7433_s5, 16 }
 0x344   : > { %s7444_s9 = sld [smem:[#allocation6 + $0x393]]  ;;  %s2103_s25 = sadd.s32 32767, %s2102_s30 }
 0x345   : > { %s12319_s0 = smov (%p2089_p2, %s2094_s0), 2143289344  ;;  %s2113_s10 = sand.u32 1, %s2112_s2 }
 0x346   : > { %10992 = sst [smem:[#allocation192_spill]] %s12319_s0  ;;  %s2104_s23 = sadd.s32 %s7431_s4, %s2103_s25 }
 0x347   : > { %s7449_s17 = sld [smem:[#allocation6 + $0x32]]  ;;  %p2100_p4 = scmp.ne.f32.partialorder %s7431_s4, %s7431_s4 }
 0x348   : > { %s2114_s13 = sadd.s32 32767, %s2113_s10  ;;  %s2105_s12 = sand.u32 4294901760, %s2104_s23 }
 0x349   : > { %s2115_s27 = sadd.s32 %s7433_s5, %s2114_s13  ;;  %s12321_s12 = smov (%p2100_p4, %s2105_s12), 2143289344 }
 0x34a   : > { %s2123_s22 = sshrl.u32 %s7444_s9, 16  ;;  %10993 = sst [smem:[#allocation193_spill]] %s12321_s12 }
 0x34b   : > { %p2111_p6 = scmp.ne.f32.partialorder %s7433_s5, %s7433_s5  ;;  %s2124_s8 = sand.u32 1, %s2123_s22 }
 0x34c   : > { %s2116_s30 = sand.u32 4294901760, %s2115_s27  ;;  %s7460_s25 = sld [smem:[#allocation6 + $0xb2]] }
 0x34d   : > { %s2134_s2 = sshrl.u32 %s7449_s17, 16  ;;  %s2125_s4 = sadd.s32 32767, %s2124_s8 }
 0x34e   : > { %s12323_s30 = smov (%p2111_p6, %s2116_s30), 2143289344  ;;  %s2135_s10 = sand.u32 1, %s2134_s2 }
 0x34f   : > { %10994 = sst [smem:[#allocation194_spill]] %s12323_s30  ;;  %s2126_s13 = sadd.s32 %s7444_s9, %s2125_s4 }
 0x350   : > { %s7467_s0 = sld [smem:[#allocation6 + $0x132]]  ;;  %p2122_p10 = scmp.ne.f32.partialorder %s7444_s9, %s7444_s9 }
 0x351   : > { %s2136_s5 = sadd.s32 32767, %s2135_s10  ;;  %s2127_s27 = sand.u32 4294901760, %s2126_s13 }
 0x352   : > { %s2145_s14 = sshrl.u32 %s7460_s25, 16  ;;  %s2137_s2 = sadd.s32 %s7449_s17, %s2136_s5 }
 0x353   : > { %s7475_s30 = sld [smem:[#allocation6 + $0x1b2]]  ;;  %s12325_s27 = smov (%p2122_p10, %s2127_s27), 2143289344 }
 0x354   : > { %10995 = sst [smem:[#allocation195_spill]] %s12325_s27  ;;  %p2133_p5 = scmp.ne.f32.partialorder %s7449_s17, %s7449_s17 }
 0x355   : > { %s2146_s4 = sand.u32 1, %s2145_s14  ;;  %s2138_s10 = sand.u32 4294901760, %s2137_s2 }
 0x356   : > { %s2156_s13 = sshrl.u32 %s7467_s0, 16  ;;  %s2147_s12 = sadd.s32 32767, %s2146_s4 }
 0x357   : > { %s12327_s10 = smov (%p2133_p5, %s2138_s10), 2143289344  ;;  %s2157_s23 = sand.u32 1, %s2156_s13 }
 0x358   : > { %10996 = sst [smem:[#allocation196_spill]] %s12327_s10  ;;  %s2148_s21 = sadd.s32 %s7460_s25, %s2147_s12 }
 0x359   : > { %s2167_s17 = sshrl.u32 %s7475_s30, 16  ;;  %s7491_s14 = sld [smem:[#allocation6 + $0x232]] }
 0x35a   : > { %p2144_p11 = scmp.ne.f32.partialorder %s7460_s25, %s7460_s25  ;;  %s2158_s22 = sadd.s32 32767, %s2157_s23 }
 0x35b   : > { %s2149_s4 = sand.u32 4294901760, %s2148_s21  ;;  %s2168_s7 = sand.u32 1, %s2167_s17 }
 0x35c   : > { %s2159_s20 = sadd.s32 %s7467_s0, %s2158_s22  ;;  %s12329_s4 = smov (%p2144_p11, %s2149_s4), 2143289344 }
 0x35d   : > { %11001 = sst [smem:[#allocation197_spill]] %s12329_s4  ;;  %p2155_p3 = scmp.ne.f32.partialorder %s7467_s0, %s7467_s0 }
 0x35e   : > { %s2169_s18 = sadd.s32 32767, %s2168_s7  ;;  %s2160_s25 = sand.u32 4294901760, %s2159_s20 }
 0x35f   : > { %s2178_s26 = sshrl.u32 %s7491_s14, 16  ;;  %s7505_s8 = sld [smem:[#allocation6 + $0x2b2]] }
 0x360   : > { %s2170_s5 = sadd.s32 %s7475_s30, %s2169_s18  ;;  %s12331_s25 = smov (%p2155_p3, %s2160_s25), 2143289344 }
 0x361   : > { %11006 = sst [smem:[#allocation198_spill]] %s12331_s25  ;;  %p2166_p7 = scmp.ne.f32.partialorder %s7475_s30, %s7475_s30 }
 0x362   : > { %s2179_s22 = sand.u32 1, %s2178_s26  ;;  %s2171_s19 = sand.u32 4294901760, %s2170_s5 }
 0x363   : > { %s7515_s27 = sld [smem:[#allocation6 + $0x332]]  ;;  %s2180_s28 = sadd.s32 32767, %s2179_s22 }
 0x364   : > { %s12333_s19 = smov (%p2166_p7, %s2171_s19), 2143289344  ;;  %s2181_s26 = sadd.s32 %s7491_s14, %s2180_s28 }
 0x365   : > { %11010 = sst [smem:[#allocation199_spill]] %s12333_s19  ;;  %s2189_s25 = sshrl.u32 %s7505_s8, 16 }
 0x366   : > { %s7525_s7 = sld [smem:[#allocation6 + $0x3b2]]  ;;  %p2177_p12 = scmp.ne.f32.partialorder %s7491_s14, %s7491_s14 }
 0x367   : > { %s2190_s5 = sand.u32 1, %s2189_s25  ;;  %s2182_s22 = sand.u32 4294901760, %s2181_s26 }
 0x368   : > { %s2191_s11 = sadd.s32 32767, %s2190_s5  ;;  %s12335_s22 = smov (%p2177_p12, %s2182_s22), 2143289344 }
 0x369   : > { %s2200_s13 = sshrl.u32 %s7515_s27, 16  ;;  %11016 = sst [smem:[#allocation200_spill]] %s12335_s22 }
 0x36a   : > { %s2201_s30 = sand.u32 1, %s2200_s13  ;;  %s2192_s10 = sadd.s32 %s7505_s8, %s2191_s11 }
 0x36b   : > { %s7539_s25 = sld [smem:[#allocation6 + $0x14]]  ;;  %p2188_p0 = scmp.ne.f32.partialorder %s7505_s8, %s7505_s8 }
 0x36c   : > { %s2211_s14 = sshrl.u32 %s7525_s7, 16  ;;  %s2202_s19 = sadd.s32 32767, %s2201_s30 }
 0x36d   : > { %s2193_s5 = sand.u32 4294901760, %s2192_s10  ;;  %s2212_s4 = sand.u32 1, %s2211_s14 }
 0x36e   : > { %s2203_s18 = sadd.s32 %s7515_s27, %s2202_s19  ;;  %s12337_s5 = smov (%p2188_p0, %s2193_s5), 2143289344 }
 0x36f   : > { %11021 = sst [smem:[#allocation201_spill]] %s12337_s5  ;;  %p2199_p1 = scmp.ne.f32.partialorder %s7515_s27, %s7515_s27 }
 0x370   : > { %s2213_s23 = sadd.s32 32767, %s2212_s4  ;;  %s2204_s8 = sand.u32 4294901760, %s2203_s18 }
 0x371   : > { %s2222_s0 = sshrl.u32 %s7539_s25, 16  ;;  %s7553_s6 = sld [smem:[#allocation6 + $0x15]] }
 0x372   : > { %s2214_s28 = sadd.s32 %s7525_s7, %s2213_s23  ;;  %s12339_s8 = smov (%p2199_p1, %s2204_s8), 2143289344 }
 0x373   : > { %11026 = sst [smem:[#allocation202_spill]] %s12339_s8  ;;  %p2210_p2 = scmp.ne.f32.partialorder %s7525_s7, %s7525_s7 }
 0x374   : > { %s2223_s19 = sand.u32 1, %s2222_s0  ;;  %s2215_s2 = sand.u32 4294901760, %s2214_s28 }
 0x375   : > { %s7563_s5 = sld [smem:[#allocation6 + $0x16]]  ;;  %s2224_s12 = sadd.s32 32767, %s2223_s19 }
 0x376   : > { %s12341_s2 = smov (%p2210_p2, %s2215_s2), 2143289344  ;;  %s2225_s0 = sadd.s32 %s7539_s25, %s2224_s12 }
 0x377   : > { %11030 = sst [smem:[#allocation203_spill]] %s12341_s2  ;;  %s2233_s8 = sshrl.u32 %s7553_s6, 16 }
 0x378   : > { %s7573_s4 = sld [smem:[#allocation6 + $0x17]]  ;;  %p2221_p4 = scmp.ne.f32.partialorder %s7539_s25, %s7539_s25 }
 0x379   : > { %s2234_s28 = sand.u32 1, %s2233_s8  ;;  %s2226_s19 = sand.u32 4294901760, %s2225_s0 }
 0x37a   : > { %s2235_s20 = sadd.s32 32767, %s2234_s28  ;;  %s12343_s19 = smov (%p2221_p4, %s2226_s19), 2143289344 }
 0x37b   : > { %s2244_s22 = sshrl.u32 %s7563_s5, 16  ;;  %11036 = sst [smem:[#allocation204_spill]] %s12343_s19 }
 0x37c   : > { %s2245_s7 = sand.u32 1, %s2244_s22  ;;  %s2236_s11 = sadd.s32 %s7553_s6, %s2235_s20 }
 0x37d   : > { %s7587_s8 = sld [smem:[#allocation6 + $0x18]]  ;;  %p2232_p6 = scmp.ne.f32.partialorder %s7553_s6, %s7553_s6 }
 0x37e   : > { %s2255_s25 = sshrl.u32 %s7573_s4, 16  ;;  %s2246_s2 = sadd.s32 32767, %s2245_s7 }
 0x37f   : > { %s2237_s28 = sand.u32 4294901760, %s2236_s11  ;;  %s2256_s1 = sand.u32 1, %s2255_s25 }
 0x380   : > { %s2247_s23 = sadd.s32 %s7563_s5, %s2246_s2  ;;  %s12345_s28 = smov (%p2232_p6, %s2237_s28), 2143289344 }
 0x381   : > { %11041 = sst [smem:[#allocation205_spill]] %s12345_s28  ;;  %p2243_p10 = scmp.ne.f32.partialorder %s7563_s5, %s7563_s5 }
 0x382   : > { %s2257_s30 = sadd.s32 32767, %s2256_s1  ;;  %s2248_s6 = sand.u32 4294901760, %s2247_s23 }
 0x383   : > { %s2266_s19 = sshrl.u32 %s7587_s8, 16  ;;  %s7601_s9 = sld [smem:[#allocation6 + $0x19]] }
 0x384   : > { %s2258_s12 = sadd.s32 %s7573_s4, %s2257_s30  ;;  %s12347_s6 = smov (%p2243_p10, %s2248_s6), 2143289344 }
 0x385   : > { %11046 = sst [smem:[#allocation206_spill]] %s12347_s6  ;;  %p2254_p5 = scmp.ne.f32.partialorder %s7573_s4, %s7573_s4 }
 0x386   : > { %s2267_s2 = sand.u32 1, %s2266_s19  ;;  %s2259_s26 = sand.u32 4294901760, %s2258_s12 }
 0x387   : > { %s7611_s14 = sld [smem:[#allocation6 + $0x1a]]  ;;  %s2268_s18 = sadd.s32 32767, %s2267_s2 }
 0x388   : > { %s12349_s26 = smov (%p2254_p5, %s2259_s26), 2143289344  ;;  %s2269_s4 = sadd.s32 %s7587_s8, %s2268_s18 }
 0x389   : > { %11050 = sst [smem:[#allocation207_spill]] %s12349_s26  ;;  %s2277_s0 = sshrl.u32 %s7601_s9, 16 }
 0x38a   : > { %s7621_s1 = sld [smem:[#allocation6 + $0x1b]]  ;;  %p2265_p11 = scmp.ne.f32.partialorder %s7587_s8, %s7587_s8 }
 0x38b   : > { %s2278_s12 = sand.u32 1, %s2277_s0  ;;  %s2270_s2 = sand.u32 4294901760, %s2269_s4 }
 0x38c   : > { %s2279_s27 = sadd.s32 32767, %s2278_s12  ;;  %s12351_s2 = smov (%p2265_p11, %s2270_s2), 2143289344 }
 0x38d   : > { %s2288_s17 = sshrl.u32 %s7611_s14, 16  ;;  %11055 = sst [smem:[#allocation208_spill]] %s12351_s2 }
 0x38e   : > { %s2289_s19 = sand.u32 1, %s2288_s17  ;;  %s2280_s7 = sadd.s32 %s7601_s9, %s2279_s27 }
 0x38f   : > { %s7635_s0 = sld [smem:[#allocation6 + $0x94]]  ;;  %p2276_p3 = scmp.ne.f32.partialorder %s7601_s9, %s7601_s9 }
 0x390   : > { %s2299_s8 = sshrl.u32 %s7621_s1, 16  ;;  %s2290_s22 = sadd.s32 32767, %s2289_s19 }
 0x391   : > { %s2281_s12 = sand.u32 4294901760, %s2280_s7  ;;  %s2300_s18 = sand.u32 1, %s2299_s8 }
 0x392   : > { %s2291_s17 = sadd.s32 %s7611_s14, %s2290_s22  ;;  %s7642_s30 = sld [smem:[#allocation6 + $0x95]] }
 0x393   : > { %s12353_s12 = smov (%p2276_p3, %s2281_s12), 2143289344  ;;  %p2287_p7 = scmp.ne.f32.partialorder %s7611_s14, %s7611_s14 }
 0x394   : > { %11060 = sst [smem:[#allocation209_spill]] %s12353_s12  ;;  %s2301_s25 = sadd.s32 32767, %s2300_s18 }
 0x395   : > { %s2292_s21 = sand.u32 4294901760, %s2291_s17  ;;  %s2310_s23 = sshrl.u32 %s7635_s0, 16 }
 0x396   : > { %s2302_s8 = sadd.s32 %s7621_s1, %s2301_s25  ;;  %s12355_s21 = smov (%p2287_p7, %s2292_s21), 2143289344 }
 0x397   : > { %11065 = sst [smem:[#allocation210_spill]] %s12355_s21  ;;  %p2298_p12 = scmp.ne.f32.partialorder %s7621_s1, %s7621_s1 }
 0x398   : > { %s2311_s22 = sand.u32 1, %s2310_s23  ;;  %s2303_s14 = sand.u32 4294901760, %s2302_s8 }
 0x399   : > { %s2321_s6 = sshrl.u32 %s7642_s30, 16  ;;  %s7659_s28 = sld [smem:[#allocation6 + $0x96]] }
 0x39a   : > { %s2312_s7 = sadd.s32 32767, %s2311_s22  ;;  %s12357_s14 = smov (%p2298_p12, %s2303_s14), 2143289344 }
 0x39b   : > { %11069 = sst [smem:[#allocation211_spill]] %s12357_s14  ;;  %s2322_s4 = sand.u32 1, %s2321_s6 }
 0x39c   : > { %s2313_s23 = sadd.s32 %s7635_s0, %s2312_s7  ;;  %s7668_s5 = sld [smem:[#allocation6 + $0x97]] }
 0x39d   : > { %p2309_p0 = scmp.ne.f32.partialorder %s7635_s0, %s7635_s0  ;;  %s2323_s10 = sadd.s32 32767, %s2322_s4 }
 0x39e   : > { %s2314_s27 = sand.u32 4294901760, %s2313_s23  ;;  %s2324_s9 = sadd.s32 %s7642_s30, %s2323_s10 }
 0x39f   : > { %s2332_s14 = sshrl.u32 %s7659_s28, 16  ;;  %s12359_s27 = smov (%p2309_p0, %s2314_s27), 2143289344 }
 0x3a0   : > { %11075 = sst [smem:[#allocation212_spill]] %s12359_s27  ;;  %p2320_p1 = scmp.ne.f32.partialorder %s7642_s30, %s7642_s30 }
 0x3a1   : > { %s2333_s7 = sand.u32 1, %s2332_s14  ;;  %s2325_s0 = sand.u32 4294901760, %s2324_s9 }
 0x3a2   : > { %s2343_s12 = sshrl.u32 %s7668_s5, 16  ;;  %s7683_s20 = sld [smem:[#allocation6 + $0x98]] }
 0x3a3   : > { %s2334_s25 = sadd.s32 32767, %s2333_s7  ;;  %s12361_s0 = smov (%p2320_p1, %s2325_s0), 2143289344 }
 0x3a4   : > { %11079 = sst [smem:[#allocation213_spill]] %s12361_s0  ;;  %s2344_s17 = sand.u32 1, %s2343_s12 }
 0x3a5   : > { %s2335_s14 = sadd.s32 %s7659_s28, %s2334_s25  ;;  %s7692_s1 = sld [smem:[#allocation6 + $0x99]] }
 0x3a6   : > { %p2331_p2 = scmp.ne.f32.partialorder %s7659_s28, %s7659_s28  ;;  %s2345_s26 = sadd.s32 32767, %s2344_s17 }
 0x3a7   : > { %s2336_s8 = sand.u32 4294901760, %s2335_s14  ;;  %s2346_s19 = sadd.s32 %s7668_s5, %s2345_s26 }
 0x3a8   : > { %s2354_s0 = sshrl.u32 %s7683_s20, 16  ;;  %s12363_s8 = smov (%p2331_p2, %s2336_s8), 2143289344 }
 0x3a9   : > { %11085 = sst [smem:[#allocation214_spill]] %s12363_s8  ;;  %p2342_p4 = scmp.ne.f32.partialorder %s7668_s5, %s7668_s5 }
 0x3aa   : > { %s2355_s25 = sand.u32 1, %s2354_s0  ;;  %s2347_s28 = sand.u32 4294901760, %s2346_s19 }
 0x3ab   : > { %s2365_s11 = sshrl.u32 %s7692_s1, 16  ;;  %s7707_s21 = sld [smem:[#allocation6 + $0x9a]] }
 0x3ac   : > { %s2356_s10 = sadd.s32 32767, %s2355_s25  ;;  %s12365_s28 = smov (%p2342_p4, %s2347_s28), 2143289344 }
 0x3ad   : > { %11089 = sst [smem:[#allocation215_spill]] %s12365_s28  ;;  %s2366_s23 = sand.u32 1, %s2365_s11 }
 0x3ae   : > { %s2357_s0 = sadd.s32 %s7683_s20, %s2356_s10  ;;  %s7716_s30 = sld [smem:[#allocation6 + $0x9b]] }
 0x3af   : > { %p2353_p6 = scmp.ne.f32.partialorder %s7683_s20, %s7683_s20  ;;  %s2367_s18 = sadd.s32 32767, %s2366_s23 }
 0x3b0   : > { %s2358_s9 = sand.u32 4294901760, %s2357_s0  ;;  %s2368_s22 = sadd.s32 %s7692_s1, %s2367_s18 }
 0x3b1   : > { %s2376_s28 = sshrl.u32 %s7707_s21, 16  ;;  %s12367_s9 = smov (%p2353_p6, %s2358_s9), 2143289344 }
 0x3b2   : > { %11095 = sst [smem:[#allocation216_spill]] %s12367_s9  ;;  %p2364_p10 = scmp.ne.f32.partialorder %s7692_s1, %s7692_s1 }
 0x3b3   : > { %s2377_s10 = sand.u32 1, %s2376_s28  ;;  %s2369_s20 = sand.u32 4294901760, %s2368_s22 }
 0x3b4   : > { %s2387_s2 = sshrl.u32 %s7716_s30, 16  ;;  %s7731_s13 = sld [smem:[#allocation6 + $0x114]] }
 0x3b5   : > { %s2378_s25 = sadd.s32 32767, %s2377_s10  ;;  %s12369_s20 = smov (%p2364_p10, %s2369_s20), 2143289344 }
 0x3b6   : > { %11098 = sst [smem:[#allocation217_spill]] %s12369_s20  ;;  %s2388_s26 = sand.u32 1, %s2387_s2 }
 0x3b7   : > { %s2379_s1 = sadd.s32 %s7707_s21, %s2378_s25  ;;  %s7740_s5 = sld [smem:[#allocation6 + $0x115]] }
 0x3b8   : > { %p2375_p5 = scmp.ne.f32.partialorder %s7707_s21, %s7707_s21  ;;  %s2389_s4 = sadd.s32 32767, %s2388_s26 }
 0x3b9   : > { %s2380_s10 = sand.u32 4294901760, %s2379_s1  ;;  %s2390_s2 = sadd.s32 %s7716_s30, %s2389_s4 }
 0x3ba   : > { %s2398_s9 = sshrl.u32 %s7731_s13, 16  ;;  %s7748_s18 = sld [smem:[#allocation6 + $0x116]] }
 0x3bb   : > { %s12371_s10 = smov (%p2375_p5, %s2380_s10), 2143289344  ;;  %p2386_p11 = scmp.ne.f32.partialorder %s7716_s30, %s7716_s30 }
 0x3bc   : > { %11104 = sst [smem:[#allocation218_spill]] %s12371_s10  ;;  %s2399_s25 = sand.u32 1, %s2398_s9 }
 0x3bd   : > { %s2391_s26 = sand.u32 4294901760, %s2390_s2  ;;  %s2409_s1 = sshrl.u32 %s7740_s5, 16 }
 0x3be   : > { %s2400_s6 = sadd.s32 32767, %s2399_s25  ;;  %s12373_s26 = smov (%p2386_p11, %s2391_s26), 2143289344 }
 0x3bf   : > { %11108 = sst [smem:[#allocation219_spill]] %s12373_s26  ;;  %s2410_s11 = sand.u32 1, %s2409_s1 }
 0x3c0   : > { %s2401_s10 = sadd.s32 %s7731_s13, %s2400_s6  ;;  %s2420_s30 = sshrl.u32 %s7748_s18, 16 }
 0x3c1   : > { %s7764_s9 = sld [smem:[#allocation6 + $0x117]]  ;;  %p2397_p3 = scmp.ne.f32.partialorder %s7731_s13, %s7731_s13 }
 0x3c2   : > { %s2411_s17 = sadd.s32 32767, %s2410_s11  ;;  %s2402_s25 = sand.u32 4294901760, %s2401_s10 }
 0x3c3   : > { %s2421_s28 = sand.u32 1, %s2420_s30  ;;  %s2412_s0 = sadd.s32 %s7740_s5, %s2411_s17 }
 0x3c4   : > { %s12375_s25 = smov (%p2397_p3, %s2402_s25), 2143289344  ;;  %p2408_p7 = scmp.ne.f32.partialorder %s7740_s5, %s7740_s5 }
 0x3c5   : > { %11113 = sst [smem:[#allocation220_spill]] %s12375_s25  ;;  %s2422_s7 = sadd.s32 32767, %s2421_s28 }
 0x3c6   : > { %s2413_s13 = sand.u32 4294901760, %s2412_s0  ;;  %s7778_s23 = sld [smem:[#allocation6 + $0x118]] }
 0x3c7   : > { %s2431_s26 = sshrl.u32 %s7764_s9, 16  ;;  %s2423_s4 = sadd.s32 %s7748_s18, %s2422_s7 }
 0x3c8   : > { %s12377_s13 = smov (%p2408_p7, %s2413_s13), 2143289344  ;;  %p2419_p12 = scmp.ne.f32.partialorder %s7748_s18, %s7748_s18 }
 0x3c9   : > { %11118 = sst [smem:[#allocation221_spill]] %s12377_s13  ;;  %s2432_s17 = sand.u32 1, %s2431_s26 }
 0x3ca   : > { %s2424_s20 = sand.u32 4294901760, %s2423_s4  ;;  %s7788_s8 = sld [smem:[#allocation6 + $0x119]] }
 0x3cb   : > { %s2433_s12 = sadd.s32 32767, %s2432_s17  ;;  %s12379_s20 = smov (%p2419_p12, %s2424_s20), 2143289344 }
 0x3cc   : > { %11122 = sst [smem:[#allocation222_spill]] %s12379_s20  ;;  %s2442_s2 = sshrl.u32 %s7778_s23, 16 }
 0x3cd   : > { %s2434_s18 = sadd.s32 %s7764_s9, %s2433_s12  ;;  %s7798_s28 = sld [smem:[#allocation6 + $0x11a]] }
 0x3ce   : > { %p2430_p0 = scmp.ne.f32.partialorder %s7764_s9, %s7764_s9  ;;  %s2443_s4 = sand.u32 1, %s2442_s2 }
 0x3cf   : > { %s2435_s17 = sand.u32 4294901760, %s2434_s18  ;;  %s2444_s25 = sadd.s32 32767, %s2443_s4 }
 0x3d0   : > { %s2453_s1 = sshrl.u32 %s7788_s8, 16  ;;  %s12381_s17 = smov (%p2430_p0, %s2435_s17), 2143289344 }
 0x3d1   : > { %11128 = sst [smem:[#allocation223_spill]] %s12381_s17  ;;  %s2454_s26 = sand.u32 1, %s2453_s1 }
 0x3d2   : > { %s2445_s20 = sadd.s32 %s7778_s23, %s2444_s25  ;;  %s7812_s2 = sld [smem:[#allocation6 + $0x11b]] }
 0x3d3   : > { %s2464_s9 = sshrl.u32 %s7798_s28, 16  ;;  %p2441_p1 = scmp.ne.f32.partialorder %s7778_s23, %s7778_s23 }
 0x3d4   : > { %s2455_s6 = sadd.s32 32767, %s2454_s26  ;;  %s2446_s4 = sand.u32 4294901760, %s2445_s20 }
 0x3d5   : > { %s2465_s21 = sand.u32 1, %s2464_s9  ;;  %s2456_s7 = sadd.s32 %s7788_s8, %s2455_s6 }
 0x3d6   : > { %s12383_s4 = smov (%p2441_p1, %s2446_s4), 2143289344  ;;  %p2452_p2 = scmp.ne.f32.partialorder %s7788_s8, %s7788_s8 }
 0x3d7   : > { %11133 = sst [smem:[#allocation224_spill]] %s12383_s4  ;;  %s2466_s11 = sadd.s32 32767, %s2465_s21 }
 0x3d8   : > { %s2457_s23 = sand.u32 4294901760, %s2456_s7  ;;  %s2475_s17 = sshrl.u32 %s7812_s2, 16 }
 0x3d9   : > { %s7826_s14 = sld [smem:[#allocation6 + $0x1c]]  ;;  %s2467_s12 = sadd.s32 %s7798_s28, %s2466_s11 }
 0x3da   : > { %s12385_s23 = smov (%p2452_p2, %s2457_s23), 2143289344  ;;  %p2463_p4 = scmp.ne.f32.partialorder %s7798_s28, %s7798_s28 }
 0x3db   : > { %11138 = sst [smem:[#allocation225_spill]] %s12385_s23  ;;  %s2476_s6 = sand.u32 1, %s2475_s17 }
 0x3dc   : > { %s2468_s13 = sand.u32 4294901760, %s2467_s12  ;;  %s7836_s30 = sld [smem:[#allocation6 + $0x1d]] }
 0x3dd   : > { %s2477_s0 = sadd.s32 32767, %s2476_s6  ;;  %s12387_s13 = smov (%p2463_p4, %s2468_s13), 2143289344 }
 0x3de   : > { %11142 = sst [smem:[#allocation226_spill]] %s12387_s13  ;;  %s2478_s28 = sadd.s32 %s7812_s2, %s2477_s0 }
 0x3df   : > { %s2486_s18 = sshrl.u32 %s7826_s14, 16  ;;  %s7846_s21 = sld [smem:[#allocation6 + $0x1e]] }
 0x3e0   : > { %p2474_p6 = scmp.ne.f32.partialorder %s7812_s2, %s7812_s2  ;;  %s2487_s12 = sand.u32 1, %s2486_s18 }
 0x3e1   : > { %s2479_s6 = sand.u32 4294901760, %s2478_s28  ;;  %s2488_s4 = sadd.s32 32767, %s2487_s12 }
 0x3e2   : > { %s2497_s19 = sshrl.u32 %s7836_s30, 16  ;;  %s12389_s6 = smov (%p2474_p6, %s2479_s6), 2143289344 }
 0x3e3   : > { %11148 = sst [smem:[#allocation227_spill]] %s12389_s6  ;;  %s2498_s17 = sand.u32 1, %s2497_s19 }
 0x3e4   : > { %s2489_s13 = sadd.s32 %s7826_s14, %s2488_s4  ;;  %s7860_s18 = sld [smem:[#allocation6 + $0x1f]] }
 0x3e5   : > { %s2508_s2 = sshrl.u32 %s7846_s21, 16  ;;  %p2485_p10 = scmp.ne.f32.partialorder %s7826_s14, %s7826_s14 }
 0x3e6   : > { %s2499_s1 = sadd.s32 32767, %s2498_s17  ;;  %s2490_s12 = sand.u32 4294901760, %s2489_s13 }
 0x3e7   : > { %s2509_s27 = sand.u32 1, %s2508_s2  ;;  %s2500_s11 = sadd.s32 %s7836_s30, %s2499_s1 }
 0x3e8   : > { %s12391_s12 = smov (%p2485_p10, %s2490_s12), 2143289344  ;;  %p2496_p5 = scmp.ne.f32.partialorder %s7836_s30, %s7836_s30 }
 0x3e9   : > { %11153 = sst [smem:[#allocation228_spill]] %s12391_s12  ;;  %s2510_s26 = sadd.s32 32767, %s2509_s27 }
 0x3ea   : > { %s2501_s14 = sand.u32 4294901760, %s2500_s11  ;;  %s2519_s6 = sshrl.u32 %s7860_s18, 16 }
 0x3eb   : > { %s7874_s5 = sld [smem:[#allocation6 + $0x20]]  ;;  %s2511_s0 = sadd.s32 %s7846_s21, %s2510_s26 }
 0x3ec   : > { %s12393_s14 = smov (%p2496_p5, %s2501_s14), 2143289344  ;;  %p2507_p11 = scmp.ne.f32.partialorder %s7846_s21, %s7846_s21 }
 0x3ed   : > { %11158 = sst [smem:[#allocation229_spill]] %s12393_s14  ;;  %s2520_s1 = sand.u32 1, %s2519_s6 }
 0x3ee   : > { %s2512_s23 = sand.u32 4294901760, %s2511_s0  ;;  %s7884_s9 = sld [smem:[#allocation6 + $0x21]] }
 0x3ef   : > { %s2521_s7 = sadd.s32 32767, %s2520_s1  ;;  %s12395_s23 = smov (%p2507_p11, %s2512_s23), 2143289344 }
 0x3f0   : > { %11162 = sst [smem:[#allocation230_spill]] %s12395_s23  ;;  %s2522_s21 = sadd.s32 %s7860_s18, %s2521_s7 }
 0x3f1   : > { %s2530_s28 = sshrl.u32 %s7874_s5, 16  ;;  %s7894_s27 = sld [smem:[#allocation6 + $0x22]] }
 0x3f2   : > { %p2518_p3 = scmp.ne.f32.partialorder %s7860_s18, %s7860_s18  ;;  %s2531_s0 = sand.u32 1, %s2530_s28 }
 0x3f3   : > { %s2523_s1 = sand.u32 4294901760, %s2522_s21  ;;  %s2532_s8 = sadd.s32 32767, %s2531_s0 }
 0x3f4   : > { %s2541_s10 = sshrl.u32 %s7884_s9, 16  ;;  %s12397_s1 = smov (%p2518_p3, %s2523_s1), 2143289344 }
 0x3f5   : > { %11167 = sst [smem:[#allocation231_spill]] %s12397_s1  ;;  %s2542_s6 = sand.u32 1, %s2541_s10 }
 0x3f6   : > { %s2533_s17 = sadd.s32 %s7874_s5, %s2532_s8  ;;  %s7908_s28 = sld [smem:[#allocation6 + $0x23]] }
 0x3f7   : > { %s2552_s18 = sshrl.u32 %s7894_s27, 16  ;;  %p2529_p7 = scmp.ne.f32.partialorder %s7874_s5, %s7874_s5 }
 0x3f8   : > { %s2543_s19 = sadd.s32 32767, %s2542_s6  ;;  %s2534_s0 = sand.u32 4294901760, %s2533_s17 }
 0x3f9   : > { %s2553_s7 = sand.u32 1, %s2552_s18  ;;  %s2544_s10 = sadd.s32 %s7884_s9, %s2543_s19 }
 0x3fa   : > { %s7915_s2 = sld [smem:[#allocation6 + $0x9c]]  ;;  %s12399_s0 = smov (%p2529_p7, %s2534_s0), 2143289344 }
 0x3fb   : > { %11173 = sst [smem:[#allocation232_spill]] %s12399_s0  ;;  %p2540_p12 = scmp.ne.f32.partialorder %s7884_s9, %s7884_s9 }
 0x3fc   : > { %s2554_s14 = sadd.s32 32767, %s2553_s7  ;;  %s2545_s6 = sand.u32 4294901760, %s2544_s10 }
 0x3fd   : > { %s2563_s17 = sshrl.u32 %s7908_s28, 16  ;;  %s2555_s19 = sadd.s32 %s7894_s27, %s2554_s14 }
 0x3fe   : > { %s12401_s6 = smov (%p2540_p12, %s2545_s6), 2143289344  ;;  %p2551_p0 = scmp.ne.f32.partialorder %s7894_s27, %s7894_s27 }
 0x3ff   : > { %11178 = sst [smem:[#allocation233_spill]] %s12401_s6  ;;  %s2564_s4 = sand.u32 1, %s2563_s17 }
 0x400   : > { %s2556_s9 = sand.u32 4294901760, %s2555_s19  ;;  %s2574_s10 = sshrl.u32 %s7915_s2, 16 }
 0x401   : > { %s2565_s23 = sadd.s32 32767, %s2564_s4  ;;  %s12403_s9 = smov (%p2551_p0, %s2556_s9), 2143289344 }
 0x402   : > { %11181 = sst [smem:[#allocation234_spill]] %s12403_s9  ;;  %s2575_s25 = sand.u32 1, %s2574_s10 }
 0x403   : > { %s2566_s27 = sadd.s32 %s7908_s28, %s2565_s23  ;;  %s7940_s0 = sld [smem:[#allocation6 + $0x9d]] }
 0x404   : > { %s11184_s19 = sld [smem:[#allocation22_spill]]  ;;  %p2562_p1 = scmp.ne.f32.partialorder %s7908_s28, %s7908_s28 }
 0x405   : > { %s2576_s13 = sadd.s32 32767, %s2575_s25  ;;  %s2567_s5 = sand.u32 4294901760, %s2566_s27 }
 0x406   : > { %p2573_p2 = scmp.ne.f32.partialorder %s7915_s2, %s7915_s2  ;;  %s2577_s23 = sadd.s32 %s7915_s2, %s2576_s13 }
 0x407   : > { %s7949_s6 = sld [smem:[#allocation6 + $0x9e]]  ;;  %s12405_s5 = smov (%p2562_p1, %s2567_s5), 2143289344 }
 0x408   : > { %11186 = sst [smem:[#allocation235_spill]] %s12405_s5  ;;  %s11187_s14 = sshrl.u32 %s11975_s24, 16 }
 0x409   : > { %s3076_s28 = sshll.u32 %s11187_s14, 16  ;;  %s11189_s11 = sshrl.u32 %s11977_s3, 16 }
 0x40a   : > { %s3084_s25 = sshll.u32 %s11189_s11, 16  ;;  %s2578_s30 = sand.u32 4294901760, %s2577_s23  ;;  %v7961_v0 = vld [vmem:[%s11184_s19] sm:$0x3]  ;;  %v7964_v1 = vld [vmem:[%s11184_s19 + $0x2] sm:$0x3] }
 0x40b   : > { %s2585_s10 = sshrl.u32 %s7940_s0, 16  ;;  %s11192_s13 = smov %s11187_s14  ;;  %v3072_v2 = vpack.c.bf16 %v7961_v0, %v7961_v0  ;;  %v3073_v3 = vpack.c.bf16 %v7964_v1, %v7964_v1  ;;  %v7988_v6 = vld [vmem:[%s11184_s19 + $0x4] sm:$0x3]  ;;  %v8022_v17 = vld [vmem:[%s11184_s19 + $0x6] sm:$0x3] }
 0x40c   : > { %s3077_s26 = sor.u32 %s3076_s28, %s11192_s13  ;;  %s11194_s20 = smov %s11189_s11  ;;  %v3074_v11 = vpack.c.bf16 %v7988_v6, %v7988_v6  ;;  %v3075_v20 = vpack.c.bf16 %v8022_v17, %v8022_v17 }
 0x40d   : > { %s3085_s5 = sor.u32 %s3084_s25, %s11194_s20  ;;  %s12407_s30 = smov (%p2573_p2, %s2578_s30), 2143289344  ;;  %v3078_v4 = vstv %s3077_s26  ;;  %v7990_v7 = vunpack.c.l.bf16 %v3072_v2  ;;  %v7992_v9 = vunpack.c.l.bf16 %v3073_v3 }
 0x40e   : > { %11195 = sst [smem:[#allocation236_spill]] %s12407_s30  ;;  %s2586_s14 = sand.u32 1, %s2585_s10  ;;  %v3086_v5 = vstv %s3085_s5  ;;  %v3081_v8 = vunpack.c.l.bf16 %v3078_v4  ;;  %v8017_v15 = vunpack.c.l.bf16 %v3074_v11  ;;  %v8054_v29 = vunpack.c.l.bf16 %v3075_v20 }
 0x40f   : > { %s2596_s24 = sshrl.u32 %s7949_s6, 16  ;;  %s11198_s2 = sshrl.u32 %s11979_s16, 16  ;;  %v3089_v10 = vunpack.c.l.bf16 %v3086_v5 }
 0x410   : > { %s3092_s28 = sshll.u32 %s11198_s2, 16  ;;  %s2587_s10 = sadd.s32 32767, %s2586_s14  ;;  %v3082_v12 = vmul.f32 %v3081_v8, %v7990_v7 }
 0x411   : > { %s2597_s11 = sand.u32 1, %s2596_s24  ;;  %s11199_s5 = smov %s11198_s2  ;;  %v3090_v13 = vmul.f32 %v3089_v10, %v7992_v9 }
 0x412   : > { %s3093_s20 = sor.u32 %s3092_s28, %s11199_s5  ;;  %s2588_s2 = sadd.s32 %s7940_s0, %s2587_s10  ;;  %v3083_v18 = vpack.c.bf16 %v3082_v12, %v3082_v12 }
 0x413   : > { %s2598_s4 = sadd.s32 32767, %s2597_s11  ;;  %p2584_p4 = scmp.ne.f32.partialorder %s7940_s0, %s7940_s0  ;;  %v3094_v14 = vstv %s3093_s20  ;;  %v3091_v19 = vpack.c.bf16 %v3090_v13, %v3090_v13 }
 0x414   : > { %s8004_s14 = sld [smem:[#allocation6 + $0x2c]]  ;;  %s2589_s16 = sand.u32 4294901760, %s2588_s2  ;;  %v3097_v16 = vunpack.c.l.bf16 %v3094_v14  ;;  %v3108_v22 = vunpack.c.l.bf16 %v3083_v18 }
 0x415   : > { %s8008_s28 = sld [smem:[#allocation6 + $0x2d]]  ;;  %s2599_s10 = sadd.s32 %s7949_s6, %s2598_s4  ;;  %v3109_v23 = vunpack.c.l.bf16 %v3091_v19 }
 0x416   : > { %s8011_s11 = sld [smem:[#allocation6 + $0x2e]]  ;;  %p2595_p6 = scmp.ne.f32.partialorder %s7949_s6, %s7949_s6  ;;  %v3098_v21 = vmul.f32 %v3097_v16, %v8017_v15 }
 0x417   : > { %s8015_s0 = sld [smem:[#allocation6 + $0x9f]]  ;;  %s12409_s16 = smov (%p2584_p4, %s2589_s16), 2143289344  ;;  %v3110_v33 = vadd.f32 %v3109_v23, %v3108_v22 }
 0x418   : > { %11201 = sst [smem:[#allocation237_spill]] %s12409_s16  ;;  %s2600_s5 = sand.u32 4294901760, %s2599_s10  ;;  %v3099_v28 = vpack.c.bf16 %v3098_v21, %v3098_v21 }
 0x419   : > { %s11202_s20 = sld [smem:[#allocation23_spill]]  ;;  %s12411_s5 = smov (%p2595_p6, %s2600_s5), 2143289344  ;;  %v3111_v44 = vpack.c.bf16 %v3110_v33, %v3110_v33 }
 0x41a   : > { %s8024_s2 = sld [smem:[#allocation6 + $0x2f]]  ;;  %v3033_v24 = vstv %s8004_s14  ;;  %v3112_v40 = vunpack.c.l.bf16 %v3099_v28 }
 0x41b   : > { %s8027_s26 = sld [smem:[#allocation6 + $0xac]]  ;;  %v3035_v25 = vstv %s8008_s28  ;;  %v3034_v30 = vmul.f32 %v3033_v24, %v7961_v0  ;;  %v3116_v60 = vunpack.c.l.bf16 %v3111_v44 }
 0x41c   : > { %s8030_s3 = sld [smem:[#allocation6 + $0xad]]  ;;  %v3037_v26 = vstv %s8011_s11  ;;  %v3036_v31 = vmul.f32 %v7964_v1, %v3035_v25 }
 0x41d   : > { %11205 = sst [smem:[#allocation23_spill]] %s12411_s5  ;;  %v3038_v34 = vmul.f32 %v7988_v6, %v3037_v26  ;;  %s2607_s23 = sshrl.u32 %s8015_s0, 16 }
 0x41e   : > { %s8040_s10 = sld [smem:[#allocation6 + $0xae]]  ;;  %v3041_v41 = vadd.f32 %v3036_v31, %v3034_v30  ;;  %p2606_p10 = scmp.ne.f32.partialorder %s8015_s0, %s8015_s0 }
 0x41f   : > { %s11206_s25 = sld [smem:[#allocation52_spill]]  ;;  %s11207_s15 = sshrl.u32 %s11202_s20, 16 }
 0x420   : > { %s3100_s24 = sshll.u32 %s11207_s15, 16  ;;  %s8047_s29 = sld [smem:[#allocation6 + $0xaf]]  ;;  %v3039_v27 = vstv %s8024_s2 }
 0x421   : > { %s11209_s6 = smov %s11207_s15  ;;  %s11210_s7 = sld [smem:[#allocation24_spill]]  ;;  %v3040_v35 = vmul.f32 %v8022_v17, %v3039_v27  ;;  %v3046_v37 = vstv %s8027_s26 }
 0x422   : > { %s3101_s27 = sor.u32 %s3100_s24, %s11209_s6  ;;  %s8056_s14 = sld [smem:[#allocation6 + $0x12c]]  ;;  %v3048_v38 = vstv %s8030_s3  ;;  %v3047_v46 = vmul.f32 %v3046_v37, %v7961_v0 }
 0x423   : > { %v3102_v32 = vstv %s3101_s27  ;;  %s8063_s24 = sld [smem:[#allocation6 + $0x12d]]  ;;  %v3042_v45 = vadd.f32 %v3040_v35, %v3038_v34  ;;  %v3049_v49 = vmul.f32 %v7964_v1, %v3048_v38 }
 0x424   : > { %s11212_s20 = sld [smem:[#allocation25_spill]]  ;;  %v3105_v36 = vunpack.c.l.bf16 %v3102_v32  ;;  %v3050_v42 = vstv %s8040_s10 }
 0x425   : > { %s11211_s15 = sshrl.u32 %s11206_s25, 16  ;;  %s8067_s6 = sld [smem:[#allocation6 + $0x12e]]  ;;  %v3051_v53 = vmul.f32 %v7988_v6, %v3050_v42  ;;  %v8114_v62 = vadd.f32 %v3042_v45, %v3041_v41  ;;  %v8116_v63 = vadd.f32 %v3049_v49, %v3047_v46 }
 0x426   : > { %s3120_s28 = sshll.u32 %s11211_s15, 16  ;;  %v3106_v39 = vmul.f32 %v3105_v36, %v8054_v29  ;;  %s11216_s4 = sld [smem:[#allocation26_spill]]  ;;  %v3052_v43 = vstv %s8047_s29 }
 0x427   : > { %s11214_s27 = sshrl.u32 %s11210_s7, 16  ;;  %s8076_s11 = sor.u32 %s3120_s28, %s11211_s15  ;;  %v3053_v54 = vmul.f32 %v8022_v17, %v3052_v43 }
 0x428   : > { %s3131_s8 = sshll.u32 %s11214_s27, 16  ;;  %s11215_s22 = smov %s11214_s27  ;;  %v3107_v47 = vpack.c.bf16 %v3106_v39, %v3106_v39  ;;  %v3122_v50 = vstv %s8076_s11  ;;  %v3059_v56 = vstv %s8056_s14 }
 0x429   : > { %s3132_s13 = sor.u32 %s3131_s8, %s11215_s22  ;;  %s11217_s18 = sld [smem:[#allocation27_spill]]  ;;  %v3061_v59 = vstv %s8063_s24  ;;  %v8108_v61 = vunpack.c.l.bf16 %v3122_v50  ;;  %v8124_v4 = vadd.f32 %v3053_v54, %v3051_v53  ;;  %v8127_v5 = vmul.f32 %v3059_v56, %v7961_v0 }
 0x42a   : > { %s11218_s26 = sshrl.u32 %s11212_s20, 16  ;;  %v3133_v48 = vstv %s3132_s13  ;;  %s11220_s22 = sld [smem:[#allocation28_spill]]  ;;  %v3113_v55 = vunpack.c.l.bf16 %v3107_v47  ;;  %v8139_v11 = vmul.f32 %v7964_v1, %v3061_v59 }
 0x42b   : > { %s3138_s27 = sshll.u32 %s11218_s26, 16  ;;  %s11219_s25 = smov %s11218_s26  ;;  %v3135_v51 = vunpack.c.l.bf16 %v3133_v48  ;;  %v3063_v8 = vstv %s8067_s6 }
 0x42c   : > { %s3139_s7 = sor.u32 %s3138_s27, %s11219_s25  ;;  %s11221_s29 = sshrl.u32 %s11216_s4, 16  ;;  %v3114_v2 = vadd.f32 %v3113_v55, %v3112_v40  ;;  %v8149_v1 = vmul.f32 %v7988_v6, %v3063_v8 }
 0x42d   : > { %v3140_v52 = vstv %s3139_s7  ;;  %s3145_s8 = sshll.u32 %s11221_s29, 16  ;;  %s11223_s28 = sld [smem:[#allocation53_spill]]  ;;  %v3136_v57 = vmul.f32 %v3135_v51, %v7990_v7 }
 0x42e   : > { %s8095_s26 = sand.u32 1, %s2607_s23  ;;  %s8097_s3 = sld [smem:[#allocation6 + $0x12f]]  ;;  %v3142_v58 = vunpack.c.l.bf16 %v3140_v52  ;;  %v3115_v0 = vpack.c.bf16 %v3114_v2, %v3114_v2 }
 0x42f   : > { %s11222_s10 = sshrl.u32 %s11217_s18, 16  ;;  %s11225_s13 = sld [smem:[#allocation29_spill]]  ;;  %v3137_v3 = vpack.c.bf16 %v3136_v57, %v3136_v57 }
 0x430   : > { %s3152_s15 = sshll.u32 %s11222_s10, 16  ;;  %s11226_s11 = smov %s11221_s29  ;;  %v3143_v10 = vmul.f32 %v3142_v58, %v7992_v9  ;;  %v3117_v19 = vunpack.c.l.bf16 %v3115_v0 }
 0x431   : > { %s3146_s20 = sor.u32 %s3145_s8, %s11226_s11  ;;  %s11227_s27 = sshrl.u32 %s11220_s22, 16  ;;  %v3159_v18 = vunpack.c.l.bf16 %v3137_v3 }
 0x432   : > { %s3182_s25 = sshll.u32 %s11227_s27, 16  ;;  %s11228_s23 = sld [smem:[#allocation30_spill]]  ;;  %v3147_v12 = vstv %s3146_s20  ;;  %v3144_v14 = vpack.c.bf16 %v3143_v10, %v3143_v10  ;;  %v3118_v25 = vadd.f32 %v3117_v19, %v3116_v60 }
 0x433   : > { %s11229_s7 = smov %s11222_s10  ;;  %s11230_s10 = sshrl.u32 %s11223_s28, 16  ;;  %v3149_v16 = vunpack.c.l.bf16 %v3147_v12 }
 0x434   : > { %11224 = sst [smem:[#allocation52_spill]] %s8097_s3  ;;  %s3153_s29 = sor.u32 %s3152_s15, %s11229_s7  ;;  %v3065_v22 = vstv %s8097_s3  ;;  %v3160_v6 = vunpack.c.l.bf16 %v3144_v14  ;;  %v3119_v34 = vpack.c.bf16 %v3118_v25, %v3118_v25 }
 0x435   : > { %s3171_s2 = sshll.u32 %s11230_s10, 16  ;;  %s11231_s4 = smov %s11227_s27  ;;  %v3154_v13 = vstv %s3153_s29  ;;  %v3150_v23 = vmul.f32 %v3149_v16, %v8017_v15 }
 0x436   : > { %s8120_s14 = sor.u32 %s3182_s25, %s11231_s4  ;;  %s11232_s8 = sshrl.u32 %s11225_s13, 16  ;;  %v3156_v17 = vunpack.c.l.bf16 %v3154_v13  ;;  %v3161_v32 = vadd.f32 %v3160_v6, %v3159_v18  ;;  %v3124_v42 = vunpack.c.l.bf16 %v3119_v34 }
 0x437   : > { %s3189_s24 = sshll.u32 %s11232_s8, 16  ;;  %s11233_s18 = sld [smem:[#allocation31_spill]]  ;;  %v3184_v20 = vstv %s8120_s14  ;;  %v3151_v30 = vpack.c.bf16 %v3150_v23, %v3150_v23 }
 0x438   : > { %s11235_s11 = smov %s11232_s8  ;;  %s11236_s7 = sshrl.u32 %s11228_s23, 16  ;;  %v3157_v24 = vmul.f32 %v3156_v17, %v8054_v29  ;;  %v3186_v27 = vunpack.c.l.bf16 %v3184_v20  ;;  %v3162_v38 = vpack.c.bf16 %v3161_v32, %v3161_v32  ;;  %v3126_v50 = vadd.f32 %v8108_v61, %v3124_v42 }
 0x439   : > { %s3190_s27 = sor.u32 %s3189_s24, %s11235_s11  ;;  %s3196_s10 = sshll.u32 %s11236_s7, 16  ;;  %v3163_v39 = vunpack.c.l.bf16 %v3151_v30 }
 0x43a   : > { %s2609_s22 = sadd.s32 32767, %s8095_s26  ;;  %s8136_s25 = sld [smem:[#allocation6 + $0xa0]]  ;;  %v3191_v21 = vstv %s3190_s27  ;;  %v3158_v31 = vpack.c.bf16 %v3157_v24, %v3157_v24  ;;  %v3187_v35 = vmul.f32 %v3186_v27, %v7990_v7  ;;  %v3167_v47 = vunpack.c.l.bf16 %v3162_v38 }
 0x43b   : > { %s11239_s13 = sshrl.u32 %s11223_s28, 16  ;;  %s11241_s20 = smov %s11236_s7  ;;  %v3193_v28 = vunpack.c.l.bf16 %v3191_v21  ;;  %v3129_v58 = vmax.f32 %v3126_v50, 0.0 }
 0x43c   : > { %s8143_s8 = sor.u32 %s3171_s2, %s11239_s13  ;;  %s3197_s29 = sor.u32 %s3196_s10, %s11241_s20  ;;  %v3164_v40 = vunpack.c.l.bf16 %v3158_v31  ;;  %v3188_v43 = vpack.c.bf16 %v3187_v35, %v3187_v35 }
 0x43d   : > { %s11240_s26 = sshrl.u32 %s11233_s18, 16  ;;  %s11242_s12 = sld [smem:[#allocation54_spill]]  ;;  %v3173_v26 = vstv %s8143_s8  ;;  %v3198_v33 = vstv %s3197_s29  ;;  %v3194_v36 = vmul.f32 %v3193_v28, %v7992_v9  ;;  %v8223_v20 = vpack.c.bf16 %v3129_v58, %v3129_v58 }
 0x43e   : > { %s3203_s24 = sshll.u32 %s11240_s26, 16  ;;  %s8156_s17 = sadd.s32 %s8015_s0, %s2609_s22  ;;  %v3200_v37 = vunpack.c.l.bf16 %v3198_v33  ;;  %v3165_v46 = vadd.f32 %v3164_v40, %v3163_v39  ;;  %v8186_v48 = vunpack.c.l.bf16 %v3173_v26  ;;  %v3210_v52 = vunpack.c.l.bf16 %v3188_v43 }
 0x43f   : > { %s11243_s28 = sld [smem:[#allocation32_spill]]  ;;  %s11244_s23 = smov %s11240_s26  ;;  %v3195_v44 = vpack.c.bf16 %v3194_v36, %v3194_v36 }
 0x440   : > { %s3204_s14 = sor.u32 %s3203_s24, %s11244_s23  ;;  %s11245_s27 = sld [smem:[#allocation33_spill]]  ;;  %v3201_v45 = vmul.f32 %v3200_v37, %v8017_v15  ;;  %v3166_v54 = vpack.c.bf16 %v3165_v46, %v3165_v46 }
 0x441   : > { %s11246_s10 = sld [smem:[#allocation34_spill]]  ;;  %v3205_v41 = vstv %s3204_s14  ;;  %s2618_s14 = sshrl.u32 %s8136_s25, 16  ;;  %v3211_v53 = vunpack.c.l.bf16 %v3195_v44 }
 0x442   : > { %s11249_s18 = sld [smem:[#allocation35_spill]]  ;;  %v3207_v49 = vunpack.c.l.bf16 %v3205_v41  ;;  %v3202_v51 = vpack.c.bf16 %v3201_v45, %v3201_v45  ;;  %v3168_v2 = vunpack.c.l.bf16 %v3166_v54  ;;  %p2617_p5 = scmp.ne.f32.partialorder %s8136_s25, %s8136_s25 }
 0x443   : > { %s11247_s22 = sshrl.u32 %s11242_s12, 16  ;;  %s11254_s11 = sld [smem:[#allocation55_spill]]  ;;  %v3212_v59 = vadd.f32 %v3211_v53, %v3210_v52 }
 0x444   : > { %s3222_s13 = sshll.u32 %s11247_s22, 16  ;;  %s11255_s15 = sld [smem:[#allocation204_spill]]  ;;  %v3208_v55 = vmul.f32 %v3207_v49, %v8054_v29  ;;  %v3214_v60 = vunpack.c.l.bf16 %v3202_v51  ;;  %v3169_v16 = vadd.f32 %v3168_v2, %v3167_v47 }
 0x445   : > { %s11248_s26 = sshrl.u32 %s11243_s28, 16  ;;  %s11252_s2 = sshrl.u32 %s11243_s28, 16  ;;  %v3213_v0 = vpack.c.bf16 %v3212_v59, %v3212_v59 }
 0x446   : > { %s3233_s20 = sshll.u32 %s11248_s26, 16  ;;  %s11250_s8 = sshrl.u32 %s11245_s27, 16  ;;  %v3209_v3 = vpack.c.bf16 %v3208_v55, %v3208_v55  ;;  %v3170_v6 = vpack.c.bf16 %v3169_v16, %v3169_v16 }
 0x447   : > { %s3240_s24 = sshll.u32 %s11250_s8, 16  ;;  %s11251_s29 = sshrl.u32 %s11246_s10, 16  ;;  %v3218_v26 = vunpack.c.l.bf16 %v3213_v0 }
 0x448   : > { %s3247_s23 = sshll.u32 %s11251_s29, 16  ;;  %s8181_s26 = sor.u32 %s3222_s13, %s11247_s22  ;;  %v3215_v17 = vunpack.c.l.bf16 %v3209_v3  ;;  %v3175_v33 = vunpack.c.l.bf16 %v3170_v6 }
 0x449   : > { %s3234_s7 = sor.u32 %s3233_s20, %s11252_s2  ;;  %s11253_s8 = sshrl.u32 %s11249_s18, 16  ;;  %v3224_v56 = vstv %s8181_s26 }
 0x44a   : > { %s3254_s29 = sshll.u32 %s11253_s8, 16  ;;  %s11256_s12 = sshrl.u32 %s11245_s27, 16  ;;  %v3235_v57 = vstv %s3234_s7  ;;  %v8213_v12 = vunpack.c.l.bf16 %v3224_v56  ;;  %v3216_v25 = vadd.f32 %v3215_v17, %v3214_v60  ;;  %v3177_v41 = vadd.f32 %v8186_v48, %v3175_v33 }
 0x44b   : > { %s3241_s28 = sor.u32 %s3240_s24, %s11256_s12  ;;  %s11257_s2 = sshrl.u32 %s11246_s10, 16  ;;  %v3237_v61 = vunpack.c.l.bf16 %v3235_v57 }
 0x44c   : > { %s3248_s13 = sor.u32 %s3247_s23, %s11257_s2  ;;  %s11258_s20 = sand.u32 4294901760, %s8156_s17  ;;  %v3242_v8 = vstv %s3241_s28  ;;  %v3217_v34 = vpack.c.bf16 %v3216_v25, %v3216_v25  ;;  %v3180_v48 = vmax.f32 %v3177_v41, 0.0 }
 0x44d   : > { %s12413_s20 = smov (%p2606_p10, %s11258_s20), 2143289344  ;;  %s11260_s22 = sld [smem:[#allocation36_spill]]  ;;  %v3249_v10 = vstv %s3248_s13  ;;  %v3238_v13 = vmul.f32 %v3237_v61, %v7990_v7  ;;  %v3244_v14 = vunpack.c.l.bf16 %v3242_v8 }
 0x44e   : > { %11259 = sst [smem:[#allocation24_spill]] %s12413_s20  ;;  %s11263_s27 = sshrl.u32 %s11249_s18, 16  ;;  %v3251_v18 = vunpack.c.l.bf16 %v3249_v10  ;;  %v3219_v42 = vunpack.c.l.bf16 %v3217_v34  ;;  %v8276_v10 = vpack.c.bf16 %v3180_v48, %v3180_v48 }
 0x44f   : > { %s11261_s8 = sld [smem:[#allocation37_spill]]  ;;  %s3255_s24 = sor.u32 %s3254_s29, %s11263_s27  ;;  %v3239_v21 = vpack.c.bf16 %v3238_v13, %v3238_v13  ;;  %v3245_v23 = vmul.f32 %v3244_v14, %v7992_v9 }
 0x450   : > { %s11262_s21 = sld [smem:[#allocation205_spill]]  ;;  %s11264_s10 = sshrl.u32 %s11254_s11, 16  ;;  %v3256_v19 = vstv %s3255_s24  ;;  %v3252_v27 = vmul.f32 %v3251_v18, %v8017_v15  ;;  %v3220_v50 = vadd.f32 %v3219_v42, %v3218_v26 }
 0x451   : > { %s3273_s23 = sshll.u32 %s11264_s10, 16  ;;  %s8211_s26 = sand.u32 1, %s2618_s14  ;;  %v3258_v24 = vunpack.c.l.bf16 %v3256_v19  ;;  %v3246_v28 = vpack.c.bf16 %v3245_v23, %v3245_v23  ;;  %v3261_v31 = vunpack.c.l.bf16 %v3239_v21 }
 0x452   : > { %s11266_s7 = sld [smem:[#allocation38_spill]]  ;;  %s11268_s28 = smov %s11264_s10  ;;  %v3253_v35 = vpack.c.bf16 %v3252_v27, %v3252_v27  ;;  %v3221_v57 = vpack.c.bf16 %v3220_v50, %v3220_v50 }
 0x453   : > { %s11265_s0 = sshrl.u32 %s11260_s22, 16  ;;  %s8221_s14 = sor.u32 %s3273_s23, %s11268_s28  ;;  %v3259_v30 = vmul.f32 %v3258_v24, %v8054_v29  ;;  %v3262_v38 = vunpack.c.l.bf16 %v3246_v28 }
 0x454   : > { %s3284_s12 = sshll.u32 %s11265_s0, 16  ;;  %s11269_s13 = sld [smem:[#allocation39_spill]]  ;;  %v3275_v32 = vstv %s8221_s14  ;;  %v3265_v43 = vunpack.c.l.bf16 %v3253_v35  ;;  %v3226_v0 = vunpack.c.l.bf16 %v3221_v57 }
 0x455   : > { %s11267_s18 = sshrl.u32 %s11261_s8, 16  ;;  %s11270_s27 = sld [smem:[#allocation206_spill]]  ;;  %v3260_v37 = vpack.c.bf16 %v3259_v30, %v3259_v30  ;;  %v3263_v45 = vadd.f32 %v3262_v38, %v3261_v31  ;;  %v8264_v58 = vunpack.c.l.bf16 %v3275_v32 }
 0x456   : > { %s3291_s29 = sshll.u32 %s11267_s18, 16  ;;  %s11271_s10 = smov %s11265_s0  ;;  %v3228_v21 = vadd.f32 %v8213_v12, %v3226_v0 }
 0x457   : > { %s3285_s0 = sor.u32 %s3284_s12, %s11271_s10  ;;  %s2620_s17 = sadd.s32 32767, %s8211_s26  ;;  %v3266_v46 = vunpack.c.l.bf16 %v3260_v37  ;;  %v3264_v53 = vpack.c.bf16 %v3263_v45, %v3263_v45 }
 0x458   : > { %s11272_s18 = sshrl.u32 %s11266_s7, 16  ;;  %s11273_s11 = sld [smem:[#allocation207_spill]]  ;;  %v3286_v36 = vstv %s3285_s0  ;;  %v3231_v12 = vmax.f32 %v3228_v21, 0.0 }
 0x459   : > { %s3298_s2 = sshll.u32 %s11272_s18, 16  ;;  %s11274_s24 = sshrl.u32 %s11261_s8, 16  ;;  %v3288_v39 = vunpack.c.l.bf16 %v3286_v36  ;;  %v3267_v54 = vadd.f32 %v3266_v46, %v3265_v43  ;;  %v3269_v2 = vunpack.c.l.bf16 %v3264_v53 }
 0x45a   : > { %s3292_s23 = sor.u32 %s3291_s29, %s11274_s24  ;;  %s8234_s28 = sld [smem:[#allocation6 + $0xa1]]  ;;  %v8308_v37 = vpack.c.bf16 %v3231_v12, %v3231_v12 }
 0x45b   : > { %s11275_s22 = sld [smem:[#allocation208_spill]]  ;;  %s11276_s12 = sshrl.u32 %s11269_s13, 16  ;;  %v3293_v40 = vstv %s3292_s23  ;;  %v3289_v47 = vmul.f32 %v3288_v39, %v7990_v7  ;;  %v3268_v61 = vpack.c.bf16 %v3267_v54, %v3267_v54 }
 0x45c   : > { %s3305_s26 = sshll.u32 %s11276_s12, 16  ;;  %s3299_s6 = sor.u32 %s3298_s2, %s11272_s18  ;;  %v3295_v44 = vunpack.c.l.bf16 %v3293_v40 }
 0x45d   : > { %s11277_s29 = sld [smem:[#allocation56_spill]]  ;;  %s8245_s24 = sadd.s32 %s8136_s25, %s2620_s17  ;;  %v3300_v49 = vstv %s3299_s6  ;;  %v3290_v55 = vpack.c.bf16 %v3289_v47, %v3289_v47  ;;  %v3270_v16 = vunpack.c.l.bf16 %v3268_v61 }
 0x45e   : > { %s11278_s4 = sld [smem:[#allocation40_spill]]  ;;  %s11279_s0 = smov %s11276_s12  ;;  %v3296_v51 = vmul.f32 %v3295_v44, %v7992_v9  ;;  %v3302_v52 = vunpack.c.l.bf16 %v3300_v49 }
 0x45f   : > { %s3306_s7 = sor.u32 %s3305_s26, %s11279_s0  ;;  %s11280_s2 = sld [smem:[#allocation41_spill]]  ;;  %v3312_v8 = vunpack.c.l.bf16 %v3290_v55  ;;  %v3271_v25 = vadd.f32 %v3270_v16, %v3269_v2 }
 0x460   : > { %s11281_s17 = sld [smem:[#allocation42_spill]]  ;;  %v3307_v56 = vstv %s3306_s7  ;;  %v3297_v59 = vpack.c.bf16 %v3296_v51, %v3296_v51  ;;  %v3303_v60 = vmul.f32 %v3302_v52, %v8017_v15  ;;  %p2628_p11 = scmp.ne.f32.partialorder %s8234_s28, %s8234_s28 }
 0x461   : > { %s11284_s13 = sld [smem:[#allocation43_spill]]  ;;  %v3309_v3 = vunpack.c.l.bf16 %v3307_v56  ;;  %v3272_v33 = vpack.c.bf16 %v3271_v25, %v3271_v25 }
 0x462   : > { %s11289_s5 = sld [smem:[#allocation44_spill]]  ;;  %v3304_v13 = vpack.c.bf16 %v3303_v60, %v3303_v60  ;;  %v3313_v14 = vunpack.c.l.bf16 %v3297_v59 }
 0x463   : > { %s11282_s12 = sshrl.u32 %s11277_s29, 16  ;;  %s11290_s16 = sld [smem:[#allocation209_spill]]  ;;  %v3310_v17 = vmul.f32 %v3309_v3, %v8054_v29  ;;  %v3277_v41 = vunpack.c.l.bf16 %v3272_v33 }
 0x464   : > { %s3324_s18 = sshll.u32 %s11282_s12, 16  ;;  %s11283_s8 = sshrl.u32 %s11278_s4, 16  ;;  %v3314_v23 = vadd.f32 %v3313_v14, %v3312_v8  ;;  %v3316_v24 = vunpack.c.l.bf16 %v3304_v13 }
 0x465   : > { %s3335_s10 = sshll.u32 %s11283_s8, 16  ;;  %s11285_s6 = sshrl.u32 %s11280_s2, 16  ;;  %v3311_v26 = vpack.c.bf16 %v3310_v17, %v3310_v17  ;;  %v3279_v48 = vadd.f32 %v8264_v58, %v3277_v41 }
 0x466   : > { %s3342_s26 = sshll.u32 %s11285_s6, 16  ;;  %s11286_s0 = sshrl.u32 %s11281_s17, 16  ;;  %v3315_v30 = vpack.c.bf16 %v3314_v23, %v3314_v23 }
 0x467   : > { %s3349_s8 = sshll.u32 %s11286_s0, 16  ;;  %s8269_s14 = sor.u32 %s3324_s18, %s11282_s12  ;;  %v3317_v34 = vunpack.c.l.bf16 %v3311_v26  ;;  %v3282_v57 = vmax.f32 %v3279_v48, 0.0 }
 0x468   : > { %s11287_s23 = sshrl.u32 %s11278_s4, 16  ;;  %s2629_s6 = sshrl.u32 %s8234_s28, 16  ;;  %v3326_v18 = vstv %s8269_s14  ;;  %v3320_v45 = vunpack.c.l.bf16 %v3315_v30 }
 0x469   : > { %s3336_s7 = sor.u32 %s3335_s10, %s11287_s23  ;;  %s11288_s0 = sshrl.u32 %s11284_s13, 16  ;;  %v8310_v38 = vunpack.c.l.bf16 %v3326_v18  ;;  %v3318_v42 = vadd.f32 %v3317_v34, %v3316_v24  ;;  %v8363_v26 = vpack.c.bf16 %v3282_v57, %v3282_v57 }
 0x46a   : > { %s3356_s20 = sshll.u32 %s11288_s0, 16  ;;  %s11291_s29 = sshrl.u32 %s11280_s2, 16  ;;  %v3337_v19 = vstv %s3336_s7 }
 0x46b   : > { %s3343_s18 = sor.u32 %s3342_s26, %s11291_s29  ;;  %s11292_s4 = sshrl.u32 %s11281_s17, 16  ;;  %v3339_v6 = vunpack.c.l.bf16 %v3337_v19  ;;  %v3319_v50 = vpack.c.bf16 %v3318_v42, %v3318_v42 }
 0x46c   : > { %s3350_s10 = sor.u32 %s3349_s8, %s11292_s4  ;;  %s11293_s23 = sand.u32 4294901760, %s8245_s24  ;;  %v3344_v27 = vstv %s3343_s18 }
 0x46d   : > { %s12415_s23 = smov (%p2617_p5, %s11293_s23), 2143289344  ;;  %s11295_s12 = sld [smem:[#allocation57_spill]]  ;;  %v3351_v28 = vstv %s3350_s10  ;;  %v3340_v31 = vmul.f32 %v3339_v6, %v7990_v7  ;;  %v3346_v32 = vunpack.c.l.bf16 %v3344_v27  ;;  %v3321_v58 = vunpack.c.l.bf16 %v3319_v50 }
 0x46e   : > { %11294 = sst [smem:[#allocation25_spill]] %s12415_s23  ;;  %s11298_s2 = sshrl.u32 %s11284_s13, 16  ;;  %v3353_v35 = vunpack.c.l.bf16 %v3351_v28 }
 0x46f   : > { %s11296_s0 = sld [smem:[#allocation45_spill]]  ;;  %s3357_s17 = sor.u32 %s3356_s20, %s11298_s2  ;;  %v3341_v39 = vpack.c.bf16 %v3340_v31, %v3340_v31  ;;  %v3347_v40 = vmul.f32 %v3346_v32, %v7992_v9  ;;  %v3322_v0 = vadd.f32 %v3321_v58, %v3320_v45 }
 0x470   : > { %s11297_s30 = sld [smem:[#allocation210_spill]]  ;;  %s11299_s26 = sshrl.u32 %s11289_s5, 16  ;;  %v3358_v36 = vstv %s3357_s17  ;;  %v3354_v43 = vmul.f32 %v3353_v35, %v8017_v15 }
 0x471   : > { %s3386_s24 = sshll.u32 %s11299_s26, 16  ;;  %s8297_s8 = sand.u32 1, %s2629_s6  ;;  %v3360_v44 = vunpack.c.l.bf16 %v3358_v36  ;;  %v3348_v46 = vpack.c.bf16 %v3347_v40, %v3347_v40  ;;  %v3363_v47 = vunpack.c.l.bf16 %v3341_v39  ;;  %v3323_v23 = vpack.c.bf16 %v3322_v0, %v3322_v0 }
 0x472   : > { %s11300_s14 = sld [smem:[#allocation46_spill]]  ;;  %s11304_s18 = smov %s11299_s26  ;;  %v3355_v51 = vpack.c.bf16 %v3354_v43, %v3354_v43 }
 0x473   : > { %s11301_s7 = sshrl.u32 %s11295_s12, 16  ;;  %s11303_s6 = sld [smem:[#allocation211_spill]]  ;;  %v3361_v52 = vmul.f32 %v3360_v44, %v8054_v29  ;;  %v3364_v53 = vunpack.c.l.bf16 %v3348_v46  ;;  %v3328_v30 = vunpack.c.l.bf16 %v3323_v23 }
 0x474   : > { %s3375_s13 = sshll.u32 %s11301_s7, 16  ;;  %s3387_s10 = sor.u32 %s3386_s24, %s11304_s18  ;;  %v3367_v60 = vunpack.c.l.bf16 %v3355_v51 }
 0x475   : > { %s11302_s20 = sshrl.u32 %s11296_s0, 16  ;;  %s2631_s2 = sadd.s32 32767, %s8297_s8  ;;  %v3388_v49 = vstv %s3387_s10  ;;  %v3362_v59 = vpack.c.bf16 %v3361_v52, %v3361_v52  ;;  %v3365_v61 = vadd.f32 %v3364_v53, %v3363_v47  ;;  %v3330_v40 = vadd.f32 %v8310_v38, %v3328_v30 }
 0x476   : > { %s3393_s29 = sshll.u32 %s11302_s20, 16  ;;  %s11305_s26 = sld [smem:[#allocation47_spill]]  ;;  %v3390_v55 = vunpack.c.l.bf16 %v3388_v49 }
 0x477   : > { %s11308_s5 = sshrl.u32 %s11295_s12, 16  ;;  %s11309_s24 = sshrl.u32 %s11296_s0, 16  ;;  %v3368_v13 = vunpack.c.l.bf16 %v3362_v59  ;;  %v3366_v17 = vpack.c.bf16 %v3365_v61, %v3365_v61  ;;  %v3333_v49 = vmax.f32 %v3330_v40, 0.0 }
 0x478   : > { %s11307_s7 = sshrl.u32 %s11300_s14, 16  ;;  %s8318_s17 = sor.u32 %s3375_s13, %s11308_s5  ;;  %v3391_v2 = vmul.f32 %v3390_v55, %v7990_v7 }
 0x479   : > { %s3400_s20 = sshll.u32 %s11307_s7, 16  ;;  %s3394_s8 = sor.u32 %s3393_s29, %s11309_s24  ;;  %v3377_v54 = vstv %s8318_s17  ;;  %v3369_v24 = vadd.f32 %v3368_v13, %v3367_v60  ;;  %v3371_v27 = vunpack.c.l.bf16 %v3366_v17  ;;  %v8403_v59 = vpack.c.bf16 %v3333_v49, %v3333_v49 }
 0x47a   : > { %s11311_s9 = sld [smem:[#allocation58_spill]]  ;;  %s11312_s12 = sshrl.u32 %s11300_s14, 16  ;;  %v3395_v56 = vstv %s3394_s8  ;;  %v8348_v14 = vunpack.c.l.bf16 %v3377_v54  ;;  %v3392_v18 = vpack.c.bf16 %v3391_v2, %v3391_v2 }
 0x47b   : > { %s3401_s0 = sor.u32 %s3400_s20, %s11312_s12  ;;  %s11313_s13 = sld [smem:[#allocation48_spill]]  ;;  %v3397_v3 = vunpack.c.l.bf16 %v3395_v56  ;;  %v3370_v31 = vpack.c.bf16 %v3369_v24, %v3369_v24  ;;  %v8422_v24 = vunpack.c.l.bf16 %v8223_v20 }
 0x47c   : > { %s11310_s7 = sshrl.u32 %s11305_s26, 16  ;;  %s8333_s29 = sadd.s32 %s8234_s28, %s2631_s2  ;;  %v3402_v8 = vstv %s3401_s0  ;;  %v3414_v12 = vunpack.c.l.bf16 %v3392_v18 }
 0x47d   : > { %s3407_s4 = sshll.u32 %s11310_s7, 16  ;;  %s11314_s5 = sld [smem:[#allocation49_spill]]  ;;  %v3404_v16 = vunpack.c.l.bf16 %v3402_v8  ;;  %v3398_v19 = vmul.f32 %v3397_v3, %v7992_v9  ;;  %v3372_v41 = vunpack.c.l.bf16 %v3370_v31 }
 0x47e   : > { %s11315_s10 = smov %s11310_s7  ;;  %s11317_s2 = sld [smem:[#allocation50_spill]] }
 0x47f   : > { %s3408_s24 = sor.u32 %s3407_s4, %s11315_s10  ;;  %s8346_s18 = sld [smem:[#allocation6 + $0xa2]]  ;;  %v3405_v6 = vmul.f32 %v3404_v16, %v8017_v15  ;;  %v3399_v28 = vpack.c.bf16 %v3398_v19, %v3398_v19  ;;  %v3373_v38 = vadd.f32 %v3372_v41, %v3371_v27 }
 0x480   : > { %s11316_s7 = sshrl.u32 %s11311_s9, 16  ;;  %s11320_s4 = sld [smem:[#allocation213_spill]]  ;;  %v3409_v21 = vstv %s3408_s24 }
 0x481   : > { %s3426_s14 = sshll.u32 %s11316_s7, 16  ;;  %s11318_s20 = sshrl.u32 %s11313_s13, 16  ;;  %v3411_v25 = vunpack.c.l.bf16 %v3409_v21  ;;  %v3406_v32 = vpack.c.bf16 %v3405_v6, %v3405_v6  ;;  %v3415_v34 = vunpack.c.l.bf16 %v3399_v28  ;;  %v3374_v55 = vpack.c.bf16 %v3373_v38, %v3373_v38 }
 0x482   : > { %s3437_s12 = sshll.u32 %s11318_s20, 16  ;;  %s11321_s26 = sld [smem:[#allocation51_spill]]  ;;  %v8431_v28 = vunpack.c.l.bf16 %v8276_v10 }
 0x483   : > { %s11319_s17 = sshrl.u32 %s11314_s5, 16  ;;  %s11322_s0 = sld [smem:[#allocation214_spill]]  ;;  %v3412_v33 = vmul.f32 %v3411_v25, %v8054_v29  ;;  %v3418_v43 = vunpack.c.l.bf16 %v3406_v32  ;;  %v3416_v44 = vadd.f32 %v3415_v34, %v3414_v12  ;;  %v3379_v61 = vunpack.c.l.bf16 %v3374_v55 }
 0x484   : > { %s3444_s23 = sshll.u32 %s11319_s17, 16  ;;  %s11323_s10 = smov %s11316_s7 }
 0x485   : > { %s8353_s7 = sor.u32 %s3426_s14, %s11323_s10  ;;  %s11324_s20 = sshrl.u32 %s11317_s2, 16  ;;  %v3413_v42 = vpack.c.bf16 %v3412_v33, %v3412_v33  ;;  %v3417_v51 = vpack.c.bf16 %v3416_v44, %v3416_v44  ;;  %v3381_v17 = vadd.f32 %v8348_v14, %v3379_v61 }
 0x486   : > { %s3451_s17 = sshll.u32 %s11324_s20, 16  ;;  %s11325_s8 = sshrl.u32 %s11313_s13, 16  ;;  %v3428_v35 = vstv %s8353_s7 }
 0x487   : > { %s3438_s1 = sor.u32 %s3437_s12, %s11325_s8  ;;  %s11326_s3 = sshrl.u32 %s11314_s5, 16  ;;  %v3419_v48 = vunpack.c.l.bf16 %v3413_v42  ;;  %v8393_v57 = vunpack.c.l.bf16 %v3428_v35  ;;  %v3384_v14 = vmax.f32 %v3381_v17, 0.0  ;;  %v8440_v35 = vunpack.c.l.bf16 %v8308_v37 }
 0x488   : > { %s3445_s19 = sor.u32 %s3444_s23, %s11326_s3  ;;  %s11327_s9 = sld [smem:[#allocation215_spill]]  ;;  %v3439_v36 = vstv %s3438_s1 }
 0x489   : > { %s11328_s14 = sshrl.u32 %s11321_s26, 16  ;;  %s11329_s25 = sld [smem:[#allocation216_spill]]  ;;  %v3446_v39 = vstv %s3445_s19  ;;  %v3441_v45 = vunpack.c.l.bf16 %v3439_v36  ;;  %v3420_v56 = vadd.f32 %v3419_v48, %v3418_v43  ;;  %v3385_v32 = vpack.c.bf16 %v3384_v14, %v3384_v14 }
 0x48a   : > { %s3458_s10 = sshll.u32 %s11328_s14, 16  ;;  %s11330_s13 = smov %s11324_s20  ;;  %v3448_v46 = vunpack.c.l.bf16 %v3446_v39  ;;  %v8453_v43 = vunpack.c.l.bf16 %v8363_v26  ;;  %v8465_v26 = vunpack.c.l.bf16 %v8403_v59 }
 0x48b   : > { %s3452_s5 = sor.u32 %s3451_s17, %s11330_s13  ;;  %s11331_s3 = sand.u32 4294901760, %s8333_s29  ;;  %v3442_v52 = vmul.f32 %v3441_v45, %v7990_v7  ;;  %v3421_v2 = vpack.c.bf16 %v3420_v56, %v3420_v56 }
 0x48c   : > { %s12417_s3 = smov (%p2628_p11, %s11331_s3), 2143289344  ;;  %s11333_s23 = sld [smem:[#allocation59_spill]]  ;;  %v3453_v47 = vstv %s3452_s5  ;;  %v3449_v53 = vmul.f32 %v3448_v46, %v7992_v9 }
 0x48d   : > { %11332 = sst [smem:[#allocation26_spill]] %s12417_s3  ;;  %s11336_s2 = sshrl.u32 %s11321_s26, 16  ;;  %v3455_v50 = vunpack.c.l.bf16 %v3453_v47  ;;  %v3443_v7 = vpack.c.bf16 %v3442_v52, %v3442_v52  ;;  %v3423_v18 = vunpack.c.l.bf16 %v3421_v2 }
 0x48e   : > { %s11334_s12 = sld [smem:[#allocation217_spill]]  ;;  %s3459_s29 = sor.u32 %s3458_s10, %s11336_s2  ;;  %v3450_v9 = vpack.c.bf16 %v3449_v53, %v3449_v53  ;;  %v8472_v53 = vunpack.c.l.bf16 %v3385_v32 }
 0x48f   : > { %s11335_s14 = sld [smem:[#allocation218_spill]]  ;;  %s11339_s13 = sshrl.u32 %s11255_s15, 16  ;;  %v3460_v54 = vstv %s3459_s29  ;;  %v3456_v58 = vmul.f32 %v3455_v50, %v8017_v15  ;;  %v3422_v15 = vunpack.c.l.bf16 %v3417_v51  ;;  %v3465_v0 = vunpack.c.l.bf16 %v3443_v7 }
 0x490   : > { %s11338_s19 = sld [smem:[#allocation219_spill]]  ;;  %s3488_s8 = sshll.u32 %s11339_s13, 16  ;;  %v3462_v60 = vunpack.c.l.bf16 %v3460_v54  ;;  %v3466_v13 = vunpack.c.l.bf16 %v3450_v9 }
 0x491   : > { %s2640_s26 = sshrl.u32 %s8346_s18, 16  ;;  %s11340_s10 = sld [smem:[#allocation220_spill]]  ;;  %v3457_v3 = vpack.c.bf16 %v3456_v58, %v3456_v58  ;;  %v3424_v25 = vadd.f32 %v3423_v18, %v3422_v15 }
 0x492   : > { %s11337_s17 = sshrl.u32 %s11333_s23, 16  ;;  %s11343_s29 = sshrl.u32 %s11255_s15, 16  ;;  %v3463_v8 = vmul.f32 %v3462_v60, %v8054_v29  ;;  %v3467_v29 = vadd.f32 %v3466_v13, %v3465_v0 }
 0x493   : > { %s3477_s7 = sshll.u32 %s11337_s17, 16  ;;  %s11341_s5 = smov %s11337_s17  ;;  %v3469_v19 = vunpack.c.l.bf16 %v3457_v3  ;;  %v3425_v33 = vpack.c.bf16 %v3424_v25, %v3424_v25 }
 0x494   : > { %s8398_s2 = sor.u32 %s3477_s7, %s11341_s5  ;;  %s11342_s17 = sshrl.u32 %s11262_s21, 16  ;;  %v3464_v23 = vpack.c.bf16 %v3463_v8, %v3463_v8  ;;  %v3468_v12 = vpack.c.bf16 %v3467_v29, %v3467_v29 }
 0x495   : > { %s3496_s13 = sshll.u32 %s11342_s17, 16  ;;  %s3489_s1 = sor.u32 %s3488_s8, %s11343_s29  ;;  %v3479_v16 = vstv %s8398_s2  ;;  %v3430_v41 = vunpack.c.l.bf16 %v3425_v33 }
 0x496   : > { %s11344_s23 = sshrl.u32 %s11270_s27, 16  ;;  %s8410_s5 = sand.u32 1, %s2640_s26  ;;  %v3490_v21 = vstv %s3489_s1  ;;  %v3470_v30 = vunpack.c.l.bf16 %v3464_v23  ;;  %v3473_v36 = vunpack.c.l.bf16 %v3468_v12  ;;  %v3482_v59 = vunpack.c.l.bf16 %v3479_v16 }
 0x497   : > { %s3504_s7 = sshll.u32 %s11344_s23, 16  ;;  %s11345_s17 = sld [smem:[#allocation221_spill]]  ;;  %v3493_v6 = vunpack.c.l.bf16 %v3490_v21  ;;  %v3432_v49 = vadd.f32 %v8393_v57, %v3430_v41 }
 0x498   : > { %s11346_s15 = sshrl.u32 %s11262_s21, 16  ;;  %s8416_s29 = sld [smem:[#allocation6 + $0xa3]]  ;;  %v3471_v10 = vadd.f32 %v3470_v30, %v3469_v19 }
 0x499   : > { %s3497_s8 = sor.u32 %s3496_s13, %s11346_s15  ;;  %s11347_s26 = sshrl.u32 %s11273_s11, 16  ;;  %v3494_v20 = vmul.f32 %v3493_v6, %v8422_v24  ;;  %v3435_v54 = vmax.f32 %v3432_v49, 0.0 }
 0x49a   : > { %s3512_s23 = sshll.u32 %s11347_s26, 16  ;;  %s11348_s28 = sld [smem:[#allocation222_spill]]  ;;  %v3498_v27 = vstv %s3497_s8  ;;  %v3472_v44 = vpack.c.bf16 %v3471_v10, %v3471_v10 }
 0x49b   : > { %s11349_s21 = sshrl.u32 %s11270_s27, 16  ;;  %s11350_s15 = sshrl.u32 %s11275_s22, 16  ;;  %v3501_v31 = vunpack.c.l.bf16 %v3498_v27  ;;  %v3495_v39 = vpack.c.bf16 %v3494_v20, %v3494_v20  ;;  %v3436_v60 = vpack.c.bf16 %v3435_v54, %v3435_v54 }
 0x49c   : > { %s3505_s13 = sor.u32 %s3504_s7, %s11349_s21  ;;  %s3520_s20 = sshll.u32 %s11350_s15, 16  ;;  %v3474_v50 = vunpack.c.l.bf16 %v3472_v44 }
 0x49d   : > { %s2416_s24 = sshrl.u32 %s11345_s17, 16  ;;  %s2642_s3 = sadd.s32 32767, %s8410_s5  ;;  %v3506_v34 = vstv %s3505_s13  ;;  %v3502_v40 = vmul.f32 %v3501_v31, %v8431_v28  ;;  %v3552_v0 = vunpack.c.l.bf16 %v3495_v39  ;;  %v8498_v17 = vunpack.c.l.bf16 %v3436_v60 }
 0x49e   : > { %s11351_s27 = smov %s11347_s26  ;;  %s11352_s7 = sshrl.u32 %s11290_s16, 16  ;;  %v3509_v42 = vunpack.c.l.bf16 %v3506_v34  ;;  %v3475_v58 = vadd.f32 %v3474_v50, %v3473_v36 }
 0x49f   : > { %s3513_s1 = sor.u32 %s3512_s23, %s11351_s27  ;;  %s3528_s26 = sshll.u32 %s11352_s7, 16  ;;  %v3503_v45 = vpack.c.bf16 %v3502_v40, %v3502_v40 }
 0x4a0   : > { %s11353_s8 = smov %s11350_s15  ;;  %p2639_p3 = scmp.ne.f32.partialorder %s8346_s18, %s8346_s18  ;;  %v3514_v37 = vstv %s3513_s1  ;;  %v3510_v38 = vmul.f32 %v3509_v42, %v8440_v35  ;;  %v3476_v3 = vpack.c.bf16 %v3475_v58, %v3475_v58 }
 0x4a1   : > { %s3521_s21 = sor.u32 %s3520_s20, %s11353_s8  ;;  %s11354_s11 = sshrl.u32 %s11297_s30, 16  ;;  %v3517_v46 = vunpack.c.l.bf16 %v3514_v37  ;;  %v3553_v13 = vunpack.c.l.bf16 %v3503_v45 }
 0x4a2   : > { %s3536_s23 = sshll.u32 %s11354_s11, 16  ;;  %s8450_s15 = sadd.s32 %s8346_s18, %s2642_s3  ;;  %v3522_v47 = vstv %s3521_s21  ;;  %v3511_v55 = vpack.c.bf16 %v3510_v38, %v3510_v38  ;;  %v3481_v23 = vunpack.c.l.bf16 %v3476_v3 }
 0x4a3   : > { %s11355_s13 = sld [smem:[#allocation223_spill]]  ;;  %s11356_s22 = smov %s11352_s7  ;;  %v3525_v48 = vunpack.c.l.bf16 %v3522_v47  ;;  %v3518_v51 = vmul.f32 %v3517_v46, %v8453_v43  ;;  %v3554_v29 = vadd.f32 %v3553_v13, %v3552_v0 }
 0x4a4   : > { %s3529_s20 = sor.u32 %s3528_s26, %s11356_s22  ;;  %s8457_s27 = sld [smem:[#allocation6 + $0x33]]  ;;  %v3556_v18 = vunpack.c.l.bf16 %v3511_v55  ;;  %v3483_v30 = vadd.f32 %v3482_v59, %v3481_v23 }
 0x4a5   : > { %s11357_s7 = sshrl.u32 %s11303_s6, 16  ;;  %s2651_s8 = sshrl.u32 %s8416_s29, 16  ;;  %v3530_v52 = vstv %s3529_s20  ;;  %v3526_v56 = vmul.f32 %v3525_v48, %v8465_v26  ;;  %v3519_v7 = vpack.c.bf16 %v3518_v51, %v3518_v51  ;;  %v3555_v20 = vpack.c.bf16 %v3554_v29, %v3554_v29 }
 0x4a6   : > { %s3544_s3 = sshll.u32 %s11357_s7, 16  ;;  %s11358_s1 = sld [smem:[#allocation212_spill]]  ;;  %v3533_v57 = vunpack.c.l.bf16 %v3530_v52  ;;  %v3486_v39 = vmax.f32 %v3483_v30, 0.0 }
 0x4a7   : > { %s11359_s16 = smov %s11354_s11  ;;  %s2644_s22 = sand.u32 4294901760, %s8450_s15  ;;  %v3527_v61 = vpack.c.bf16 %v3526_v56, %v3526_v56  ;;  %v3557_v19 = vunpack.c.l.bf16 %v3519_v7  ;;  %v3568_v40 = vunpack.c.l.bf16 %v3555_v20 }
 0x4a8   : > { %s3537_s26 = sor.u32 %s3536_s23, %s11359_s16  ;;  %s11360_s21 = smov %s11357_s7  ;;  %v3534_v2 = vmul.f32 %v3533_v57, %v8472_v53  ;;  %v3487_v47 = vpack.c.bf16 %v3486_v39, %v3486_v39 }
 0x4a9   : > { %s8477_s30 = sor.u32 %s3544_s3, %s11360_s21  ;;  %s8481_s7 = sand.u32 1, %s2651_s8  ;;  %v3538_v9 = vstv %s3537_s26  ;;  %v3560_v6 = vunpack.c.l.bf16 %v3527_v61  ;;  %v3558_v27 = vadd.f32 %v3557_v19, %v3556_v18 }
 0x4aa   : > { %s11362_s20 = sshrl.u32 %s11320_s4, 16  ;;  %s12419_s22 = smov (%p2639_p3, %s2644_s22), 2143289344  ;;  %v3541_v15 = vunpack.c.l.bf16 %v3538_v9  ;;  %v3546_v8 = vstv %s8477_s30  ;;  %v3535_v16 = vpack.c.bf16 %v3534_v2, %v3534_v2  ;;  %v3044_v21 = vstv %s8457_s27 }
 0x4ab   : > { %s3589_s16 = sshll.u32 %s11362_s20, 16  ;;  %s11363_s6 = sld [smem:[#allocation60_spill]]  ;;  %v3549_v25 = vunpack.c.l.bf16 %v3546_v8  ;;  %v3559_v34 = vpack.c.bf16 %v3558_v27, %v3558_v27  ;;  %v8548_v55 = vunpack.c.l.bf16 %v3487_v47 }
 0x4ac   : > { %s11361_s23 = sshrl.u32 %s11358_s1, 16  ;;  %s11365_s8 = sshrl.u32 %s11322_s0, 16  ;;  %v3542_v14 = vmul.f32 %v3541_v15, %v8498_v17  ;;  %v3561_v12 = vunpack.c.l.bf16 %v3535_v16 }
 0x4ad   : > { %s3582_s15 = sshll.u32 %s11361_s23, 16  ;;  %s11364_s2 = smov %s11361_s23  ;;  %v3569_v44 = vunpack.c.l.bf16 %v3559_v34  ;;  %v3550_v61 = vmul.f32 %v3549_v25, %v8548_v55 }
 0x4ae   : > { %s3583_s3 = sor.u32 %s3582_s15, %s11364_s2  ;;  %s3596_s18 = sshll.u32 %s11365_s8, 16  ;;  %v3543_v33 = vpack.c.bf16 %v3542_v14, %v3542_v14  ;;  %v3562_v10 = vadd.f32 %v3561_v12, %v3560_v6 }
 0x4af   : > { %s11366_s26 = smov %s11362_s20  ;;  %s8504_s11 = sld [smem:[#allocation6 + $0x11c]]  ;;  %v3584_v31 = vstv %s3583_s3  ;;  %v8540_v51 = vadd.f32 %v3569_v44, %v3568_v40  ;;  %v3551_v18 = vpack.c.bf16 %v3550_v61, %v3550_v61 }
 0x4b0   : > { %s3590_s21 = sor.u32 %s3589_s16, %s11366_s26  ;;  %s11368_s1 = sshrl.u32 %s11327_s9, 16  ;;  %v3586_v36 = vunpack.c.l.bf16 %v3584_v31  ;;  %v3563_v37 = vpack.c.bf16 %v3562_v10, %v3562_v10  ;;  %v3564_v50 = vunpack.c.l.bf16 %v3543_v33 }
 0x4b1   : > { %s11367_s23 = sshrl.u32 %s11363_s6, 16  ;;  %s3603_s30 = sshll.u32 %s11368_s1, 16  ;;  %v3591_v32 = vstv %s3590_s21  ;;  %v3571_v8 = vpack.c.bf16 %v8540_v51, %v8540_v51  ;;  %v3565_v12 = vunpack.c.l.bf16 %v3551_v18 }
 0x4b2   : > { %s3754_s20 = sshll.u32 %s11367_s23, 16  ;;  %s2653_s15 = sadd.s32 32767, %s8481_s7  ;;  %v3593_v41 = vunpack.c.l.bf16 %v3591_v32  ;;  %v3587_v45 = vmul.f32 %v3586_v36, %v8422_v24  ;;  %v8542_v52 = vunpack.c.l.bf16 %v3563_v37 }
 0x4b3   : > { %s11369_s4 = sld [smem:[#allocation224_spill]]  ;;  %s11370_s16 = smov %s11365_s8  ;;  %v3566_v36 = vadd.f32 %v3565_v12, %v3564_v50 }
 0x4b4   : > { %s3597_s2 = sor.u32 %s3596_s18, %s11370_s16  ;;  %s11371_s8 = sshrl.u32 %s11329_s25, 16  ;;  %v3594_v49 = vmul.f32 %v3593_v41, %v8431_v28  ;;  %v3588_v56 = vpack.c.bf16 %v3587_v45, %v3587_v45 }
 0x4b5   : > { %s3610_s26 = sshll.u32 %s11371_s8, 16  ;;  %s8517_s7 = sor.u32 %s3754_s20, %s11367_s23  ;;  %v3598_v42 = vstv %s3597_s2  ;;  %v3567_v47 = vpack.c.bf16 %v3566_v36, %v3566_v36 }
 0x4b6   : > { %s3604_s0 = sor.u32 %s3603_s30, %s11368_s1  ;;  %s11372_s18 = sshrl.u32 %s11334_s12, 16  ;;  %v3756_v46 = vstv %s8517_s7  ;;  %v3600_v38 = vunpack.c.l.bf16 %v3598_v42  ;;  %v3595_v59 = vpack.c.bf16 %v3594_v49, %v3594_v49  ;;  %v3638_v29 = vunpack.c.l.bf16 %v3588_v56 }
 0x4b7   : > { %s3617_s16 = sshll.u32 %s11372_s18, 16  ;;  %s11373_s6 = sshrl.u32 %s11335_s14, 16  ;;  %v3605_v48 = vstv %s3604_s0 }
 0x4b8   : > { %s3624_s3 = sshll.u32 %s11373_s6, 16  ;;  %s8527_s21 = sadd.s32 %s8416_s29, %s2653_s15  ;;  %v3607_v54 = vunpack.c.l.bf16 %v3605_v48  ;;  %v3601_v57 = vmul.f32 %v3600_v38, %v8440_v35  ;;  %v3639_v27 = vunpack.c.l.bf16 %v3595_v59 }
 0x4b9   : > { %s2449_s5 = sshrl.u32 %s11369_s4, 16  ;;  %s11374_s9 = sld [smem:[#allocation225_spill]] }
 0x4ba   : > { %s11375_s20 = smov %s11371_s8  ;;  %s11376_s2 = smov %s11372_s18  ;;  %v3608_v7 = vmul.f32 %v3607_v54, %v8453_v43  ;;  %v3602_v2 = vpack.c.bf16 %v3601_v57, %v3601_v57  ;;  %v3640_v34 = vadd.f32 %v3639_v27, %v3638_v29  ;;  %v3573_v57 = vunpack.c.l.bf16 %v3567_v47 }
 0x4bb   : > { %s3611_s30 = sor.u32 %s3610_s26, %s11375_s20  ;;  %s3618_s8 = sor.u32 %s3617_s16, %s11376_s2 }
 0x4bc   : > { %s11377_s23 = sshrl.u32 %s11338_s19, 16  ;;  %p2650_p7 = scmp.ne.f32.partialorder %s8416_s29, %s8416_s29  ;;  %v3612_v58 = vstv %s3611_s30  ;;  %v3619_v60 = vstv %s3618_s8  ;;  %v3609_v0 = vpack.c.bf16 %v3608_v7, %v3608_v7  ;;  %v3642_v20 = vunpack.c.l.bf16 %v3602_v2 }
 0x4bd   : > { %s3631_s15 = sshll.u32 %s11377_s23, 16  ;;  %s11378_s25 = smov %s11373_s6  ;;  %v3614_v9 = vunpack.c.l.bf16 %v3612_v58  ;;  %v3621_v15 = vunpack.c.l.bf16 %v3619_v60  ;;  %v3641_v37 = vpack.c.bf16 %v3640_v34, %v3640_v34 }
 0x4be   : > { %s3625_s26 = sor.u32 %s3624_s3, %s11378_s25  ;;  %s2655_s18 = sand.u32 4294901760, %s8527_s21  ;;  %v3643_v31 = vunpack.c.l.bf16 %v3609_v0 }
 0x4bf   : > { %s2460_s1 = sshrl.u32 %s11374_s9, 16  ;;  %s8551_s12 = sld [smem:[#allocation6 + $0x11d]]  ;;  %v3626_v3 = vstv %s3625_s26  ;;  %v3615_v13 = vmul.f32 %v3614_v9, %v8465_v26  ;;  %v3622_v19 = vmul.f32 %v3621_v15, %v8472_v53  ;;  %v3654_v51 = vunpack.c.l.bf16 %v3641_v37 }
 0x4c0   : > { %s11379_s0 = sld [smem:[#allocation226_spill]]  ;;  %s11380_s14 = smov %s11377_s23  ;;  %v3628_v16 = vunpack.c.l.bf16 %v3626_v3  ;;  %v3644_v39 = vadd.f32 %v3643_v31, %v3642_v20  ;;  %v3576_v9 = vunpack.c.l.bf16 %v3571_v8  ;;  %v3574_v15 = vadd.f32 %v3573_v57, %v8542_v52 }
 0x4c1   : > { %s3632_s16 = sor.u32 %s3631_s15, %s11380_s14  ;;  %s2662_s6 = sshrl.u32 %s8504_s11, 16  ;;  %v3616_v6 = vpack.c.bf16 %v3615_v13, %v3615_v13  ;;  %v3623_v30 = vpack.c.bf16 %v3622_v19, %v3622_v19 }
 0x4c2   : > { %s11381_s3 = sshrl.u32 %s11340_s10, 16  ;;  %s12421_s18 = smov (%p2650_p7, %s2655_s18), 2143289344  ;;  %v3633_v23 = vstv %s3632_s16  ;;  %v3629_v14 = vmul.f32 %v3628_v16, %v8498_v17  ;;  %v3645_v49 = vpack.c.bf16 %v3644_v39, %v3644_v39 }
 0x4c3   : > { %s3668_s21 = sshll.u32 %s11381_s3, 16  ;;  %s11382_s20 = sld [smem:[#allocation227_spill]]  ;;  %v3635_v25 = vunpack.c.l.bf16 %v3633_v23  ;;  %v3646_v10 = vunpack.c.l.bf16 %v3616_v6  ;;  %v3647_v40 = vunpack.c.l.bf16 %v3623_v30  ;;  %v3575_v23 = vpack.c.bf16 %v3574_v15, %v3574_v15 }
 0x4c4   : > { %s3675_s29 = sshll.u32 %s2416_s24, 16  ;;  %s8572_s30 = sand.u32 1, %s2662_s6  ;;  %v3630_v32 = vpack.c.bf16 %v3629_v14, %v3629_v14  ;;  %v3655_v59 = vunpack.c.l.bf16 %v3645_v49 }
 0x4c5   : > { %s11383_s2 = smov %s11381_s3  ;;  %s11384_s15 = sshrl.u32 %s11348_s28, 16  ;;  %v3636_v33 = vmul.f32 %v3635_v25, %v8548_v55  ;;  %v3648_v38 = vadd.f32 %v3647_v40, %v3646_v10  ;;  %v3577_v30 = vunpack.c.l.bf16 %v3575_v23 }
 0x4c6   : > { %s2471_s19 = sshrl.u32 %s11379_s0, 16  ;;  %s3669_s8 = sor.u32 %s3668_s21, %s11383_s2  ;;  %v3650_v44 = vunpack.c.l.bf16 %v3630_v32  ;;  %v3656_v3 = vadd.f32 %v3655_v59, %v3654_v51 }
 0x4c7   : > { %s3682_s25 = sshll.u32 %s11384_s15, 16  ;;  %s8580_s26 = sld [smem:[#allocation6 + $0x11e]]  ;;  %v3670_v41 = vstv %s3669_s8  ;;  %v3637_v42 = vpack.c.bf16 %v3636_v33, %v3636_v33  ;;  %v3649_v58 = vpack.c.bf16 %v3648_v38, %v3648_v38  ;;  %v3578_v37 = vadd.f32 %v3577_v30, %v3576_v9 }
 0x4c8   : > { %s3676_s10 = sor.u32 %s3675_s29, %s2416_s24  ;;  %s2664_s14 = sadd.s32 32767, %s8572_s30  ;;  %v3672_v45 = vunpack.c.l.bf16 %v3670_v41  ;;  %v3657_v52 = vpack.c.bf16 %v3656_v3, %v3656_v3 }
 0x4c9   : > { %s2482_s23 = sshrl.u32 %s11382_s20, 16  ;;  %s11385_s16 = sshrl.u32 %s11355_s13, 16  ;;  %v3677_v48 = vstv %s3676_s10  ;;  %v3651_v50 = vunpack.c.l.bf16 %v3637_v42  ;;  %v3658_v16 = vunpack.c.l.bf16 %v3649_v58  ;;  %v3056_v58 = vadd.f32 %v8124_v4, %v8116_v63 }
 0x4ca   : > { %s3689_s6 = sshll.u32 %s11385_s16, 16  ;;  %s2673_s3 = sshrl.u32 %s8551_s12, 16  ;;  %v3673_v54 = vmul.f32 %v3672_v45, %v8422_v24  ;;  %v3679_v56 = vunpack.c.l.bf16 %v3677_v48  ;;  %v3662_v39 = vunpack.c.l.bf16 %v3657_v52 }
 0x4cb   : > { %s11386_s21 = smov %s11384_s15  ;;  %s3696_s24 = sshll.u32 %s2449_s5, 16  ;;  %v3652_v60 = vadd.f32 %v3651_v50, %v3650_v44 }
 0x4cc   : > { %s3683_s2 = sor.u32 %s3682_s25, %s11386_s21  ;;  %s3703_s17 = sshll.u32 %s2460_s1, 16  ;;  %v3680_v61 = vmul.f32 %v3679_v56, %v8431_v28  ;;  %v3674_v0 = vpack.c.bf16 %v3673_v54, %v3673_v54 }
 0x4cd   : > { %s8596_s29 = sadd.s32 %s8504_s11, %s2664_s14  ;;  %s11387_s28 = smov %s11385_s16  ;;  %v3684_v7 = vstv %s3683_s2  ;;  %v3653_v8 = vpack.c.bf16 %v3652_v60, %v3652_v60  ;;  %v3758_v60 = vunpack.c.l.bf16 %v3756_v46 }
 0x4ce   : > { %s3690_s30 = sor.u32 %s3689_s6, %s11387_s28  ;;  %s8601_s8 = sand.u32 1, %s2673_s3  ;;  %v3686_v2 = vunpack.c.l.bf16 %v3684_v7  ;;  %v3681_v25 = vpack.c.bf16 %v3680_v61, %v3680_v61  ;;  %v3724_v42 = vunpack.c.l.bf16 %v3674_v0 }
 0x4cf   : > { %s3710_s15 = sshll.u32 %s2471_s19, 16  ;;  %s3697_s13 = sor.u32 %s3696_s24, %s2449_s5  ;;  %v3691_v13 = vstv %s3690_s30  ;;  %v3659_v14 = vunpack.c.l.bf16 %v3653_v8 }
 0x4d0   : > { %s3704_s25 = sor.u32 %s3703_s17, %s2460_s1  ;;  %p2661_p12 = scmp.ne.f32.partialorder %s8504_s11, %s8504_s11  ;;  %v3687_v18 = vmul.f32 %v3686_v2, %v8440_v35  ;;  %v3693_v19 = vunpack.c.l.bf16 %v3691_v13  ;;  %v3698_v29 = vstv %s3697_s13  ;;  %v3725_v48 = vunpack.c.l.bf16 %v3681_v25 }
 0x4d1   : > { %s3717_s10 = sshll.u32 %s2482_s23, 16  ;;  %s2666_s14 = sand.u32 4294901760, %s8596_s29  ;;  %v3705_v6 = vstv %s3704_s25  ;;  %v3700_v12 = vunpack.c.l.bf16 %v3698_v29  ;;  %v3660_v33 = vadd.f32 %v3659_v14, %v3658_v16  ;;  %v3579_v2 = vpack.c.bf16 %v3578_v37, %v3578_v37 }
 0x4d2   : > { %s3711_s5 = sor.u32 %s3710_s15, %s2471_s19  ;;  %s2675_s4 = sadd.s32 32767, %s8601_s8  ;;  %v3694_v27 = vmul.f32 %v3693_v19, %v8453_v43  ;;  %v3688_v20 = vpack.c.bf16 %v3687_v18, %v3687_v18  ;;  %v3707_v31 = vunpack.c.l.bf16 %v3705_v6  ;;  %v3726_v9 = vadd.f32 %v3725_v48, %v3724_v42 }
 0x4d3   : > { %s2684_s9 = sshrl.u32 %s8580_s26, 16  ;;  %s8621_s1 = sld [smem:[#allocation6 + $0xb3]]  ;;  %v3712_v32 = vstv %s3711_s5  ;;  %v3701_v10 = vmul.f32 %v3700_v12, %v8465_v26  ;;  %v3661_v44 = vpack.c.bf16 %v3660_v33, %v3660_v33  ;;  %v3759_v18 = vmul.f32 %v3758_v60, %v8422_v24 }
 0x4d4   : > { %s3718_s6 = sor.u32 %s3717_s10, %s2482_s23  ;;  %p2672_p0 = scmp.ne.f32.partialorder %s8551_s12, %s8551_s12  ;;  %v3695_v34 = vpack.c.bf16 %v3694_v27, %v3694_v27  ;;  %v3714_v36 = vunpack.c.l.bf16 %v3712_v32  ;;  %v3708_v40 = vmul.f32 %v3707_v31, %v8472_v53  ;;  %v3728_v50 = vunpack.c.l.bf16 %v3688_v20 }
 0x4d5   : > { %s12423_s14 = smov (%p2661_p12, %s2666_s14), 2143289344  ;;  %s11389_s19 = sld [smem:[#allocation61_spill]]  ;;  %v3719_v41 = vstv %s3718_s6  ;;  %v3702_v49 = vpack.c.bf16 %v3701_v10, %v3701_v10  ;;  %v3663_v51 = vunpack.c.l.bf16 %v3661_v44  ;;  %v3727_v0 = vpack.c.bf16 %v3726_v9, %v3726_v9 }
 0x4d6   : > { %s8636_s3 = sadd.s32 %s8551_s12, %s2675_s4  ;;  %s8638_s20 = sand.u32 1, %s2684_s9  ;;  %v3715_v45 = vmul.f32 %v3714_v36, %v8498_v17  ;;  %v3721_v47 = vunpack.c.l.bf16 %v3719_v41  ;;  %v3709_v38 = vpack.c.bf16 %v3708_v40, %v3708_v40  ;;  %v3729_v57 = vunpack.c.l.bf16 %v3695_v34 }
 0x4d7   : > { %s11390_s23 = sld [smem:[#allocation62_spill]]  ;;  %p2683_p1 = scmp.ne.f32.partialorder %s8580_s26, %s8580_s26  ;;  %v8673_v46 = vadd.f32 %v3663_v51, %v3662_v39  ;;  %v3732_v15 = vunpack.c.l.bf16 %v3702_v49  ;;  %v8699_v52 = vunpack.c.l.bf16 %v3579_v2  ;;  %v3740_v12 = vunpack.c.l.bf16 %v3727_v0 }
 0x4d8   : > { %s11391_s11 = sld [smem:[#allocation22_spill]]  ;;  %s2677_s8 = sand.u32 4294901760, %s8636_s3  ;;  %v3716_v54 = vpack.c.bf16 %v3715_v45, %v3715_v45  ;;  %v3722_v56 = vmul.f32 %v3721_v47, %v8548_v55  ;;  %v3730_v4 = vadd.f32 %v3729_v57, %v3728_v50  ;;  %v3733_v3 = vunpack.c.l.bf16 %v3709_v38 }
 0x4d9   : > { %s8646_s17 = sld [smem:[#allocation6 + $0x11f]]  ;;  %s2686_s15 = sadd.s32 32767, %s8638_s20  ;;  %v3057_v61 = vstv %s8621_s1  ;;  %v3665_v25 = vpack.c.bf16 %v8673_v46, %v8673_v46  ;;  %v3760_v20 = vpack.c.bf16 %v3759_v18, %v3759_v18 }
 0x4da   : > { %s11394_s29 = sld [smem:[#allocation63_spill]]  ;;  %v3723_v63 = vpack.c.bf16 %v3722_v56, %v3722_v56  ;;  %v3736_v13 = vunpack.c.l.bf16 %v3716_v54  ;;  %v8689_v16 = vadd.f32 %v3057_v61, %v3056_v58  ;;  %v3731_v29 = vpack.c.bf16 %v3730_v4, %v3730_v4  ;;  %s12425_s8 = smov (%p2672_p0, %s2677_s8), 2143289344 }
 0x4db   : > { %s11392_s21 = sshrl.u32 %s11389_s19, 16  ;;  %s11396_s13 = sld [smem:[#allocation64_spill]]  ;;  %v3810_v51 = vunpack.c.l.bf16 %v3760_v20 }
 0x4dc   : > { %s3761_s24 = sshll.u32 %s11392_s21, 16  ;;  %s11397_s25 = sld [smem:[#allocation65_spill]]  ;;  %v3737_v8 = vunpack.c.l.bf16 %v3723_v63  ;;  %v3741_v34 = vunpack.c.l.bf16 %v3731_v29 }
 0x4dd   : > { %s11395_s28 = sshrl.u32 %s11390_s23, 16  ;;  %s11398_s10 = smov %s11392_s21 }
 0x4de   : > { %s3768_s30 = sshll.u32 %s11395_s28, 16  ;;  %v6294_v59 = vld [vmem:[%s11391_s11 + $0x6] sm:$0x3]  ;;  %s3762_s5 = sor.u32 %s3761_s24, %s11398_s10  ;;  %v3738_v27 = vadd.f32 %v3737_v8, %v3736_v13  ;;  %v3742_v54 = vadd.f32 %v3741_v34, %v3740_v12  ;;  %v8758_v13 = vunpack.c.l.bf16 %v3665_v25 }
 0x4df   : > { %v3066_v7 = vmul.f32 %v6294_v59, %v3065_v22  ;;  %s8664_s6 = sld [smem:[#allocation6 + $0x120]]  ;;  %s11400_s20 = smov %s11395_s28  ;;  %v8671_v22 = vadd.f32 %v8139_v11, %v8127_v5  ;;  %v3763_v5 = vstv %s3762_s5  ;;  %v8687_v11 = vadd.f32 %v3044_v21, %v8114_v62 }
 0x4e0   : > { %s11399_s4 = sshrl.u32 %s11394_s29, 16  ;;  %s3769_s11 = sor.u32 %s3768_s30, %s11400_s20  ;;  %v3765_v19 = vunpack.c.l.bf16 %v3763_v5  ;;  %v3734_v21 = vadd.f32 %v3733_v3, %v3732_v15  ;;  %v3739_v45 = vpack.c.bf16 %v3738_v27, %v3738_v27  ;;  %v3743_v8 = vpack.c.bf16 %v3742_v54, %v3742_v54 }
 0x4e1   : > { %s3775_s9 = sshll.u32 %s11399_s4, 16  ;;  %s11401_s7 = sld [smem:[#allocation66_spill]]  ;;  %v8697_v23 = vadd.f32 %v3066_v7, %v8149_v1  ;;  %v3770_v62 = vstv %s3769_s11 }
 0x4e2   : > { %s11402_s19 = sld [smem:[#allocation67_spill]]  ;;  %s11403_s21 = sshrl.u32 %s11396_s13, 16  ;;  %v3766_v1 = vmul.f32 %v3765_v19, %v8431_v28  ;;  %v3772_v6 = vunpack.c.l.bf16 %v3770_v62  ;;  %v3735_v44 = vpack.c.bf16 %v3734_v21, %v3734_v21  ;;  %v3745_v2 = vunpack.c.l.bf16 %v3739_v45 }
 0x4e3   : > { %s3782_s2 = sshll.u32 %s11403_s21, 16  ;;  %s11404_s1 = sshrl.u32 %s11397_s25, 16 }
 0x4e4   : > { %s3789_s24 = sshll.u32 %s11404_s1, 16  ;;  %s8680_s28 = sadd.s32 %s8580_s26, %s2686_s15  ;;  %v3773_v31 = vmul.f32 %v3772_v6, %v8440_v35  ;;  %v3767_v10 = vpack.c.bf16 %v3766_v1, %v3766_v1  ;;  %v3744_v61 = vunpack.c.l.bf16 %v3735_v44 }
 0x4e5   : > { %s11405_s23 = smov %s11399_s4  ;;  %s11408_s27 = smov %s11403_s21 }
 0x4e6   : > { %s3776_s30 = sor.u32 %s3775_s9, %s11405_s23  ;;  %s3783_s29 = sor.u32 %s3782_s2, %s11408_s27  ;;  %v3774_v40 = vpack.c.bf16 %v3773_v31, %v3773_v31  ;;  %v3811_v57 = vunpack.c.l.bf16 %v3767_v10  ;;  %v8771_v1 = vadd.f32 %v3745_v2, %v3744_v61  ;;  %v8782_v31 = vunpack.c.l.bf16 %v3743_v8 }
 0x4e7   : > { %s11406_s15 = sshrl.u32 %s11401_s7, 16  ;;  %s11409_s5 = smov %s11404_s1  ;;  %v3777_v14 = vstv %s3776_s30  ;;  %v3784_v32 = vstv %s3783_s29 }
 0x4e8   : > { %s3796_s10 = sshll.u32 %s11406_s15, 16  ;;  %s11407_s4 = sshrl.u32 %s11402_s19, 16  ;;  %v3779_v30 = vunpack.c.l.bf16 %v3777_v14  ;;  %v3786_v39 = vunpack.c.l.bf16 %v3784_v32  ;;  %v3814_v58 = vunpack.c.l.bf16 %v3774_v40  ;;  %v3812_v63 = vadd.f32 %v3811_v57, %v3810_v51 }
 0x4e9   : > { %s3803_s20 = sshll.u32 %s11407_s4, 16  ;;  %s3790_s9 = sor.u32 %s3789_s24, %s11409_s5 }
 0x4ea   : > { %s2688_s21 = sand.u32 4294901760, %s8680_s28  ;;  %s2695_s1 = sshrl.u32 %s8646_s17, 16  ;;  %v3791_v33 = vstv %s3790_s9  ;;  %v3780_v36 = vmul.f32 %v3779_v30, %v8453_v43  ;;  %v3787_v49 = vmul.f32 %v3786_v39, %v8465_v26  ;;  %v3813_v5 = vpack.c.bf16 %v3812_v63, %v3812_v63 }
 0x4eb   : > { %s11411_s13 = smov %s11406_s15  ;;  %s11412_s25 = smov %s11407_s4  ;;  %v3793_v41 = vunpack.c.l.bf16 %v3791_v33 }
 0x4ec   : > { %s3797_s11 = sor.u32 %s3796_s10, %s11411_s13  ;;  %s3804_s2 = sor.u32 %s3803_s20, %s11412_s25  ;;  %v3781_v47 = vpack.c.bf16 %v3780_v36, %v3780_v36  ;;  %v3788_v56 = vpack.c.bf16 %v3787_v49, %v3787_v49  ;;  %v3826_v6 = vunpack.c.l.bf16 %v3813_v5 }
 0x4ed   : > { %s11413_s28 = sld [smem:[#allocation68_spill]]  ;;  %s8723_s30 = sand.u32 1, %s2695_s1  ;;  %v3798_v42 = vstv %s3797_s11  ;;  %v3805_v37 = vstv %s3804_s2  ;;  %v3794_v38 = vmul.f32 %v3793_v41, %v8472_v53 }
 0x4ee   : > { %s12427_s21 = smov (%p2683_p1, %s2688_s21), 2143289344  ;;  %s8731_s12 = sld [smem:[#allocation6 + $0x121]]  ;;  %v3800_v48 = vunpack.c.l.bf16 %v3798_v42  ;;  %v3807_v50 = vunpack.c.l.bf16 %v3805_v37  ;;  %v3815_v60 = vunpack.c.l.bf16 %v3781_v47  ;;  %v3818_v4 = vunpack.c.l.bf16 %v3788_v56 }
 0x4ef   : > { %11414 = sst [smem:[#allocation27_spill]] %s12427_s21  ;;  %p2694_p2 = scmp.ne.f32.partialorder %s8646_s17, %s8646_s17  ;;  %v3795_v59 = vpack.c.bf16 %v3794_v38, %v3794_v38 }
 0x4f0   : > { %s11415_s3 = sld [smem:[#allocation69_spill]]  ;;  %s2697_s26 = sadd.s32 32767, %s8723_s30  ;;  %v3801_v7 = vmul.f32 %v3800_v48, %v8498_v17  ;;  %v3808_v9 = vmul.f32 %v3807_v50, %v8548_v55  ;;  %v3816_v3 = vadd.f32 %v3815_v60, %v3814_v58 }
 0x4f1   : > { %s11417_s15 = sld [smem:[#allocation70_spill]]  ;;  %s2706_s10 = sshrl.u32 %s8664_s6, 16  ;;  %v3819_v0 = vunpack.c.l.bf16 %v3795_v59 }
 0x4f2   : > { %s11418_s4 = sld [smem:[#allocation71_spill]]  ;;  %s8750_s11 = sadd.s32 %s8646_s17, %s2697_s26  ;;  %v3802_v46 = vpack.c.bf16 %v3801_v7, %v3801_v7  ;;  %v3809_v15 = vpack.c.bf16 %v3808_v9, %v3808_v9  ;;  %v3817_v19 = vpack.c.bf16 %v3816_v3, %v3816_v3 }
 0x4f3   : > { %s11416_s7 = sshrl.u32 %s11413_s28, 16  ;;  %s11422_s13 = sld [smem:[#allocation124_spill]]  ;;  %v3820_v29 = vadd.f32 %v3819_v0, %v3818_v4 }
 0x4f4   : > { %s3849_s19 = sshll.u32 %s11416_s7, 16  ;;  %s11420_s29 = smov %s11416_s7  ;;  %v3822_v62 = vunpack.c.l.bf16 %v3802_v46  ;;  %v3823_v21 = vunpack.c.l.bf16 %v3809_v15  ;;  %v3827_v30 = vunpack.c.l.bf16 %v3817_v19 }
 0x4f5   : > { %s3850_s5 = sor.u32 %s3849_s19, %s11420_s29  ;;  %s8754_s30 = sand.u32 1, %s2706_s10  ;;  %v3821_v27 = vpack.c.bf16 %v3820_v29, %v3820_v29 }
 0x4f6   : > { %s11419_s20 = sshrl.u32 %s11415_s3, 16  ;;  %s11424_s7 = sld [smem:[#allocation72_spill]]  ;;  %v3851_v18 = vstv %s3850_s5  ;;  %v3824_v12 = vadd.f32 %v3823_v21, %v3822_v62  ;;  %v3828_v36 = vadd.f32 %v3827_v30, %v3826_v6 }
 0x4f7   : > { %s3856_s27 = sshll.u32 %s11419_s20, 16  ;;  %s11421_s9 = sshrl.u32 %s11417_s15, 16  ;;  %v3853_v14 = vunpack.c.l.bf16 %v3851_v18  ;;  %v3830_v39 = vunpack.c.l.bf16 %v3821_v27 }
 0x4f8   : > { %s3863_s1 = sshll.u32 %s11421_s9, 16  ;;  %s11423_s25 = sshrl.u32 %s11418_s4, 16  ;;  %v3825_v10 = vpack.c.bf16 %v3824_v12, %v3824_v12  ;;  %v3829_v45 = vpack.c.bf16 %v3828_v36, %v3828_v36 }
 0x4f9   : > { %s3870_s2 = sshll.u32 %s11423_s25, 16  ;;  %s11425_s28 = smov %s11419_s20  ;;  %v3854_v32 = vmul.f32 %v3853_v14, %v8422_v24 }
 0x4fa   : > { %s3857_s19 = sor.u32 %s3856_s27, %s11425_s28  ;;  %s11426_s26 = sld [smem:[#allocation73_spill]]  ;;  %v3831_v47 = vunpack.c.l.bf16 %v3825_v10  ;;  %v3834_v57 = vunpack.c.l.bf16 %v3829_v45 }
 0x4fb   : > { %s11427_s20 = sshrl.u32 %s11422_s13, 16  ;;  %s8764_s10 = sor.u32 %s3863_s1, %s11421_s9  ;;  %v3858_v25 = vstv %s3857_s19  ;;  %v3855_v42 = vpack.c.bf16 %v3854_v32, %v3854_v32 }
 0x4fc   : > { %s3838_s29 = sshll.u32 %s11427_s20, 16  ;;  %s11428_s25 = sld [smem:[#allocation74_spill]]  ;;  %v3860_v20 = vunpack.c.l.bf16 %v3858_v25  ;;  %v3865_v33 = vstv %s8764_s10  ;;  %v3832_v56 = vadd.f32 %v3831_v47, %v3830_v39 }
 0x4fd   : > { %s11429_s3 = sshrl.u32 %s11418_s4, 16  ;;  %s11430_s28 = sshrl.u32 %s11424_s7, 16  ;;  %v3867_v37 = vunpack.c.l.bf16 %v3865_v33  ;;  %v3905_v46 = vunpack.c.l.bf16 %v3855_v42 }
 0x4fe   : > { %s3871_s27 = sor.u32 %s3870_s2, %s11429_s3  ;;  %s3877_s24 = sshll.u32 %s11430_s28, 16  ;;  %v3861_v40 = vmul.f32 %v3860_v20, %v8431_v28  ;;  %v3833_v2 = vpack.c.bf16 %v3832_v56, %v3832_v56 }
 0x4ff   : > { %s2699_s0 = sand.u32 4294901760, %s8750_s11  ;;  %s11432_s1 = sld [smem:[#allocation75_spill]]  ;;  %v3872_v34 = vstv %s3871_s27  ;;  %v3868_v48 = vmul.f32 %v3867_v37, %v8440_v35 }
 0x500   : > { %s11431_s15 = sshrl.u32 %s11426_s26, 16  ;;  %s8777_s4 = sor.u32 %s3838_s29, %s11427_s20  ;;  %v3874_v44 = vunpack.c.l.bf16 %v3872_v34  ;;  %v3862_v49 = vpack.c.bf16 %v3861_v40, %v3861_v40  ;;  %v3835_v5 = vunpack.c.l.bf16 %v3833_v2 }
 0x501   : > { %s3884_s5 = sshll.u32 %s11431_s15, 16  ;;  %s2708_s3 = sadd.s32 32767, %s8754_s30  ;;  %v3840_v41 = vstv %s8777_s4  ;;  %v3869_v7 = vpack.c.bf16 %v3868_v48, %v3868_v48 }
 0x502   : > { %s11433_s2 = sshrl.u32 %s11428_s25, 16  ;;  %s11434_s19 = smov %s11430_s28  ;;  %v3875_v50 = vmul.f32 %v3874_v44, %v8453_v43  ;;  %v3906_v8 = vunpack.c.l.bf16 %v3862_v49  ;;  %v3836_v25 = vadd.f32 %v3835_v5, %v3834_v57  ;;  %v3843_v27 = vunpack.c.l.bf16 %v3840_v41 }
 0x503   : > { %s3891_s9 = sshll.u32 %s11433_s2, 16  ;;  %s3878_s28 = sor.u32 %s3877_s24, %s11434_s19  ;;  %v3909_v19 = vunpack.c.l.bf16 %v3869_v7 }
 0x504   : > { %s11435_s13 = smov %s11431_s15  ;;  %s8793_s20 = sld [smem:[#allocation6 + $0x122]]  ;;  %v3879_v38 = vstv %s3878_s28  ;;  %v3876_v9 = vpack.c.bf16 %v3875_v50, %v3875_v50  ;;  %v3907_v6 = vadd.f32 %v3906_v8, %v3905_v46  ;;  %v3837_v10 = vpack.c.bf16 %v3836_v25, %v3836_v25 }
 0x505   : > { %s3885_s30 = sor.u32 %s3884_s5, %s11435_s13  ;;  %s11436_s29 = sshrl.u32 %s11432_s1, 16  ;;  %v3881_v51 = vunpack.c.l.bf16 %v3879_v38 }
 0x506   : > { %s3898_s15 = sshll.u32 %s11436_s29, 16  ;;  %s11437_s24 = smov %s11433_s2  ;;  %v3886_v54 = vstv %s3885_s30  ;;  %v3910_v29 = vunpack.c.l.bf16 %v3876_v9  ;;  %v3908_v32 = vpack.c.bf16 %v3907_v6, %v3907_v6  ;;  %v3842_v45 = vunpack.c.l.bf16 %v3837_v10 }
 0x507   : > { %s3892_s7 = sor.u32 %s3891_s9, %s11437_s24  ;;  %s12429_s0 = smov (%p2694_p2, %s2699_s0), 2143289344  ;;  %v3888_v58 = vunpack.c.l.bf16 %v3886_v54  ;;  %v3882_v60 = vmul.f32 %v3881_v51, %v8465_v26 }
 0x508   : > { %11438 = sst [smem:[#allocation28_spill]] %s12429_s0  ;;  %s8806_s26 = sadd.s32 %s8664_s6, %s2708_s3  ;;  %v3893_v59 = vstv %s3892_s7  ;;  %v3911_v12 = vadd.f32 %v3910_v29, %v3909_v19  ;;  %v3921_v42 = vunpack.c.l.bf16 %v3908_v32  ;;  %v3844_v56 = vadd.f32 %v3843_v27, %v3842_v45 }
 0x509   : > { %s11439_s10 = sld [smem:[#allocation125_spill]]  ;;  %s11440_s25 = smov %s11436_s29  ;;  %v3895_v61 = vunpack.c.l.bf16 %v3893_v59  ;;  %v3889_v63 = vmul.f32 %v3888_v58, %v8472_v53  ;;  %v3883_v15 = vpack.c.bf16 %v3882_v60, %v3882_v60 }
 0x50a   : > { %s3899_s11 = sor.u32 %s3898_s15, %s11440_s25  ;;  %p2705_p4 = scmp.ne.f32.partialorder %s8664_s6, %s8664_s6  ;;  %v3912_v36 = vpack.c.bf16 %v3911_v12, %v3911_v12  ;;  %v3847_v5 = vmax.f32 %v3844_v56, 0.0 }
 0x50b   : > { %s2717_s17 = sshrl.u32 %s8731_s12, 16  ;;  %s11441_s27 = sld [smem:[#allocation76_spill]]  ;;  %v3900_v4 = vstv %s3899_s11  ;;  %v3896_v3 = vmul.f32 %v3895_v61, %v8498_v17  ;;  %v3890_v18 = vpack.c.bf16 %v3889_v63, %v3889_v63  ;;  %v3913_v14 = vunpack.c.l.bf16 %v3883_v15 }
 0x50c   : > { %p2716_p6 = scmp.ne.f32.partialorder %s8731_s12, %s8731_s12  ;;  %s11442_s5 = sld [smem:[#allocation77_spill]]  ;;  %v3902_v0 = vunpack.c.l.bf16 %v3900_v4  ;;  %v3922_v49 = vunpack.c.l.bf16 %v3912_v36 }
 0x50d   : > { %s11444_s9 = sld [smem:[#allocation78_spill]]  ;;  %s8824_s28 = sand.u32 1, %s2717_s17  ;;  %v3897_v62 = vpack.c.bf16 %v3896_v3, %v3896_v3  ;;  %v3914_v30 = vunpack.c.l.bf16 %v3890_v18 }
 0x50e   : > { %s11446_s13 = sld [smem:[#allocation79_spill]]  ;;  %v3903_v21 = vmul.f32 %v3902_v0, %v8548_v55  ;;  %v3923_v57 = vadd.f32 %v3922_v49, %v3921_v42  ;;  %p2727_p10 = scmp.ne.f32.partialorder %s8793_s20, %s8793_s20 }
 0x50f   : > { %s11443_s4 = sshrl.u32 %s11439_s10, 16  ;;  %s11452_s1 = sld [smem:[#allocation80_spill]]  ;;  %v3917_v33 = vunpack.c.l.bf16 %v3897_v62  ;;  %v3915_v39 = vadd.f32 %v3914_v30, %v3913_v14 }
 0x510   : > { %s3933_s2 = sshll.u32 %s11443_s4, 16  ;;  %s11448_s15 = smov %s11443_s4  ;;  %v3904_v20 = vpack.c.bf16 %v3903_v21, %v3903_v21  ;;  %v3924_v2 = vpack.c.bf16 %v3923_v57, %v3923_v57 }
 0x511   : > { %s11445_s3 = sshrl.u32 %s11441_s27, 16  ;;  %s8831_s24 = sor.u32 %s3933_s2, %s11448_s15  ;;  %v3916_v47 = vpack.c.bf16 %v3915_v39, %v3915_v39 }
 0x512   : > { %s3944_s19 = sshll.u32 %s11445_s3, 16  ;;  %s11447_s30 = sshrl.u32 %s11442_s5, 16  ;;  %v3935_v34 = vstv %s8831_s24  ;;  %v3918_v41 = vunpack.c.l.bf16 %v3904_v20  ;;  %v3929_v18 = vunpack.c.l.bf16 %v3924_v2 }
 0x513   : > { %s3951_s29 = sshll.u32 %s11447_s30, 16  ;;  %s11449_s7 = sshrl.u32 %s11444_s9, 16  ;;  %v8875_v58 = vunpack.c.l.bf16 %v3935_v34  ;;  %v3925_v9 = vunpack.c.l.bf16 %v3916_v47 }
 0x514   : > { %s3958_s25 = sshll.u32 %s11449_s7, 16  ;;  %s11450_s11 = smov %s11445_s3  ;;  %v3919_v48 = vadd.f32 %v3918_v41, %v3917_v33  ;;  %v8919_v41 = vpack.c.bf16 %v3847_v5, %v3847_v5 }
 0x515   : > { %s3945_s17 = sor.u32 %s3944_s19, %s11450_s11  ;;  %s11451_s4 = sshrl.u32 %s11446_s13, 16 }
 0x516   : > { %s3965_s3 = sshll.u32 %s11451_s4, 16  ;;  %s11453_s10 = smov %s11447_s30  ;;  %v3946_v40 = vstv %s3945_s17  ;;  %v3920_v7 = vpack.c.bf16 %v3919_v48, %v3919_v48 }
 0x517   : > { %s3952_s2 = sor.u32 %s3951_s29, %s11453_s10  ;;  %s8843_s15 = sld [smem:[#allocation6 + $0x123]]  ;;  %v3948_v37 = vunpack.c.l.bf16 %v3946_v40 }
 0x518   : > { %s11454_s27 = smov %s11449_s7  ;;  %s11455_s7 = sld [smem:[#allocation81_spill]]  ;;  %v3953_v44 = vstv %s3952_s2  ;;  %v3926_v15 = vunpack.c.l.bf16 %v3920_v7 }
 0x519   : > { %s8848_s19 = sor.u32 %s3958_s25, %s11454_s27  ;;  %s11456_s11 = sld [smem:[#allocation82_spill]]  ;;  %v3955_v38 = vunpack.c.l.bf16 %v3953_v44  ;;  %v3949_v50 = vmul.f32 %v3948_v37, %v8422_v24 }
 0x51a   : > { %s3966_s5 = sor.u32 %s3965_s3, %s11451_s4  ;;  %s11457_s29 = sshrl.u32 %s11452_s1, 16  ;;  %v3960_v51 = vstv %s8848_s19  ;;  %v3927_v62 = vadd.f32 %v3926_v15, %v3925_v9 }
 0x51b   : > { %s3972_s10 = sshll.u32 %s11457_s29, 16  ;;  %s11458_s30 = sand.u32 4294901760, %s8806_s26  ;;  %v3967_v54 = vstv %s3966_s5  ;;  %v3956_v59 = vmul.f32 %v3955_v38, %v8431_v28  ;;  %v3962_v60 = vunpack.c.l.bf16 %v3960_v51  ;;  %v3950_v63 = vpack.c.bf16 %v3949_v50, %v3949_v50 }
 0x51c   : > { %s12431_s30 = smov (%p2705_p4, %s11458_s30), 2143289344  ;;  %s11460_s9 = sld [smem:[#allocation83_spill]]  ;;  %v3969_v61 = vunpack.c.l.bf16 %v3967_v54  ;;  %v3928_v20 = vpack.c.bf16 %v3927_v62, %v3927_v62 }
 0x51d   : > { %11459 = sst [smem:[#allocation53_spill]] %s12431_s30  ;;  %s11463_s3 = sadd.s32 32767, %s8824_s28  ;;  %v3957_v4 = vpack.c.bf16 %v3956_v59, %v3956_v59  ;;  %v3963_v3 = vmul.f32 %v3962_v60, %v8440_v35  ;;  %v4000_v30 = vunpack.c.l.bf16 %v3950_v63 }
 0x51e   : > { %s11461_s13 = sshrl.u32 %s11455_s7, 16  ;;  %s8868_s26 = sadd.s32 %s8731_s12, %s11463_s3  ;;  %v3970_v0 = vmul.f32 %v3969_v61, %v8453_v43  ;;  %v3930_v42 = vunpack.c.l.bf16 %v3928_v20 }
 0x51f   : > { %s3979_s24 = sshll.u32 %s11461_s13, 16  ;;  %s11462_s25 = sshrl.u32 %s11456_s11, 16  ;;  %v3964_v21 = vpack.c.bf16 %v3963_v3, %v3963_v3  ;;  %v4001_v34 = vunpack.c.l.bf16 %v3957_v4 }
 0x520   : > { %s3986_s17 = sshll.u32 %s11462_s25, 16  ;;  %s11465_s2 = smov %s11457_s29  ;;  %v3971_v6 = vpack.c.bf16 %v3970_v0, %v3970_v0  ;;  %v3931_v48 = vadd.f32 %v3930_v42, %v3929_v18 }
 0x521   : > { %s3973_s27 = sor.u32 %s3972_s10, %s11465_s2  ;;  %s2728_s4 = sshrl.u32 %s8793_s20, 16  ;;  %v4004_v39 = vunpack.c.l.bf16 %v3964_v21  ;;  %v4002_v44 = vadd.f32 %v4001_v34, %v4000_v30 }
 0x522   : > { %s11466_s28 = sshrl.u32 %s11460_s9, 16  ;;  %s11467_s19 = smov %s11461_s13  ;;  %v3974_v46 = vstv %s3973_s27  ;;  %v4005_v40 = vunpack.c.l.bf16 %v3971_v6  ;;  %v3932_v9 = vpack.c.bf16 %v3931_v48, %v3931_v48 }
 0x523   : > { %s3993_s29 = sshll.u32 %s11466_s28, 16  ;;  %s3980_s13 = sor.u32 %s3979_s24, %s11467_s19  ;;  %v3976_v8 = vunpack.c.l.bf16 %v3974_v46  ;;  %v4003_v51 = vpack.c.bf16 %v4002_v44, %v4002_v44 }
 0x524   : > { %s11468_s5 = smov %s11462_s25  ;;  %s2721_s25 = sand.u32 4294901760, %s8868_s26  ;;  %v3981_v19 = vstv %s3980_s13  ;;  %v4006_v49 = vadd.f32 %v4005_v40, %v4004_v39  ;;  %v3937_v3 = vunpack.c.l.bf16 %v3932_v9 }
 0x525   : > { %s3987_s1 = sor.u32 %s3986_s17, %s11468_s5  ;;  %s11469_s3 = sld [smem:[#allocation126_spill]]  ;;  %v3977_v14 = vmul.f32 %v3976_v8, %v8465_v26  ;;  %v3983_v25 = vunpack.c.l.bf16 %v3981_v19  ;;  %v4016_v61 = vunpack.c.l.bf16 %v4003_v51 }
 0x526   : > { %s8886_s2 = sand.u32 1, %s2728_s4  ;;  %s11470_s7 = smov %s11466_s28  ;;  %v3988_v29 = vstv %s3987_s1  ;;  %v4007_v56 = vpack.c.bf16 %v4006_v49, %v4006_v49  ;;  %v3939_v21 = vadd.f32 %v8875_v58, %v3937_v3 }
 0x527   : > { %s3994_s11 = sor.u32 %s3993_s29, %s11470_s7  ;;  %s2739_s24 = sshrl.u32 %s8843_s15, 16  ;;  %v3990_v27 = vunpack.c.l.bf16 %v3988_v29  ;;  %v3978_v32 = vpack.c.bf16 %v3977_v14, %v3977_v14  ;;  %v3984_v10 = vmul.f32 %v3983_v25, %v8472_v53 }
 0x528   : > { %s11471_s17 = sld [smem:[#allocation84_spill]]  ;;  %s12433_s25 = smov (%p2716_p6, %s2721_s25), 2143289344  ;;  %v3995_v12 = vstv %s3994_s11  ;;  %v4017_v4 = vunpack.c.l.bf16 %v4007_v56 }
 0x529   : > { %11473 = sst [smem:[#allocation29_spill]] %s12433_s25  ;;  %s2730_s27 = sadd.s32 32767, %s8886_s2  ;;  %v3997_v33 = vunpack.c.l.bf16 %v3995_v12  ;;  %v3991_v36 = vmul.f32 %v3990_v27, %v8498_v17  ;;  %v3985_v45 = vpack.c.bf16 %v3984_v10, %v3984_v10  ;;  %v4008_v38 = vunpack.c.l.bf16 %v3978_v32 }
 0x52a   : > { %s11474_s9 = sld [smem:[#allocation85_spill]]  ;;  %s8904_s13 = sand.u32 1, %s2739_s24  ;;  %v4018_v19 = vadd.f32 %v4017_v4, %v4016_v61  ;;  %v3942_v10 = vmax.f32 %v3939_v21, 0.0 }
 0x52b   : > { %s11472_s26 = sshrl.u32 %s11469_s3, 16  ;;  %s11475_s4 = sld [smem:[#allocation86_spill]]  ;;  %v3998_v37 = vmul.f32 %v3997_v33, %v8548_v55  ;;  %v3992_v47 = vpack.c.bf16 %v3991_v36, %v3991_v36  ;;  %v4009_v57 = vunpack.c.l.bf16 %v3985_v45 }
 0x52c   : > { %s4028_s28 = sshll.u32 %s11472_s26, 16  ;;  %s11477_s12 = smov %s11472_s26  ;;  %v4019_v27 = vpack.c.bf16 %v4018_v19, %v4018_v19 }
 0x52d   : > { %s8908_s5 = sor.u32 %s4028_s28, %s11477_s12  ;;  %s11478_s1 = sld [smem:[#allocation87_spill]]  ;;  %v3999_v50 = vpack.c.bf16 %v3998_v37, %v3998_v37  ;;  %v4012_v59 = vunpack.c.l.bf16 %v3992_v47  ;;  %v4010_v63 = vadd.f32 %v4009_v57, %v4008_v38 }
 0x52e   : > { %s11476_s29 = sshrl.u32 %s11471_s17, 16  ;;  %s8917_s26 = sadd.s32 %s8793_s20, %s2730_s27  ;;  %v4030_v54 = vstv %s8908_s5  ;;  %v4024_v36 = vunpack.c.l.bf16 %v4019_v27 }
 0x52f   : > { %s4039_s19 = sshll.u32 %s11476_s29, 16  ;;  %s11481_s3 = smov %s11476_s29  ;;  %v4013_v60 = vunpack.c.l.bf16 %v3999_v50  ;;  %v4011_v18 = vpack.c.bf16 %v4010_v63, %v4010_v63  ;;  %v8955_v14 = vunpack.c.l.bf16 %v4030_v54 }
 0x530   : > { %s11479_s2 = sshrl.u32 %s11474_s9, 16  ;;  %s4040_s28 = sor.u32 %s4039_s19, %s11481_s3 }
 0x531   : > { %s4046_s7 = sshll.u32 %s11479_s2, 16  ;;  %s11480_s11 = sshrl.u32 %s11475_s4, 16  ;;  %v4041_v7 = vstv %s4040_s28  ;;  %v4014_v0 = vadd.f32 %v4013_v60, %v4012_v59  ;;  %v4020_v12 = vunpack.c.l.bf16 %v4011_v18 }
 0x532   : > { %s4053_s24 = sshll.u32 %s11480_s11, 16  ;;  %s2741_s29 = sadd.s32 32767, %s8904_s13  ;;  %v4043_v2 = vunpack.c.l.bf16 %v4041_v7 }
 0x533   : > { %s11482_s12 = sshrl.u32 %s11478_s1, 16  ;;  %s11483_s27 = sld [smem:[#allocation88_spill]]  ;;  %v4015_v6 = vpack.c.bf16 %v4014_v0, %v4014_v0  ;;  %v9006_v0 = vpack.c.bf16 %v3942_v10, %v3942_v10 }
 0x534   : > { %s4060_s2 = sshll.u32 %s11482_s12, 16  ;;  %s11484_s11 = sshrl.u32 %s11474_s9, 16  ;;  %v4044_v8 = vmul.f32 %v4043_v2, %v8422_v24 }
 0x535   : > { %s4047_s10 = sor.u32 %s4046_s7, %s11484_s11  ;;  %s11485_s6 = sshrl.u32 %s11475_s4, 16  ;;  %v4021_v58 = vunpack.c.l.bf16 %v4015_v6 }
 0x536   : > { %s4054_s17 = sor.u32 %s4053_s24, %s11485_s6  ;;  %s8934_s19 = sld [smem:[#allocation6 + $0x24]]  ;;  %v4048_v46 = vstv %s4047_s10  ;;  %v4045_v32 = vpack.c.bf16 %v4044_v8, %v4044_v8 }
 0x537   : > { %s11486_s13 = sld [smem:[#allocation89_spill]]  ;;  %s11488_s9 = smov %s11482_s12  ;;  %v4055_v15 = vstv %s4054_s17  ;;  %v4050_v5 = vunpack.c.l.bf16 %v4048_v46  ;;  %v4022_v42 = vadd.f32 %v4021_v58, %v4020_v12 }
 0x538   : > { %s11487_s3 = sld [smem:[#allocation90_spill]]  ;;  %s4061_s5 = sor.u32 %s4060_s2, %s11488_s9  ;;  %v4057_v29 = vunpack.c.l.bf16 %v4055_v15  ;;  %v4095_v54 = vunpack.c.l.bf16 %v4045_v32 }
 0x539   : > { %s11489_s7 = sshrl.u32 %s11483_s27, 16  ;;  %s2732_s6 = sand.u32 4294901760, %s8917_s26  ;;  %v4062_v62 = vstv %s4061_s5  ;;  %v4051_v25 = vmul.f32 %v4050_v5, %v8431_v28  ;;  %v4023_v50 = vpack.c.bf16 %v4022_v42, %v4022_v42 }
 0x53a   : > { %s4067_s4 = sshll.u32 %s11489_s7, 16  ;;  %s8942_s24 = sadd.s32 %s8843_s15, %s2741_s29  ;;  %v4058_v30 = vmul.f32 %v4057_v29, %v8440_v35  ;;  %v4064_v20 = vunpack.c.l.bf16 %v4062_v62 }
 0x53b   : > { %s11490_s28 = sld [smem:[#allocation91_spill]]  ;;  %p2738_p5 = scmp.ne.f32.partialorder %s8843_s15, %s8843_s15  ;;  %v4052_v33 = vpack.c.bf16 %v4051_v25, %v4051_v25  ;;  %v4025_v60 = vunpack.c.l.bf16 %v4023_v50 }
 0x53c   : > { %s11493_s10 = smov %s11489_s7  ;;  %s2743_s17 = sand.u32 4294901760, %s8942_s24  ;;  %v4065_v39 = vmul.f32 %v4064_v20, %v8453_v43  ;;  %v4059_v37 = vpack.c.bf16 %v4058_v30, %v4058_v30 }
 0x53d   : > { %s11491_s12 = sshrl.u32 %s11486_s13, 16  ;;  %s4068_s29 = sor.u32 %s4067_s4, %s11493_s10  ;;  %v4096_v56 = vunpack.c.l.bf16 %v4052_v33  ;;  %v4026_v8 = vadd.f32 %v4025_v60, %v4024_v36 }
 0x53e   : > { %s4074_s1 = sshll.u32 %s11491_s12, 16  ;;  %s11492_s2 = sshrl.u32 %s11487_s3, 16  ;;  %v4069_v34 = vstv %s4068_s29  ;;  %v4066_v47 = vpack.c.bf16 %v4065_v39, %v4065_v39  ;;  %v4099_v2 = vunpack.c.l.bf16 %v4059_v37 }
 0x53f   : > { %s4081_s11 = sshll.u32 %s11492_s2, 16  ;;  %s11495_s27 = smov %s11491_s12  ;;  %v4071_v40 = vunpack.c.l.bf16 %v4069_v34  ;;  %v4097_v61 = vadd.f32 %v4096_v56, %v4095_v54  ;;  %v4027_v6 = vpack.c.bf16 %v4026_v8, %v4026_v8 }
 0x540   : > { %s4075_s5 = sor.u32 %s4074_s1, %s11495_s27  ;;  %s11496_s4 = smov %s11492_s2  ;;  %v4100_v63 = vunpack.c.l.bf16 %v4066_v47 }
 0x541   : > { %s11494_s9 = sshrl.u32 %s11490_s28, 16  ;;  %s4082_s24 = sor.u32 %s4081_s11, %s11496_s4  ;;  %v4076_v44 = vstv %s4075_s5  ;;  %v4072_v49 = vmul.f32 %v4071_v40, %v8465_v26  ;;  %v4098_v5 = vpack.c.bf16 %v4097_v61, %v4097_v61  ;;  %v4032_v33 = vunpack.c.l.bf16 %v4027_v6 }
 0x542   : > { %s4088_s7 = sshll.u32 %s11494_s9, 16  ;;  %s12435_s6 = smov (%p2727_p10, %s2732_s6), 2143289344  ;;  %v4083_v45 = vstv %s4082_s24  ;;  %v4078_v38 = vunpack.c.l.bf16 %v4076_v44  ;;  %v4101_v18 = vadd.f32 %v4100_v63, %v4099_v2 }
 0x543   : > { %11497 = sst [smem:[#allocation30_spill]] %s12435_s6  ;;  %s2750_s2 = sshrl.u32 %s8934_s19, 16  ;;  %v4085_v48 = vunpack.c.l.bf16 %v4083_v45  ;;  %v4073_v57 = vpack.c.bf16 %v4072_v49, %v4072_v49  ;;  %v4111_v27 = vunpack.c.l.bf16 %v4098_v5  ;;  %v4034_v44 = vadd.f32 %v8955_v14, %v4032_v33 }
 0x544   : > { %s11498_s12 = sld [smem:[#allocation228_spill]]  ;;  %s11500_s13 = smov %s11494_s9  ;;  %v4079_v59 = vmul.f32 %v4078_v38, %v8472_v53  ;;  %v4102_v25 = vpack.c.bf16 %v4101_v18, %v4101_v18 }
 0x545   : > { %s11499_s10 = sld [smem:[#allocation127_spill]]  ;;  %s4089_s1 = sor.u32 %s4088_s7, %s11500_s13  ;;  %v4086_v7 = vmul.f32 %v4085_v48, %v8498_v17  ;;  %v4103_v3 = vunpack.c.l.bf16 %v4073_v57 }
 0x546   : > { %s12437_s17 = smov (%p2738_p5, %s2743_s17), 2143289344  ;;  %s11502_s20 = sld [smem:[#allocation92_spill]]  ;;  %v4090_v51 = vstv %s4089_s1  ;;  %v4080_v4 = vpack.c.bf16 %v4079_v59, %v4079_v59  ;;  %v4112_v34 = vunpack.c.l.bf16 %v4102_v25 }
 0x547   : > { %11501 = sst [smem:[#allocation31_spill]] %s12437_s17  ;;  %s8989_s27 = sand.u32 1, %s2750_s2  ;;  %v4092_v9 = vunpack.c.l.bf16 %v4090_v51  ;;  %v4087_v46 = vpack.c.bf16 %v4086_v7, %v4086_v7  ;;  %v4037_v51 = vmax.f32 %v4034_v44, 0.0 }
 0x548   : > { %s11503_s3 = sld [smem:[#allocation93_spill]]  ;;  %s2752_s16 = sadd.s32 32767, %s8989_s27  ;;  %v4104_v29 = vunpack.c.l.bf16 %v4080_v4  ;;  %v4113_v45 = vadd.f32 %v4112_v34, %v4111_v27 }
 0x549   : > { %s8985_s9 = sld [smem:[#allocation6 + $0x25]]  ;;  %v4093_v15 = vmul.f32 %v4092_v9, %v8548_v55  ;;  %v4107_v62 = vunpack.c.l.bf16 %v4087_v46  ;;  %p2749_p11 = scmp.ne.f32.partialorder %s8934_s19, %s8934_s19 }
 0x54a   : > { %s11505_s15 = sld [smem:[#allocation94_spill]]  ;;  %v4105_v30 = vadd.f32 %v4104_v29, %v4103_v3  ;;  %v4114_v54 = vpack.c.bf16 %v4113_v45, %v4113_v45 }
 0x54b   : > { %s11504_s11 = sshrl.u32 %s11499_s10, 16  ;;  %s11508_s24 = sld [smem:[#allocation95_spill]]  ;;  %v4094_v19 = vpack.c.bf16 %v4093_v15, %v4093_v15 }
 0x54c   : > { %s4123_s29 = sshll.u32 %s11504_s11, 16  ;;  %s11506_s28 = sshrl.u32 %s11502_s20, 16  ;;  %v4106_v39 = vpack.c.bf16 %v4105_v30, %v4105_v30  ;;  %v4119_v61 = vunpack.c.l.bf16 %v4114_v54 }
 0x54d   : > { %s4134_s7 = sshll.u32 %s11506_s28, 16  ;;  %s11509_s13 = smov %s11504_s11  ;;  %v4108_v20 = vunpack.c.l.bf16 %v4094_v19 }
 0x54e   : > { %s11507_s5 = sshrl.u32 %s11503_s3, 16  ;;  %s8997_s1 = sor.u32 %s4123_s29, %s11509_s13  ;;  %v4115_v48 = vunpack.c.l.bf16 %v4106_v39 }
 0x54f   : > { %s4141_s4 = sshll.u32 %s11507_s5, 16  ;;  %s9001_s28 = sld [smem:[#allocation6 + $0x26]]  ;;  %v4125_v21 = vstv %s8997_s1  ;;  %v4109_v40 = vadd.f32 %v4108_v20, %v4107_v62 }
 0x550   : > { %s11510_s2 = sshrl.u32 %s11505_s15, 16  ;;  %s11511_s5 = sshrl.u32 %s11502_s20, 16  ;;  %v9042_v14 = vunpack.c.l.bf16 %v4125_v21 }
 0x551   : > { %s4148_s11 = sshll.u32 %s11510_s2, 16  ;;  %s4135_s26 = sor.u32 %s4134_s7, %s11511_s5  ;;  %v4110_v38 = vpack.c.bf16 %v4109_v40, %v4109_v40 }
 0x552   : > { %s11512_s10 = sld [smem:[#allocation96_spill]]  ;;  %s11513_s29 = sshrl.u32 %s11503_s3, 16  ;;  %v4136_v12 = vstv %s4135_s26 }
 0x553   : > { %s4142_s13 = sor.u32 %s4141_s4, %s11513_s29  ;;  %s11514_s2 = sshrl.u32 %s11508_s24, 16  ;;  %v4138_v58 = vunpack.c.l.bf16 %v4136_v12  ;;  %v4116_v59 = vunpack.c.l.bf16 %v4110_v38 }
 0x554   : > { %s4155_s23 = sshll.u32 %s11514_s2, 16  ;;  %s11515_s17 = sld [smem:[#allocation97_spill]]  ;;  %v4143_v32 = vstv %s4142_s13 }
 0x555   : > { %s11516_s20 = sshrl.u32 %s11505_s15, 16  ;;  %s11518_s27 = sld [smem:[#allocation98_spill]]  ;;  %v4145_v10 = vunpack.c.l.bf16 %v4143_v32  ;;  %v4139_v42 = vmul.f32 %v4138_v58, %v8422_v24  ;;  %v4117_v46 = vadd.f32 %v4116_v59, %v4115_v48 }
 0x556   : > { %s4149_s7 = sor.u32 %s4148_s11, %s11516_s20  ;;  %s11519_s5 = sld [smem:[#allocation99_spill]] }
 0x557   : > { %s11520_s29 = smov %s11514_s2  ;;  %s9025_s15 = sadd.s32 %s8934_s19, %s2752_s16  ;;  %v4150_v36 = vstv %s4149_s7  ;;  %v4146_v47 = vmul.f32 %v4145_v10, %v8431_v28  ;;  %v4140_v56 = vpack.c.bf16 %v4139_v42, %v4139_v42  ;;  %v4118_v62 = vpack.c.bf16 %v4117_v46, %v4117_v46 }
 0x558   : > { %s11517_s3 = sshrl.u32 %s11512_s10, 16  ;;  %s4156_s2 = sor.u32 %s4155_s23, %s11520_s29  ;;  %v4152_v37 = vunpack.c.l.bf16 %v4150_v36  ;;  %v9084_v10 = vpack.c.bf16 %v4037_v51, %v4037_v51 }
 0x559   : > { %s4162_s4 = sshll.u32 %s11517_s3, 16  ;;  %s2761_s11 = sshrl.u32 %s8985_s9, 16  ;;  %v4157_v49 = vstv %s4156_s2  ;;  %v4147_v7 = vpack.c.bf16 %v4146_v47, %v4146_v47  ;;  %v4190_v6 = vunpack.c.l.bf16 %v4140_v56  ;;  %v4120_v58 = vunpack.c.l.bf16 %v4118_v62 }
 0x55a   : > { %s11521_s6 = sshrl.u32 %s11515_s17, 16  ;;  %s11524_s16 = sld [smem:[#allocation229_spill]]  ;;  %v4153_v50 = vmul.f32 %v4152_v37, %v8440_v35  ;;  %v4159_v57 = vunpack.c.l.bf16 %v4157_v49 }
 0x55b   : > { %s4169_s1 = sshll.u32 %s11521_s6, 16  ;;  %s11522_s26 = sshrl.u32 %s11518_s27, 16  ;;  %v4191_v25 = vunpack.c.l.bf16 %v4147_v7  ;;  %v4121_v42 = vadd.f32 %v4120_v58, %v4119_v61 }
 0x55c   : > { %s4176_s24 = sshll.u32 %s11522_s26, 16  ;;  %s11523_s23 = sshrl.u32 %s11519_s5, 16  ;;  %v4154_v2 = vpack.c.bf16 %v4153_v50, %v4153_v50  ;;  %v4160_v63 = vmul.f32 %v4159_v57, %v8453_v43 }
 0x55d   : > { %s4183_s13 = sshll.u32 %s11523_s23, 16  ;;  %s11525_s6 = smov %s11517_s3  ;;  %v4192_v33 = vadd.f32 %v4191_v25, %v4190_v6  ;;  %v4122_v50 = vpack.c.bf16 %v4121_v42, %v4121_v42 }
 0x55e   : > { %s4163_s20 = sor.u32 %s4162_s4, %s11525_s6  ;;  %s11526_s7 = sshrl.u32 %s11515_s17, 16  ;;  %v4161_v5 = vpack.c.bf16 %v4160_v63, %v4160_v63  ;;  %v4194_v20 = vunpack.c.l.bf16 %v4154_v2 }
 0x55f   : > { %s4170_s3 = sor.u32 %s4169_s1, %s11526_s7  ;;  %s2754_s29 = sand.u32 4294901760, %s9025_s15  ;;  %v4164_v9 = vstv %s4163_s20  ;;  %v4193_v37 = vpack.c.bf16 %v4192_v33, %v4192_v33 }
 0x560   : > { %s9040_s25 = sand.u32 1, %s2761_s11  ;;  %s11527_s10 = smov %s11522_s26  ;;  %v4171_v60 = vstv %s4170_s3  ;;  %v4166_v4 = vunpack.c.l.bf16 %v4164_v9  ;;  %v4195_v34 = vunpack.c.l.bf16 %v4161_v5 }
 0x561   : > { %s4177_s17 = sor.u32 %s4176_s24, %s11527_s10  ;;  %s11528_s4 = smov %s11523_s23  ;;  %v4173_v15 = vunpack.c.l.bf16 %v4171_v60  ;;  %v4206_v56 = vunpack.c.l.bf16 %v4193_v37  ;;  %v4127_v60 = vunpack.c.l.bf16 %v4122_v50 }
 0x562   : > { %s4184_s2 = sor.u32 %s4183_s13, %s11528_s4  ;;  %p2760_p3 = scmp.ne.f32.partialorder %s8985_s9, %s8985_s9  ;;  %v4178_v3 = vstv %s4177_s17  ;;  %v4167_v18 = vmul.f32 %v4166_v4, %v8465_v26  ;;  %v4196_v44 = vadd.f32 %v4195_v34, %v4194_v20 }
 0x563   : > { %s11529_s15 = sld [smem:[#allocation128_spill]]  ;;  %s2763_s11 = sadd.s32 32767, %s9040_s25  ;;  %v4185_v8 = vstv %s4184_s2  ;;  %v4180_v19 = vunpack.c.l.bf16 %v4178_v3  ;;  %v4174_v21 = vmul.f32 %v4173_v15, %v8472_v53 }
 0x564   : > { %s11530_s26 = sld [smem:[#allocation100_spill]]  ;;  %s2772_s23 = sshrl.u32 %s9001_s28, 16  ;;  %v4187_v29 = vunpack.c.l.bf16 %v4185_v8  ;;  %v4168_v27 = vpack.c.bf16 %v4167_v18, %v4167_v18  ;;  %v4197_v51 = vpack.c.bf16 %v4196_v44, %v4196_v44  ;;  %v4129_v8 = vadd.f32 %v9042_v14, %v4127_v60 }
 0x565   : > { %s12439_s29 = smov (%p2749_p11, %s2754_s29), 2143289344  ;;  %s11532_s27 = sld [smem:[#allocation101_spill]]  ;;  %v4181_v12 = vmul.f32 %v4180_v19, %v8498_v17  ;;  %v4175_v32 = vpack.c.bf16 %v4174_v21, %v4174_v21 }
 0x566   : > { %11531 = sst [smem:[#allocation54_spill]] %s12439_s29  ;;  %s9066_s20 = sadd.s32 %s8985_s9, %s2763_s11  ;;  %v4188_v30 = vmul.f32 %v4187_v29, %v8548_v55  ;;  %v4198_v40 = vunpack.c.l.bf16 %v4168_v27  ;;  %v4207_v2 = vunpack.c.l.bf16 %v4197_v51 }
 0x567   : > { %s11533_s25 = sld [smem:[#allocation102_spill]]  ;;  %s9068_s19 = sand.u32 1, %s2772_s23  ;;  %v4182_v36 = vpack.c.bf16 %v4181_v12, %v4181_v12  ;;  %v4199_v45 = vunpack.c.l.bf16 %v4175_v32 }
 0x568   : > { %s11536_s7 = sld [smem:[#allocation103_spill]]  ;;  %s2765_s1 = sand.u32 4294901760, %s9066_s20  ;;  %v4189_v39 = vpack.c.bf16 %v4188_v30, %v4188_v30  ;;  %v4208_v5 = vadd.f32 %v4207_v2, %v4206_v56  ;;  %v4132_v30 = vmax.f32 %v4129_v8, 0.0 }
 0x569   : > { %s11534_s5 = sshrl.u32 %s11529_s15, 16  ;;  %s11539_s2 = sld [smem:[#allocation230_spill]]  ;;  %v4202_v47 = vunpack.c.l.bf16 %v4182_v36  ;;  %v4200_v54 = vadd.f32 %v4199_v45, %v4198_v40 }
 0x56a   : > { %s4218_s24 = sshll.u32 %s11534_s5, 16  ;;  %s11535_s13 = sshrl.u32 %s11530_s26, 16  ;;  %v4203_v49 = vunpack.c.l.bf16 %v4189_v39  ;;  %v4209_v14 = vpack.c.bf16 %v4208_v5, %v4208_v5 }
 0x56b   : > { %s4229_s6 = sshll.u32 %s11535_s13, 16  ;;  %s11537_s3 = sshrl.u32 %s11532_s27, 16  ;;  %v4201_v61 = vpack.c.bf16 %v4200_v54, %v4200_v54 }
 0x56c   : > { %s4236_s10 = sshll.u32 %s11537_s3, 16  ;;  %s11540_s11 = smov %s11534_s5  ;;  %v4204_v57 = vadd.f32 %v4203_v49, %v4202_v47  ;;  %v4214_v33 = vunpack.c.l.bf16 %v4209_v14 }
 0x56d   : > { %s11538_s17 = sshrl.u32 %s11533_s25, 16  ;;  %s9079_s23 = sor.u32 %s4218_s24, %s11540_s11  ;;  %v4210_v18 = vunpack.c.l.bf16 %v4201_v61 }
 0x56e   : > { %s4243_s4 = sshll.u32 %s11538_s17, 16  ;;  %s11541_s5 = smov %s11535_s13  ;;  %v4220_v38 = vstv %s9079_s23  ;;  %v4205_v4 = vpack.c.bf16 %v4204_v57, %v4204_v57 }
 0x56f   : > { %s4230_s13 = sor.u32 %s4229_s6, %s11541_s5  ;;  %s11542_s3 = sshrl.u32 %s11536_s7, 16  ;;  %v9120_v62 = vunpack.c.l.bf16 %v4220_v38 }
 0x570   : > { %s4250_s17 = sshll.u32 %s11542_s3, 16  ;;  %s11543_s29 = sld [smem:[#allocation104_spill]]  ;;  %v4231_v48 = vstv %s4230_s13  ;;  %v4211_v29 = vunpack.c.l.bf16 %v4205_v4 }
 0x571   : > { %s11544_s15 = sshrl.u32 %s11532_s27, 16  ;;  %s11545_s24 = sshrl.u32 %s11533_s25, 16  ;;  %v4233_v59 = vunpack.c.l.bf16 %v4231_v48 }
 0x572   : > { %s4237_s26 = sor.u32 %s4236_s10, %s11544_s15  ;;  %s4244_s6 = sor.u32 %s4243_s4, %s11545_s24  ;;  %v4212_v20 = vadd.f32 %v4211_v29, %v4210_v18 }
 0x573   : > { %s2774_s11 = sadd.s32 32767, %s9068_s19  ;;  %s11546_s5 = sld [smem:[#allocation105_spill]]  ;;  %v4238_v7 = vstv %s4237_s26  ;;  %v4245_v9 = vstv %s4244_s6  ;;  %v4234_v46 = vmul.f32 %v4233_v59, %v8422_v24 }
 0x574   : > { %s11547_s3 = sld [smem:[#allocation106_spill]]  ;;  %s11548_s30 = sshrl.u32 %s11536_s7, 16  ;;  %v4240_v63 = vunpack.c.l.bf16 %v4238_v7  ;;  %v4247_v15 = vunpack.c.l.bf16 %v4245_v9  ;;  %v4213_v40 = vpack.c.bf16 %v4212_v20, %v4212_v20 }
 0x575   : > { %s4251_s0 = sor.u32 %s4250_s17, %s11548_s30  ;;  %s12441_s1 = smov (%p2760_p3, %s2765_s1), 2143289344  ;;  %v4235_v25 = vpack.c.bf16 %v4234_v46, %v4234_v46 }
 0x576   : > { %s11549_s21 = sshrl.u32 %s11543_s29, 16  ;;  %11550 = sst [smem:[#allocation32_spill]] %s12441_s1  ;;  %v4252_v3 = vstv %s4251_s0  ;;  %v4241_v19 = vmul.f32 %v4240_v63, %v8431_v28  ;;  %v4248_v21 = vmul.f32 %v4247_v15, %v8440_v35  ;;  %v4215_v48 = vunpack.c.l.bf16 %v4213_v40 }
 0x577   : > { %s4257_s27 = sshll.u32 %s11549_s21, 16  ;;  %s11551_s25 = sld [smem:[#allocation107_spill]]  ;;  %v4254_v6 = vunpack.c.l.bf16 %v4252_v3  ;;  %v4285_v49 = vunpack.c.l.bf16 %v4235_v25  ;;  %v9163_v63 = vpack.c.bf16 %v4132_v30, %v4132_v30 }
 0x578   : > { %s9109_s4 = sadd.s32 %s9001_s28, %s2774_s11  ;;  %s4258_s9 = sor.u32 %s4257_s27, %s11549_s21  ;;  %v4242_v27 = vpack.c.bf16 %v4241_v19, %v4241_v19  ;;  %v4249_v34 = vpack.c.bf16 %v4248_v21, %v4248_v21  ;;  %v4216_v9 = vadd.f32 %v4215_v48, %v4214_v33 }
 0x579   : > { %s11552_s19 = sshrl.u32 %s11546_s5, 16  ;;  %p2771_p7 = scmp.ne.f32.partialorder %s9001_s28, %s9001_s28  ;;  %v4259_v12 = vstv %s4258_s9  ;;  %v4255_v58 = vmul.f32 %v4254_v6, %v8453_v43 }
 0x57a   : > { %s4264_s10 = sshll.u32 %s11552_s19, 16  ;;  %s11553_s7 = sshrl.u32 %s11547_s3, 16  ;;  %v4261_v32 = vunpack.c.l.bf16 %v4259_v12  ;;  %v4286_v38 = vunpack.c.l.bf16 %v4242_v27  ;;  %v4289_v59 = vunpack.c.l.bf16 %v4249_v34  ;;  %v4217_v3 = vpack.c.bf16 %v4216_v9, %v4216_v9 }
 0x57b   : > { %s4271_s30 = sshll.u32 %s11553_s7, 16  ;;  %s11557_s29 = smov %s11552_s19  ;;  %v4256_v42 = vpack.c.bf16 %v4255_v58, %v4255_v58 }
 0x57c   : > { %s4265_s15 = sor.u32 %s4264_s10, %s11557_s29  ;;  %s11558_s26 = smov %s11553_s7  ;;  %v4262_v37 = vmul.f32 %v4261_v32, %v8465_v26  ;;  %v4287_v57 = vadd.f32 %v4286_v38, %v4285_v49  ;;  %v4222_v14 = vunpack.c.l.bf16 %v4217_v3 }
 0x57d   : > { %s11555_s13 = sshrl.u32 %s11551_s25, 16  ;;  %s4272_s24 = sor.u32 %s4271_s30, %s11558_s26  ;;  %v4266_v36 = vstv %s4265_s15  ;;  %v4290_v7 = vunpack.c.l.bf16 %v4256_v42 }
 0x57e   : > { %s4278_s17 = sshll.u32 %s11555_s13, 16  ;;  %s2776_s6 = sand.u32 4294901760, %s9109_s4  ;;  %v4273_v39 = vstv %s4272_s24  ;;  %v4268_v44 = vunpack.c.l.bf16 %v4266_v36  ;;  %v4263_v50 = vpack.c.bf16 %v4262_v37, %v4262_v37  ;;  %v4288_v46 = vpack.c.bf16 %v4287_v57, %v4287_v57 }
 0x57f   : > { %s9128_s11 = sld [smem:[#allocation6 + $0x27]]  ;;  %s11561_s5 = smov %s11555_s13  ;;  %v4275_v45 = vunpack.c.l.bf16 %v4273_v39  ;;  %v4291_v15 = vadd.f32 %v4290_v7, %v4289_v59  ;;  %v9186_v33 = vadd.f32 %v9120_v62, %v4222_v14 }
 0x580   : > { %s11559_s27 = sld [smem:[#allocation129_spill]]  ;;  %s4279_s3 = sor.u32 %s4278_s17, %s11561_s5  ;;  %v4269_v51 = vmul.f32 %v4268_v44, %v8472_v53  ;;  %v4293_v2 = vunpack.c.l.bf16 %v4263_v50  ;;  %v4301_v21 = vunpack.c.l.bf16 %v4288_v46 }
 0x581   : > { %s11562_s30 = sld [smem:[#allocation108_spill]]  ;;  %s12443_s6 = smov (%p2771_p7, %s2776_s6), 2143289344  ;;  %v4280_v47 = vstv %s4279_s3  ;;  %v4276_v56 = vmul.f32 %v4275_v45, %v8498_v17  ;;  %v4292_v19 = vpack.c.bf16 %v4291_v15, %v4291_v15 }
 0x582   : > { %11564 = sst [smem:[#allocation33_spill]] %s12443_s6  ;;  %v4282_v54 = vunpack.c.l.bf16 %v4280_v47  ;;  %v4270_v60 = vpack.c.bf16 %v4269_v51, %v4269_v51 }
 0x583   : > { %s11565_s9 = sld [smem:[#allocation109_spill]]  ;;  %v4277_v4 = vpack.c.bf16 %v4276_v56, %v4276_v56  ;;  %v4302_v30 = vunpack.c.l.bf16 %v4292_v19 }
 0x584   : > { %s11566_s13 = sld [smem:[#allocation110_spill]]  ;;  %v4283_v61 = vmul.f32 %v4282_v54, %v8548_v55  ;;  %v4294_v5 = vunpack.c.l.bf16 %v4270_v60  ;;  %v4227_v54 = vmax.f32 %v9186_v33, 0.0 }
 0x585   : > { %s11567_s17 = sld [smem:[#allocation111_spill]]  ;;  %v4297_v29 = vunpack.c.l.bf16 %v4277_v4  ;;  %v4303_v40 = vadd.f32 %v4302_v30, %v4301_v21  ;;  %p2782_p12 = scmp.ne.f32.partialorder %s9128_s11, %s9128_s11 }
 0x586   : > { %s11563_s4 = sshrl.u32 %s11559_s27, 16  ;;  %s11576_s20 = sld [smem:[#allocation112_spill]]  ;;  %v4284_v8 = vpack.c.bf16 %v4283_v61, %v4283_v61  ;;  %v4295_v25 = vadd.f32 %v4294_v5, %v4293_v2  ;;  %v9242_v33 = vpack.c.bf16 %v4227_v54, %v4227_v54 }
 0x587   : > { %s4313_s21 = sshll.u32 %s11563_s4, 16  ;;  %s11569_s15 = sshrl.u32 %s11562_s30, 16  ;;  %v4304_v38 = vpack.c.bf16 %v4303_v40, %v4303_v40 }
 0x588   : > { %s4324_s26 = sshll.u32 %s11569_s15, 16  ;;  %s11570_s28 = smov %s11563_s4  ;;  %v4298_v27 = vunpack.c.l.bf16 %v4284_v8  ;;  %v4296_v34 = vpack.c.bf16 %v4295_v25, %v4295_v25 }
 0x589   : > { %s9149_s24 = sor.u32 %s4313_s21, %s11570_s28  ;;  %s11571_s5 = sshrl.u32 %s11565_s9, 16  ;;  %v4309_v7 = vunpack.c.l.bf16 %v4304_v38 }
 0x58a   : > { %s4331_s4 = sshll.u32 %s11571_s5, 16  ;;  %s11572_s3 = sshrl.u32 %s11566_s13, 16  ;;  %v4315_v18 = vstv %s9149_s24  ;;  %v4299_v36 = vadd.f32 %v4298_v27, %v4297_v29  ;;  %v4305_v45 = vunpack.c.l.bf16 %v4296_v34 }
 0x58b   : > { %s4338_s15 = sshll.u32 %s11572_s3, 16  ;;  %s11573_s25 = sshrl.u32 %s11567_s17, 16  ;;  %v9201_v47 = vunpack.c.l.bf16 %v4315_v18 }
 0x58c   : > { %s4345_s10 = sshll.u32 %s11573_s25, 16  ;;  %s11575_s21 = sshrl.u32 %s11562_s30, 16  ;;  %v4300_v62 = vpack.c.bf16 %v4299_v36, %v4299_v36 }
 0x58d   : > { %s4325_s28 = sor.u32 %s4324_s26, %s11575_s21  ;;  %s2783_s5 = sshrl.u32 %s9128_s11, 16 }
 0x58e   : > { %s11578_s25 = sshrl.u32 %s11565_s9, 16  ;;  %s11579_s6 = sld [smem:[#allocation113_spill]]  ;;  %v4326_v6 = vstv %s4325_s28  ;;  %v4306_v56 = vunpack.c.l.bf16 %v4300_v62 }
 0x58f   : > { %s9167_s19 = sor.u32 %s4331_s4, %s11578_s25  ;;  %s11580_s1 = sshrl.u32 %s11566_s13, 16  ;;  %v4328_v12 = vunpack.c.l.bf16 %v4326_v6 }
 0x590   : > { %s4339_s29 = sor.u32 %s4338_s15, %s11580_s1  ;;  %s11581_s30 = sshrl.u32 %s11567_s17, 16  ;;  %v4333_v20 = vstv %s9167_s19  ;;  %v4307_v2 = vadd.f32 %v4306_v56, %v4305_v45 }
 0x591   : > { %s4346_s26 = sor.u32 %s4345_s10, %s11581_s30  ;;  %s11582_s7 = sshrl.u32 %s11576_s20, 16  ;;  %v4340_v58 = vstv %s4339_s29  ;;  %v4329_v39 = vmul.f32 %v4328_v12, %v8422_v24  ;;  %v4335_v42 = vunpack.c.l.bf16 %v4333_v20 }
 0x592   : > { %s4352_s0 = sshll.u32 %s11582_s7, 16  ;;  %s11583_s4 = sld [smem:[#allocation114_spill]]  ;;  %v4347_v32 = vstv %s4346_s26  ;;  %v4342_v37 = vunpack.c.l.bf16 %v4340_v58  ;;  %v4308_v19 = vpack.c.bf16 %v4307_v2, %v4307_v2 }
 0x593   : > { %s9180_s1 = sand.u32 1, %s2783_s5  ;;  %s9182_s10 = sld [smem:[#allocation6 + $0x28]]  ;;  %v4349_v44 = vunpack.c.l.bf16 %v4347_v32  ;;  %v4330_v49 = vpack.c.bf16 %v4329_v39, %v4329_v39  ;;  %v4336_v48 = vmul.f32 %v4335_v42, %v8431_v28 }
 0x594   : > { %s11584_s24 = sshrl.u32 %s11579_s6, 16  ;;  %s11585_s17 = sld [smem:[#allocation115_spill]]  ;;  %v4343_v50 = vmul.f32 %v4342_v37, %v8440_v35  ;;  %v4310_v30 = vunpack.c.l.bf16 %v4308_v19 }
 0x595   : > { %s4359_s13 = sshll.u32 %s11584_s24, 16  ;;  %s11588_s28 = sshrl.u32 %s11576_s20, 16  ;;  %v4350_v51 = vmul.f32 %v4349_v44, %v8453_v43  ;;  %v4337_v9 = vpack.c.bf16 %v4336_v48, %v4336_v48  ;;  %v4380_v5 = vunpack.c.l.bf16 %v4330_v49 }
 0x596   : > { %s9191_s5 = sor.u32 %s4352_s0, %s11588_s28  ;;  %s11591_s29 = smov %s11584_s24  ;;  %v4344_v60 = vpack.c.bf16 %v4343_v50, %v4343_v50  ;;  %v4311_v40 = vadd.f32 %v4310_v30, %v4309_v7 }
 0x597   : > { %s4360_s26 = sor.u32 %s4359_s13, %s11591_s29  ;;  %s2785_s3 = sadd.s32 32767, %s9180_s1  ;;  %v4354_v57 = vstv %s9191_s5  ;;  %v4351_v61 = vpack.c.bf16 %v4350_v51, %v4350_v51  ;;  %v4381_v18 = vunpack.c.l.bf16 %v4337_v9 }
 0x598   : > { %s11589_s25 = sshrl.u32 %s11583_s4, 16  ;;  %v4361_v59 = vstv %s4360_s26  ;;  %s11596_s0 = sld [smem:[#allocation130_spill]]  ;;  %v4356_v4 = vunpack.c.l.bf16 %v4354_v57  ;;  %v4384_v27 = vunpack.c.l.bf16 %v4344_v60  ;;  %v4312_v48 = vpack.c.bf16 %v4311_v40, %v4311_v40 }
 0x599   : > { %s4366_s30 = sshll.u32 %s11589_s25, 16  ;;  %s11594_s6 = smov %s11589_s25  ;;  %v4363_v46 = vunpack.c.l.bf16 %v4361_v59  ;;  %v4382_v25 = vadd.f32 %v4381_v18, %v4380_v5  ;;  %v4385_v12 = vunpack.c.l.bf16 %v4351_v61 }
 0x59a   : > { %s11592_s24 = sshrl.u32 %s11585_s17, 16  ;;  %s4367_s13 = sor.u32 %s4366_s30, %s11594_s6  ;;  %v4357_v29 = vmul.f32 %v4356_v4, %v8465_v26  ;;  %v4317_v9 = vunpack.c.l.bf16 %v4312_v48 }
 0x59b   : > { %s4373_s9 = sshll.u32 %s11592_s24, 16  ;;  %s11595_s28 = smov %s11592_s24  ;;  %v4368_v15 = vstv %s4367_s13  ;;  %v4364_v21 = vmul.f32 %v4363_v46, %v8472_v53  ;;  %v4383_v36 = vpack.c.bf16 %v4382_v25, %v4382_v25  ;;  %v4386_v39 = vadd.f32 %v4385_v12, %v4384_v27 }
 0x59c   : > { %s4374_s25 = sor.u32 %s4373_s9, %s11595_s28  ;;  %s9216_s24 = sadd.s32 %s9128_s11, %s2785_s3  ;;  %v4370_v3 = vunpack.c.l.bf16 %v4368_v15  ;;  %v4358_v20 = vpack.c.bf16 %v4357_v29, %v4357_v29 }
 0x59d   : > { %s9220_s4 = sld [smem:[#allocation6 + $0x29]]  ;;  %s2794_s17 = sshrl.u32 %s9182_s10, 16  ;;  %v4375_v8 = vstv %s4374_s25  ;;  %v4365_v58 = vpack.c.bf16 %v4364_v21, %v4364_v21  ;;  %v4387_v62 = vpack.c.bf16 %v4386_v39, %v4386_v39  ;;  %v4396_v49 = vunpack.c.l.bf16 %v4383_v36 }
 0x59e   : > { %s11597_s30 = sld [smem:[#allocation116_spill]]  ;;  %s11600_s5 = sshrl.u32 %s11596_s0, 16  ;;  %v4377_v6 = vunpack.c.l.bf16 %v4375_v8  ;;  %v4371_v14 = vmul.f32 %v4370_v3, %v8498_v17  ;;  %v4388_v37 = vunpack.c.l.bf16 %v4358_v20  ;;  %v4319_v8 = vadd.f32 %v9201_v47, %v4317_v9 }
 0x59f   : > { %s11598_s9 = sld [smem:[#allocation117_spill]]  ;;  %s4408_s26 = sshll.u32 %s11600_s5, 16  ;;  %v4389_v44 = vunpack.c.l.bf16 %v4365_v58  ;;  %v4397_v56 = vunpack.c.l.bf16 %v4387_v62 }
 0x5a0   : > { %s11599_s3 = sld [smem:[#allocation118_spill]]  ;;  %s9235_s6 = sand.u32 1, %s2794_s17  ;;  %v4378_v32 = vmul.f32 %v4377_v6, %v8548_v55  ;;  %v4372_v34 = vpack.c.bf16 %v4371_v14, %v4371_v14  ;;  %v4322_v27 = vmax.f32 %v4319_v8, 0.0 }
 0x5a1   : > { %s11602_s13 = sld [smem:[#allocation119_spill]]  ;;  %s11612_s23 = sand.u32 4294901760, %s9216_s24  ;;  %v4390_v50 = vadd.f32 %v4389_v44, %v4388_v37  ;;  %v4398_v4 = vadd.f32 %v4397_v56, %v4396_v49 }
 0x5a2   : > { %s11608_s7 = sld [smem:[#allocation120_spill]]  ;;  %v4379_v42 = vpack.c.bf16 %v4378_v32, %v4378_v32  ;;  %s12445_s23 = smov (%p2782_p12, %s11612_s23), 2143289344  ;;  %v4392_v45 = vunpack.c.l.bf16 %v4372_v34 }
 0x5a3   : > { %s11609_s15 = sld [smem:[#allocation26_spill]]  ;;  %s2796_s24 = sadd.s32 32767, %s9235_s6  ;;  %v4391_v60 = vpack.c.bf16 %v4390_v50, %v4390_v50  ;;  %v4399_v29 = vpack.c.bf16 %v4398_v4, %v4398_v4 }
 0x5a4   : > { %s11601_s28 = sshrl.u32 %s11597_s30, 16  ;;  %s11606_s17 = sshrl.u32 %s11597_s30, 16  ;;  %v4393_v51 = vunpack.c.l.bf16 %v4379_v42 }
 0x5a5   : > { %s4419_s29 = sshll.u32 %s11601_s28, 16  ;;  %s11603_s25 = sshrl.u32 %s11598_s9, 16  ;;  %v4400_v18 = vunpack.c.l.bf16 %v4391_v60  ;;  %v4404_v12 = vunpack.c.l.bf16 %v4399_v29 }
 0x5a6   : > { %s4426_s1 = sshll.u32 %s11603_s25, 16  ;;  %s11604_s5 = sshrl.u32 %s11599_s3, 16  ;;  %v4394_v61 = vadd.f32 %v4393_v51, %v4392_v45 }
 0x5a7   : > { %s4433_s21 = sshll.u32 %s11604_s5, 16  ;;  %s11605_s28 = sshrl.u32 %s11596_s0, 16 }
 0x5a8   : > { %s9240_s20 = sor.u32 %s4408_s26, %s11605_s28  ;;  %s4420_s25 = sor.u32 %s4419_s29, %s11606_s17  ;;  %v4395_v5 = vpack.c.bf16 %v4394_v61, %v4394_v61 }
 0x5a9   : > { %s11607_s5 = sshrl.u32 %s11602_s13, 16  ;;  %s11610_s0 = sshrl.u32 %s11598_s9, 16  ;;  %v4410_v38 = vstv %s9240_s20  ;;  %v4421_v54 = vstv %s4420_s25 }
 0x5aa   : > { %s4440_s19 = sshll.u32 %s11607_s5, 16  ;;  %s4427_s26 = sor.u32 %s4426_s1, %s11610_s0  ;;  %v4423_v57 = vunpack.c.l.bf16 %v4421_v54  ;;  %v9281_v21 = vunpack.c.l.bf16 %v4410_v38  ;;  %v4401_v47 = vunpack.c.l.bf16 %v4395_v5 }
 0x5ab   : > { %s11611_s28 = sshrl.u32 %s11599_s3, 16  ;;  %11613 = sst [smem:[#allocation34_spill]] %s12445_s23  ;;  %v4428_v59 = vstv %s4427_s26 }
 0x5ac   : > { %s4434_s27 = sor.u32 %s4433_s21, %s11611_s28  ;;  %s11614_s29 = sld [smem:[#allocation121_spill]]  ;;  %v4430_v2 = vunpack.c.l.bf16 %v4428_v59  ;;  %v4424_v46 = vmul.f32 %v4423_v57, %v8422_v24  ;;  %v4402_v20 = vadd.f32 %v4401_v47, %v4400_v18  ;;  %v9323_v59 = vpack.c.bf16 %v4322_v27, %v4322_v27 }
 0x5ad   : > { %s11615_s30 = sld [smem:[#allocation122_spill]]  ;;  %s11616_s17 = smov %s11607_s5  ;;  %v4435_v7 = vstv %s4434_s27 }
 0x5ae   : > { %s4441_s9 = sor.u32 %s4440_s19, %s11616_s17  ;;  %s11617_s1 = sshrl.u32 %s11608_s7, 16  ;;  %v4437_v15 = vunpack.c.l.bf16 %v4435_v7  ;;  %v4431_v19 = vmul.f32 %v4430_v2, %v8431_v28  ;;  %v4425_v28 = vpack.c.bf16 %v4424_v46, %v4424_v46 }
 0x5af   : > { %s4447_s3 = sshll.u32 %s11617_s1, 16  ;;  %s11618_s11 = sld [smem:[#allocation123_spill]]  ;;  %v4442_v3 = vstv %s4441_s9 }
 0x5b0   : > { %s11621_s27 = smov %s11617_s1  ;;  %s9275_s0 = sadd.s32 %s9182_s10, %s2796_s24  ;;  %v4438_v24 = vmul.f32 %v4437_v15, %v8440_v35  ;;  %v4444_v6 = vunpack.c.l.bf16 %v4442_v3  ;;  %v4432_v14 = vpack.c.bf16 %v4431_v19, %v4431_v19  ;;  %v4475_v44 = vunpack.c.l.bf16 %v4425_v28 }
 0x5b1   : > { %s4448_s6 = sor.u32 %s4447_s3, %s11621_s27  ;;  %p2793_p0 = scmp.ne.f32.partialorder %s9182_s10, %s9182_s10  ;;  %v9339_v19 = vunpack.c.l.bf16 %v8919_v41  ;;  %v9346_v28 = vunpack.c.l.bf16 %v9006_v0  ;;  %v9356_v0 = vunpack.c.l.bf16 %v9084_v10 }
 0x5b2   : > { %s11619_s20 = sshrl.u32 %s11614_s29, 16  ;;  %v4449_v25 = vstv %s4448_s6  ;;  %s2805_s24 = sshrl.u32 %s9220_s4, 16  ;;  %v4445_v35 = vmul.f32 %v4444_v6, %v8453_v43  ;;  %v4439_v58 = vpack.c.bf16 %v4438_v24, %v4438_v24  ;;  %v4403_v43 = vpack.c.bf16 %v4402_v20, %v4402_v20 }
 0x5b3   : > { %s4454_s5 = sshll.u32 %s11619_s20, 16  ;;  %s11620_s25 = sshrl.u32 %s11615_s30, 16  ;;  %v4451_v30 = vunpack.c.l.bf16 %v4449_v25  ;;  %v4476_v62 = vunpack.c.l.bf16 %v4432_v14 }
 0x5b4   : > { %s4461_s13 = sshll.u32 %s11620_s25, 16  ;;  %s11623_s7 = smov %s11619_s20  ;;  %v4446_v36 = vpack.c.bf16 %v4445_v35, %v4445_v35  ;;  %v4405_v48 = vunpack.c.l.bf16 %v4403_v43  ;;  %v4479_v51 = vunpack.c.l.bf16 %v4439_v58  ;;  %v9372_v43 = vunpack.c.l.bf16 %v9163_v63 }
 0x5b5   : > { %s11622_s26 = sshrl.u32 %s11618_s11, 16  ;;  %s4455_s17 = sor.u32 %s4454_s5, %s11623_s7  ;;  %v4452_v39 = vmul.f32 %v4451_v30, %v8465_v26  ;;  %v4477_v50 = vadd.f32 %v4476_v62, %v4475_v44  ;;  %v9383_v63 = vunpack.c.l.bf16 %v9242_v33 }
 0x5b6   : > { %s4468_s28 = sshll.u32 %s11622_s26, 16  ;;  %s11624_s9 = smov %s11620_s25  ;;  %v4456_v32 = vstv %s4455_s17  ;;  %v4480_v54 = vunpack.c.l.bf16 %v4446_v36  ;;  %v4406_v7 = vadd.f32 %v4405_v48, %v4404_v12 }
 0x5b7   : > { %s4462_s1 = sor.u32 %s4461_s13, %s11624_s9  ;;  %s11625_s20 = sld [smem:[#allocation131_spill]]  ;;  %v4458_v40 = vunpack.c.l.bf16 %v4456_v32  ;;  %v4453_v26 = vpack.c.bf16 %v4452_v39, %v4452_v39  ;;  %v4478_v9 = vpack.c.bf16 %v4477_v50, %v4477_v50 }
 0x5b8   : > { %s11626_s29 = smov %s11622_s26  ;;  %s2798_s30 = sand.u32 4294901760, %s9275_s0  ;;  %v4463_v34 = vstv %s4462_s1  ;;  %v4481_v60 = vadd.f32 %v4480_v54, %v4479_v51  ;;  %v4407_v46 = vpack.c.bf16 %v4406_v7, %v4406_v7  ;;  %v9392_v54 = vunpack.c.l.bf16 %v9323_v59 }
 0x5b9   : > { %s4469_s25 = sor.u32 %s4468_s28, %s11626_s29  ;;  %v4465_v42 = vunpack.c.l.bf16 %v4463_v34  ;;  %s9301_s11 = sand.u32 1, %s2805_s24  ;;  %v4459_v45 = vmul.f32 %v4458_v40, %v8472_v53  ;;  %v4491_v3 = vunpack.c.l.bf16 %v4478_v9  ;;  %v3747_v7 = vpack.c.bf16 %v8771_v1, %v8771_v1 }
 0x5ba   : > { %v4470_v37 = vstv %s4469_s25  ;;  %s11628_s0 = sshrl.u32 %s11498_s12, 16  ;;  %s12447_s30 = smov (%p2793_p0, %s2798_s30), 2143289344  ;;  %v4482_v15 = vpack.c.bf16 %v4481_v60, %v4481_v60  ;;  %v4412_v24 = vunpack.c.l.bf16 %v4407_v46 }
 0x5bb   : > { %s4514_s26 = sshll.u32 %s11628_s0, 16  ;;  %11629 = sst [smem:[#allocation35_spill]] %s12447_s30  ;;  %v4466_v49 = vmul.f32 %v4465_v42, %v8498_v17  ;;  %v4472_v38 = vunpack.c.l.bf16 %v4470_v37  ;;  %v4460_v56 = vpack.c.bf16 %v4459_v45, %v4459_v45  ;;  %v4483_v17 = vunpack.c.l.bf16 %v4453_v26 }
 0x5bc   : > { %s11630_s28 = sld [smem:[#allocation27_spill]]  ;;  %s11632_s9 = sshrl.u32 %s11524_s16, 16  ;;  %v4492_v6 = vunpack.c.l.bf16 %v4482_v15  ;;  %v4414_v12 = vadd.f32 %v9281_v21, %v4412_v24 }
 0x5bd   : > { %s11627_s27 = sshrl.u32 %s11625_s20, 16  ;;  %s4522_s10 = sshll.u32 %s11632_s9, 16  ;;  %v4467_v57 = vpack.c.bf16 %v4466_v49, %v4466_v49  ;;  %v4473_v53 = vmul.f32 %v4472_v38, %v8548_v55  ;;  %v4484_v2 = vunpack.c.l.bf16 %v4460_v56 }
 0x5be   : > { %s4503_s6 = sshll.u32 %s11627_s27, 16  ;;  %s11631_s7 = smov %s11627_s27  ;;  %v4493_v35 = vadd.f32 %v4492_v6, %v4491_v3  ;;  %v4417_v10 = vmax.f32 %v4414_v12, 0.0 }
 0x5bf   : > { %s9314_s17 = sor.u32 %s4503_s6, %s11631_s7  ;;  %s2807_s1 = sadd.s32 32767, %s9301_s11  ;;  %v4474_v61 = vpack.c.bf16 %v4473_v53, %v4473_v53  ;;  %v4487_v55 = vunpack.c.l.bf16 %v4467_v57  ;;  %v4485_v5 = vadd.f32 %v4484_v2, %v4483_v17 }
 0x5c0   : > { %s11633_s24 = smov %s11628_s0  ;;  %s11634_s27 = sld [smem:[#allocation231_spill]]  ;;  %v4505_v4 = vstv %s9314_s17  ;;  %v4494_v21 = vpack.c.bf16 %v4493_v35, %v4493_v35  ;;  %v4418_v44 = vpack.c.bf16 %v4417_v10, %v4417_v10  ;;  %v9446_v35 = vunpack.c.l.bf16 %v3747_v7 }
 0x5c1   : > { %s4515_s29 = sor.u32 %s4514_s26, %s11633_s24  ;;  %s11635_s20 = sld [smem:[#allocation28_spill]]  ;;  %v4488_v18 = vunpack.c.l.bf16 %v4474_v61  ;;  %v4486_v14 = vpack.c.bf16 %v4485_v5, %v4485_v5  ;;  %v4508_v2 = vunpack.c.l.bf16 %v4505_v4 }
 0x5c2   : > { %s11636_s6 = sshrl.u32 %s11539_s2, 16  ;;  %s9327_s0 = sld [smem:[#allocation6 + $0x2a]]  ;;  %v4516_v8 = vstv %s4515_s29  ;;  %v4499_v62 = vunpack.c.l.bf16 %v4494_v21  ;;  %v9403_v59 = vunpack.c.l.bf16 %v4418_v44 }
 0x5c3   : > { %s4530_s11 = sshll.u32 %s11636_s6, 16  ;;  %s11637_s12 = smov %s11632_s9  ;;  %v4519_v29 = vunpack.c.l.bf16 %v4516_v8  ;;  %v4489_v41 = vadd.f32 %v4488_v18, %v4487_v55  ;;  %v4495_v58 = vunpack.c.l.bf16 %v4486_v14 }
 0x5c4   : > { %s4523_s26 = sor.u32 %s4522_s10, %s11637_s12  ;;  %s9333_s7 = sadd.s32 %s9220_s4, %s2807_s1 }
 0x5c5   : > { %s11638_s9 = sld [smem:[#allocation232_spill]]  ;;  %s11640_s16 = sshrl.u32 %s11539_s2, 16  ;;  %v4524_v47 = vstv %s4523_s26  ;;  %v4520_v25 = vmul.f32 %v4519_v29, %v9339_v19  ;;  %v4490_v20 = vpack.c.bf16 %v4489_v41, %v4489_v41 }
 0x5c6   : > { %s11639_s24 = sshrl.u32 %s11634_s27, 16  ;;  %s4531_s10 = sor.u32 %s4530_s11, %s11640_s16  ;;  %v4527_v27 = vunpack.c.l.bf16 %v4524_v47 }
 0x5c7   : > { %s4538_s6 = sshll.u32 %s11639_s24, 16  ;;  %p2804_p1 = scmp.ne.f32.partialorder %s9220_s4, %s9220_s4  ;;  %v4532_v30 = vstv %s4531_s10  ;;  %v4521_v32 = vpack.c.bf16 %v4520_v25, %v4520_v25  ;;  %v4496_v40 = vunpack.c.l.bf16 %v4490_v20 }
 0x5c8   : > { %s11641_s1 = sld [smem:[#allocation233_spill]]  ;;  %s2809_s25 = sand.u32 4294901760, %s9333_s7  ;;  %v4528_v34 = vmul.f32 %v4527_v27, %v9346_v28  ;;  %v4535_v36 = vunpack.c.l.bf16 %v4532_v30 }
 0x5c9   : > { %s11642_s12 = sld [smem:[#allocation234_spill]]  ;;  %s11645_s2 = sshrl.u32 %s11634_s27, 16  ;;  %v4497_v49 = vadd.f32 %v4496_v40, %v4495_v58  ;;  %v4578_v60 = vunpack.c.l.bf16 %v4521_v32 }
 0x5ca   : > { %s11643_s13 = sld [smem:[#allocation53_spill]]  ;;  %s4539_s11 = sor.u32 %s4538_s6, %s11645_s2  ;;  %v4529_v42 = vpack.c.bf16 %v4528_v34, %v4528_v34  ;;  %v4536_v26 = vmul.f32 %v4535_v36, %v9356_v0 }
 0x5cb   : > { %s11644_s29 = sshrl.u32 %s11638_s9, 16  ;;  %s11648_s3 = sld [smem:[#allocation29_spill]]  ;;  %v4540_v39 = vstv %s4539_s11  ;;  %v4498_v33 = vpack.c.bf16 %v4497_v49, %v4497_v49 }
 0x5cc   : > { %s4546_s24 = sshll.u32 %s11644_s29, 16  ;;  %s11649_s27 = sshrl.u32 %s11638_s9, 16  ;;  %v4543_v37 = vunpack.c.l.bf16 %v4540_v39  ;;  %v4537_v50 = vpack.c.bf16 %v4536_v26, %v4536_v26  ;;  %v4579_v15 = vunpack.c.l.bf16 %v4529_v42 }
 0x5cd   : > { %s4547_s6 = sor.u32 %s4546_s24, %s11649_s27  ;;  %s12449_s25 = smov (%p2804_p1, %s2809_s25), 2143289344  ;;  %v4500_v61 = vunpack.c.l.bf16 %v4498_v33 }
 0x5ce   : > { %s11646_s26 = sshrl.u32 %s11641_s1, 16  ;;  %11650 = sst [smem:[#allocation55_spill]] %s12449_s25  ;;  %v4548_v45 = vstv %s4547_s6  ;;  %v4544_v38 = vmul.f32 %v4543_v37, %v9372_v43  ;;  %v4582_v3 = vunpack.c.l.bf16 %v4537_v50  ;;  %v4580_v6 = vadd.f32 %v4579_v15, %v4578_v60 }
 0x5cf   : > { %s4554_s16 = sshll.u32 %s11646_s26, 16  ;;  %s11647_s7 = sshrl.u32 %s11642_s12, 16  ;;  %v4551_v48 = vunpack.c.l.bf16 %v4548_v45  ;;  %v4501_v4 = vadd.f32 %v4500_v61, %v4499_v62 }
 0x5d0   : > { %s4562_s29 = sshll.u32 %s11647_s7, 16  ;;  %s11651_s10 = sld [smem:[#allocation235_spill]]  ;;  %v4545_v57 = vpack.c.bf16 %v4544_v38, %v4544_v38  ;;  %v4581_v20 = vpack.c.bf16 %v4580_v6, %v4580_v6 }
 0x5d1   : > { %s11652_s2 = sld [smem:[#allocation132_spill]]  ;;  %s4555_s7 = sor.u32 %s4554_s16, %s11646_s26  ;;  %v4552_v53 = vmul.f32 %v4551_v48, %v9383_v63  ;;  %v4502_v41 = vpack.c.bf16 %v4501_v4, %v4501_v4 }
 0x5d2   : > { %s11653_s5 = sshrl.u32 %s11642_s12, 16  ;;  %s2816_s4 = sshrl.u32 %s9327_s0, 16  ;;  %v4556_v51 = vstv %s4555_s7  ;;  %v4583_v8 = vunpack.c.l.bf16 %v4545_v57  ;;  %v4594_v36 = vunpack.c.l.bf16 %v4581_v20 }
 0x5d3   : > { %s4563_s9 = sor.u32 %s4562_s29, %s11653_s5  ;;  %s11654_s27 = sld [smem:[#allocation133_spill]]  ;;  %v4559_v17 = vunpack.c.l.bf16 %v4556_v51  ;;  %v4553_v55 = vpack.c.bf16 %v4552_v53, %v4552_v53  ;;  %v4507_v32 = vunpack.c.l.bf16 %v4502_v41 }
 0x5d4   : > { %s11655_s11 = sld [smem:[#allocation134_spill]]  ;;  %v4564_v56 = vstv %s4563_s9  ;;  %s9396_s24 = sand.u32 1, %s2816_s4  ;;  %v4584_v47 = vadd.f32 %v4583_v8, %v4582_v3 }
 0x5d5   : > { %s9389_s29 = sld [smem:[#allocation6 + $0x2b]]  ;;  %v4567_v9 = vunpack.c.l.bf16 %v4564_v56  ;;  %v4560_v1 = vmul.f32 %v4559_v17, %v9392_v54  ;;  %v4586_v29 = vunpack.c.l.bf16 %v4553_v55  ;;  %v4509_v37 = vadd.f32 %v4508_v2, %v4507_v32  ;;  %p2815_p2 = scmp.ne.f32.partialorder %s9327_s0, %s9327_s0 }
 0x5d6   : > { %s11656_s1 = sshrl.u32 %s11651_s10, 16  ;;  %s11659_s19 = sld [smem:[#allocation236_spill]]  ;;  %v4585_v58 = vpack.c.bf16 %v4584_v47, %v4584_v47 }
 0x5d7   : > { %s4570_s16 = sshll.u32 %s11656_s1, 16  ;;  %s11657_s12 = sshrl.u32 %s11652_s2, 16  ;;  %v4568_v46 = vmul.f32 %v4567_v9, %v9403_v59  ;;  %v4561_v5 = vpack.c.bf16 %v4560_v1, %v4560_v1  ;;  %v4512_v50 = vmax.f32 %v4509_v37, 0.0 }
 0x5d8   : > { %s4780_s5 = sshll.u32 %s11657_s12, 16  ;;  %s11661_s7 = sld [smem:[#allocation237_spill]]  ;;  %v4595_v39 = vunpack.c.l.bf16 %v4585_v58 }
 0x5d9   : > { %s11658_s6 = sshrl.u32 %s11654_s27, 16  ;;  %s11662_s9 = sshrl.u32 %s11651_s10, 16  ;;  %v4569_v24 = vpack.c.bf16 %v4568_v46, %v4568_v46  ;;  %v4587_v25 = vunpack.c.l.bf16 %v4561_v5  ;;  %v4513_v9 = vpack.c.bf16 %v4512_v50, %v4512_v50 }
 0x5da   : > { %s4787_s26 = sshll.u32 %s11658_s6, 16  ;;  %s11660_s1 = sshrl.u32 %s11655_s11, 16  ;;  %v4596_v45 = vadd.f32 %v4595_v39, %v4594_v36 }
 0x5db   : > { %s4794_s12 = sshll.u32 %s11660_s1, 16  ;;  %s9407_s4 = sor.u32 %s4570_s16, %s11662_s9  ;;  %v4588_v34 = vadd.f32 %v4587_v25, %v4586_v29  ;;  %v9455_v10 = vunpack.c.l.bf16 %v4569_v24  ;;  %v9513_v3 = vunpack.c.l.bf16 %v4513_v9 }
 0x5dc   : > { %s11663_s6 = sshrl.u32 %s11652_s2, 16  ;;  %s11664_s1 = sshrl.u32 %s11659_s19, 16  ;;  %v4572_v18 = vstv %s9407_s4  ;;  %v4597_v57 = vpack.c.bf16 %v4596_v45, %v4596_v45 }
 0x5dd   : > { %s9411_s21 = sor.u32 %s4780_s5, %s11663_s6  ;;  %s4608_s25 = sshll.u32 %s11664_s1, 16  ;;  %v9448_v30 = vunpack.c.l.bf16 %v4572_v18  ;;  %v4589_v44 = vpack.c.bf16 %v4588_v34, %v4588_v34 }
 0x5de   : > { %s11665_s30 = sshrl.u32 %s11654_s27, 16  ;;  %s11666_s10 = sld [smem:[#allocation23_spill]]  ;;  %v4782_v14 = vstv %s9411_s21  ;;  %v9503_v55 = vunpack.c.l.bf16 %v4597_v57 }
 0x5df   : > { %s9420_s23 = sor.u32 %s4787_s26, %s11665_s30  ;;  %s11667_s2 = sshrl.u32 %s11661_s7, 16  ;;  %v9459_v21 = vunpack.c.l.bf16 %v4782_v14  ;;  %v9489_v51 = vunpack.c.l.bf16 %v4589_v44  ;;  %v4576_v47 = vmul.f32 %v9448_v30, %v9513_v3 }
 0x5e0   : > { %s4615_s17 = sshll.u32 %s11667_s2, 16  ;;  %s11668_s16 = sshrl.u32 %s11655_s11, 16  ;;  %v4789_v27 = vstv %s9420_s23 }
 0x5e1   : > { %s9427_s5 = sor.u32 %s4794_s12, %s11668_s16  ;;  %s11669_s9 = sld [smem:[#allocation24_spill]]  ;;  %v9468_v40 = vunpack.c.l.bf16 %v4789_v27  ;;  %v4577_v30 = vpack.c.bf16 %v4576_v47, %v4576_v47 }
 0x5e2   : > { %s9430_s27 = sld [smem:[#allocation6 + $0xa4]]  ;;  %s11671_s26 = smov %s11664_s1  ;;  %v4796_v12 = vstv %s9427_s5 }
 0x5e3   : > { %s11670_s30 = sld [smem:[#allocation25_spill]]  ;;  %s9435_s11 = sor.u32 %s4608_s25, %s11671_s26  ;;  %v9470_v42 = vunpack.c.l.bf16 %v4796_v12 }
 0x5e4   : > { %s11672_s12 = sshrl.u32 %s11666_s10, 16  ;;  %s4616_s16 = sor.u32 %s4615_s17, %s11667_s2  ;;  %v4610_v62 = vstv %s9435_s11 }
 0x5e5   : > { %s4622_s1 = sshll.u32 %s11672_s12, 16  ;;  %s11675_s25 = sshrl.u32 %s11609_s15, 16  ;;  %v4617_v26 = vstv %s4616_s16  ;;  %v4612_v49 = vunpack.c.l.bf16 %v4610_v62 }
 0x5e6   : > { %s4643_s26 = sshll.u32 %s11675_s25, 16  ;;  %s2827_s7 = sshrl.u32 %s9389_s29, 16  ;;  %v4619_v38 = vunpack.c.l.bf16 %v4617_v26  ;;  %v4591_v26 = vunpack.c.l.bf16 %v4577_v30 }
 0x5e7   : > { %s11673_s6 = sshrl.u32 %s11669_s9, 16  ;;  %s11676_s23 = smov %s11672_s12  ;;  %v4613_v53 = vmul.f32 %v4612_v49, %v9339_v19 }
 0x5e8   : > { %s4629_s4 = sshll.u32 %s11673_s6, 16  ;;  %s4623_s17 = sor.u32 %s4622_s1, %s11676_s23  ;;  %v4620_v17 = vmul.f32 %v4619_v38, %v9346_v28  ;;  %v4592_v57 = vadd.f32 %v4591_v26, %v9455_v10 }
 0x5e9   : > { %s11674_s19 = sshrl.u32 %s11670_s30, 16  ;;  %s11677_s5 = sadd.s32 32767, %s9396_s24  ;;  %v4624_v48 = vstv %s4623_s17  ;;  %v4614_v1 = vpack.c.bf16 %v4613_v53, %v4613_v53 }
 0x5ea   : > { %s4636_s21 = sshll.u32 %s11674_s19, 16  ;;  %s9464_s6 = sadd.s32 %s9327_s0, %s11677_s5  ;;  %v4626_v56 = vunpack.c.l.bf16 %v4624_v48  ;;  %v4621_v46 = vpack.c.bf16 %v4620_v17, %v4620_v17 }
 0x5eb   : > { %s11678_s12 = sshrl.u32 %s11669_s9, 16  ;;  %s11679_s10 = sld [smem:[#allocation30_spill]]  ;;  %v4664_v6 = vunpack.c.l.bf16 %v4614_v1  ;;  %v4593_v1 = vpack.c.bf16 %v4592_v57, %v4592_v57 }
 0x5ec   : > { %s4630_s2 = sor.u32 %s4629_s4, %s11678_s12  ;;  %s11680_s1 = smov %s11674_s19  ;;  %v4627_v60 = vmul.f32 %v4626_v56, %v9356_v0  ;;  %v4665_v12 = vunpack.c.l.bf16 %v4621_v46 }
 0x5ed   : > { %s9475_s24 = sor.u32 %s4636_s21, %s11680_s1  ;;  %s11681_s19 = smov %s11675_s25  ;;  %v4631_v33 = vstv %s4630_s2 }
 0x5ee   : > { %s9479_s25 = sor.u32 %s4643_s26, %s11681_s19  ;;  %s11682_s9 = sshrl.u32 %s12419_s22, 16  ;;  %v4633_v7 = vunpack.c.l.bf16 %v4631_v33  ;;  %v4638_v61 = vstv %s9475_s24  ;;  %v4628_v8 = vpack.c.bf16 %v4627_v60, %v4627_v60  ;;  %v4666_v37 = vadd.f32 %v4665_v12, %v4664_v6 }
 0x5ef   : > { %s4650_s4 = sshll.u32 %s11682_s9, 16  ;;  %s11683_s23 = sshrl.u32 %s12421_s18, 16  ;;  %v4645_v2 = vstv %s9479_s25  ;;  %v4640_v4 = vunpack.c.l.bf16 %v4638_v61 }
 0x5f0   : > { %s4657_s5 = sshll.u32 %s11683_s23, 16  ;;  %s9487_s30 = sand.u32 1, %s2827_s7  ;;  %v4634_v15 = vmul.f32 %v4633_v7, %v9372_v43  ;;  %v4647_v5 = vunpack.c.l.bf16 %v4645_v2  ;;  %v4668_v20 = vunpack.c.l.bf16 %v4628_v8  ;;  %v4667_v50 = vpack.c.bf16 %v4666_v37, %v4666_v37 }
 0x5f1   : > { %s2735_s15 = sshrl.u32 %s11679_s10, 16  ;;  %s2820_s11 = sand.u32 4294901760, %s9464_s6  ;;  %v4641_v14 = vmul.f32 %v4640_v4, %v9383_v63 }
 0x5f2   : > { %s11684_s16 = sld [smem:[#allocation31_spill]]  ;;  %s11685_s21 = smov %s11682_s9  ;;  %v4635_v18 = vpack.c.bf16 %v4634_v15, %v4634_v15  ;;  %v4648_v41 = vmul.f32 %v4647_v5, %v9392_v54  ;;  %v4680_v60 = vunpack.c.l.bf16 %v4667_v50 }
 0x5f3   : > { %s4651_s26 = sor.u32 %s4650_s4, %s11685_s21  ;;  %s11686_s7 = smov %s11683_s23  ;;  %v4642_v32 = vpack.c.bf16 %v4641_v14, %v4641_v14 }
 0x5f4   : > { %s4658_s17 = sor.u32 %s4657_s5, %s11686_s7  ;;  %s2829_s6 = sadd.s32 32767, %s9487_s30  ;;  %v4652_v29 = vstv %s4651_s26  ;;  %v4669_v58 = vunpack.c.l.bf16 %v4635_v18  ;;  %v4649_v34 = vpack.c.bf16 %v4648_v41, %v4648_v41 }
 0x5f5   : > { %s11687_s12 = sshrl.u32 %s12423_s14, 16  ;;  %s12451_s11 = smov (%p2815_p2, %s2820_s11), 2143289344  ;;  %v4659_v24 = vstv %s4658_s17  ;;  %v4654_v25 = vunpack.c.l.bf16 %v4652_v29  ;;  %v4672_v49 = vunpack.c.l.bf16 %v4642_v32  ;;  %v4599_v29 = vunpack.c.l.bf16 %v4593_v1 }
 0x5f6   : > { %s4694_s2 = sshll.u32 %s11687_s12, 16  ;;  %s2838_s18 = sshrl.u32 %s9430_s27, 16  ;;  %v4661_v27 = vunpack.c.l.bf16 %v4659_v24  ;;  %v4670_v44 = vadd.f32 %v4669_v58, %v4668_v20  ;;  %v4673_v38 = vunpack.c.l.bf16 %v4649_v34 }
 0x5f7   : > { %s11688_s0 = smov %s11687_s12  ;;  %s11689_s24 = sshrl.u32 %s12425_s8, 16  ;;  %v4655_v36 = vmul.f32 %v4654_v25, %v9403_v59  ;;  %v4600_v12 = vadd.f32 %v4599_v29, %v9489_v51 }
 0x5f8   : > { %s2746_s22 = sshrl.u32 %s11684_s16, 16  ;;  %s4695_s1 = sor.u32 %s4694_s2, %s11688_s0  ;;  %v4662_v39 = vmul.f32 %v4661_v27, %v9513_v3  ;;  %v4671_v56 = vpack.c.bf16 %v4670_v44, %v4670_v44  ;;  %v4674_v53 = vadd.f32 %v4673_v38, %v4672_v49 }
 0x5f9   : > { %s4701_s19 = sshll.u32 %s11689_s24, 16  ;;  %p2826_p4 = scmp.ne.f32.partialorder %s9389_s29, %s9389_s29  ;;  %v4696_v62 = vstv %s4695_s1  ;;  %v4656_v45 = vpack.c.bf16 %v4655_v36, %v4655_v36  ;;  %v4601_v37 = vpack.c.bf16 %v4600_v12, %v4600_v12  ;;  %v4792_v12 = vmul.f32 %v9468_v40, %v9346_v28 }
 0x5fa   : > { %s9528_s25 = sadd.s32 %s9389_s29, %s2829_s6  ;;  %s9530_s9 = sld [smem:[#allocation6 + $0xa5]]  ;;  %v4663_v48 = vpack.c.bf16 %v4662_v39, %v4662_v39  ;;  %v4698_v33 = vunpack.c.l.bf16 %v4696_v62  ;;  %v4681_v61 = vunpack.c.l.bf16 %v4671_v56  ;;  %v4675_v10 = vpack.c.bf16 %v4674_v53, %v4674_v53 }
 0x5fb   : > { %s11690_s14 = sshrl.u32 %s11630_s28, 16  ;;  %s9535_s23 = sand.u32 1, %s2838_s18  ;;  %v4676_v17 = vunpack.c.l.bf16 %v4656_v45 }
 0x5fc   : > { %s4708_s4 = sshll.u32 %s11690_s14, 16  ;;  %s11691_s5 = smov %s11689_s24  ;;  %v4677_v9 = vunpack.c.l.bf16 %v4663_v48  ;;  %v4699_v2 = vmul.f32 %v4698_v33, %v9339_v19  ;;  %v4682_v4 = vadd.f32 %v4681_v61, %v4680_v60  ;;  %v4684_v24 = vunpack.c.l.bf16 %v4675_v10 }
 0x5fd   : > { %s4702_s30 = sor.u32 %s4701_s19, %s11691_s5  ;;  %s9540_s21 = sld [smem:[#allocation6 + $0xa6]]  ;;  %v4603_v48 = vunpack.c.l.bf16 %v4601_v37 }
 0x5fe   : > { %s11692_s26 = sshrl.u32 %s11635_s20, 16  ;;  %s11693_s17 = smov %s11690_s14  ;;  %v4703_v7 = vstv %s4702_s30  ;;  %v4678_v8 = vadd.f32 %v4677_v9, %v4676_v17  ;;  %v4700_v5 = vpack.c.bf16 %v4699_v2, %v4699_v2  ;;  %v4683_v41 = vpack.c.bf16 %v4682_v4, %v4682_v4 }
 0x5ff   : > { %s4715_s7 = sshll.u32 %s11692_s26, 16  ;;  %s4709_s6 = sor.u32 %s4708_s4, %s11693_s17  ;;  %v4705_v46 = vunpack.c.l.bf16 %v4703_v7  ;;  %v4604_v9 = vadd.f32 %v4603_v48, %v9503_v55 }
 0x600   : > { %s11694_s12 = sshrl.u32 %s11643_s13, 16  ;;  %p2837_p6 = scmp.ne.f32.partialorder %s9430_s27, %s9430_s27  ;;  %v4710_v15 = vstv %s4709_s6  ;;  %v4679_v14 = vpack.c.bf16 %v4678_v8, %v4678_v8  ;;  %v4688_v34 = vunpack.c.l.bf16 %v4683_v41  ;;  %v4750_v17 = vunpack.c.l.bf16 %v4700_v5 }
 0x601   : > { %s4722_s8 = sshll.u32 %s11694_s12, 16  ;;  %s11695_s2 = sshrl.u32 %s11648_s3, 16  ;;  %v4712_v18 = vunpack.c.l.bf16 %v4710_v15  ;;  %v4706_v6 = vmul.f32 %v4705_v46, %v9346_v28  ;;  %v4785_v5 = vmul.f32 %v9459_v21, %v9339_v19  ;;  %v9635_v21 = vadd.f32 %v8699_v52, %v8687_v11 }
 0x602   : > { %s4729_s18 = sshll.u32 %s11695_s2, 16  ;;  %s2840_s0 = sadd.s32 32767, %s9535_s23  ;;  %v4685_v32 = vunpack.c.l.bf16 %v4679_v14  ;;  %v3667_v11 = vadd.f32 %v8758_v13, %v8689_v16  ;;  %v9653_v52 = vadd.f32 %v9446_v35, %v8782_v31  ;;  %v4793_v31 = vpack.c.bf16 %v4792_v12, %v4792_v12 }
 0x603   : > { %s11696_s28 = smov %s11692_s26  ;;  %s11697_s24 = smov %s11694_s12  ;;  %v4713_v25 = vmul.f32 %v4712_v18, %v9356_v0  ;;  %v4707_v20 = vpack.c.bf16 %v4706_v6, %v4706_v6  ;;  %v4605_v18 = vpack.c.bf16 %v4604_v9, %v4604_v9 }
 0x604   : > { %s4716_s1 = sor.u32 %s4715_s7, %s11696_s28  ;;  %s9559_s19 = sor.u32 %s4722_s8, %s11697_s24  ;;  %v4686_v26 = vadd.f32 %v4685_v32, %v4684_v24  ;;  %v4786_v32 = vpack.c.bf16 %v4785_v5, %v4785_v5 }
 0x605   : > { %s4736_s14 = sshll.u32 %s2735_s15, 16  ;;  %s11698_s4 = smov %s11695_s2  ;;  %v4717_v47 = vstv %s4716_s1  ;;  %v4724_v58 = vstv %s9559_s19  ;;  %v4714_v36 = vpack.c.bf16 %v4713_v25, %v4713_v25  ;;  %v4751_v7 = vunpack.c.l.bf16 %v4707_v20 }
 0x606   : > { %s4730_s23 = sor.u32 %s4729_s18, %s11698_s4  ;;  %s4743_s20 = sshll.u32 %s2746_s22, 16  ;;  %v4719_v27 = vunpack.c.l.bf16 %v4717_v47  ;;  %v4726_v51 = vunpack.c.l.bf16 %v4724_v58  ;;  %v4687_v57 = vpack.c.bf16 %v4686_v26, %v4686_v26  ;;  %v4799_v20 = vmul.f32 %v9470_v42, %v9356_v0 }
 0x607   : > { %s2831_s5 = sand.u32 4294901760, %s9528_s25  ;;  %s9569_s30 = sadd.s32 %s9430_s27, %s2840_s0  ;;  %v4731_v30 = vstv %s4730_s23  ;;  %v4752_v46 = vadd.f32 %v4751_v7, %v4750_v17  ;;  %v4754_v15 = vunpack.c.l.bf16 %v4714_v36  ;;  %v4606_v58 = vunpack.c.l.bf16 %v4605_v18 }
 0x608   : > { %s2849_s13 = sshrl.u32 %s9530_s9, 16  ;;  %s11699_s26 = sld [smem:[#allocation201_spill]]  ;;  %v4720_v39 = vmul.f32 %v4719_v27, %v9372_v43  ;;  %v4733_v44 = vunpack.c.l.bf16 %v4731_v30  ;;  %v4727_v50 = vmul.f32 %v4726_v51, %v9383_v63  ;;  %v4689_v1 = vunpack.c.l.bf16 %v4687_v57 }
 0x609   : > { %s4737_s3 = sor.u32 %s4736_s14, %s2735_s15  ;;  %s2860_s25 = sshrl.u32 %s9540_s21, 16  ;;  %v4753_v47 = vpack.c.bf16 %v4752_v46, %v4752_v46  ;;  %v4800_v35 = vpack.c.bf16 %v4799_v20, %v4799_v20  ;;  %v4836_v9 = vunpack.c.l.bf16 %v4786_v32 }
 0x60a   : > { %s4744_s7 = sor.u32 %s4743_s20, %s2746_s22  ;;  %s12453_s5 = smov (%p2826_p4, %s2831_s5), 2143289344  ;;  %v4738_v62 = vstv %s4737_s3  ;;  %v4721_v45 = vpack.c.bf16 %v4720_v39, %v4720_v39  ;;  %v4734_v56 = vmul.f32 %v4733_v44, %v9392_v54  ;;  %v4728_v60 = vpack.c.bf16 %v4727_v50, %v4727_v50 }
 0x60b   : > { %s2842_s6 = sand.u32 4294901760, %s9569_s30  ;;  %s11700_s10 = sld [smem:[#allocation135_spill]]  ;;  %v4740_v49 = vunpack.c.l.bf16 %v4738_v62  ;;  %v4745_v38 = vstv %s4744_s7  ;;  %v4690_v29 = vadd.f32 %v4689_v1, %v4688_v34  ;;  %v4766_v16 = vunpack.c.l.bf16 %v4753_v47 }
 0x60c   : > { %s9589_s15 = sand.u32 1, %s2849_s13  ;;  %s9591_s16 = sand.u32 1, %s2860_s25  ;;  %v4747_v33 = vunpack.c.l.bf16 %v4745_v38  ;;  %v4735_v61 = vpack.c.bf16 %v4734_v56, %v4734_v56  ;;  %v4755_v55 = vunpack.c.l.bf16 %v4721_v45  ;;  %v4758_v4 = vunpack.c.l.bf16 %v4728_v60 }
 0x60d   : > { %s9593_s29 = sld [smem:[#allocation6 + $0xa7]]  ;;  %s12455_s6 = smov (%p2837_p6, %s2842_s6), 2143289344  ;;  %v4741_v53 = vmul.f32 %v4740_v49, %v9403_v59  ;;  %v4691_v30 = vpack.c.bf16 %v4690_v29, %v4690_v29  ;;  %v4837_v60 = vunpack.c.l.bf16 %v4793_v31 }
 0x60e   : > { %s11702_s8 = sld [smem:[#allocation136_spill]]  ;;  %s2851_s18 = sadd.s32 32767, %s9589_s15  ;;  %v4748_v2 = vmul.f32 %v4747_v33, %v9513_v3  ;;  %v4759_v24 = vunpack.c.l.bf16 %v4735_v61  ;;  %v4756_v14 = vadd.f32 %v4755_v55, %v4754_v15 }
 0x60f   : > { %s11703_s2 = sld [smem:[#allocation202_spill]]  ;;  %s2862_s0 = sadd.s32 32767, %s9591_s16  ;;  %v4742_v10 = vpack.c.bf16 %v4741_v53, %v4741_v53  ;;  %v4692_v56 = vunpack.c.l.bf16 %v4691_v30  ;;  %v4838_v15 = vadd.f32 %v4837_v60, %v4836_v9 }
 0x610   : > { %s11704_s28 = sld [smem:[#allocation137_spill]]  ;;  %v4749_v8 = vpack.c.bf16 %v4748_v2, %v4748_v2  ;;  %s9621_s30 = sadd.s32 %s9530_s9, %s2851_s18  ;;  %v4760_v27 = vadd.f32 %v4759_v24, %v4758_v4  ;;  %v4757_v40 = vpack.c.bf16 %v4756_v14, %v4756_v14  ;;  %v9698_v4 = vadd.f32 %v4606_v58, %v9635_v21 }
 0x611   : > { %s11701_s22 = sshrl.u32 %s11700_s10, 16  ;;  %s11707_s4 = sld [smem:[#allocation138_spill]]  ;;  %v4762_v6 = vunpack.c.l.bf16 %v4742_v10  ;;  %v9704_v24 = vadd.f32 %v4692_v56, %v3667_v11 }
 0x612   : > { %s4801_s12 = sshll.u32 %s11701_s22, 16  ;;  %s11705_s27 = smov %s11701_s22  ;;  %v4763_v41 = vunpack.c.l.bf16 %v4749_v8  ;;  %v4761_v36 = vpack.c.bf16 %v4760_v27, %v4760_v27  ;;  %v4767_v62 = vunpack.c.l.bf16 %v4757_v40  ;;  %v4840_v8 = vunpack.c.l.bf16 %v4800_v35 }
 0x613   : > { %s9611_s1 = sor.u32 %s4801_s12, %s11705_s27  ;;  %s9624_s13 = sadd.s32 %s9540_s21, %s2862_s0 }
 0x614   : > { %s11706_s24 = sshrl.u32 %s11702_s8, 16  ;;  %s11709_s3 = sld [smem:[#allocation139_spill]]  ;;  %v4803_v25 = vstv %s9611_s1  ;;  %v4764_v42 = vadd.f32 %v4763_v41, %v4762_v6  ;;  %v4770_v33 = vunpack.c.l.bf16 %v4761_v36  ;;  %v9687_v61 = vadd.f32 %v4767_v62, %v4766_v16 }
 0x615   : > { %s4808_s19 = sshll.u32 %s11706_s24, 16  ;;  %s11710_s25 = smov %s11706_s24  ;;  %v4805_v34 = vunpack.c.l.bf16 %v4803_v25  ;;  %v4839_v6 = vpack.c.bf16 %v4838_v15, %v4838_v15 }
 0x616   : > { %s11708_s23 = sshrl.u32 %s11704_s28, 16  ;;  %s9629_s7 = sor.u32 %s4808_s19, %s11710_s25  ;;  %v4765_v44 = vpack.c.bf16 %v4764_v42, %v4764_v42  ;;  %v4769_v41 = vpack.c.bf16 %v9687_v61, %v9687_v61 }
 0x617   : > { %s4815_s20 = sshll.u32 %s11708_s23, 16  ;;  %s11711_s10 = sshrl.u32 %s11707_s4, 16  ;;  %v4810_v13 = vstv %s9629_s7  ;;  %v4806_v37 = vmul.f32 %v4805_v34, %v9372_v43  ;;  %v4852_v20 = vunpack.c.l.bf16 %v4839_v6 }
 0x618   : > { %s4822_s15 = sshll.u32 %s11711_s10, 16  ;;  %s11712_s16 = smov %s11708_s23  ;;  %v4812_v51 = vunpack.c.l.bf16 %v4810_v13  ;;  %v4771_v2 = vunpack.c.l.bf16 %v4765_v44 }
 0x619   : > { %s4816_s22 = sor.u32 %s4815_s20, %s11712_s16  ;;  %p2848_p10 = scmp.ne.f32.partialorder %s9530_s9, %s9530_s9  ;;  %v4807_v49 = vpack.c.bf16 %v4806_v37, %v4806_v37 }
 0x61a   : > { %s11713_s12 = sshrl.u32 %s11709_s3, 16  ;;  %p2859_p5 = scmp.ne.f32.partialorder %s9540_s21, %s9540_s21  ;;  %v4817_v39 = vstv %s4816_s22  ;;  %v4813_v38 = vmul.f32 %v4812_v51, %v9383_v63  ;;  %v9716_v25 = vadd.f32 %v4771_v2, %v4770_v33 }
 0x61b   : > { %s4829_s8 = sshll.u32 %s11713_s12, 16  ;;  %s2853_s18 = sand.u32 4294901760, %s9621_s30  ;;  %v4819_v26 = vunpack.c.l.bf16 %v4817_v39  ;;  %v4841_v55 = vunpack.c.l.bf16 %v4807_v49 }
 0x61c   : > { %s11714_s0 = smov %s11711_s10  ;;  %s2864_s27 = sand.u32 4294901760, %s9624_s13  ;;  %v4814_v17 = vpack.c.bf16 %v4813_v38, %v4813_v38  ;;  %v4773_v39 = vpack.c.bf16 %v9716_v25, %v9716_v25 }
 0x61d   : > { %s4823_s28 = sor.u32 %s4822_s15, %s11714_s0  ;;  %s11715_s1 = smov %s11713_s12  ;;  %v4820_v57 = vmul.f32 %v4819_v26, %v9392_v54  ;;  %v4842_v47 = vadd.f32 %v4841_v55, %v4840_v8 }
 0x61e   : > { %s4830_s24 = sor.u32 %s4829_s8, %s11715_s1  ;;  %s2871_s19 = sshrl.u32 %s9593_s29, 16  ;;  %v4824_v45 = vstv %s4823_s28  ;;  %v4844_v18 = vunpack.c.l.bf16 %v4814_v17 }
 0x61f   : > { %s9663_s23 = sld [smem:[#allocation6 + $0xa8]]  ;;  %s12457_s18 = smov (%p2848_p10, %s2853_s18), 2143289344  ;;  %v4826_v48 = vunpack.c.l.bf16 %v4824_v45  ;;  %v4831_v50 = vstv %s4830_s24  ;;  %v4821_v1 = vpack.c.bf16 %v4820_v57, %v4820_v57  ;;  %v4843_v12 = vpack.c.bf16 %v4842_v47, %v4842_v47 }
 0x620   : > { %s11716_s4 = sld [smem:[#allocation140_spill]]  ;;  %s12459_s27 = smov (%p2859_p5, %s2864_s27), 2143289344  ;;  %v4833_v53 = vunpack.c.l.bf16 %v4831_v50 }
 0x621   : > { %s11717_s20 = sld [smem:[#allocation141_spill]]  ;;  %p2870_p11 = scmp.ne.f32.partialorder %s9593_s29, %s9593_s29  ;;  %v4827_v7 = vmul.f32 %v4826_v48, %v9403_v59  ;;  %v4845_v29 = vunpack.c.l.bf16 %v4821_v1  ;;  %v4853_v34 = vunpack.c.l.bf16 %v4843_v12 }
 0x622   : > { %s11718_s30 = sld [smem:[#allocation196_spill]]  ;;  %s9679_s9 = sand.u32 1, %s2871_s19  ;;  %v4834_v10 = vmul.f32 %v4833_v53, %v9513_v3 }
 0x623   : > { %s11719_s13 = sld [smem:[#allocation142_spill]]  ;;  %s2873_s8 = sadd.s32 32767, %s9679_s9  ;;  %v4828_v46 = vpack.c.bf16 %v4827_v7, %v4827_v7  ;;  %v4846_v21 = vadd.f32 %v4845_v29, %v4844_v18  ;;  %v4854_v51 = vadd.f32 %v4853_v34, %v4852_v20 }
 0x624   : > { %s11720_s21 = sld [smem:[#allocation143_spill]]  ;;  %v4835_v5 = vpack.c.bf16 %v4834_v10, %v4834_v10 }
 0x625   : > { %s11726_s1 = sld [smem:[#allocation144_spill]]  ;;  %v4848_v14 = vunpack.c.l.bf16 %v4828_v46  ;;  %v4847_v42 = vpack.c.bf16 %v4846_v21, %v4846_v21  ;;  %p2881_p3 = scmp.ne.f32.partialorder %s9663_s23, %s9663_s23  ;;  %v4855_v50 = vpack.c.bf16 %v4854_v51, %v4854_v51 }
 0x626   : > { %s11721_s3 = sshrl.u32 %s11716_s4, 16  ;;  %s11730_s17 = sld [smem:[#allocation145_spill]]  ;;  %v4849_v27 = vunpack.c.l.bf16 %v4835_v5 }
 0x627   : > { %s4875_s25 = sshll.u32 %s11721_s3, 16  ;;  %s11722_s7 = sshrl.u32 %s11717_s20, 16  ;;  %v4856_v35 = vunpack.c.l.bf16 %v4847_v42  ;;  %v4860_v60 = vunpack.c.l.bf16 %v4855_v50 }
 0x628   : > { %s4882_s10 = sshll.u32 %s11722_s7, 16  ;;  %s11723_s15 = sshrl.u32 %s11718_s30, 16  ;;  %v4850_v58 = vadd.f32 %v4849_v27, %v4848_v14 }
 0x629   : > { %s4864_s16 = sshll.u32 %s11723_s15, 16  ;;  %s11724_s22 = sshrl.u32 %s11719_s13, 16 }
 0x62a   : > { %s4889_s12 = sshll.u32 %s11724_s22, 16  ;;  %s11725_s0 = sshrl.u32 %s11720_s21, 16  ;;  %v4851_v31 = vpack.c.bf16 %v4850_v58, %v4850_v58 }
 0x62b   : > { %s4896_s28 = sshll.u32 %s11725_s0, 16  ;;  %s11727_s24 = smov %s11721_s3 }
 0x62c   : > { %s4876_s19 = sor.u32 %s4875_s25, %s11727_s24  ;;  %s11728_s3 = smov %s11722_s7  ;;  %v4857_v45 = vunpack.c.l.bf16 %v4851_v31 }
 0x62d   : > { %s4883_s7 = sor.u32 %s4882_s10, %s11728_s3  ;;  %s9708_s22 = sor.u32 %s4864_s16, %s11723_s15  ;;  %v4877_v11 = vstv %s4876_s19 }
 0x62e   : > { %s11729_s0 = sshrl.u32 %s11719_s13, 16  ;;  %s11731_s4 = sld [smem:[#allocation146_spill]]  ;;  %v4884_v40 = vstv %s4883_s7  ;;  %v4866_v30 = vstv %s9708_s22  ;;  %v4879_v32 = vunpack.c.l.bf16 %v4877_v11  ;;  %v4858_v53 = vadd.f32 %v4857_v45, %v4856_v35 }
 0x62f   : > { %s9712_s14 = sor.u32 %s4889_s12, %s11729_s0  ;;  %s11732_s20 = sshrl.u32 %s11720_s21, 16  ;;  %v4886_v36 = vunpack.c.l.bf16 %v4884_v40  ;;  %v9752_v49 = vunpack.c.l.bf16 %v4866_v30 }
 0x630   : > { %s4897_s25 = sor.u32 %s4896_s28, %s11732_s20  ;;  %s11733_s30 = sshrl.u32 %s11726_s1, 16  ;;  %v4891_v16 = vstv %s9712_s14  ;;  %v4880_v37 = vmul.f32 %v4879_v32, %v9339_v19  ;;  %v4859_v46 = vpack.c.bf16 %v4858_v53, %v4858_v53 }
 0x631   : > { %s4903_s10 = sshll.u32 %s11733_s30, 16  ;;  %s2882_s13 = sshrl.u32 %s9663_s23, 16  ;;  %v4898_v13 = vstv %s4897_s25  ;;  %v4887_v44 = vmul.f32 %v4886_v36, %v9346_v28  ;;  %v4893_v62 = vunpack.c.l.bf16 %v4891_v16 }
 0x632   : > { %s9723_s16 = sld [smem:[#allocation6 + $0xa9]]  ;;  %s11735_s24 = sshrl.u32 %s11730_s17, 16  ;;  %v4900_v26 = vunpack.c.l.bf16 %v4898_v13  ;;  %v4881_v38 = vpack.c.bf16 %v4880_v37, %v4880_v37  ;;  %v4861_v47 = vunpack.c.l.bf16 %v4859_v46 }
 0x633   : > { %s11734_s12 = sld [smem:[#allocation147_spill]]  ;;  %s4910_s3 = sshll.u32 %s11735_s24, 16  ;;  %v4888_v56 = vpack.c.bf16 %v4887_v44, %v4887_v44  ;;  %v4894_v33 = vmul.f32 %v4893_v62, %v9356_v0 }
 0x634   : > { %s11736_s21 = sshrl.u32 %s11731_s4, 16  ;;  %s9733_s15 = sadd.s32 %s9593_s29, %s2873_s8  ;;  %v4901_v57 = vmul.f32 %v4900_v26, %v9372_v43  ;;  %v4931_v29 = vunpack.c.l.bf16 %v4881_v38  ;;  %v4862_v42 = vadd.f32 %v4861_v47, %v4860_v60 }
 0x635   : > { %s4917_s28 = sshll.u32 %s11736_s21, 16  ;;  %s11738_s19 = smov %s11733_s30  ;;  %v4895_v2 = vpack.c.bf16 %v4894_v33, %v4894_v33  ;;  %v4932_v6 = vunpack.c.l.bf16 %v4888_v56 }
 0x636   : > { %s4904_s7 = sor.u32 %s4903_s10, %s11738_s19  ;;  %s9738_s20 = sand.u32 1, %s2882_s13  ;;  %v4902_v1 = vpack.c.bf16 %v4901_v57, %v4901_v57  ;;  %v4863_v31 = vpack.c.bf16 %v4862_v42, %v4862_v42 }
 0x637   : > { %s11740_s14 = smov %s11735_s24  ;;  %s11741_s22 = smov %s11736_s21  ;;  %v4905_v48 = vstv %s4904_s7  ;;  %v4935_v27 = vunpack.c.l.bf16 %v4895_v2  ;;  %v4933_v11 = vadd.f32 %v4932_v6, %v4931_v29 }
 0x638   : > { %s4911_s1 = sor.u32 %s4910_s3, %s11740_s14  ;;  %s4918_s25 = sor.u32 %s4917_s28, %s11741_s22  ;;  %v4907_v17 = vunpack.c.l.bf16 %v4905_v48  ;;  %v4936_v40 = vunpack.c.l.bf16 %v4902_v1  ;;  %v4868_v38 = vunpack.c.l.bf16 %v4863_v31 }
 0x639   : > { %s11739_s9 = sshrl.u32 %s11734_s12, 16  ;;  %s2875_s10 = sand.u32 4294901760, %s9733_s15  ;;  %v4912_v7 = vstv %s4911_s1  ;;  %v4919_v9 = vstv %s4918_s25  ;;  %v4934_v36 = vpack.c.bf16 %v4933_v11, %v4933_v11 }
 0x63a   : > { %s4924_s8 = sshll.u32 %s11739_s9, 16  ;;  %s11742_s13 = sld [smem:[#allocation197_spill]]  ;;  %v4914_v10 = vunpack.c.l.bf16 %v4912_v7  ;;  %v4908_v15 = vmul.f32 %v4907_v17, %v9383_v63  ;;  %v4921_v8 = vunpack.c.l.bf16 %v4919_v9  ;;  %v4937_v16 = vadd.f32 %v4936_v40, %v4935_v27 }
 0x63b   : > { %s11743_s17 = smov %s11739_s9  ;;  %s2884_s24 = sadd.s32 32767, %s9738_s20  ;;  %v4947_v45 = vunpack.c.l.bf16 %v4934_v36  ;;  %v4870_v7 = vadd.f32 %v9752_v49, %v4868_v38 }
 0x63c   : > { %s4925_s4 = sor.u32 %s4924_s8, %s11743_s17  ;;  %s11744_s3 = sld [smem:[#allocation148_spill]]  ;;  %v4915_v5 = vmul.f32 %v4914_v10, %v9392_v54  ;;  %v4909_v14 = vpack.c.bf16 %v4908_v15, %v4908_v15  ;;  %v4922_v21 = vmul.f32 %v4921_v8, %v9403_v59  ;;  %v4938_v44 = vpack.c.bf16 %v4937_v16, %v4937_v16 }
 0x63d   : > { %s12461_s10 = smov (%p2870_p11, %s2875_s10), 2143289344  ;;  %s2893_s15 = sshrl.u32 %s9723_s16, 16  ;;  %v4926_v55 = vstv %s4925_s4  ;;  %v4873_v49 = vmax.f32 %v4870_v7, 0.0 }
 0x63e   : > { %s11746_s12 = sld [smem:[#allocation149_spill]]  ;;  %s9773_s9 = sadd.s32 %s9663_s23, %s2884_s24  ;;  %v4928_v18 = vunpack.c.l.bf16 %v4926_v55  ;;  %v4916_v12 = vpack.c.bf16 %v4915_v5, %v4915_v5  ;;  %v4923_v58 = vpack.c.bf16 %v4922_v21, %v4922_v21  ;;  %v4939_v30 = vunpack.c.l.bf16 %v4909_v14 }
 0x63f   : > { %s11747_s19 = sld [smem:[#allocation150_spill]]  ;;  %s9783_s4 = sand.u32 1, %s2893_s15  ;;  %v4948_v53 = vunpack.c.l.bf16 %v4938_v44  ;;  %v9833_v14 = vpack.c.bf16 %v4873_v49, %v4873_v49 }
 0x640   : > { %s11745_s21 = sshrl.u32 %s11742_s13, 16  ;;  %s11750_s14 = sld [smem:[#allocation151_spill]]  ;;  %v4929_v20 = vmul.f32 %v4928_v18, %v9513_v3  ;;  %v4940_v13 = vunpack.c.l.bf16 %v4916_v12  ;;  %v4943_v35 = vunpack.c.l.bf16 %v4923_v58 }
 0x641   : > { %s4959_s28 = sshll.u32 %s11745_s21, 16  ;;  %s11749_s29 = smov %s11745_s21  ;;  %v4949_v10 = vadd.f32 %v4948_v53, %v4947_v45 }
 0x642   : > { %s11748_s7 = sshrl.u32 %s11744_s3, 16  ;;  %s4960_s8 = sor.u32 %s4959_s28, %s11749_s29  ;;  %v4930_v34 = vpack.c.bf16 %v4929_v20, %v4929_v20  ;;  %v4941_v62 = vadd.f32 %v4940_v13, %v4939_v30 }
 0x643   : > { %s4970_s20 = sshll.u32 %s11748_s7, 16  ;;  %s11753_s13 = smov %s11748_s7  ;;  %v4961_v32 = vstv %s4960_s8  ;;  %v4950_v18 = vpack.c.bf16 %v4949_v10, %v4949_v10 }
 0x644   : > { %s11751_s1 = sshrl.u32 %s11746_s12, 16  ;;  %s4971_s24 = sor.u32 %s4970_s20, %s11753_s13  ;;  %v9798_v37 = vunpack.c.l.bf16 %v4961_v32  ;;  %v4944_v26 = vunpack.c.l.bf16 %v4930_v34  ;;  %v4942_v33 = vpack.c.bf16 %v4941_v62, %v4941_v62 }
 0x645   : > { %s4977_s22 = sshll.u32 %s11751_s1, 16  ;;  %s11752_s25 = sshrl.u32 %s11747_s19, 16  ;;  %v4972_v51 = vstv %s4971_s24  ;;  %v4955_v11 = vunpack.c.l.bf16 %v4950_v18 }
 0x646   : > { %s4984_s17 = sshll.u32 %s11752_s25, 16  ;;  %s2886_s21 = sand.u32 4294901760, %s9773_s9  ;;  %v4974_v48 = vunpack.c.l.bf16 %v4972_v51  ;;  %v4945_v57 = vadd.f32 %v4944_v26, %v4943_v35  ;;  %v4951_v46 = vunpack.c.l.bf16 %v4942_v33 }
 0x647   : > { %s11754_s28 = sshrl.u32 %s11750_s14, 16  ;;  %s11755_s15 = sld [smem:[#allocation152_spill]] }
 0x648   : > { %s4991_s7 = sshll.u32 %s11754_s28, 16  ;;  %s11756_s29 = smov %s11751_s1  ;;  %v4975_v9 = vmul.f32 %v4974_v48, %v9339_v19  ;;  %v4946_v1 = vpack.c.bf16 %v4945_v57, %v4945_v57 }
 0x649   : > { %s4978_s1 = sor.u32 %s4977_s22, %s11756_s29  ;;  %s4985_s3 = sor.u32 %s4984_s17, %s11752_s25 }
 0x64a   : > { %s2895_s20 = sadd.s32 32767, %s9783_s4  ;;  %s9796_s9 = sld [smem:[#allocation6 + $0xaa]]  ;;  %v4979_v50 = vstv %s4978_s1  ;;  %v4986_v56 = vstv %s4985_s3  ;;  %v4976_v8 = vpack.c.bf16 %v4975_v9, %v4975_v9  ;;  %v4952_v29 = vunpack.c.l.bf16 %v4946_v1 }
 0x64b   : > { %s11757_s8 = sld [smem:[#allocation153_spill]]  ;;  %s4992_s12 = sor.u32 %s4991_s7, %s11754_s28  ;;  %v4981_v17 = vunpack.c.l.bf16 %v4979_v50  ;;  %v4988_v60 = vunpack.c.l.bf16 %v4986_v56 }
 0x64c   : > { %s11758_s13 = sld [smem:[#allocation154_spill]]  ;;  %s12463_s21 = smov (%p2881_p3, %s2886_s21), 2143289344  ;;  %v4993_v2 = vstv %s4992_s12  ;;  %v4953_v20 = vadd.f32 %v4952_v29, %v4951_v46  ;;  %v5026_v13 = vunpack.c.l.bf16 %v4976_v8 }
 0x64d   : > { %s11759_s22 = sshrl.u32 %s11755_s15, 16  ;;  %s11760_s17 = sld [smem:[#allocation155_spill]]  ;;  %v4982_v15 = vmul.f32 %v4981_v17, %v9346_v28  ;;  %v4989_v55 = vmul.f32 %v4988_v60, %v9356_v0  ;;  %v4995_v5 = vunpack.c.l.bf16 %v4993_v2 }
 0x64e   : > { %s4998_s19 = sshll.u32 %s11759_s22, 16  ;;  %s9814_s29 = sadd.s32 %s9723_s16, %s2895_s20  ;;  %v4954_v36 = vpack.c.bf16 %v4953_v20, %v4953_v20 }
 0x64f   : > { %s11764_s1 = smov %s11759_s22  ;;  %p2892_p7 = scmp.ne.f32.partialorder %s9723_s16, %s9723_s16  ;;  %v4983_v6 = vpack.c.bf16 %v4982_v15, %v4982_v15  ;;  %v4990_v21 = vpack.c.bf16 %v4989_v55, %v4989_v55  ;;  %v4996_v27 = vmul.f32 %v4995_v5, %v9372_v43 }
 0x650   : > { %s4999_s25 = sor.u32 %s4998_s19, %s11764_s1  ;;  %s11769_s1 = sld [smem:[#allocation198_spill]]  ;;  %v4956_v26 = vunpack.c.l.bf16 %v4954_v36 }
 0x651   : > { %s11761_s4 = sshrl.u32 %s11757_s8, 16  ;;  %v5000_v47 = vstv %s4999_s25  ;;  %s11774_s25 = sld [smem:[#allocation157_spill]]  ;;  %v4997_v58 = vpack.c.bf16 %v4996_v27, %v4996_v27  ;;  %v5027_v31 = vunpack.c.l.bf16 %v4983_v6  ;;  %v5030_v38 = vunpack.c.l.bf16 %v4990_v21 }
 0x652   : > { %s5005_s24 = sshll.u32 %s11761_s4, 16  ;;  %s11762_s14 = sshrl.u32 %s11758_s13, 16  ;;  %v5002_v12 = vunpack.c.l.bf16 %v5000_v47  ;;  %v4957_v53 = vadd.f32 %v4956_v26, %v4955_v11 }
 0x653   : > { %s5012_s7 = sshll.u32 %s11762_s14, 16  ;;  %s11766_s20 = sshrl.u32 %s11760_s17, 16  ;;  %v5028_v45 = vadd.f32 %v5027_v31, %v5026_v13  ;;  %v5031_v48 = vunpack.c.l.bf16 %v4997_v58 }
 0x654   : > { %s5019_s28 = sshll.u32 %s11766_s20, 16  ;;  %s11767_s12 = smov %s11761_s4  ;;  %v5003_v30 = vmul.f32 %v5002_v12, %v9383_v63  ;;  %v4958_v46 = vpack.c.bf16 %v4957_v53, %v4957_v53 }
 0x655   : > { %s5006_s15 = sor.u32 %s5005_s24, %s11767_s12  ;;  %s11768_s22 = smov %s11762_s14  ;;  %v5029_v17 = vpack.c.bf16 %v5028_v45, %v5028_v45  ;;  %v5032_v7 = vadd.f32 %v5031_v48, %v5030_v38 }
 0x656   : > { %s5013_s19 = sor.u32 %s5012_s7, %s11768_s22  ;;  %s2897_s14 = sand.u32 4294901760, %s9814_s29  ;;  %v5007_v40 = vstv %s5006_s15  ;;  %v5004_v35 = vpack.c.bf16 %v5003_v30, %v5003_v30  ;;  %v4963_v6 = vunpack.c.l.bf16 %v4958_v46 }
 0x657   : > { %s11770_s8 = smov %s11766_s20  ;;  %s2904_s13 = sshrl.u32 %s9796_s9, 16  ;;  %v5014_v42 = vstv %s5013_s19  ;;  %v5009_v32 = vunpack.c.l.bf16 %v5007_v40  ;;  %v5033_v15 = vpack.c.bf16 %v5032_v7, %v5032_v7  ;;  %v5042_v49 = vunpack.c.l.bf16 %v5029_v17 }
 0x658   : > { %s5020_s24 = sor.u32 %s5019_s28, %s11770_s8  ;;  %s11771_s7 = sld [smem:[#allocation156_spill]]  ;;  %v5016_v34 = vunpack.c.l.bf16 %v5014_v42  ;;  %v5034_v57 = vunpack.c.l.bf16 %v5004_v35  ;;  %v4965_v42 = vadd.f32 %v9798_v37, %v4963_v6 }
 0x659   : > { %s11772_s29 = sshrl.u32 %s11769_s1, 16  ;;  %s12465_s14 = smov (%p2892_p7, %s2897_s14), 2143289344  ;;  %v5021_v16 = vstv %s5020_s24  ;;  %v5010_v51 = vmul.f32 %v5009_v32, %v9392_v54  ;;  %v5043_v47 = vunpack.c.l.bf16 %v5033_v15 }
 0x65a   : > { %s5054_s12 = sshll.u32 %s11772_s29, 16  ;;  %11773 = sst [smem:[#allocation204_spill]] %s12465_s14  ;;  %v5017_v44 = vmul.f32 %v5016_v34, %v9403_v59  ;;  %v5023_v62 = vunpack.c.l.bf16 %v5021_v16  ;;  %v4968_v13 = vmax.f32 %v4965_v42, 0.0 }
 0x65b   : > { %s9847_s17 = sld [smem:[#allocation6 + $0xab]]  ;;  %s11778_s19 = smov %s11772_s29  ;;  %v5011_v50 = vpack.c.bf16 %v5010_v51, %v5010_v51  ;;  %v5044_v58 = vadd.f32 %v5043_v47, %v5042_v49 }
 0x65c   : > { %s11775_s28 = sld [smem:[#allocation158_spill]]  ;;  %s5055_s8 = sor.u32 %s5054_s12, %s11778_s19  ;;  %v5018_v56 = vpack.c.bf16 %v5017_v44, %v5017_v44  ;;  %v5024_v33 = vmul.f32 %v5023_v62, %v9513_v3  ;;  %v9914_v38 = vpack.c.bf16 %v4968_v13, %v4968_v13 }
 0x65d   : > { %s11777_s16 = sld [smem:[#allocation159_spill]]  ;;  %s11779_s29 = sshrl.u32 %s11774_s25, 16  ;;  %v5056_v9 = vstv %s5055_s8  ;;  %v5035_v2 = vunpack.c.l.bf16 %v5011_v50  ;;  %v5045_v31 = vpack.c.bf16 %v5044_v58, %v5044_v58 }
 0x65e   : > { %s11776_s15 = sshrl.u32 %s11771_s7, 16  ;;  %s5072_s20 = sshll.u32 %s11779_s29, 16  ;;  %v5025_v60 = vpack.c.bf16 %v5024_v33, %v5024_v33  ;;  %v5038_v1 = vunpack.c.l.bf16 %v5018_v56  ;;  %v9871_v10 = vunpack.c.l.bf16 %v5056_v9 }
 0x65f   : > { %s5065_s22 = sshll.u32 %s11776_s15, 16  ;;  %s9857_s4 = sand.u32 1, %s2904_s13  ;;  %v5036_v55 = vadd.f32 %v5035_v2, %v5034_v57  ;;  %v5050_v48 = vunpack.c.l.bf16 %v5045_v31 }
 0x660   : > { %s11781_s1 = sshrl.u32 %s11771_s7, 16  ;;  %s9866_s29 = sld [smem:[#allocation6 + $0x124]]  ;;  %v5039_v5 = vunpack.c.l.bf16 %v5025_v60 }
 0x661   : > { %s5066_s12 = sor.u32 %s5065_s22, %s11781_s1  ;;  %s11783_s30 = sshrl.u32 %s11774_s25, 16  ;;  %v5037_v12 = vpack.c.bf16 %v5036_v55, %v5036_v55 }
 0x662   : > { %s11780_s24 = sshrl.u32 %s11775_s28, 16  ;;  %s2906_s3 = sadd.s32 32767, %s9857_s4  ;;  %v5067_v8 = vstv %s5066_s12  ;;  %v5040_v20 = vadd.f32 %v5039_v5, %v5038_v1 }
 0x663   : > { %s5079_s15 = sshll.u32 %s11780_s24, 16  ;;  %s11782_s19 = sshrl.u32 %s11777_s16, 16  ;;  %v5069_v18 = vunpack.c.l.bf16 %v5067_v8  ;;  %v5046_v36 = vunpack.c.l.bf16 %v5037_v12 }
 0x664   : > { %s5086_s13 = sshll.u32 %s11782_s19, 16  ;;  %s5073_s24 = sor.u32 %s5072_s20, %s11783_s30  ;;  %v5041_v34 = vpack.c.bf16 %v5040_v20, %v5040_v20 }
 0x665   : > { %s11784_s23 = sld [smem:[#allocation160_spill]]  ;;  %s11786_s7 = sshrl.u32 %s11775_s28, 16  ;;  %v5074_v29 = vstv %s5073_s24  ;;  %v5070_v11 = vmul.f32 %v5069_v18, %v9339_v19 }
 0x666   : > { %s11785_s0 = sld [smem:[#allocation161_spill]]  ;;  %s5080_s22 = sor.u32 %s5079_s15, %s11786_s7  ;;  %v5076_v21 = vunpack.c.l.bf16 %v5074_v29  ;;  %v5047_v44 = vunpack.c.l.bf16 %v5041_v34 }
 0x667   : > { %p2903_p12 = scmp.ne.f32.partialorder %s9796_s9, %s9796_s9  ;;  %s11787_s25 = smov %s11782_s19  ;;  %v5081_v27 = vstv %s5080_s22  ;;  %v5071_v16 = vpack.c.bf16 %v5070_v11, %v5070_v11 }
 0x668   : > { %s9879_s30 = sor.u32 %s5086_s13, %s11787_s25  ;;  %s11788_s4 = sld [smem:[#allocation162_spill]]  ;;  %v5083_v40 = vunpack.c.l.bf16 %v5081_v27  ;;  %v5077_v30 = vmul.f32 %v5076_v21, %v9346_v28  ;;  %v5048_v33 = vadd.f32 %v5047_v44, %v5046_v36 }
 0x669   : > { %s11789_s20 = sld [smem:[#allocation163_spill]]  ;;  %s9886_s15 = sadd.s32 %s9796_s9, %s2906_s3  ;;  %v5088_v32 = vstv %s9879_s30  ;;  %v5121_v15 = vunpack.c.l.bf16 %v5071_v16 }
 0x66a   : > { %s2915_s7 = sshrl.u32 %s9847_s17, 16  ;;  %v5084_v37 = vmul.f32 %v5083_v40, %v9356_v0  ;;  %v5078_v35 = vpack.c.bf16 %v5077_v30, %v5077_v30  ;;  %v5090_v51 = vunpack.c.l.bf16 %v5088_v32  ;;  %p2914_p0 = scmp.ne.f32.partialorder %s9847_s17, %s9847_s17  ;;  %v5049_v1 = vpack.c.bf16 %v5048_v33, %v5048_v33 }
 0x66b   : > { %s11790_s8 = sshrl.u32 %s11784_s23, 16  ;;  %s9902_s14 = sand.u32 1, %s2915_s7 }
 0x66c   : > { %s5093_s1 = sshll.u32 %s11790_s8, 16  ;;  %s11791_s19 = sshrl.u32 %s11785_s0, 16  ;;  %v5085_v62 = vpack.c.bf16 %v5084_v37, %v5084_v37  ;;  %v5091_v50 = vmul.f32 %v5090_v51, %v9372_v43  ;;  %v5122_v49 = vunpack.c.l.bf16 %v5078_v35  ;;  %v5051_v29 = vunpack.c.l.bf16 %v5049_v1 }
 0x66d   : > { %s5100_s28 = sshll.u32 %s11791_s19, 16  ;;  %s11794_s3 = smov %s11790_s8 }
 0x66e   : > { %s11792_s16 = sshrl.u32 %s11788_s4, 16  ;;  %s5094_s22 = sor.u32 %s5093_s1, %s11794_s3  ;;  %v5092_v7 = vpack.c.bf16 %v5091_v50, %v5091_v50  ;;  %v5125_v18 = vunpack.c.l.bf16 %v5085_v62  ;;  %v5123_v47 = vadd.f32 %v5122_v49, %v5121_v15  ;;  %v5052_v40 = vadd.f32 %v5051_v29, %v5050_v48 }
 0x66f   : > { %s5107_s12 = sshll.u32 %s11792_s16, 16  ;;  %s11793_s13 = sshrl.u32 %s11789_s20, 16  ;;  %v5095_v26 = vstv %s5094_s22 }
 0x670   : > { %s5114_s24 = sshll.u32 %s11793_s13, 16  ;;  %s11795_s25 = smov %s11791_s19  ;;  %v5097_v56 = vunpack.c.l.bf16 %v5095_v26  ;;  %v5126_v21 = vunpack.c.l.bf16 %v5092_v7  ;;  %v5124_v42 = vpack.c.bf16 %v5123_v47, %v5123_v47  ;;  %v5053_v37 = vpack.c.bf16 %v5052_v40, %v5052_v40 }
 0x671   : > { %s5101_s8 = sor.u32 %s5100_s28, %s11795_s25  ;;  %s2908_s19 = sand.u32 4294901760, %s9886_s15 }
 0x672   : > { %s11796_s16 = sld [smem:[#allocation199_spill]]  ;;  %s11797_s23 = sshrl.u32 %s11788_s4, 16  ;;  %v5102_v45 = vstv %s5101_s8  ;;  %v5098_v9 = vmul.f32 %v5097_v56, %v9383_v63  ;;  %v5127_v58 = vadd.f32 %v5126_v21, %v5125_v18  ;;  %v5137_v35 = vunpack.c.l.bf16 %v5124_v42 }
 0x673   : > { %s5108_s30 = sor.u32 %s5107_s12, %s11797_s23  ;;  %s11798_s0 = smov %s11793_s13  ;;  %v5104_v57 = vunpack.c.l.bf16 %v5102_v45  ;;  %v5058_v45 = vunpack.c.l.bf16 %v5053_v37 }
 0x674   : > { %s5115_s1 = sor.u32 %s5114_s24, %s11798_s0  ;;  %s9911_s28 = sld [smem:[#allocation6 + $0x125]]  ;;  %v5109_v53 = vstv %s5108_s30  ;;  %v5099_v8 = vpack.c.bf16 %v5098_v9, %v5098_v9  ;;  %v5128_v13 = vpack.c.bf16 %v5127_v58, %v5127_v58 }
 0x675   : > { %s2917_s15 = sadd.s32 32767, %s9902_s14  ;;  %s11799_s7 = sld [smem:[#allocation164_spill]]  ;;  %v5116_v17 = vstv %s5115_s1  ;;  %v5111_v60 = vunpack.c.l.bf16 %v5109_v53  ;;  %v5105_v46 = vmul.f32 %v5104_v57, %v9392_v54  ;;  %v5060_v7 = vadd.f32 %v9871_v10, %v5058_v45 }
 0x676   : > { %s12467_s19 = smov (%p2903_p12, %s2908_s19), 2143289344  ;;  %s2926_s12 = sshrl.u32 %s9866_s29, 16  ;;  %v5118_v2 = vunpack.c.l.bf16 %v5116_v17  ;;  %v5129_v20 = vunpack.c.l.bf16 %v5099_v8  ;;  %v5138_v50 = vunpack.c.l.bf16 %v5128_v13 }
 0x677   : > { %11801 = sst [smem:[#allocation36_spill]] %s12467_s19  ;;  %s9929_s22 = sadd.s32 %s9847_s17, %s2917_s15  ;;  %v5112_v55 = vmul.f32 %v5111_v60, %v9403_v59  ;;  %v5106_v6 = vpack.c.bf16 %v5105_v46, %v5105_v46  ;;  %v5063_v10 = vmax.f32 %v5060_v7, 0.0 }
 0x678   : > { %s11800_s4 = sshrl.u32 %s11796_s16, 16  ;;  %s11802_s14 = sld [smem:[#allocation165_spill]]  ;;  %v5119_v5 = vmul.f32 %v5118_v2, %v9513_v3  ;;  %v5139_v9 = vadd.f32 %v5138_v50, %v5137_v35 }
 0x679   : > { %s5149_s20 = sshll.u32 %s11800_s4, 16  ;;  %s11803_s13 = sld [smem:[#allocation166_spill]]  ;;  %v5113_v27 = vpack.c.bf16 %v5112_v55, %v5112_v55  ;;  %v5130_v30 = vunpack.c.l.bf16 %v5106_v6  ;;  %v9994_v21 = vpack.c.bf16 %v5063_v10, %v5063_v10 }
 0x67a   : > { %s11805_s9 = smov %s11800_s4  ;;  %s11806_s8 = sld [smem:[#allocation167_spill]]  ;;  %v5120_v12 = vpack.c.bf16 %v5119_v5, %v5119_v5  ;;  %v5140_v8 = vpack.c.bf16 %v5139_v9, %v5139_v9 }
 0x67b   : > { %s11804_s24 = sshrl.u32 %s11799_s7, 16  ;;  %s5150_s25 = sor.u32 %s5149_s20, %s11805_s9  ;;  %v5133_v32 = vunpack.c.l.bf16 %v5113_v27  ;;  %v5131_v31 = vadd.f32 %v5130_v30, %v5129_v20 }
 0x67c   : > { %s5160_s3 = sshll.u32 %s11804_s24, 16  ;;  %s9940_s15 = sand.u32 1, %s2926_s12  ;;  %v5151_v11 = vstv %s5150_s25  ;;  %v5134_v34 = vunpack.c.l.bf16 %v5120_v12  ;;  %v5145_v27 = vunpack.c.l.bf16 %v5140_v8 }
 0x67d   : > { %s11809_s16 = smov %s11804_s24  ;;  %s2919_s20 = sand.u32 4294901760, %s9929_s22  ;;  %v9954_v36 = vunpack.c.l.bf16 %v5151_v11  ;;  %v5132_v48 = vpack.c.bf16 %v5131_v31, %v5131_v31 }
 0x67e   : > { %s11807_s23 = sshrl.u32 %s11802_s14, 16  ;;  %s5161_s4 = sor.u32 %s5160_s3, %s11809_s16  ;;  %v5135_v51 = vadd.f32 %v5134_v34, %v5133_v32 }
 0x67f   : > { %s5167_s30 = sshll.u32 %s11807_s23, 16  ;;  %s11808_s0 = sshrl.u32 %s11803_s13, 16  ;;  %v5162_v16 = vstv %s5161_s4  ;;  %v5141_v60 = vunpack.c.l.bf16 %v5132_v48 }
 0x680   : > { %s5174_s1 = sshll.u32 %s11808_s0, 16  ;;  %s11810_s24 = sshrl.u32 %s11806_s8, 16  ;;  %v5164_v44 = vunpack.c.l.bf16 %v5162_v16  ;;  %v5136_v33 = vpack.c.bf16 %v5135_v51, %v5135_v51 }
 0x681   : > { %s5181_s9 = sshll.u32 %s11810_s24, 16  ;;  %s11811_s12 = sld [smem:[#allocation168_spill]] }
 0x682   : > { %s5168_s0 = sor.u32 %s5167_s30, %s11807_s23  ;;  %s11812_s19 = sshrl.u32 %s11803_s13, 16  ;;  %v5165_v57 = vmul.f32 %v5164_v44, %v9339_v19  ;;  %v5142_v1 = vunpack.c.l.bf16 %v5136_v33 }
 0x683   : > { %s5175_s7 = sor.u32 %s5174_s1, %s11812_s19  ;;  %p2925_p1 = scmp.ne.f32.partialorder %s9866_s29, %s9866_s29  ;;  %v5169_v62 = vstv %s5168_s0 }
 0x684   : > { %s2928_s3 = sadd.s32 32767, %s9940_s15  ;;  %s11813_s22 = sld [smem:[#allocation169_spill]]  ;;  %v5176_v26 = vstv %s5175_s7  ;;  %v5171_v56 = vunpack.c.l.bf16 %v5169_v62  ;;  %v5166_v46 = vpack.c.bf16 %v5165_v57, %v5165_v57  ;;  %v5143_v18 = vadd.f32 %v5142_v1, %v5141_v60 }
 0x685   : > { %s11814_s25 = sld [smem:[#allocation170_spill]]  ;;  %s11815_s16 = smov %s11810_s24  ;;  %v5178_v53 = vunpack.c.l.bf16 %v5176_v26 }
 0x686   : > { %s5182_s14 = sor.u32 %s5181_s9, %s11815_s16  ;;  %s12469_s20 = smov (%p2914_p0, %s2919_s20), 2143289344  ;;  %v5172_v2 = vmul.f32 %v5171_v56, %v9346_v28  ;;  %v5144_v11 = vpack.c.bf16 %v5143_v18, %v5143_v18  ;;  %v5216_v34 = vunpack.c.l.bf16 %v5166_v46 }
 0x687   : > { %s11816_s30 = sshrl.u32 %s11811_s12, 16  ;;  %11817 = sst [smem:[#allocation37_spill]] %s12469_s20  ;;  %v5183_v17 = vstv %s5182_s14  ;;  %v5179_v15 = vmul.f32 %v5178_v53, %v9356_v0 }
 0x688   : > { %s5188_s13 = sshll.u32 %s11816_s30, 16  ;;  %s11818_s19 = sld [smem:[#allocation171_spill]]  ;;  %v5185_v49 = vunpack.c.l.bf16 %v5183_v17  ;;  %v5173_v55 = vpack.c.bf16 %v5172_v2, %v5172_v2  ;;  %v5146_v37 = vunpack.c.l.bf16 %v5144_v11 }
 0x689   : > { %s9970_s24 = sadd.s32 %s9866_s29, %s2928_s3  ;;  %s11821_s17 = smov %s11816_s30  ;;  %v5180_v29 = vpack.c.bf16 %v5179_v15, %v5179_v15 }
 0x68a   : > { %s11819_s1 = sshrl.u32 %s11813_s22, 16  ;;  %s5189_s9 = sor.u32 %s5188_s13, %s11821_s17  ;;  %v5186_v6 = vmul.f32 %v5185_v49, %v9372_v43  ;;  %v5217_v16 = vunpack.c.l.bf16 %v5173_v55  ;;  %v5147_v45 = vadd.f32 %v5146_v37, %v5145_v27 }
 0x68b   : > { %s5195_s15 = sshll.u32 %s11819_s1, 16  ;;  %s11820_s8 = sshrl.u32 %s11814_s25, 16  ;;  %v5190_v5 = vstv %s5189_s9  ;;  %v5220_v62 = vunpack.c.l.bf16 %v5180_v29 }
 0x68c   : > { %s5202_s4 = sshll.u32 %s11820_s8, 16  ;;  %s2937_s23 = sshrl.u32 %s9911_s28, 16  ;;  %v5192_v47 = vunpack.c.l.bf16 %v5190_v5  ;;  %v5187_v40 = vpack.c.bf16 %v5186_v6, %v5186_v6  ;;  %v5218_v44 = vadd.f32 %v5217_v16, %v5216_v34  ;;  %v5148_v7 = vpack.c.bf16 %v5147_v45, %v5147_v45 }
 0x68d   : > { %s11824_s16 = smov %s11819_s1  ;;  %s11825_s12 = smov %s11820_s8 }
 0x68e   : > { %s11822_s0 = sshrl.u32 %s11818_s19, 16  ;;  %s5196_s14 = sor.u32 %s5195_s15, %s11824_s16  ;;  %v5193_v42 = vmul.f32 %v5192_v47, %v9383_v63  ;;  %v5221_v26 = vunpack.c.l.bf16 %v5187_v40  ;;  %v5219_v57 = vpack.c.bf16 %v5218_v44, %v5218_v44  ;;  %v5153_v10 = vunpack.c.l.bf16 %v5148_v7 }
 0x68f   : > { %s5209_s7 = sshll.u32 %s11822_s0, 16  ;;  %s5203_s30 = sor.u32 %s5202_s4, %s11825_s12  ;;  %v5197_v12 = vstv %s5196_s14 }
 0x690   : > { %s2930_s13 = sand.u32 4294901760, %s9970_s24  ;;  %s9986_s1 = sld [smem:[#allocation6 + $0x126]]  ;;  %v5204_v20 = vstv %s5203_s30  ;;  %v5199_v58 = vunpack.c.l.bf16 %v5197_v12  ;;  %v5194_v13 = vpack.c.bf16 %v5193_v42, %v5193_v42  ;;  %v5222_v53 = vadd.f32 %v5221_v26, %v5220_v62 }
 0x691   : > { %s11826_s8 = sld [smem:[#allocation200_spill]]  ;;  %s9988_s17 = sand.u32 1, %s2937_s23  ;;  %v5206_v30 = vunpack.c.l.bf16 %v5204_v20  ;;  %v5232_v15 = vunpack.c.l.bf16 %v5219_v57  ;;  %v5155_v27 = vadd.f32 %v9954_v36, %v5153_v10 }
 0x692   : > { %s11827_s22 = smov %s11822_s0  ;;  %s11828_s4 = sld [smem:[#allocation172_spill]]  ;;  %v5200_v31 = vmul.f32 %v5199_v58, %v9392_v54  ;;  %v5224_v56 = vunpack.c.l.bf16 %v5194_v13  ;;  %v5223_v1 = vpack.c.bf16 %v5222_v53, %v5222_v53 }
 0x693   : > { %s5210_s25 = sor.u32 %s5209_s7, %s11827_s22  ;;  %s12471_s13 = smov (%p2925_p1, %s2930_s13), 2143289344  ;;  %v5207_v51 = vmul.f32 %v5206_v30, %v9403_v59  ;;  %v5158_v36 = vmax.f32 %v5155_v27, 0.0 }
 0x694   : > { %11830 = sst [smem:[#allocation205_spill]] %s12471_s13  ;;  %s2939_s19 = sadd.s32 32767, %s9988_s17  ;;  %v5211_v32 = vstv %s5210_s25  ;;  %v5201_v48 = vpack.c.bf16 %v5200_v31, %v5200_v31  ;;  %v5233_v18 = vunpack.c.l.bf16 %v5223_v1 }
 0x695   : > { %s11831_s9 = sld [smem:[#allocation173_spill]]  ;;  %v5213_v35 = vunpack.c.l.bf16 %v5211_v32  ;;  %s10018_s15 = sadd.s32 %s9911_s28, %s2939_s19  ;;  %v5208_v33 = vpack.c.bf16 %v5207_v51, %v5207_v51  ;;  %v10070_v51 = vpack.c.bf16 %v5158_v36, %v5158_v36 }
 0x696   : > { %s11832_s23 = sld [smem:[#allocation174_spill]]  ;;  %v5225_v60 = vunpack.c.l.bf16 %v5201_v48  ;;  %p2936_p2 = scmp.ne.f32.partialorder %s9911_s28, %s9911_s28  ;;  %v5234_v40 = vadd.f32 %v5233_v18, %v5232_v15 }
 0x697   : > { %s11829_s24 = sshrl.u32 %s11826_s8, 16  ;;  %s11833_s7 = sld [smem:[#allocation175_spill]]  ;;  %v5214_v50 = vmul.f32 %v5213_v35, %v9513_v3  ;;  %v5228_v46 = vunpack.c.l.bf16 %v5208_v33 }
 0x698   : > { %s5244_s0 = sshll.u32 %s11829_s24, 16  ;;  %s11834_s16 = sshrl.u32 %s11828_s4, 16  ;;  %v5226_v8 = vadd.f32 %v5225_v60, %v5224_v56  ;;  %v5235_v37 = vpack.c.bf16 %v5234_v40, %v5234_v40 }
 0x699   : > { %s5255_s14 = sshll.u32 %s11834_s16, 16  ;;  %s11835_s29 = smov %s11829_s24  ;;  %v5215_v9 = vpack.c.bf16 %v5214_v50, %v5214_v50 }
 0x69a   : > { %s5245_s12 = sor.u32 %s5244_s0, %s11835_s29  ;;  %s11839_s8 = sshrl.u32 %s11828_s4, 16  ;;  %v5227_v12 = vpack.c.bf16 %v5226_v8, %v5226_v8  ;;  %v5240_v45 = vunpack.c.l.bf16 %v5235_v37 }
 0x69b   : > { %s11836_s30 = sshrl.u32 %s11831_s9, 16  ;;  %s5256_s0 = sor.u32 %s5255_s14, %s11839_s8  ;;  %v5246_v17 = vstv %s5245_s12  ;;  %v5229_v55 = vunpack.c.l.bf16 %v5215_v9 }
 0x69c   : > { %s5262_s17 = sshll.u32 %s11836_s30, 16  ;;  %s11837_s22 = sshrl.u32 %s11832_s23, 16  ;;  %v10028_v2 = vunpack.c.l.bf16 %v5246_v17  ;;  %v5257_v49 = vstv %s5256_s0  ;;  %v5236_v34 = vunpack.c.l.bf16 %v5227_v12 }
 0x69d   : > { %s5269_s25 = sshll.u32 %s11837_s22, 16  ;;  %s11838_s24 = sshrl.u32 %s11833_s7, 16  ;;  %v5259_v5 = vunpack.c.l.bf16 %v5257_v49  ;;  %v5230_v20 = vadd.f32 %v5229_v55, %v5228_v46 }
 0x69e   : > { %s5276_s16 = sshll.u32 %s11838_s24, 16  ;;  %s2948_s29 = sshrl.u32 %s9986_s1, 16 }
 0x69f   : > { %s11840_s30 = sld [smem:[#allocation176_spill]]  ;;  %s11841_s22 = sshrl.u32 %s11831_s9, 16  ;;  %v5260_v11 = vmul.f32 %v5259_v5, %v9339_v19  ;;  %v5231_v32 = vpack.c.bf16 %v5230_v20, %v5230_v20 }
 0x6a0   : > { %s10026_s24 = sor.u32 %s5262_s17, %s11841_s22  ;;  %s11842_s19 = sld [smem:[#allocation177_spill]] }
 0x6a1   : > { %s11843_s13 = sshrl.u32 %s11832_s23, 16  ;;  %s11844_s4 = sshrl.u32 %s11833_s7, 16  ;;  %v5264_v29 = vstv %s10026_s24  ;;  %v5261_v16 = vpack.c.bf16 %v5260_v11, %v5260_v11  ;;  %v5237_v44 = vunpack.c.l.bf16 %v5231_v32 }
 0x6a2   : > { %s5270_s20 = sor.u32 %s5269_s25, %s11843_s13  ;;  %s5277_s14 = sor.u32 %s5276_s16, %s11844_s4  ;;  %v5266_v42 = vunpack.c.l.bf16 %v5264_v29 }
 0x6a3   : > { %s10038_s17 = sld [smem:[#allocation6 + $0x127]]  ;;  %s2941_s7 = sand.u32 4294901760, %s10018_s15  ;;  %v5271_v6 = vstv %s5270_s20  ;;  %v5278_v47 = vstv %s5277_s14  ;;  %v5238_v33 = vadd.f32 %v5237_v44, %v5236_v34  ;;  %v5311_v60 = vunpack.c.l.bf16 %v5261_v16 }
 0x6a4   : > { %s11846_s8 = sld [smem:[#allocation178_spill]]  ;;  %s10043_s25 = sand.u32 1, %s2948_s29  ;;  %v5273_v58 = vunpack.c.l.bf16 %v5271_v6  ;;  %v5280_v30 = vunpack.c.l.bf16 %v5278_v47  ;;  %v5267_v13 = vmul.f32 %v5266_v42, %v9346_v28 }
 0x6a5   : > { %s11845_s9 = sshrl.u32 %s11840_s30, 16  ;;  %s11848_s16 = sld [smem:[#allocation179_spill]]  ;;  %v5239_v46 = vpack.c.bf16 %v5238_v33, %v5238_v33 }
 0x6a6   : > { %s5283_s12 = sshll.u32 %s11845_s9, 16  ;;  %s11847_s13 = sshrl.u32 %s11842_s19, 16  ;;  %v5274_v31 = vmul.f32 %v5273_v58, %v9356_v0  ;;  %v5281_v35 = vmul.f32 %v5280_v30, %v9372_v43  ;;  %v5268_v48 = vpack.c.bf16 %v5267_v13, %v5267_v13 }
 0x6a7   : > { %s5290_s23 = sshll.u32 %s11847_s13, 16  ;;  %s11850_s22 = smov %s11845_s9  ;;  %v5241_v29 = vunpack.c.l.bf16 %v5239_v46 }
 0x6a8   : > { %s10050_s4 = sor.u32 %s5283_s12, %s11850_s22  ;;  %s11852_s20 = smov %s11847_s13  ;;  %v5275_v50 = vpack.c.bf16 %v5274_v31, %v5274_v31  ;;  %v5282_v56 = vpack.c.bf16 %v5281_v35, %v5281_v35  ;;  %v5312_v1 = vunpack.c.l.bf16 %v5268_v48 }
 0x6a9   : > { %s5291_s24 = sor.u32 %s5290_s23, %s11852_s20  ;;  %s12473_s7 = smov (%p2936_p2, %s2941_s7), 2143289344  ;;  %v5285_v62 = vstv %s10050_s4  ;;  %v5242_v42 = vadd.f32 %v5241_v29, %v5240_v45 }
 0x6aa   : > { %s11851_s15 = sshrl.u32 %s11846_s8, 16  ;;  %11854 = sst [smem:[#allocation38_spill]] %s12473_s7  ;;  %v5292_v26 = vstv %s5291_s24  ;;  %v5287_v57 = vunpack.c.l.bf16 %v5285_v62  ;;  %v5313_v55 = vadd.f32 %v5312_v1, %v5311_v60  ;;  %v5315_v5 = vunpack.c.l.bf16 %v5275_v50 }
 0x6ab   : > { %s5297_s29 = sshll.u32 %s11851_s15, 16  ;;  %s11853_s14 = sshrl.u32 %s11848_s16, 16  ;;  %v5294_v53 = vunpack.c.l.bf16 %v5292_v26  ;;  %v5316_v18 = vunpack.c.l.bf16 %v5282_v56  ;;  %v5243_v13 = vpack.c.bf16 %v5242_v42, %v5242_v42 }
 0x6ac   : > { %s5304_s9 = sshll.u32 %s11853_s14, 16  ;;  %s11857_s28 = smov %s11851_s15  ;;  %v5288_v15 = vmul.f32 %v5287_v57, %v9383_v63  ;;  %v5314_v20 = vpack.c.bf16 %v5313_v55, %v5313_v55 }
 0x6ad   : > { %s5298_s13 = sor.u32 %s5297_s29, %s11857_s28  ;;  %s2950_s23 = sadd.s32 32767, %s10043_s25  ;;  %v5295_v49 = vmul.f32 %v5294_v53, %v9392_v54  ;;  %v5317_v11 = vadd.f32 %v5316_v18, %v5315_v5  ;;  %v5248_v50 = vunpack.c.l.bf16 %v5243_v13 }
 0x6ae   : > { %s11858_s22 = smov %s11853_s14  ;;  %s11859_s14 = sshrl.u32 %s11699_s26, 16  ;;  %v5299_v17 = vstv %s5298_s13  ;;  %v5289_v6 = vpack.c.bf16 %v5288_v15, %v5288_v15  ;;  %v5327_v16 = vunpack.c.l.bf16 %v5314_v20 }
 0x6af   : > { %s5305_s15 = sor.u32 %s5304_s9, %s11858_s22  ;;  %s5339_s12 = sshll.u32 %s11859_s14, 16  ;;  %v5301_v7 = vunpack.c.l.bf16 %v5299_v17  ;;  %v5296_v47 = vpack.c.bf16 %v5295_v49, %v5295_v49  ;;  %v5318_v32 = vpack.c.bf16 %v5317_v11, %v5317_v11  ;;  %v5250_v60 = vadd.f32 %v10028_v2, %v5248_v50 }
 0x6b0   : > { %p2947_p4 = scmp.ne.f32.partialorder %s9986_s1, %s9986_s1  ;;  %s11860_s8 = sld [smem:[#allocation180_spill]]  ;;  %v5306_v9 = vstv %s5305_s15  ;;  %v5319_v30 = vunpack.c.l.bf16 %v5289_v6 }
 0x6b1   : > { %s10082_s25 = sadd.s32 %s9986_s1, %s2950_s23  ;;  %s11861_s16 = sld [smem:[#allocation181_spill]]  ;;  %v5308_v10 = vunpack.c.l.bf16 %v5306_v9  ;;  %v5302_v8 = vmul.f32 %v5301_v7, %v9403_v59  ;;  %v5320_v36 = vunpack.c.l.bf16 %v5296_v47  ;;  %v5328_v62 = vunpack.c.l.bf16 %v5318_v32 }
 0x6b2   : > { %s2959_s4 = sshrl.u32 %s10038_s17, 16  ;;  %s11862_s29 = sld [smem:[#allocation182_spill]]  ;;  %v5253_v2 = vmax.f32 %v5250_v60, 0.0 }
 0x6b3   : > { %s11863_s24 = smov %s11859_s14  ;;  %s11865_s23 = sld [smem:[#allocation183_spill]]  ;;  %v5309_v27 = vmul.f32 %v5308_v10, %v9513_v3  ;;  %v5303_v12 = vpack.c.bf16 %v5302_v8, %v5302_v8  ;;  %v5321_v31 = vadd.f32 %v5320_v36, %v5319_v30  ;;  %v5329_v53 = vadd.f32 %v5328_v62, %v5327_v16 }
 0x6b4   : > { %s10089_s9 = sor.u32 %s5339_s12, %s11863_s24  ;;  %s10099_s19 = sand.u32 1, %s2959_s4  ;;  %v10155_v20 = vpack.c.bf16 %v5253_v2, %v5253_v2 }
 0x6b5   : > { %v5341_v40 = vstv %s10089_s9  ;;  %v5310_v58 = vpack.c.bf16 %v5309_v27, %v5309_v27  ;;  %s11870_s4 = sld [smem:[#allocation184_spill]]  ;;  %s2961_s3 = sadd.s32 32767, %s10099_s19  ;;  %v5323_v34 = vunpack.c.l.bf16 %v5303_v12  ;;  %v5322_v56 = vpack.c.bf16 %v5321_v31, %v5321_v31 }
 0x6b6   : > { %s11864_s28 = sshrl.u32 %s11860_s8, 16  ;;  %v10113_v37 = vunpack.c.l.bf16 %v5341_v40  ;;  %s11872_s8 = sld [smem:[#allocation185_spill]]  ;;  %v5330_v49 = vpack.c.bf16 %v5329_v53, %v5329_v53 }
 0x6b7   : > { %s5350_s13 = sshll.u32 %s11864_s28, 16  ;;  %s11866_s22 = sshrl.u32 %s11861_s16, 16  ;;  %v5324_v35 = vunpack.c.l.bf16 %v5310_v58  ;;  %v5331_v46 = vunpack.c.l.bf16 %v5322_v56 }
 0x6b8   : > { %s5357_s15 = sshll.u32 %s11866_s22, 16  ;;  %s11867_s14 = sshrl.u32 %s11862_s29, 16  ;;  %v5335_v6 = vunpack.c.l.bf16 %v5330_v49 }
 0x6b9   : > { %s5364_s7 = sshll.u32 %s11867_s14, 16  ;;  %s11868_s26 = smov %s11864_s28  ;;  %v5325_v33 = vadd.f32 %v5324_v35, %v5323_v34 }
 0x6ba   : > { %s5351_s12 = sor.u32 %s5350_s13, %s11868_s26  ;;  %s11869_s24 = sshrl.u32 %s11865_s23, 16 }
 0x6bb   : > { %s5371_s28 = sshll.u32 %s11869_s24, 16  ;;  %s5358_s14 = sor.u32 %s5357_s15, %s11866_s22  ;;  %v5352_v44 = vstv %s5351_s12  ;;  %v5326_v1 = vpack.c.bf16 %v5325_v33, %v5325_v33 }
 0x6bc   : > { %s11871_s20 = sshrl.u32 %s11862_s29, 16  ;;  %s11873_s9 = sld [smem:[#allocation186_spill]]  ;;  %v5354_v26 = vunpack.c.l.bf16 %v5352_v44  ;;  %v5359_v45 = vstv %s5358_s14 }
 0x6bd   : > { %s5365_s30 = sor.u32 %s5364_s7, %s11871_s20  ;;  %s11874_s13 = smov %s11869_s24  ;;  %v5361_v57 = vunpack.c.l.bf16 %v5359_v45  ;;  %v5332_v5 = vunpack.c.l.bf16 %v5326_v1 }
 0x6be   : > { %s5372_s26 = sor.u32 %s5371_s28, %s11874_s13  ;;  %s11875_s16 = sshrl.u32 %s11870_s4, 16  ;;  %v5366_v48 = vstv %s5365_s30  ;;  %v5355_v17 = vmul.f32 %v5354_v26, %v9339_v19 }
 0x6bf   : > { %s5378_s15 = sshll.u32 %s11875_s16, 16  ;;  %s11876_s29 = sand.u32 4294901760, %s10082_s25  ;;  %v5368_v7 = vunpack.c.l.bf16 %v5366_v48  ;;  %v5373_v9 = vstv %s5372_s26  ;;  %v5362_v15 = vmul.f32 %v5361_v57, %v9346_v28  ;;  %v5333_v11 = vadd.f32 %v5332_v5, %v5331_v46 }
 0x6c0   : > { %s12475_s29 = smov (%p2947_p4, %s11876_s29), 2143289344  ;;  %s11877_s7 = sld [smem:[#allocation187_spill]]  ;;  %v5356_v10 = vpack.c.bf16 %v5355_v17, %v5355_v17  ;;  %v5375_v55 = vunpack.c.l.bf16 %v5373_v9 }
 0x6c1   : > { %s11878_s19 = sshrl.u32 %s11872_s8, 16  ;;  %s10131_s24 = sadd.s32 %s10038_s17, %s2961_s3  ;;  %v5369_v8 = vmul.f32 %v5368_v7, %v9356_v0  ;;  %v5363_v18 = vpack.c.bf16 %v5362_v15, %v5362_v15  ;;  %v5334_v34 = vpack.c.bf16 %v5333_v11, %v5333_v11 }
 0x6c2   : > { %s5385_s20 = sshll.u32 %s11878_s19, 16  ;;  %s11879_s23 = sshrl.u32 %s11873_s9, 16  ;;  %v5376_v27 = vmul.f32 %v5375_v55, %v9372_v43  ;;  %v5406_v13 = vunpack.c.l.bf16 %v5356_v10 }
 0x6c3   : > { %s5392_s12 = sshll.u32 %s11879_s23, 16  ;;  %s11880_s1 = smov %s11875_s16  ;;  %v5370_v47 = vpack.c.bf16 %v5369_v8, %v5369_v8  ;;  %v5407_v31 = vunpack.c.l.bf16 %v5363_v18  ;;  %v5336_v45 = vunpack.c.l.bf16 %v5334_v34 }
 0x6c4   : > { %s5379_s30 = sor.u32 %s5378_s15, %s11880_s1  ;;  %p2958_p6 = scmp.ne.f32.partialorder %s10038_s17, %s10038_s17  ;;  %v5377_v58 = vpack.c.bf16 %v5376_v27, %v5376_v27 }
 0x6c5   : > { %s11882_s28 = smov %s11878_s19  ;;  %s11883_s22 = smov %s11879_s23  ;;  %v5380_v29 = vstv %s5379_s30  ;;  %v5408_v48 = vadd.f32 %v5407_v31, %v5406_v13  ;;  %v5410_v50 = vunpack.c.l.bf16 %v5370_v47  ;;  %v5337_v7 = vadd.f32 %v5336_v45, %v5335_v6 }
 0x6c6   : > { %s11881_s3 = sshrl.u32 %s11877_s7, 16  ;;  %s5386_s4 = sor.u32 %s5385_s20, %s11882_s28  ;;  %v5382_v12 = vunpack.c.l.bf16 %v5380_v29  ;;  %v5411_v56 = vunpack.c.l.bf16 %v5377_v58 }
 0x6c7   : > { %s5399_s25 = sshll.u32 %s11881_s3, 16  ;;  %s5393_s14 = sor.u32 %s5392_s12, %s11883_s22  ;;  %v5387_v40 = vstv %s5386_s4  ;;  %v5409_v9 = vpack.c.bf16 %v5408_v48, %v5408_v48  ;;  %v5338_v8 = vpack.c.bf16 %v5337_v7, %v5337_v7 }
 0x6c8   : > { %s2963_s26 = sand.u32 4294901760, %s10131_s24  ;;  %s10149_s16 = sld [smem:[#allocation6 + $0x128]]  ;;  %v5394_v42 = vstv %s5393_s14  ;;  %v5383_v30 = vmul.f32 %v5382_v12, %v9383_v63  ;;  %v5389_v36 = vunpack.c.l.bf16 %v5387_v40  ;;  %v5412_v60 = vadd.f32 %v5411_v56, %v5410_v50 }
 0x6c9   : > { %s11884_s8 = smov %s11881_s3  ;;  %s11885_s19 = sld [smem:[#allocation188_spill]]  ;;  %v5396_v32 = vunpack.c.l.bf16 %v5394_v42  ;;  %v5422_v2 = vunpack.c.l.bf16 %v5409_v9  ;;  %v5343_v27 = vunpack.c.l.bf16 %v5338_v8 }
 0x6ca   : > { %s5400_s15 = sor.u32 %s5399_s25, %s11884_s8  ;;  %s11886_s20 = sshrl.u32 %s11703_s2, 16  ;;  %v5384_v35 = vpack.c.bf16 %v5383_v30, %v5383_v30  ;;  %v5390_v44 = vmul.f32 %v5389_v36, %v9392_v54  ;;  %v5413_v55 = vpack.c.bf16 %v5412_v60, %v5412_v60 }
 0x6cb   : > { %s5434_s23 = sshll.u32 %s11886_s20, 16  ;;  %s12477_s26 = smov (%p2958_p6, %s2963_s26), 2143289344  ;;  %v5401_v16 = vstv %s5400_s15  ;;  %v5397_v62 = vmul.f32 %v5396_v32, %v9403_v59  ;;  %v5345_v32 = vadd.f32 %v10113_v37, %v5343_v27 }
 0x6cc   : > { %s11887_s12 = sld [smem:[#allocation189_spill]]  ;;  %v5403_v26 = vunpack.c.l.bf16 %v5401_v16  ;;  %s11891_s3 = smov %s11886_s20  ;;  %v5391_v33 = vpack.c.bf16 %v5390_v44, %v5390_v44  ;;  %v5414_v17 = vunpack.c.l.bf16 %v5384_v35  ;;  %v5423_v12 = vunpack.c.l.bf16 %v5413_v55 }
 0x6cd   : > { %s10165_s7 = sld [smem:[#allocation6 + $0x129]]  ;;  %s5435_s25 = sor.u32 %s5434_s23, %s11891_s3  ;;  %v5398_v57 = vpack.c.bf16 %v5397_v62, %v5397_v62  ;;  %v5348_v44 = vmax.f32 %v5345_v32, 0.0 }
 0x6ce   : > { %s11888_s24 = sld [smem:[#allocation190_spill]]  ;;  %v5404_v53 = vmul.f32 %v5403_v26, %v9513_v3  ;;  %v5436_v1 = vstv %s5435_s25  ;;  %v5415_v15 = vunpack.c.l.bf16 %v5391_v33  ;;  %v5424_v34 = vadd.f32 %v5423_v12, %v5422_v2  ;;  %p2969_p10 = scmp.ne.f32.partialorder %s10149_s16, %s10149_s16 }
 0x6cf   : > { %s11889_s1 = sshrl.u32 %s11885_s19, 16  ;;  %s11890_s17 = sld [smem:[#allocation191_spill]]  ;;  %v5418_v49 = vunpack.c.l.bf16 %v5398_v57  ;;  %v10187_v10 = vunpack.c.l.bf16 %v5436_v1  ;;  %v10226_v33 = vpack.c.bf16 %v5348_v44, %v5348_v44  ;;  %v10279_v44 = vunpack.c.l.bf16 %v9833_v14 }
 0x6d0   : > { %s5445_s30 = sshll.u32 %s11889_s1, 16  ;;  %s11894_s2 = smov %s11889_s1  ;;  %v5405_v46 = vpack.c.bf16 %v5404_v53, %v5404_v53  ;;  %v5416_v18 = vadd.f32 %v5415_v15, %v5414_v17  ;;  %v5425_v62 = vpack.c.bf16 %v5424_v34, %v5424_v34 }
 0x6d1   : > { %s5446_s15 = sor.u32 %s5445_s30, %s11894_s2  ;;  %s11897_s22 = sld [smem:[#allocation192_spill]] }
 0x6d2   : > { %s11892_s28 = sshrl.u32 %s11887_s12, 16  ;;  %s11898_s9 = sld [smem:[#allocation193_spill]]  ;;  %v5447_v5 = vstv %s5446_s15  ;;  %v5419_v29 = vunpack.c.l.bf16 %v5405_v46  ;;  %v5417_v42 = vpack.c.bf16 %v5416_v18, %v5416_v18 }
 0x6d3   : > { %s5452_s4 = sshll.u32 %s11892_s28, 16  ;;  %s11896_s3 = smov %s11892_s28  ;;  %v5449_v6 = vunpack.c.l.bf16 %v5447_v5 }
 0x6d4   : > { %s11893_s14 = sshrl.u32 %s11888_s24, 16  ;;  %s5453_s28 = sor.u32 %s5452_s4, %s11896_s3  ;;  %v5420_v58 = vadd.f32 %v5419_v29, %v5418_v49  ;;  %v5426_v31 = vunpack.c.l.bf16 %v5417_v42 }
 0x6d5   : > { %s5459_s8 = sshll.u32 %s11893_s14, 16  ;;  %s11895_s20 = sshrl.u32 %s11890_s17, 16  ;;  %v5454_v47 = vstv %s5453_s28  ;;  %v5450_v30 = vmul.f32 %v5449_v6, %v9339_v19 }
 0x6d6   : > { %s5466_s23 = sshll.u32 %s11895_s20, 16  ;;  %s2970_s14 = sshrl.u32 %s10149_s16, 16  ;;  %v5456_v11 = vunpack.c.l.bf16 %v5454_v47  ;;  %v5421_v19 = vpack.c.bf16 %v5420_v58, %v5420_v58 }
 0x6d7   : > { %s11899_s19 = sshrl.u32 %s11888_s24, 16  ;;  %s10194_s25 = sor.u32 %s5466_s23, %s11895_s20  ;;  %v5451_v35 = vpack.c.bf16 %v5450_v30, %v5450_v30 }
 0x6d8   : > { %s5460_s30 = sor.u32 %s5459_s8, %s11899_s19  ;;  %s11900_s12 = sld [smem:[#allocation194_spill]]  ;;  %v5457_v16 = vmul.f32 %v5456_v11, %v9346_v28  ;;  %v5468_v13 = vstv %s10194_s25  ;;  %v5427_v45 = vunpack.c.l.bf16 %v5421_v19 }
 0x6d9   : > { %s11901_s4 = sld [smem:[#allocation195_spill]]  ;;  %s11902_s3 = sshrl.u32 %s11897_s22, 16  ;;  %v5461_v40 = vstv %s5460_s30  ;;  %v5470_v26 = vunpack.c.l.bf16 %v5468_v13  ;;  %v5501_v55 = vunpack.c.l.bf16 %v5451_v35 }
 0x6da   : > { %s5473_s1 = sshll.u32 %s11902_s3, 16  ;;  %s11903_s13 = sshrl.u32 %s11898_s9, 16  ;;  %v5463_v36 = vunpack.c.l.bf16 %v5461_v40  ;;  %v5458_v28 = vpack.c.bf16 %v5457_v16, %v5457_v16  ;;  %v5428_v17 = vadd.f32 %v5427_v45, %v5426_v31 }
 0x6db   : > { %s5480_s0 = sshll.u32 %s11903_s13, 16  ;;  %s10200_s24 = sand.u32 1, %s2970_s14  ;;  %v5471_v57 = vmul.f32 %v5470_v26, %v9372_v43 }
 0x6dc   : > { %s2981_s8 = sshrl.u32 %s10165_s7, 16  ;;  %s11906_s28 = sld [smem:[#allocation204_spill]]  ;;  %v5464_v37 = vmul.f32 %v5463_v36, %v9356_v0  ;;  %v5430_v0 = vunpack.c.l.bf16 %v5425_v62  ;;  %v5429_v49 = vpack.c.bf16 %v5428_v17, %v5428_v17  ;;  %v5502_v2 = vunpack.c.l.bf16 %v5458_v28 }
 0x6dd   : > { %s11907_s14 = smov %s11902_s3  ;;  %s11908_s30 = sshrl.u32 %s11898_s9, 16  ;;  %v5472_v1 = vpack.c.bf16 %v5471_v57, %v5471_v57 }
 0x6de   : > { %s11904_s17 = sshrl.u32 %s11900_s12, 16  ;;  %s5474_s19 = sor.u32 %s5473_s1, %s11907_s14  ;;  %v5465_v48 = vpack.c.bf16 %v5464_v37, %v5464_v37  ;;  %v5431_v6 = vunpack.c.l.bf16 %v5429_v49  ;;  %v5503_v47 = vadd.f32 %v5502_v2, %v5501_v55 }
 0x6df   : > { %s5487_s15 = sshll.u32 %s11904_s17, 16  ;;  %s11905_s23 = sshrl.u32 %s11901_s4, 16  ;;  %v5475_v50 = vstv %s5474_s19  ;;  %v5506_v27 = vunpack.c.l.bf16 %v5472_v1 }
 0x6e0   : > { %s5494_s13 = sshll.u32 %s11905_s23, 16  ;;  %s5481_s20 = sor.u32 %s5480_s0, %s11908_s30  ;;  %v5477_v53 = vunpack.c.l.bf16 %v5475_v50  ;;  %v5505_v29 = vunpack.c.l.bf16 %v5465_v48  ;;  %v5504_v42 = vpack.c.bf16 %v5503_v47, %v5503_v47  ;;  %v10283_v50 = vunpack.c.l.bf16 %v9914_v38 }
 0x6e1   : > { %s10216_s2 = sand.u32 1, %s2981_s8  ;;  %s11909_s17 = sld [smem:[#allocation36_spill]]  ;;  %v5482_v56 = vstv %s5481_s20  ;;  %v10294_v38 = vunpack.c.l.bf16 %v9994_v21 }
 0x6e2   : > { %s11910_s23 = sld [smem:[#allocation203_spill]]  ;;  %s11911_s22 = sshrl.u32 %s11900_s12, 16  ;;  %v5484_v7 = vunpack.c.l.bf16 %v5482_v56  ;;  %v5478_v46 = vmul.f32 %v5477_v53, %v9383_v63  ;;  %v5507_v58 = vadd.f32 %v5506_v27, %v5505_v29  ;;  %v5517_v35 = vunpack.c.l.bf16 %v5504_v42 }
 0x6e3   : > { %s5488_s25 = sor.u32 %s5487_s15, %s11911_s22  ;;  %s11912_s1 = sshrl.u32 %s11901_s4, 16 }
 0x6e4   : > { %s5495_s9 = sor.u32 %s5494_s13, %s11912_s1  ;;  %s2972_s14 = sadd.s32 32767, %s10200_s24  ;;  %v5489_v9 = vstv %s5488_s25  ;;  %v5485_v8 = vmul.f32 %v5484_v7, %v9392_v54  ;;  %v5479_v5 = vpack.c.bf16 %v5478_v46, %v5478_v46  ;;  %v5508_v19 = vpack.c.bf16 %v5507_v58, %v5507_v58 }
 0x6e5   : > { %s11913_s30 = sld [smem:[#allocation54_spill]]  ;;  %s2983_s4 = sadd.s32 32767, %s10216_s2  ;;  %v5496_v60 = vstv %s5495_s9  ;;  %v5491_v43 = vunpack.c.l.bf16 %v5489_v9 }
 0x6e6   : > { %s10232_s13 = sld [smem:[#allocation6 + $0x12a]]  ;;  %s10235_s24 = sadd.s32 %s10149_s16, %s2972_s14  ;;  %v5498_v15 = vunpack.c.l.bf16 %v5496_v60  ;;  %v5486_v54 = vpack.c.bf16 %v5485_v8, %v5485_v8  ;;  %v5509_v11 = vunpack.c.l.bf16 %v5479_v5  ;;  %v5518_v48 = vunpack.c.l.bf16 %v5508_v19 }
 0x6e7   : > { %s11915_s19 = sld [smem:[#allocation32_spill]]  ;;  %s10246_s1 = sadd.s32 %s10165_s7, %s2983_s4  ;;  %v5492_v63 = vmul.f32 %v5491_v43, %v9403_v59 }
 0x6e8   : > { %s11914_s12 = sshrl.u32 %s11910_s23, 16  ;;  %s11918_s9 = sld [smem:[#allocation33_spill]]  ;;  %v5499_v18 = vmul.f32 %v5498_v15, %v9513_v3  ;;  %v5432_v3 = vadd.f32 %v5431_v6, %v5430_v0  ;;  %v5510_v30 = vunpack.c.l.bf16 %v5486_v54  ;;  %v5519_v17 = vadd.f32 %v5518_v48, %v5517_v35 }
 0x6e9   : > { %s5529_s15 = sshll.u32 %s11914_s12, 16  ;;  %s11917_s2 = smov %s11914_s12  ;;  %v5493_v12 = vpack.c.bf16 %v5492_v63, %v5492_v63  ;;  %v10306_v15 = vunpack.c.l.bf16 %v10070_v51 }
 0x6ea   : > { %s5530_s25 = sor.u32 %s5529_s15, %s11917_s2  ;;  %p2980_p5 = scmp.ne.f32.partialorder %s10165_s7, %s10165_s7  ;;  %v5500_v59 = vpack.c.bf16 %v5499_v18, %v5499_v18  ;;  %v5433_v13 = vpack.c.bf16 %v5432_v3, %v5432_v3  ;;  %v5511_v31 = vadd.f32 %v5510_v30, %v5509_v11  ;;  %v5520_v43 = vpack.c.bf16 %v5519_v17, %v5519_v17 }
 0x6eb   : > { %s11916_s20 = sshrl.u32 %s11913_s30, 16  ;;  %s11920_s23 = sshrl.u32 %s11913_s30, 16  ;;  %v5531_v40 = vstv %s5530_s25  ;;  %v5513_v36 = vunpack.c.l.bf16 %v5493_v12  ;;  %v10319_v18 = vunpack.c.l.bf16 %v10155_v20  ;;  %v10328_v12 = vunpack.c.l.bf16 %v10226_v33 }
 0x6ec   : > { %s5540_s22 = sshll.u32 %s11916_s20, 16  ;;  %s2974_s20 = sand.u32 4294901760, %s10235_s24  ;;  %v5514_v32 = vunpack.c.l.bf16 %v5500_v59  ;;  %v10267_v34 = vunpack.c.l.bf16 %v5531_v40  ;;  %v5438_v26 = vunpack.c.l.bf16 %v5433_v13  ;;  %v5512_v45 = vpack.c.bf16 %v5511_v31, %v5511_v31 }
 0x6ed   : > { %s11919_s14 = sshrl.u32 %s11915_s19, 16  ;;  %s5541_s15 = sor.u32 %s5540_s22, %s11920_s23  ;;  %v5525_v5 = vunpack.c.l.bf16 %v5520_v43 }
 0x6ee   : > { %s5548_s12 = sshll.u32 %s11919_s14, 16  ;;  %s11921_s4 = sshrl.u32 %s11918_s9, 16  ;;  %v5542_v16 = vstv %s5541_s15  ;;  %v5515_v37 = vadd.f32 %v5514_v32, %v5513_v36  ;;  %v5440_v53 = vadd.f32 %v10187_v10, %v5438_v26  ;;  %v5521_v7 = vunpack.c.l.bf16 %v5512_v45 }
 0x6ef   : > { %s5556_s2 = sshll.u32 %s11921_s4, 16  ;;  %s2985_s14 = sand.u32 4294901760, %s10246_s1  ;;  %v5545_v62 = vunpack.c.l.bf16 %v5542_v16 }
 0x6f0   : > { %s11922_s24 = sld [smem:[#allocation34_spill]]  ;;  %s11923_s8 = sshrl.u32 %s11915_s19, 16  ;;  %v5516_v56 = vpack.c.bf16 %v5515_v37, %v5515_v37  ;;  %v5443_v10 = vmax.f32 %v5440_v53, 0.0 }
 0x6f1   : > { %s5549_s30 = sor.u32 %s5548_s12, %s11923_s8  ;;  %s12479_s20 = smov (%p2969_p10, %s2974_s20), 2143289344  ;;  %v5546_v14 = vmul.f32 %v5545_v62, %v10279_v44 }
 0x6f2   : > { %s11924_s22 = sld [smem:[#allocation37_spill]]  ;;  %s11926_s1 = smov %s11921_s4  ;;  %v5550_v28 = vstv %s5549_s30  ;;  %v5522_v9 = vunpack.c.l.bf16 %v5516_v56  ;;  %v5444_v51 = vpack.c.bf16 %v5443_v10, %v5443_v10 }
 0x6f3   : > { %s11925_s25 = sld [smem:[#allocation35_spill]]  ;;  %s5557_s23 = sor.u32 %s5556_s2, %s11926_s1  ;;  %v5553_v0 = vunpack.c.l.bf16 %v5550_v28  ;;  %v5547_v60 = vpack.c.bf16 %v5546_v14, %v5546_v14 }
 0x6f4   : > { %s12481_s14 = smov (%p2980_p5, %s2985_s14), 2143289344  ;;  %s11929_s8 = sld [smem:[#allocation55_spill]]  ;;  %v5558_v57 = vstv %s5557_s23  ;;  %v5523_v49 = vadd.f32 %v5522_v9, %v5521_v7  ;;  %v10330_v20 = vunpack.c.l.bf16 %v5444_v51 }
 0x6f5   : > { %11928 = sst [smem:[#allocation39_spill]] %s12481_s14  ;;  %s2992_s16 = sshrl.u32 %s10232_s13, 16  ;;  %v5554_v1 = vmul.f32 %v5553_v0, %v10283_v50  ;;  %v5561_v46 = vunpack.c.l.bf16 %v5558_v57  ;;  %v5604_v30 = vunpack.c.l.bf16 %v5547_v60 }
 0x6f6   : > { %s11927_s4 = sshrl.u32 %s11922_s24, 16  ;;  %s10287_s9 = sld [smem:[#allocation6 + $0x12b]]  ;;  %v5524_v29 = vpack.c.bf16 %v5523_v49, %v5523_v49 }
 0x6f7   : > { %s5564_s0 = sshll.u32 %s11927_s4, 16  ;;  %s11931_s12 = sld [smem:[#allocation205_spill]]  ;;  %v5555_v8 = vpack.c.bf16 %v5554_v1, %v5554_v1  ;;  %v5562_v55 = vmul.f32 %v5561_v46, %v10294_v38 }
 0x6f8   : > { %s11932_s15 = smov %s11927_s4  ;;  %s11934_s4 = sshrl.u32 %s12451_s11, 16  ;;  %v5526_v11 = vunpack.c.l.bf16 %v5524_v29 }
 0x6f9   : > { %s11930_s7 = sshrl.u32 %s11925_s25, 16  ;;  %s5565_s2 = sor.u32 %s5564_s0, %s11932_s15  ;;  %v5563_v6 = vpack.c.bf16 %v5562_v55, %v5562_v55  ;;  %v5605_v36 = vunpack.c.l.bf16 %v5555_v8 }
 0x6fa   : > { %s5572_s19 = sshll.u32 %s11930_s7, 16  ;;  %s11933_s30 = sshrl.u32 %s11929_s8, 16  ;;  %v5566_v21 = vstv %s5565_s2  ;;  %v5527_v32 = vadd.f32 %v5526_v11, %v5525_v5 }
 0x6fb   : > { %s5580_s1 = sshll.u32 %s11933_s30, 16  ;;  %s5588_s7 = sshll.u32 %s11934_s4, 16  ;;  %v5569_v2 = vunpack.c.l.bf16 %v5566_v21  ;;  %v5606_v35 = vadd.f32 %v5605_v36, %v5604_v30  ;;  %v5608_v37 = vunpack.c.l.bf16 %v5563_v6 }
 0x6fc   : > { %s11935_s24 = sld [smem:[#allocation38_spill]]  ;;  %s11936_s0 = sshrl.u32 %s11925_s25, 16  ;;  %v5528_v28 = vpack.c.bf16 %v5527_v32, %v5527_v32 }
 0x6fd   : > { %s5573_s23 = sor.u32 %s5572_s19, %s11936_s0  ;;  %s11937_s30 = sshrl.u32 %s12453_s5, 16  ;;  %v5570_v54 = vmul.f32 %v5569_v2, %v10306_v15  ;;  %v5607_v14 = vpack.c.bf16 %v5606_v35, %v5606_v35 }
 0x6fe   : > { %s5596_s4 = sshll.u32 %s11937_s30, 16  ;;  %s11938_s3 = sshrl.u32 %s11929_s8, 16  ;;  %v5574_v63 = vstv %s5573_s23  ;;  %v5533_v53 = vunpack.c.l.bf16 %v5528_v28 }
 0x6ff   : > { %s5581_s25 = sor.u32 %s5580_s1, %s11938_s3  ;;  %s11939_s19 = sshrl.u32 %s12451_s11, 16  ;;  %v5577_v47 = vunpack.c.l.bf16 %v5574_v63  ;;  %v5571_v40 = vpack.c.bf16 %v5570_v54, %v5570_v54  ;;  %v5620_v46 = vunpack.c.l.bf16 %v5607_v14 }
 0x700   : > { %s5589_s0 = sor.u32 %s5588_s7, %s11939_s19  ;;  %s10316_s14 = sand.u32 1, %s2992_s16  ;;  %v5582_v27 = vstv %s5581_s25  ;;  %v5535_v43 = vadd.f32 %v10267_v34, %v5533_v53 }
 0x701   : > { %s11940_s11 = smov %s11937_s30  ;;  %s11941_s8 = sshrl.u32 %s12455_s6, 16  ;;  %v5590_v59 = vstv %s5589_s0  ;;  %v5578_v3 = vmul.f32 %v5577_v47, %v10319_v18  ;;  %v5585_v42 = vunpack.c.l.bf16 %v5582_v27  ;;  %v5609_v62 = vunpack.c.l.bf16 %v5571_v40 }
 0x702   : > { %s2944_s15 = sshrl.u32 %s11935_s24, 16  ;;  %s5597_s3 = sor.u32 %s5596_s4, %s11940_s11  ;;  %v5593_v58 = vunpack.c.l.bf16 %v5590_v59  ;;  %v5538_v34 = vmax.f32 %v5535_v43, 0.0 }
 0x703   : > { %s5634_s16 = sshll.u32 %s11941_s8, 16  ;;  %s2955_s2 = sshrl.u32 %s12475_s29, 16  ;;  %v5598_v33 = vstv %s5597_s3  ;;  %v5579_v16 = vpack.c.bf16 %v5578_v3, %v5578_v3  ;;  %v5586_v13 = vmul.f32 %v5585_v42, %v10328_v12  ;;  %v5610_v0 = vadd.f32 %v5609_v62, %v5608_v37 }
 0x704   : > { %s11942_s1 = sshrl.u32 %s12457_s18, 16  ;;  %s2994_s23 = sadd.s32 32767, %s10316_s14  ;;  %v10342_v19 = vunpack.c.l.bf16 %v5598_v33  ;;  %v5594_v31 = vmul.f32 %v5593_v58, %v10330_v20  ;;  %v5539_v11 = vpack.c.bf16 %v5538_v34, %v5538_v34 }
 0x705   : > { %s5641_s7 = sshll.u32 %s11942_s1, 16  ;;  %s11943_s5 = sshrl.u32 %s12459_s27, 16  ;;  %v5587_v26 = vpack.c.bf16 %v5586_v13, %v5586_v13  ;;  %v5612_v45 = vunpack.c.l.bf16 %v5579_v16  ;;  %v5611_v60 = vpack.c.bf16 %v5610_v0, %v5610_v0 }
 0x706   : > { %s5648_s30 = sshll.u32 %s11943_s5, 16  ;;  %s3003_s4 = sshrl.u32 %s10287_s9, 16  ;;  %v5595_v56 = vpack.c.bf16 %v5594_v31, %v5594_v31  ;;  %v10411_v32 = vunpack.c.l.bf16 %v5539_v11 }
 0x707   : > { %s11944_s25 = smov %s11941_s8  ;;  %s11945_s14 = smov %s11942_s1  ;;  %v5613_v17 = vunpack.c.l.bf16 %v5587_v26  ;;  %v5621_v55 = vunpack.c.l.bf16 %v5611_v60 }
 0x708   : > { %s5635_s19 = sor.u32 %s5634_s16, %s11944_s25  ;;  %s10346_s0 = sor.u32 %s5641_s7, %s11945_s14  ;;  %v10370_v1 = vunpack.c.l.bf16 %v5595_v56  ;;  %v5602_v26 = vmul.f32 %v10342_v19, %v10411_v32 }
 0x709   : > { %s11946_s11 = sshrl.u32 %s12461_s10, 16  ;;  %s11947_s6 = smov %s11943_s5  ;;  %v5636_v48 = vstv %s5635_s19  ;;  %v5643_v7 = vstv %s10346_s0  ;;  %v5614_v21 = vadd.f32 %v5613_v17, %v5612_v45  ;;  %v5622_v54 = vadd.f32 %v5621_v55, %v5620_v46 }
 0x70a   : > { %s5655_s8 = sshll.u32 %s11946_s11, 16  ;;  %s5649_s3 = sor.u32 %s5648_s30, %s11947_s6  ;;  %v5638_v57 = vunpack.c.l.bf16 %v5636_v48  ;;  %v5645_v49 = vunpack.c.l.bf16 %v5643_v7  ;;  %v5603_v19 = vpack.c.bf16 %v5602_v26, %v5602_v26 }
 0x70b   : > { %s11948_s16 = sshrl.u32 %s12463_s21, 16  ;;  %s10356_s5 = sadd.s32 %s10232_s13, %s2994_s23  ;;  %v5650_v9 = vstv %s5649_s3  ;;  %v5615_v63 = vpack.c.bf16 %v5614_v21, %v5614_v21  ;;  %v5623_v58 = vpack.c.bf16 %v5622_v54, %v5622_v54 }
 0x70c   : > { %s5662_s1 = sshll.u32 %s11948_s16, 16  ;;  %s11949_s18 = sshrl.u32 %s11906_s28, 16  ;;  %v5639_v10 = vmul.f32 %v5638_v57, %v10279_v44  ;;  %v5652_v8 = vunpack.c.l.bf16 %v5650_v9  ;;  %v5646_v29 = vmul.f32 %v5645_v49, %v10283_v50  ;;  %v5617_v21 = vunpack.c.l.bf16 %v5603_v19 }
 0x70d   : > { %s5669_s7 = sshll.u32 %s11949_s18, 16  ;;  %p2991_p11 = scmp.ne.f32.partialorder %s10232_s13, %s10232_s13  ;;  %v10399_v40 = vunpack.c.l.bf16 %v5615_v63  ;;  %v10414_v35 = vunpack.c.l.bf16 %v5623_v58 }
 0x70e   : > { %s10362_s25 = sand.u32 1, %s3003_s4  ;;  %s11950_s27 = smov %s11946_s11  ;;  %v5640_v2 = vpack.c.bf16 %v5639_v10, %v5639_v10  ;;  %v5653_v6 = vmul.f32 %v5652_v8, %v10294_v38  ;;  %v5647_v3 = vpack.c.bf16 %v5646_v29, %v5646_v29  ;;  %v5618_v63 = vadd.f32 %v5617_v21, %v10370_v1 }
 0x70f   : > { %s5656_s23 = sor.u32 %s5655_s8, %s11950_s27  ;;  %s11951_s30 = smov %s11948_s16 }
 0x710   : > { %s5663_s19 = sor.u32 %s5662_s1, %s11951_s30  ;;  %s2996_s14 = sand.u32 4294901760, %s10356_s5  ;;  %v5657_v51 = vstv %s5656_s23  ;;  %v5654_v42 = vpack.c.bf16 %v5653_v6, %v5653_v6  ;;  %v5690_v31 = vunpack.c.l.bf16 %v5640_v2  ;;  %v5691_v56 = vunpack.c.l.bf16 %v5647_v3 }
 0x711   : > { %s11952_s4 = smov %s11949_s18  ;;  %s11953_s10 = sshrl.u32 %s11909_s17, 16  ;;  %v5664_v5 = vstv %s5663_s19  ;;  %v5659_v47 = vunpack.c.l.bf16 %v5657_v51  ;;  %v5619_v3 = vpack.c.bf16 %v5618_v63, %v5618_v63 }
 0x712   : > { %s10375_s11 = sor.u32 %s5669_s7, %s11952_s4  ;;  %s5676_s21 = sshll.u32 %s11953_s10, 16  ;;  %v5666_v27 = vunpack.c.l.bf16 %v5664_v5  ;;  %v5694_v0 = vunpack.c.l.bf16 %v5654_v42  ;;  %v5692_v9 = vadd.f32 %v5691_v56, %v5690_v31 }
 0x713   : > { %s11954_s0 = sshrl.u32 %s11924_s22, 16  ;;  %s2966_s6 = sshrl.u32 %s12477_s26, 16  ;;  %v5671_v59 = vstv %s10375_s11  ;;  %v5660_v33 = vmul.f32 %v5659_v47, %v10306_v15 }
 0x714   : > { %s5683_s8 = sshll.u32 %s11954_s0, 16  ;;  %s3005_s3 = sadd.s32 32767, %s10362_s25  ;;  %v5667_v30 = vmul.f32 %v5666_v27, %v10319_v18  ;;  %v5673_v36 = vunpack.c.l.bf16 %v5671_v59  ;;  %v5693_v55 = vpack.c.bf16 %v5692_v9, %v5692_v9 }
 0x715   : > { %s12483_s14 = smov (%p2991_p11, %s2996_s14), 2143289344  ;;  %s11955_s28 = sld [smem:[#allocation39_spill]]  ;;  %v5661_v37 = vpack.c.bf16 %v5660_v33, %v5660_v33 }
 0x716   : > { %s11956_s16 = smov %s11953_s10  ;;  %s11957_s13 = smov %s11954_s0  ;;  %v5668_v62 = vpack.c.bf16 %v5667_v30, %v5667_v30  ;;  %v5674_v28 = vmul.f32 %v5673_v36, %v10328_v12  ;;  %v5706_v54 = vunpack.c.l.bf16 %v5693_v55 }
 0x717   : > { %s5677_s1 = sor.u32 %s5676_s21, %s11956_s16  ;;  %s5684_s5 = sor.u32 %s5683_s8, %s11957_s13  ;;  %v5695_v57 = vunpack.c.l.bf16 %v5661_v37 }
 0x718   : > { %s10397_s18 = sadd.s32 %s10287_s9, %s3005_s3  ;;  %s11958_s7 = sshrl.u32 %s11931_s12, 16  ;;  %v5678_v16 = vstv %s5677_s1  ;;  %v5685_v13 = vstv %s5684_s5  ;;  %v5675_v14 = vpack.c.bf16 %v5674_v28, %v5674_v28  ;;  %v5698_v53 = vunpack.c.l.bf16 %v5668_v62 }
 0x719   : > { %s5720_s25 = sshll.u32 %s11958_s7, 16  ;;  %s2977_s27 = sshrl.u32 %s12479_s20, 16  ;;  %v5680_v45 = vunpack.c.l.bf16 %v5678_v16  ;;  %v5687_v48 = vunpack.c.l.bf16 %v5685_v13  ;;  %v5696_v60 = vadd.f32 %v5695_v57, %v5694_v0 }
 0x71a   : > { %s5727_s17 = sshll.u32 %s2944_s15, 16  ;;  %p3002_p3 = scmp.ne.f32.partialorder %s10287_s9, %s10287_s9  ;;  %v5699_v46 = vunpack.c.l.bf16 %v5675_v14 }
 0x71b   : > { %s2988_s22 = sshrl.u32 %s11955_s28, 16  ;;  %s3007_s23 = sand.u32 4294901760, %s10397_s18  ;;  %v5681_v17 = vmul.f32 %v5680_v45, %v10330_v20  ;;  %v5688_v7 = vmul.f32 %v5687_v48, %v10411_v32  ;;  %v5697_v2 = vpack.c.bf16 %v5696_v60, %v5696_v60 }
 0x71c   : > { %s11959_s30 = smov %s11958_s7  ;;  %s5728_s4 = sor.u32 %s5727_s17, %s2944_s15  ;;  %v5700_v51 = vadd.f32 %v5699_v46, %v5698_v53 }
 0x71d   : > { %s10419_s19 = sor.u32 %s5720_s25, %s11959_s30  ;;  %s5734_s11 = sshll.u32 %s2955_s2, 16  ;;  %v5729_v43 = vstv %s5728_s4  ;;  %v5682_v49 = vpack.c.bf16 %v5681_v17, %v5681_v17  ;;  %v5689_v8 = vpack.c.bf16 %v5688_v7, %v5688_v7  ;;  %v5707_v27 = vunpack.c.l.bf16 %v5697_v2 }
 0x71e   : > { %s2999_s10 = sshrl.u32 %s12483_s14, 16  ;;  %s5741_s12 = sshll.u32 %s2966_s6, 16  ;;  %v5722_v10 = vstv %s10419_s19  ;;  %v5731_v34 = vunpack.c.l.bf16 %v5729_v43  ;;  %v5701_v47 = vpack.c.bf16 %v5700_v51, %v5700_v51 }
 0x71f   : > { %s12485_s23 = smov (%p3002_p3, %s3007_s23), 2143289344  ;;  %s10440_s24 = sor.u32 %s5734_s11, %s2955_s2  ;;  %v5724_v5 = vunpack.c.l.bf16 %v5722_v10  ;;  %v5702_v29 = vunpack.c.l.bf16 %v5682_v49  ;;  %v5703_v6 = vunpack.c.l.bf16 %v5689_v8  ;;  %v5708_v1 = vadd.f32 %v5707_v27, %v5706_v54 }
 0x720   : > { %s10444_s9 = sor.u32 %s5741_s12, %s2966_s6  ;;  %s5748_s15 = sshll.u32 %s2977_s27, 16  ;;  %v5732_v11 = vmul.f32 %v5731_v34, %v10283_v50  ;;  %v5736_v58 = vstv %s10440_s24  ;;  %v5710_v30 = vunpack.c.l.bf16 %v5701_v47 }
 0x721   : > { %s5755_s29 = sshll.u32 %s2988_s22, 16  ;;  %s5762_s2 = sshll.u32 %s2999_s10, 16  ;;  %v5725_v59 = vmul.f32 %v5724_v5, %v10279_v44  ;;  %v5704_v42 = vadd.f32 %v5703_v6, %v5702_v29  ;;  %v5743_v33 = vstv %s10444_s9  ;;  %v5625_v44 = vunpack.c.l.bf16 %v5619_v3 }
 0x722   : > { %s3010_s21 = sshrl.u32 %s12485_s23, 16  ;;  %s5749_s26 = sor.u32 %s5748_s15, %s2977_s27  ;;  %v5733_v16 = vpack.c.bf16 %v5732_v11, %v5732_v11  ;;  %v5738_v50 = vunpack.c.l.bf16 %v5736_v58  ;;  %v5745_v31 = vunpack.c.l.bf16 %v5743_v33  ;;  %v5709_v37 = vpack.c.bf16 %v5708_v1, %v5708_v1 }
 0x723   : > { %s5756_s0 = sor.u32 %s5755_s29, %s2988_s22  ;;  %s5763_s8 = sor.u32 %s5762_s2, %s2999_s10  ;;  %v5726_v36 = vpack.c.bf16 %v5725_v59, %v5725_v59  ;;  %v5705_v13 = vpack.c.bf16 %v5704_v42, %v5704_v42  ;;  %v5750_v62 = vstv %s5749_s26  ;;  %v5626_v45 = vadd.f32 %v5625_v44, %v10399_v40 }
 0x724   : > { %s5769_s6 = sshll.u32 %s3010_s21, 16  ;;  %v5757_v28 = vstv %s5756_s0  ;;  %v5764_v26 = vstv %s5763_s8  ;;  %v5739_v56 = vmul.f32 %v5738_v50, %v10294_v38  ;;  %v5746_v14 = vmul.f32 %v5745_v31, %v10306_v15  ;;  %s11960_s14 = sld [smem:[#allocation21_spill]] }
 0x725   : > { %v5711_v48 = vunpack.c.l.bf16 %v5705_v13  ;;  %s5770_s20 = sor.u32 %s5769_s6, %s3010_s21  ;;  %v5714_v0 = vunpack.c.l.bf16 %v5709_v37  ;;  %v5752_v57 = vunpack.c.l.bf16 %v5750_v62  ;;  %v5759_v53 = vunpack.c.l.bf16 %v5757_v28  ;;  %s10477_s28 = sld [smem:[#allocation6 + $0x133]] }
 0x726   : > { %v5766_v19 = vunpack.c.l.bf16 %v5764_v26  ;;  %v5627_v17 = vpack.c.bf16 %v5626_v45, %v5626_v45  ;;  %v5740_v9 = vpack.c.bf16 %v5739_v56, %v5739_v56  ;;  %v5747_v60 = vpack.c.bf16 %v5746_v14, %v5746_v14  ;;  %s11961_s16 = sld [smem:[#allocation14_spill]] }
 0x727   : > { %v5712_v7 = vadd.f32 %v5711_v48, %v5710_v30  ;;  %v5753_v46 = vmul.f32 %v5752_v57, %v10319_v18  ;;  %v5760_v40 = vmul.f32 %v5759_v53, %v10328_v12  ;;  %v5771_v38 = vstv %s5770_s20  ;;  %s11962_s7 = sld [smem:[#allocation240_spill]] }
 0x728   : > { %v5767_v10 = vmul.f32 %v5766_v19, %v10330_v20  ;;  %v5629_v43 = vunpack.c.l.bf16 %v5627_v17  ;;  %v5773_v21 = vunpack.c.l.bf16 %v5771_v38  ;;  %v5776_v49 = vunpack.c.l.bf16 %v5726_v36 }
 0x729   : > { %v5713_v15 = vpack.c.bf16 %v5712_v7, %v5712_v7  ;;  %v5754_v8 = vpack.c.bf16 %v5753_v46, %v5753_v46  ;;  %v5761_v55 = vpack.c.bf16 %v5760_v40, %v5760_v40  ;;  %v5777_v51 = vunpack.c.l.bf16 %v5733_v16 }
 0x72a   : > { %v5768_v2 = vpack.c.bf16 %v5767_v10, %v5767_v10  ;;  %v5630_v5 = vadd.f32 %v5629_v43, %v10414_v35  ;;  %v5774_v63 = vmul.f32 %v5773_v21, %v10411_v32  ;;  %v5780_v18 = vunpack.c.l.bf16 %v5740_v9  ;;  %s6215_s3 = smul.u32 6, %s11960_s14  ;;  %s5812_s23 = scalar_lea.sflag [#allocation4], %s11960_s14 }
 0x72b   : > { %v5715_v34 = vunpack.c.l.bf16 %v5713_v15  ;;  %v5778_v12 = vadd.f32 %v5777_v51, %v5776_v49  ;;  %v5781_v20 = vunpack.c.l.bf16 %v5747_v60  ;;  %v5784_v29 = vunpack.c.l.bf16 %v5754_v8 }
 0x72c   : > { %v5785_v6 = vunpack.c.l.bf16 %v5761_v55  ;;  %v5631_v54 = vpack.c.bf16 %v5630_v5, %v5630_v5  ;;  %v5775_v27 = vpack.c.bf16 %v5774_v63, %v5774_v63  ;;  %v5788_v59 = vunpack.c.l.bf16 %v5768_v2  ;;  %s194_s1 = scalar_lea.vmem [#allocation7], %s6215_s3  ;;  %s6216_s13 = smul.u32 6, %s11961_s16 }
 0x72d   : > { %v5716_v47 = vadd.f32 %v5715_v34, %v5714_v0  ;;  %v4774_v11 = vunpack.c.l.bf16 %v4769_v41  ;;  %v5779_v35 = vpack.c.bf16 %v5778_v12, %v5778_v12  ;;  %v5782_v3 = vadd.f32 %v5781_v20, %v5780_v18  ;;  %s5825_s17 = sshll.u32 %s194_s1, 4  ;;  %s6360_s10 = scalar_lea.hbm %s11962_s7, 12  ;;  %s5826_s17 = int_to_ptr.vmem [resolvable:$true] %s5825_s17 }
 0x72e   : > { %v5786_v42 = vadd.f32 %v5785_v6, %v5784_v29  ;;  %v4775_v32 = vunpack.c.l.bf16 %v4773_v39  ;;  %v5632_v58 = vunpack.c.l.bf16 %v5631_v54  ;;  %v5789_v1 = vunpack.c.l.bf16 %v5775_v27  ;;  %s5824_s25 = scalar_lea.hbm %s11962_s7, %s6216_s13 }
 0x72f   : > { %v5717_v33 = vpack.c.bf16 %v5716_v47, %v5716_v47  ;;  %v5783_v30 = vpack.c.bf16 %v5782_v3, %v5782_v3  ;;  %v5792_v16 = vunpack.c.l.bf16 %v5779_v35  ;;  %v3069_v41 = vadd.f32 %v8697_v23, %v8671_v22  ;;  %s5827_s22 = sshll.u32 %s5824_s25, 4  ;;  %s5828_s22 = int_to_ptr.hbm [resolvable:$true] %s5827_s22 }
 0x730   : > { %v5787_v36 = vpack.c.bf16 %v5786_v42, %v5786_v42  ;;  %v5633_v44 = vadd.f32 %v5632_v58, %v9698_v4  ;;  %v5790_v61 = vadd.f32 %v5789_v1, %v5788_v59  ;;  %v3751_v50 = vpack.c.bf16 %v9653_v52, %v9653_v52  ;;  %s6354_s30 = sshra.s32 %s5828_s22, 4  ;;  %s6355_s30 = int_to_ptr.hbm [resolvable:$true] %s6354_s30 }
 0x731   : > { %v5718_v13 = vunpack.c.l.bf16 %v5717_v33  ;;  %v5793_v25 = vunpack.c.l.bf16 %v5783_v30  ;;  %v4776_v39 = vadd.f32 %v4775_v32, %v4774_v11  ;;  %v3070_v28 = vstv %s10477_s28  ;;  %s6356_s19 = scalar_lea.hbm %s6355_s30, 6  ;;  %p6361_p1 = scmp.lt.s32.totalorder %s6355_s30, %s11962_s7 }
 0x732   : > { %v5791_v37 = vpack.c.bf16 %v5790_v61, %v5790_v61  ;;  %v5796_v62 = vunpack.c.l.bf16 %v5787_v36  ;;  %5806 = vst [vmem:[%s194_s1] sm:$0x3] %v5633_v44  ;;  %v3071_v48 = vadd.f32 %v3070_v28, %v3069_v41  ;;  %v3752_v22 = vunpack.c.l.bf16 %v3751_v50  ;;  %p6357_p7 = scmp.ne.s32.totalorder %s6355_s30, %s6356_s19  ;;  %p6362_p2 = scmp.lt.s32.totalorder %s6360_s10, %s6356_s19 }
 0x733   : > { %v5719_v31 = vadd.f32 %v5718_v13, %v9704_v24  ;;  %v5794_v4 = vadd.f32 %v5793_v25, %v5792_v16  ;;  %v4777_v23 = vpack.c.bf16 %v4776_v39, %v4776_v39 }
 0x734   : > { %v5797_v26 = vunpack.c.l.bf16 %v5791_v37  ;;  %v3753_v0 = vadd.f32 %v3752_v22, %v3071_v48  ;;  %p6358_p12 = pnand %p6357_p7, %p6500_p8  ;;  %p6363_p4 = por %p6362_p2, %p6361_p1 }
 0x735   : > { %6209 = vst [vmem:[%s194_s1 + $0x2] sm:$0x3] %v5719_v31  ;;  %v5795_v45 = vpack.c.bf16 %v5794_v4, %v5794_v4  ;;  %v4778_v24 = vunpack.c.l.bf16 %v4777_v23 }
 0x736   : > { %v5798_v56 = vadd.f32 %v5797_v26, %v5796_v62  ;;  %p6359_p0 = pneg %p6358_p12 }
 0x737   : > { %v5800_v14 = vunpack.c.l.bf16 %v5795_v45  ;;  %v4779_v19 = vadd.f32 %v4778_v24, %v3753_v0 }
 0x738   : > { %v5799_v52 = vpack.c.bf16 %v5798_v56, %v5798_v56  ;;  %p6364_p6 = pnand %p6363_p4, %p6359_p0 }
 0x73a   : > { %v5801_v57 = vunpack.c.l.bf16 %v5799_v52 }
 0x73c   : > { %v5802_v53 = vadd.f32 %v5801_v57, %v5800_v14 }
 0x73e   : > { %v5803_v17 = vpack.c.bf16 %v5802_v53, %v5802_v53 }
 0x740   : > { %v5804_v7 = vunpack.c.l.bf16 %v5803_v17 }
 0x742   : > { %v5805_v9 = vadd.f32 %v5804_v7, %v4779_v19 }
 0x744   : > { %6210 = vst [vmem:[%s194_s1 + $0x4] sm:$0x3] %v5805_v9 }
 0x745   : > { %6367 = shalt.err (!%p6364_p6)
}
 0x746   : > { %s6431_s9 = smov 32   ;;  %s6432_s15 = smov 2  }
 0x747   : > { %6223 = dma.vmem_to_hbm [thread:$0]  (%p6500_p8), %s5826_s17, 96, %s5828_s22, %s5812_s23, %s6431_s9, %s6431_s9, %s6432_s15  }
 0x748 PF: > { %s11964_s29 = sld [smem:[#allocation11_spill]]  ;;  %p6234_p10 = pnand %p5929_p13, %p6504_p9 }
 0x749   : > { %s11966_s21 = sld [smem:[#allocation16_spill]] }
 0x74a   : > { %p6235_p5 = pneg %p6234_p10 }
 0x74e   : > { %s5842_s26 = sand.u32 1, %s11964_s29  }
 0x74f   : > { %s5843_s0 = scalar_lea.sflag [#allocation4], %s5842_s26 }
 0x750   : > { %6401 = dma.done.wait (%p6235_p5), %s5843_s0, 96  }
 0x751   : > { %6403 = vsyncadd (%p6235_p5), %s5843_s0, 4294967200  ;;  %s19_s14 = sadd.s32 1, %s11966_s21   ;;  %s11967_s9 = sld [smem:[#allocation12_spill]] }
 0x752   : > { %p16_p11 = scmp.ge.s32.totalorder %s19_s14, 4   ;;  %s11968_s10 = sld [smem:[#allocation13_spill]] }
 0x753   : > { %s11969_s11 = sld [smem:[#allocation20_spill]] }
 0x754   : > { %s11970_s12 = sld [smem:[#allocation15_spill]]  ;;  %18 = sbr.rel (!%p16_p11) target bundleno = 11 (0xb), region = 83 }
 0x755   : > { %s11971_s13 = sld [smem:[#allocation19_spill]] }
 0x759   :  { %5849 = vsyncpa [#allocation3], 1 }
 0x75a   :  { %5851 = vsyncpa [#allocation3 + $0x1], 1 }
 0x75b   :  { %5852 = vsyncpa [#allocation4], 1 }
 0x75c   :  { %5854 = vsyncpa [#allocation4 + $0x1], 1 }
 0x75d   :  { %5855 = vsyncpa [#allocation5], 1 }
 0x75e   :  { %5857 = vsyncpa [#allocation5 + $0x1], 1 }

</bundles_post_ra>
